<compile_context>
chip_gen: v5e
topology: v5e:2x2
jax: 0.10.0
libtpu: 0.0.40
codegen_flags: <defaults>
</compile_context>

<pallas_src>
import functools

import jax
import jax.numpy as jnp
from jax.experimental import pallas as pl
from jax.experimental.pallas import tpu as pltpu


@functools.lru_cache(maxsize=1)
def _vmem_limit():
    """Generation-aware vmem_limit_bytes (3/4 of physical VMEM, <= 100 MiB)."""
    phys = 64 * 1024 * 1024
    try:
        phys = int(pltpu.get_tpu_info().vmem_capacity_bytes)
    except Exception:
        pass
    return int(min(phys * 3 // 4, 100 * 1024 * 1024))


def _pick_tt(T, per_step_bytes, budget_bytes, cap=32):
    """Largest divisor of T whose per-block working set fits the VMEM budget."""
    cap = int(max(1, min(cap, T, budget_bytes // max(per_step_bytes, 1))))
    tt = 1
    for c in range(1, cap + 1):
        if T % c == 0:
            tt = c
    return tt


# ----------------------------------------------------------------------------
# Fused encoder kernel:
#   [Conv1d(k=3,p=1) -> GroupNorm(C,C) -> IFNode -> AvgPool] x3 in one kernel.
# Grid = (B_blocks, T_blocks); membrane potentials carried in VMEM scratch
# across the ("arbitrary") time axis; all stage intermediates stay in VMEM.
# ----------------------------------------------------------------------------
def _conv3_gn(x, w_fused, cb, gamma, beta, eps):
    """x: [tt, bb, Ls, Cin]; w_fused: [3*Cin, C] (tap-major rows).  Returns the
    GroupNorm(C, C)-normalized conv output [tt, bb, Ls, C]."""
    tt, bb, Ls, Cin = x.shape
    C = w_fused.shape[1]
    tb = tt * bb
    x2 = x.reshape(tb, Ls, Cin)
    # In-kernel halo: zero boundary rows, shifted views built in VMEM.
    zrow = jnp.zeros((tb, 1, Cin), jnp.float32)
    left = jnp.concatenate([zrow, x2[:, :Ls - 1, :]], axis=1)    # x[l-1]
    right = jnp.concatenate([x2[:, 1:, :], zrow], axis=1)        # x[l+1]
    xcat = jnp.concatenate([left, x2, right], axis=-1)           # [tb, Ls, 3*Cin]
    y = jnp.dot(xcat.reshape(tb * Ls, 3 * Cin), w_fused,
                preferred_element_type=jnp.float32)
    y = y.reshape(tt, bb, Ls, C) + cb                            # conv bias (1, C)
    # GroupNorm with num_groups == num_channels: normalize each (t,b,c) over L.
    mean = jnp.mean(y, axis=2, keepdims=True)
    var = jnp.mean((y - mean) ** 2, axis=2, keepdims=True)
    return (y - mean) * jax.lax.rsqrt(var + eps) * gamma + beta


def _if_avgpool(yn_ref, v_ref, sp_ref, *, pool):
    """Sequential IF dynamics (v_th=1, hard reset to 0) + AvgPool1d(pool).
    Reads one timestep slice from VMEM per iteration (bounded live ranges)."""
    tt, bb, Ls, C = yn_ref.shape
    Lp = Ls // pool
    inv = 1.0 / float(pool)
    for s in range(tt):
        v = v_ref[...] + yn_ref[s]                    # charge
        spike = (v >= 1.0).astype(jnp.float32)        # fire
        v_ref[...] = v * (1.0 - spike)                # hard reset (v_reset = 0)
        sp_ref[s] = spike.reshape(bb, Lp, pool, C).sum(axis=2) * inv


def fused_encoder_kernel(x_ref,
                         w1_ref, cb1_ref, g1_ref, be1_ref,
                         w2_ref, cb2_ref, g2_ref, be2_ref,
                         w3_ref, cb3_ref, g3_ref, be3_ref,
                         o_ref,
                         v1_ref, v2_ref, v3_ref,
                         yn1_ref, yn2_ref, yn3_ref,
                         sp1_ref, sp2_ref,
                         *, pool3, eps=1e-5):
    @pl.when(pl.program_id(1) == 0)
    def _():
        v1_ref[...] = jnp.zeros_like(v1_ref)
        v2_ref[...] = jnp.zeros_like(v2_ref)
        v3_ref[...] = jnp.zeros_like(v3_ref)

    # ---- stage 1: Conv(2->16) + GN, batched over the tt timesteps ----
    yn1_ref[...] = _conv3_gn(x_ref[...], w1_ref[...], cb1_ref[...],
                             g1_ref[...], be1_ref[...], eps)
    _if_avgpool(yn1_ref, v1_ref, sp1_ref, pool=2)

    # ---- stage 2: Conv(16->32) + GN ----
    yn2_ref[...] = _conv3_gn(sp1_ref[...], w2_ref[...], cb2_ref[...],
                             g2_ref[...], be2_ref[...], eps)
    _if_avgpool(yn2_ref, v2_ref, sp2_ref, pool=2)

    # ---- stage 3: Conv(32->64) + GN + IF + adaptive avg pool + flatten ----
    yn3_ref[...] = _conv3_gn(sp2_ref[...], w3_ref[...], cb3_ref[...],
                             g3_ref[...], be3_ref[...], eps)
    tt, bb, L3, C3 = yn3_ref.shape
    Lp = L3 // pool3
    inv = 1.0 / float(pool3)
    for s in range(tt):
        v = v3_ref[...] + yn3_ref[s]
        spike = (v >= 1.0).astype(jnp.float32)
        v3_ref[...] = v * (1.0 - spike)
        pooled = spike.reshape(bb, Lp, pool3, C3).sum(axis=2) * inv   # [bb, Lp, C3]
        # Lane-dense flatten in (L', C) order (lanes = Lp*C3 >= 128); the GRU
        # Wih rows are permuted in the wrapper to match PyTorch's (C, L') order.
        o_ref[s] = jnp.concatenate([pooled[:, l, :] for l in range(Lp)], axis=-1)


def fused_encoder(xc, params, *, enc_out, tt):
    """xc: [T, B, L, 2] channels-last -> flattened features [T, B, 64*enc_out]."""
    T, B, L, Cin = xc.shape
    C1, C2, C3 = 16, 32, 64
    L1, L2 = L // 2, L // 4
    pool3 = L2 // enc_out
    F = C3 * enc_out
    bb = B            # single batch block; see TODO(synk) for the v7x B-split

    def wspec(shape):
        return pl.BlockSpec(shape, lambda b, t, _n=len(shape): (0,) * _n)

    return pl.pallas_call(
        functools.partial(fused_encoder_kernel, pool3=pool3),
        out_shape=jax.ShapeDtypeStruct((T, B, F), jnp.float32),
        grid_spec=pltpu.PrefetchScalarGridSpec(
            num_scalar_prefetch=0,
            grid=(B // bb, T // tt),
            in_specs=[
                pl.BlockSpec((tt, bb, L, Cin), lambda b, t: (t, b, 0, 0)),
                # constant-index weight specs: fetched once, never re-DMA'd
                wspec((3 * Cin, C1)), wspec((1, C1)), wspec((1, C1)), wspec((1, C1)),
                wspec((3 * C1, C2)), wspec((1, C2)), wspec((1, C2)), wspec((1, C2)),
                wspec((3 * C2, C3)), wspec((1, C3)), wspec((1, C3)), wspec((1, C3)),
            ],
            out_specs=pl.BlockSpec((tt, bb, F), lambda b, t: (t, b, 0)),
            scratch_shapes=[
                pltpu.VMEM((bb, L, C1), jnp.float32),       # v1 membrane
                pltpu.VMEM((bb, L1, C2), jnp.float32),      # v2 membrane
                pltpu.VMEM((bb, L2, C3), jnp.float32),      # v3 membrane
                pltpu.VMEM((tt, bb, L, C1), jnp.float32),   # stage-1 conv+GN
                pltpu.VMEM((tt, bb, L1, C2), jnp.float32),  # stage-2 conv+GN
                pltpu.VMEM((tt, bb, L2, C3), jnp.float32),  # stage-3 conv+GN
                pltpu.VMEM((tt, bb, L1, C1), jnp.float32),  # stage-1 pooled spikes
                pltpu.VMEM((tt, bb, L2, C2), jnp.float32),  # stage-2 pooled spikes
            ],
        ),
        compiler_params=pltpu.CompilerParams(
            dimension_semantics=("parallel", "arbitrary"),  # IF state carries over T
            vmem_limit_bytes=_vmem_limit(),
        ),
    )(xc,
      params["w1"], params["b1"].reshape(1, C1), params["g1"].reshape(1, C1),
      params["be1"].reshape(1, C1),
      params["w2"], params["b2"].reshape(1, C2), params["g2"].reshape(1, C2),
      params["be2"].reshape(1, C2),
      params["w3"], params["b3"].reshape(1, C3), params["g3"].reshape(1, C3),
      params["be3"].reshape(1, C3))


# ----------------------------------------------------------------------------
# Bidirectional GRU recurrence.  Grid = (direction, T // tt): direction axis is
# "parallel" (2nd TensorCore on v7x), time axis "arbitrary" (hidden state in
# VMEM scratch).  Input projections are precomputed outside; gates use a
# leading size-3 axis so r/z/n selection never lane-slices at 64/192 offsets.
# ----------------------------------------------------------------------------
def bigru_kernel(gi_ref, whh_ref, bhh_ref, o_ref, h_ref):
    @pl.when(pl.program_id(1) == 0)
    def _():
        h_ref[...] = jnp.zeros_like(h_ref)

    tt = gi_ref.shape[1]
    wr, wz, wn = whh_ref[0], whh_ref[1], whh_ref[2]     # [Hh, Hh] each
    br, bz, bn = bhh_ref[0], bhh_ref[1], bhh_ref[2]     # [1, Hh] each

    for s in range(tt):
        h = h_ref[...]                                  # [B, Hh]
        ghr = jnp.dot(h, wr, preferred_element_type=jnp.float32) + br
        ghz = jnp.dot(h, wz, preferred_element_type=jnp.float32) + bz
        ghn = jnp.dot(h, wn, preferred_element_type=jnp.float32) + bn
        r = jax.nn.sigmoid(gi_ref[0, s] + ghr)
        z = jax.nn.sigmoid(gi_ref[1, s] + ghz)
        n = jnp.tanh(gi_ref[2, s] + r * ghn)
        h_new = (1.0 - z) * n + z * h
        h_ref[...] = h_new
        o_ref[s] = h_new


def bigru(gi, whh, bhh, *, tt):
    """gi: [2, 3, T, B, Hh] (dir 1 already time-reversed, b_ih folded in),
    whh: [2, 3, Hh, Hh], bhh: [2, 3, 1, Hh] -> hidden states [2, T, B, Hh]."""
    _, _, T, B, Hh = gi.shape
    return pl.pallas_call(
        bigru_kernel,
        out_shape=jax.ShapeDtypeStruct((2, T, B, Hh), jnp.float32),
        grid_spec=pltpu.PrefetchScalarGridSpec(
            num_scalar_prefetch=0,
            grid=(2, T // tt),
            in_specs=[
                pl.BlockSpec((None, 3, tt, B, Hh), lambda d, i: (d, 0, i, 0, 0)),
                pl.BlockSpec((None, 3, Hh, Hh), lambda d, i: (d, 0, 0, 0)),
                pl.BlockSpec((None, 3, 1, Hh), lambda d, i: (d, 0, 0, 0)),
            ],
            out_specs=pl.BlockSpec((None, tt, B, Hh), lambda d, i: (d, i, 0, 0)),
            scratch_shapes=[pltpu.VMEM((B, Hh), jnp.float32)],
        ),
        compiler_params=pltpu.CompilerParams(
            dimension_semantics=("parallel", "arbitrary"),
            vmem_limit_bytes=_vmem_limit(),
        ),
    )(gi, whh, bhh)


def _wih_lane_order(wih, C, Lp):
    """Permute GRU input-weight rows from PyTorch's (C, L') flatten order to the
    kernel's lane-dense (L', C) order (pure weight-side relabeling; exact math)."""
    g, F, Hh = wih.shape
    return wih.reshape(g, C, Lp, Hh).transpose(0, 2, 1, 3).reshape(g, F, Hh)


# ----------------------------------------------------------------------------
# Full forward
# ----------------------------------------------------------------------------
def snn_forward(params, x, subjects):
    # x: [T, B, 2, H]  subjects: [B] int32
    T, B, Cin, H = x.shape
    N = T * B

    # --- subject layer: gather + tiny einsum in plain XLA ---
    # Exactly reproduces the reference: x.flatten(0,1) (t-major rows) paired
    # with subjects.repeat_interleave(T).
    x_flat = x.reshape(N, Cin, H)
    subj_flat = jnp.repeat(subjects, T)
    w_g = params["subj_w"][subj_flat]                            # [N, Cin, Cout]
    b_g = params["subj_b"][subj_flat]                            # [N, 1, Cout]
    y = jnp.einsum('bct,bcd->bdt', x_flat, w_g) + jnp.transpose(b_g, (0, 2, 1))
    x = y.reshape(T, B, -1, H)

    # channels-last layout for the fused encoder kernel
    xc = jnp.transpose(x, (0, 1, 3, 2))                          # [T, B, L, 2]
    L = H
    enc_out = H // 8 if H > 8 else H
    assert H % 4 == 0 and (H // 4) % enc_out == 0, \
        "AdaptiveAvgPool1d upsampling path (H <= 8) not implemented"

    tt = _pick_tt(T, per_step_bytes=4 * B * L * (2 * Cin + 96),
                  budget_bytes=_vmem_limit() // 2)
    feat = fused_encoder(xc, params, enc_out=enc_out, tt=tt)     # [T, B, F]

    # --- bidirectional GRU ---
    C3 = 64
    Fsz = C3 * enc_out
    Hh = Fsz // 2
    gf, gb = params["gru_fwd"], params["gru_bwd"]
    wih_f = _wih_lane_order(gf["wih"], C3, enc_out)
    wih_b = _wih_lane_order(gb["wih"], C3, enc_out)
    # Input projections for all T*B rows hoisted out of the recurrence.
    gi_f = jnp.einsum('tbf,gfh->gtbh', feat, wih_f) + gf["bih"]  # [3, T, B, Hh]
    gi_b = jnp.einsum('tbf,gfh->gtbh', feat[::-1], wih_b) + gb["bih"]
    gi = jnp.stack([gi_f, gi_b], axis=0)                         # [2, 3, T, B, Hh]
    whh = jnp.stack([gf["whh"], gb["whh"]], axis=0)              # [2, 3, Hh, Hh]
    bhh = jnp.stack([gf["bhh"], gb["bhh"]], axis=0)              # [2, 3, 1, Hh]

    tt_g = _pick_tt(T, per_step_bytes=4 * B * Hh * 12,
                    budget_bytes=_vmem_limit() // 4)
    hs = bigru(gi, whh, bhh, tt=tt_g)                            # [2, T, B, Hh]
    rnn_out = jnp.concatenate([hs[0], hs[1][::-1]], axis=-1)     # [T, B, 2*Hh]

    # --- Linear(F, 1, bias=False) + single-step IFNode (v0=0 => spike = I>=1)
    # Plain XLA: a (N, 1)-wide Pallas output would force 1-lane masked stores.
    I = jnp.einsum('tbf,fo->tbo', rnn_out, params["lin_w"])
    return (I >= 1.0).astype(jnp.float32)                        # [T, B, 1]


# ----------------------------------------------------------------------------
# Deterministic parameter init (synthetic; shapes match the PyTorch module)
# ----------------------------------------------------------------------------
def init_params(key, H, n_subjects):
    enc_out = H // 8 if H > 8 else H
    Fsz = 64 * enc_out
    Hh = Fsz // 2
    ks = iter(jax.random.split(key, 64))

    def conv_w_fused(k, cin, cout):
        w = jax.random.normal(k, (cout, cin, 3), jnp.float32) / (cin * 3) ** 0.5
        # [Cout, Cin, 3] -> taps-major [3, Cin, Cout] -> fused [3*Cin, Cout];
        # fused row (tap*Cin + c) pairs with im2col lane (tap*Cin + c).
        return jnp.transpose(w, (2, 1, 0)).reshape(3 * cin, cout)

    p = {}
    # SubjectLayers: xavier_normal-ish then * 1/sqrt(in_channels); zero bias
    p["subj_w"] = jax.random.normal(next(ks), (n_subjects, 2, 2), jnp.float32) * (0.5 / 2 ** 0.5)
    p["subj_b"] = jnp.zeros((n_subjects, 1, 2), jnp.float32)

    for i, (cin, cout) in enumerate([(2, 16), (16, 32), (32, 64)], start=1):
        p[f"w{i}"] = conv_w_fused(next(ks), cin, cout)           # [3*Cin, Cout]
        p[f"b{i}"] = jax.random.normal(next(ks), (cout,), jnp.float32) * 0.1
        p[f"g{i}"] = jnp.ones((cout,), jnp.float32)
        p[f"be{i}"] = jnp.zeros((cout,), jnp.float32)

    def gru_dir():
        s = 1.0 / Hh ** 0.5
        u = lambda shape: jax.random.uniform(next(ks), shape, jnp.float32, -s, s)
        return dict(wih=u((3, Fsz, Hh)),     # gate-major [r|z|n], torch (C,L') row order
                    whh=u((3, Hh, Hh)),
                    bih=u((3, 1, 1, Hh)),
                    bhh=u((3, 1, Hh)))

    p["gru_fwd"] = gru_dir()
    p["gru_bwd"] = gru_dir()

    s = 1.0 / Fsz ** 0.5
    p["lin_w"] = jax.random.uniform(next(ks), (Fsz, 1), jnp.float32, -s, s)
    return p


if __name__ == "__main__":
    T, B, H, n_subjects = 4, 2, 16, 4
    key = jax.random.PRNGKey(0)
    k_par, k_x, k_s = jax.random.split(key, 3)

    params = init_params(k_par, H, n_subjects)
    x = jax.random.normal(k_x, (T, B, 2, H), jnp.float32)        # [T, B, C=2, H]
    subjects = jax.random.randint(k_s, (B,), 0, n_subjects, jnp.int32)

    fwd = jax.jit(snn_forward)
    out = jax.block_until_ready(fwd(params, x, subjects))
    assert out.shape == (T, B, 1)
    assert out.dtype == jnp.float32
    print("KERNEL_OK")
</pallas_src>

<mosaic_0001>
module attributes {stable_mosaic.version = 11 : i64} {
  func.func @fused_encoder_kernel(%arg0: i32, %arg1: i32, %arg2: memref<4x2x16x2xf32, #tpu.memory_space<vmem>>, %arg3: memref<6x16xf32, #tpu.memory_space<vmem>>, %arg4: memref<1x16xf32, #tpu.memory_space<vmem>>, %arg5: memref<1x16xf32, #tpu.memory_space<vmem>>, %arg6: memref<1x16xf32, #tpu.memory_space<vmem>>, %arg7: memref<48x32xf32, #tpu.memory_space<vmem>>, %arg8: memref<1x32xf32, #tpu.memory_space<vmem>>, %arg9: memref<1x32xf32, #tpu.memory_space<vmem>>, %arg10: memref<1x32xf32, #tpu.memory_space<vmem>>, %arg11: memref<96x64xf32, #tpu.memory_space<vmem>>, %arg12: memref<1x64xf32, #tpu.memory_space<vmem>>, %arg13: memref<1x64xf32, #tpu.memory_space<vmem>>, %arg14: memref<1x64xf32, #tpu.memory_space<vmem>>, %arg15: memref<4x2x128xf32, #tpu.memory_space<vmem>>, %arg16: memref<2x16x16xf32, #tpu.memory_space<vmem>>, %arg17: memref<2x8x32xf32, #tpu.memory_space<vmem>>, %arg18: memref<2x4x64xf32, #tpu.memory_space<vmem>>, %arg19: memref<4x2x16x16xf32, #tpu.memory_space<vmem>>, %arg20: memref<4x2x8x32xf32, #tpu.memory_space<vmem>>, %arg21: memref<4x2x4x64xf32, #tpu.memory_space<vmem>>, %arg22: memref<4x2x8x16xf32, #tpu.memory_space<vmem>>, %arg23: memref<4x2x4x32xf32, #tpu.memory_space<vmem>>) attributes {dimension_semantics = [#tpu.dimension_semantics<parallel>, #tpu.dimension_semantics<arbitrary>], iteration_bounds = array<i64: 1, 1>, scalar_prefetch = 0 : i64, scratch_operands = 8 : i64, tpu.core_type = #tpu.core_type<tc>, window_params = [{transform_indices = @transform_0, window_bounds = array<i64: 4, 2, 16, 2>}, {pipeline_mode = #tpu.pipeline_mode<synchronous>, transform_indices = @transform_1, window_bounds = array<i64: 6, 16>}, {pipeline_mode = #tpu.pipeline_mode<synchronous>, transform_indices = @transform_2, window_bounds = array<i64: 1, 16>}, {pipeline_mode = #tpu.pipeline_mode<synchronous>, transform_indices = @transform_3, window_bounds = array<i64: 1, 16>}, {pipeline_mode = #tpu.pipeline_mode<synchronous>, transform_indices = @transform_4, window_bounds = array<i64: 1, 16>}, {pipeline_mode = #tpu.pipeline_mode<synchronous>, transform_indices = @transform_5, window_bounds = array<i64: 48, 32>}, {pipeline_mode = #tpu.pipeline_mode<synchronous>, transform_indices = @transform_6, window_bounds = array<i64: 1, 32>}, {pipeline_mode = #tpu.pipeline_mode<synchronous>, transform_indices = @transform_7, window_bounds = array<i64: 1, 32>}, {pipeline_mode = #tpu.pipeline_mode<synchronous>, transform_indices = @transform_8, window_bounds = array<i64: 1, 32>}, {pipeline_mode = #tpu.pipeline_mode<synchronous>, transform_indices = @transform_9, window_bounds = array<i64: 96, 64>}, {pipeline_mode = #tpu.pipeline_mode<synchronous>, transform_indices = @transform_10, window_bounds = array<i64: 1, 64>}, {pipeline_mode = #tpu.pipeline_mode<synchronous>, transform_indices = @transform_11, window_bounds = array<i64: 1, 64>}, {pipeline_mode = #tpu.pipeline_mode<synchronous>, transform_indices = @transform_12, window_bounds = array<i64: 1, 64>}, {transform_indices = @transform_13, window_bounds = array<i64: 4, 2, 128>}]} {
    %c0_i32 = arith.constant 0 : i32
    %0 = arith.cmpi eq, %arg1, %c0_i32 : i32
    %1 = arith.extui %0 : i1 to i32
    %c0_i32_0 = arith.constant 0 : i32
    %2 = arith.cmpi ne, %1, %c0_i32_0 : i32
    scf.if %2 {
      %cst_277 = arith.constant 0.000000e+00 : f32
      %380 = vector.broadcast %cst_277 : f32 to vector<2x16x16xf32>
      %c0_278 = arith.constant 0 : index
      %c0_279 = arith.constant 0 : index
      %c0_280 = arith.constant 0 : index
      %381 = vector.load %arg16[%c0_278, %c0_279, %c0_280] : memref<2x16x16xf32, #tpu.memory_space<vmem>>, vector<2x16x16xf32>
      tpu.vector_store %arg16[%c0_278, %c0_279, %c0_280], %380 {strides = array<i32>} : memref<2x16x16xf32, #tpu.memory_space<vmem>>, vector<2x16x16xf32>,
      %cst_281 = arith.constant 0.000000e+00 : f32
      %382 = vector.broadcast %cst_281 : f32 to vector<2x8x32xf32>
      %c0_282 = arith.constant 0 : index
      %c0_283 = arith.constant 0 : index
      %c0_284 = arith.constant 0 : index
      %383 = vector.load %arg17[%c0_282, %c0_283, %c0_284] : memref<2x8x32xf32, #tpu.memory_space<vmem>>, vector<2x8x32xf32>
      tpu.vector_store %arg17[%c0_282, %c0_283, %c0_284], %382 {strides = array<i32>} : memref<2x8x32xf32, #tpu.memory_space<vmem>>, vector<2x8x32xf32>,
      %cst_285 = arith.constant 0.000000e+00 : f32
      %384 = vector.broadcast %cst_285 : f32 to vector<2x4x64xf32>
      %c0_286 = arith.constant 0 : index
      %c0_287 = arith.constant 0 : index
      %c0_288 = arith.constant 0 : index
      %385 = vector.load %arg18[%c0_286, %c0_287, %c0_288] : memref<2x4x64xf32, #tpu.memory_space<vmem>>, vector<2x4x64xf32>
      tpu.vector_store %arg18[%c0_286, %c0_287, %c0_288], %384 {strides = array<i32>} : memref<2x4x64xf32, #tpu.memory_space<vmem>>, vector<2x4x64xf32>,
    } else {
    }
    %c0 = arith.constant 0 : index
    %c0_1 = arith.constant 0 : index
    %c0_2 = arith.constant 0 : index
    %c0_3 = arith.constant 0 : index
    %3 = vector.load %arg2[%c0, %c0_1, %c0_2, %c0_3] : memref<4x2x16x2xf32, #tpu.memory_space<vmem>>, vector<4x2x16x2xf32>
    %c0_4 = arith.constant 0 : index
    %c0_5 = arith.constant 0 : index
    %4 = vector.load %arg3[%c0_4, %c0_5] : memref<6x16xf32, #tpu.memory_space<vmem>>, vector<6x16xf32>
    %c0_6 = arith.constant 0 : index
    %c0_7 = arith.constant 0 : index
    %5 = vector.load %arg4[%c0_6, %c0_7] : memref<1x16xf32, #tpu.memory_space<vmem>>, vector<1x16xf32>
    %c0_8 = arith.constant 0 : index
    %c0_9 = arith.constant 0 : index
    %6 = vector.load %arg5[%c0_8, %c0_9] : memref<1x16xf32, #tpu.memory_space<vmem>>, vector<1x16xf32>
    %c0_10 = arith.constant 0 : index
    %c0_11 = arith.constant 0 : index
    %7 = vector.load %arg6[%c0_10, %c0_11] : memref<1x16xf32, #tpu.memory_space<vmem>>, vector<1x16xf32>
    %8 = vector.shape_cast %3 : vector<4x2x16x2xf32> to vector<8x16x2xf32>
    %cst = arith.constant 0.000000e+00 : f32
    %9 = vector.broadcast %cst : f32 to vector<8x1x2xf32>
    %10 = vector.extract_strided_slice %8 {offsets = [0, 0, 0], sizes = [8, 15, 2], strides = [1, 1, 1]} : vector<8x16x2xf32> to vector<8x15x2xf32>
    %11 = tpu.concatenate %9, %10 in 1 : vector<8x1x2xf32>, vector<8x15x2xf32> -> vector<8x16x2xf32>
    %12 = vector.extract_strided_slice %8 {offsets = [0, 1, 0], sizes = [8, 15, 2], strides = [1, 1, 1]} : vector<8x16x2xf32> to vector<8x15x2xf32>
    %13 = tpu.concatenate %12, %9 in 1 : vector<8x15x2xf32>, vector<8x1x2xf32> -> vector<8x16x2xf32>
    %14 = tpu.concatenate %11, %8, %13 in 2 : vector<8x16x2xf32>, vector<8x16x2xf32>, vector<8x16x2xf32> -> vector<8x16x6xf32>
    %15 = vector.shape_cast %14 : vector<8x16x6xf32> to vector<128x6xf32>
    %cst_12 = arith.constant dense<0.000000e+00> : vector<128x16xf32>
    %16 = tpu.matmul %15, %4, %cst_12 {dimension_numbers = #tpu.dot_dimension_numbers<[1], [0], [0], [1], [0, 0, 1, 1], [], []>} : vector<128x6xf32>, vector<6x16xf32>, vector<128x16xf32> -> vector<128x16xf32>
    %17 = vector.shape_cast %16 : vector<128x16xf32> to vector<4x2x16x16xf32>
    %18 = vector.shape_cast %5 : vector<1x16xf32> to vector<1x1x1x16xf32>
    %19 = vector.broadcast %18 : vector<1x1x1x16xf32> to vector<4x2x16x16xf32>
    %20 = arith.addf %17, %19 : vector<4x2x16x16xf32>
    %cst_13 = arith.constant dense<0.000000e+00> : vector<4x2x16xf32>
    %21 = vector.multi_reduction <add>, %20, %cst_13 [2] : vector<4x2x16x16xf32> to vector<4x2x16xf32>
    %22 = vector.shape_cast %21 : vector<4x2x16xf32> to vector<4x2x1x16xf32>
    %cst_14 = arith.constant 1.600000e+01 : f32
    %23 = vector.broadcast %cst_14 : f32 to vector<4x2x1x16xf32>
    %24 = arith.divf %22, %23 : vector<4x2x1x16xf32>
    %25 = vector.broadcast %24 : vector<4x2x1x16xf32> to vector<4x2x16x16xf32>
    %26 = arith.subf %20, %25 : vector<4x2x16x16xf32>
    %27 = arith.mulf %26, %26 : vector<4x2x16x16xf32>
    %cst_15 = arith.constant dense<0.000000e+00> : vector<4x2x16xf32>
    %28 = vector.multi_reduction <add>, %27, %cst_15 [2] : vector<4x2x16x16xf32> to vector<4x2x16xf32>
    %29 = vector.shape_cast %28 : vector<4x2x16xf32> to vector<4x2x1x16xf32>
    %cst_16 = arith.constant 1.600000e+01 : f32
    %30 = vector.broadcast %cst_16 : f32 to vector<4x2x1x16xf32>
    %31 = arith.divf %29, %30 : vector<4x2x1x16xf32>
    %32 = vector.broadcast %24 : vector<4x2x1x16xf32> to vector<4x2x16x16xf32>
    %33 = arith.subf %20, %32 : vector<4x2x16x16xf32>
    %cst_17 = arith.constant 9.99999974E-6 : f32
    %34 = vector.broadcast %cst_17 : f32 to vector<4x2x1x16xf32>
    %35 = arith.addf %31, %34 : vector<4x2x1x16xf32>
    %36 = math.rsqrt %35 : vector<4x2x1x16xf32>
    %37 = vector.broadcast %36 : vector<4x2x1x16xf32> to vector<4x2x16x16xf32>
    %38 = arith.mulf %33, %37 : vector<4x2x16x16xf32>
    %39 = vector.shape_cast %6 : vector<1x16xf32> to vector<1x1x1x16xf32>
    %40 = vector.broadcast %39 : vector<1x1x1x16xf32> to vector<4x2x16x16xf32>
    %41 = arith.mulf %38, %40 : vector<4x2x16x16xf32>
    %42 = vector.shape_cast %7 : vector<1x16xf32> to vector<1x1x1x16xf32>
    %43 = vector.broadcast %42 : vector<1x1x1x16xf32> to vector<4x2x16x16xf32>
    %44 = arith.addf %41, %43 : vector<4x2x16x16xf32>
    %c0_18 = arith.constant 0 : index
    %c0_19 = arith.constant 0 : index
    %c0_20 = arith.constant 0 : index
    %c0_21 = arith.constant 0 : index
    %45 = vector.load %arg19[%c0_18, %c0_19, %c0_20, %c0_21] : memref<4x2x16x16xf32, #tpu.memory_space<vmem>>, vector<4x2x16x16xf32>
    tpu.vector_store %arg19[%c0_18, %c0_19, %c0_20, %c0_21], %44 {strides = array<i32>} : memref<4x2x16x16xf32, #tpu.memory_space<vmem>>, vector<4x2x16x16xf32>,
    %c0_22 = arith.constant 0 : index
    %c0_23 = arith.constant 0 : index
    %c0_24 = arith.constant 0 : index
    %46 = vector.load %arg16[%c0_22, %c0_23, %c0_24] : memref<2x16x16xf32, #tpu.memory_space<vmem>>, vector<2x16x16xf32>
    %c0_25 = arith.constant 0 : index
    %c0_26 = arith.constant 0 : index
    %c0_27 = arith.constant 0 : index
    %c0_28 = arith.constant 0 : index
    %47 = vector.load %arg19[%c0_25, %c0_26, %c0_27, %c0_28] : memref<4x2x16x16xf32, #tpu.memory_space<vmem>>, vector<1x2x16x16xf32>
    %48 = vector.shape_cast %47 : vector<1x2x16x16xf32> to vector<2x16x16xf32>
    %49 = arith.addf %46, %48 : vector<2x16x16xf32>
    %cst_29 = arith.constant 1.000000e+00 : f32
    %50 = vector.broadcast %cst_29 : f32 to vector<2x16x16xf32>
    %51 = arith.cmpf oge, %49, %50 : vector<2x16x16xf32>
    %52 = arith.extui %51 : vector<2x16x16xi1> to vector<2x16x16xi32>
    %53 = arith.sitofp %52 : vector<2x16x16xi32> to vector<2x16x16xf32>
    %cst_30 = arith.constant 1.000000e+00 : f32
    %54 = vector.broadcast %cst_30 : f32 to vector<2x16x16xf32>
    %55 = arith.subf %54, %53 : vector<2x16x16xf32>
    %56 = arith.mulf %49, %55 : vector<2x16x16xf32>
    %c0_31 = arith.constant 0 : index
    %c0_32 = arith.constant 0 : index
    %c0_33 = arith.constant 0 : index
    %57 = vector.load %arg16[%c0_31, %c0_32, %c0_33] : memref<2x16x16xf32, #tpu.memory_space<vmem>>, vector<2x16x16xf32>
    tpu.vector_store %arg16[%c0_31, %c0_32, %c0_33], %56 {strides = array<i32>} : memref<2x16x16xf32, #tpu.memory_space<vmem>>, vector<2x16x16xf32>,
    %58 = vector.shape_cast %53 : vector<2x16x16xf32> to vector<2x8x2x16xf32>
    %cst_34 = arith.constant dense<0.000000e+00> : vector<2x8x16xf32>
    %59 = vector.multi_reduction <add>, %58, %cst_34 [2] : vector<2x8x2x16xf32> to vector<2x8x16xf32>
    %cst_35 = arith.constant 5.000000e-01 : f32
    %60 = vector.broadcast %cst_35 : f32 to vector<2x8x16xf32>
    %61 = arith.mulf %59, %60 : vector<2x8x16xf32>
    %c0_36 = arith.constant 0 : index
    %c0_37 = arith.constant 0 : index
    %c0_38 = arith.constant 0 : index
    %c0_39 = arith.constant 0 : index
    %62 = vector.load %arg22[%c0_36, %c0_37, %c0_38, %c0_39] : memref<4x2x8x16xf32, #tpu.memory_space<vmem>>, vector<1x2x8x16xf32>
    %63 = vector.shape_cast %62 : vector<1x2x8x16xf32> to vector<2x8x16xf32>
    %64 = vector.shape_cast %61 : vector<2x8x16xf32> to vector<1x2x8x16xf32>
    tpu.vector_store %arg22[%c0_36, %c0_37, %c0_38, %c0_39], %64 {strides = array<i32>} : memref<4x2x8x16xf32, #tpu.memory_space<vmem>>, vector<1x2x8x16xf32>,
    %c0_40 = arith.constant 0 : index
    %c0_41 = arith.constant 0 : index
    %c0_42 = arith.constant 0 : index
    %65 = vector.load %arg16[%c0_40, %c0_41, %c0_42] : memref<2x16x16xf32, #tpu.memory_space<vmem>>, vector<2x16x16xf32>
    %c1 = arith.constant 1 : index
    %c0_43 = arith.constant 0 : index
    %c0_44 = arith.constant 0 : index
    %c0_45 = arith.constant 0 : index
    %66 = vector.load %arg19[%c1, %c0_43, %c0_44, %c0_45] : memref<4x2x16x16xf32, #tpu.memory_space<vmem>>, vector<1x2x16x16xf32>
    %67 = vector.shape_cast %66 : vector<1x2x16x16xf32> to vector<2x16x16xf32>
    %68 = arith.addf %65, %67 : vector<2x16x16xf32>
    %cst_46 = arith.constant 1.000000e+00 : f32
    %69 = vector.broadcast %cst_46 : f32 to vector<2x16x16xf32>
    %70 = arith.cmpf oge, %68, %69 : vector<2x16x16xf32>
    %71 = arith.extui %70 : vector<2x16x16xi1> to vector<2x16x16xi32>
    %72 = arith.sitofp %71 : vector<2x16x16xi32> to vector<2x16x16xf32>
    %cst_47 = arith.constant 1.000000e+00 : f32
    %73 = vector.broadcast %cst_47 : f32 to vector<2x16x16xf32>
    %74 = arith.subf %73, %72 : vector<2x16x16xf32>
    %75 = arith.mulf %68, %74 : vector<2x16x16xf32>
    %c0_48 = arith.constant 0 : index
    %c0_49 = arith.constant 0 : index
    %c0_50 = arith.constant 0 : index
    %76 = vector.load %arg16[%c0_48, %c0_49, %c0_50] : memref<2x16x16xf32, #tpu.memory_space<vmem>>, vector<2x16x16xf32>
    tpu.vector_store %arg16[%c0_48, %c0_49, %c0_50], %75 {strides = array<i32>} : memref<2x16x16xf32, #tpu.memory_space<vmem>>, vector<2x16x16xf32>,
    %77 = vector.shape_cast %72 : vector<2x16x16xf32> to vector<2x8x2x16xf32>
    %cst_51 = arith.constant dense<0.000000e+00> : vector<2x8x16xf32>
    %78 = vector.multi_reduction <add>, %77, %cst_51 [2] : vector<2x8x2x16xf32> to vector<2x8x16xf32>
    %cst_52 = arith.constant 5.000000e-01 : f32
    %79 = vector.broadcast %cst_52 : f32 to vector<2x8x16xf32>
    %80 = arith.mulf %78, %79 : vector<2x8x16xf32>
    %c1_53 = arith.constant 1 : index
    %c0_54 = arith.constant 0 : index
    %c0_55 = arith.constant 0 : index
    %c0_56 = arith.constant 0 : index
    %81 = vector.load %arg22[%c1_53, %c0_54, %c0_55, %c0_56] : memref<4x2x8x16xf32, #tpu.memory_space<vmem>>, vector<1x2x8x16xf32>
    %82 = vector.shape_cast %81 : vector<1x2x8x16xf32> to vector<2x8x16xf32>
    %83 = vector.shape_cast %80 : vector<2x8x16xf32> to vector<1x2x8x16xf32>
    tpu.vector_store %arg22[%c1_53, %c0_54, %c0_55, %c0_56], %83 {strides = array<i32>} : memref<4x2x8x16xf32, #tpu.memory_space<vmem>>, vector<1x2x8x16xf32>,
    %c0_57 = arith.constant 0 : index
    %c0_58 = arith.constant 0 : index
    %c0_59 = arith.constant 0 : index
    %84 = vector.load %arg16[%c0_57, %c0_58, %c0_59] : memref<2x16x16xf32, #tpu.memory_space<vmem>>, vector<2x16x16xf32>
    %c2 = arith.constant 2 : index
    %c0_60 = arith.constant 0 : index
    %c0_61 = arith.constant 0 : index
    %c0_62 = arith.constant 0 : index
    %85 = vector.load %arg19[%c2, %c0_60, %c0_61, %c0_62] : memref<4x2x16x16xf32, #tpu.memory_space<vmem>>, vector<1x2x16x16xf32>
    %86 = vector.shape_cast %85 : vector<1x2x16x16xf32> to vector<2x16x16xf32>
    %87 = arith.addf %84, %86 : vector<2x16x16xf32>
    %cst_63 = arith.constant 1.000000e+00 : f32
    %88 = vector.broadcast %cst_63 : f32 to vector<2x16x16xf32>
    %89 = arith.cmpf oge, %87, %88 : vector<2x16x16xf32>
    %90 = arith.extui %89 : vector<2x16x16xi1> to vector<2x16x16xi32>
    %91 = arith.sitofp %90 : vector<2x16x16xi32> to vector<2x16x16xf32>
    %cst_64 = arith.constant 1.000000e+00 : f32
    %92 = vector.broadcast %cst_64 : f32 to vector<2x16x16xf32>
    %93 = arith.subf %92, %91 : vector<2x16x16xf32>
    %94 = arith.mulf %87, %93 : vector<2x16x16xf32>
    %c0_65 = arith.constant 0 : index
    %c0_66 = arith.constant 0 : index
    %c0_67 = arith.constant 0 : index
    %95 = vector.load %arg16[%c0_65, %c0_66, %c0_67] : memref<2x16x16xf32, #tpu.memory_space<vmem>>, vector<2x16x16xf32>
    tpu.vector_store %arg16[%c0_65, %c0_66, %c0_67], %94 {strides = array<i32>} : memref<2x16x16xf32, #tpu.memory_space<vmem>>, vector<2x16x16xf32>,
    %96 = vector.shape_cast %91 : vector<2x16x16xf32> to vector<2x8x2x16xf32>
    %cst_68 = arith.constant dense<0.000000e+00> : vector<2x8x16xf32>
    %97 = vector.multi_reduction <add>, %96, %cst_68 [2] : vector<2x8x2x16xf32> to vector<2x8x16xf32>
    %cst_69 = arith.constant 5.000000e-01 : f32
    %98 = vector.broadcast %cst_69 : f32 to vector<2x8x16xf32>
    %99 = arith.mulf %97, %98 : vector<2x8x16xf32>
    %c2_70 = arith.constant 2 : index
    %c0_71 = arith.constant 0 : index
    %c0_72 = arith.constant 0 : index
    %c0_73 = arith.constant 0 : index
    %100 = vector.load %arg22[%c2_70, %c0_71, %c0_72, %c0_73] : memref<4x2x8x16xf32, #tpu.memory_space<vmem>>, vector<1x2x8x16xf32>
    %101 = vector.shape_cast %100 : vector<1x2x8x16xf32> to vector<2x8x16xf32>
    %102 = vector.shape_cast %99 : vector<2x8x16xf32> to vector<1x2x8x16xf32>
    tpu.vector_store %arg22[%c2_70, %c0_71, %c0_72, %c0_73], %102 {strides = array<i32>} : memref<4x2x8x16xf32, #tpu.memory_space<vmem>>, vector<1x2x8x16xf32>,
    %c0_74 = arith.constant 0 : index
    %c0_75 = arith.constant 0 : index
    %c0_76 = arith.constant 0 : index
    %103 = vector.load %arg16[%c0_74, %c0_75, %c0_76] : memref<2x16x16xf32, #tpu.memory_space<vmem>>, vector<2x16x16xf32>
    %c3 = arith.constant 3 : index
    %c0_77 = arith.constant 0 : index
    %c0_78 = arith.constant 0 : index
    %c0_79 = arith.constant 0 : index
    %104 = vector.load %arg19[%c3, %c0_77, %c0_78, %c0_79] : memref<4x2x16x16xf32, #tpu.memory_space<vmem>>, vector<1x2x16x16xf32>
    %105 = vector.shape_cast %104 : vector<1x2x16x16xf32> to vector<2x16x16xf32>
    %106 = arith.addf %103, %105 : vector<2x16x16xf32>
    %cst_80 = arith.constant 1.000000e+00 : f32
    %107 = vector.broadcast %cst_80 : f32 to vector<2x16x16xf32>
    %108 = arith.cmpf oge, %106, %107 : vector<2x16x16xf32>
    %109 = arith.extui %108 : vector<2x16x16xi1> to vector<2x16x16xi32>
    %110 = arith.sitofp %109 : vector<2x16x16xi32> to vector<2x16x16xf32>
    %cst_81 = arith.constant 1.000000e+00 : f32
    %111 = vector.broadcast %cst_81 : f32 to vector<2x16x16xf32>
    %112 = arith.subf %111, %110 : vector<2x16x16xf32>
    %113 = arith.mulf %106, %112 : vector<2x16x16xf32>
    %c0_82 = arith.constant 0 : index
    %c0_83 = arith.constant 0 : index
    %c0_84 = arith.constant 0 : index
    %114 = vector.load %arg16[%c0_82, %c0_83, %c0_84] : memref<2x16x16xf32, #tpu.memory_space<vmem>>, vector<2x16x16xf32>
    tpu.vector_store %arg16[%c0_82, %c0_83, %c0_84], %113 {strides = array<i32>} : memref<2x16x16xf32, #tpu.memory_space<vmem>>, vector<2x16x16xf32>,
    %115 = vector.shape_cast %110 : vector<2x16x16xf32> to vector<2x8x2x16xf32>
    %cst_85 = arith.constant dense<0.000000e+00> : vector<2x8x16xf32>
    %116 = vector.multi_reduction <add>, %115, %cst_85 [2] : vector<2x8x2x16xf32> to vector<2x8x16xf32>
    %cst_86 = arith.constant 5.000000e-01 : f32
    %117 = vector.broadcast %cst_86 : f32 to vector<2x8x16xf32>
    %118 = arith.mulf %116, %117 : vector<2x8x16xf32>
    %c3_87 = arith.constant 3 : index
    %c0_88 = arith.constant 0 : index
    %c0_89 = arith.constant 0 : index
    %c0_90 = arith.constant 0 : index
    %119 = vector.load %arg22[%c3_87, %c0_88, %c0_89, %c0_90] : memref<4x2x8x16xf32, #tpu.memory_space<vmem>>, vector<1x2x8x16xf32>
    %120 = vector.shape_cast %119 : vector<1x2x8x16xf32> to vector<2x8x16xf32>
    %121 = vector.shape_cast %118 : vector<2x8x16xf32> to vector<1x2x8x16xf32>
    tpu.vector_store %arg22[%c3_87, %c0_88, %c0_89, %c0_90], %121 {strides = array<i32>} : memref<4x2x8x16xf32, #tpu.memory_space<vmem>>, vector<1x2x8x16xf32>,
    %c0_91 = arith.constant 0 : index
    %c0_92 = arith.constant 0 : index
    %c0_93 = arith.constant 0 : index
    %c0_94 = arith.constant 0 : index
    %122 = vector.load %arg22[%c0_91, %c0_92, %c0_93, %c0_94] : memref<4x2x8x16xf32, #tpu.memory_space<vmem>>, vector<4x2x8x16xf32>
    %c0_95 = arith.constant 0 : index
    %c0_96 = arith.constant 0 : index
    %123 = vector.load %arg7[%c0_95, %c0_96] : memref<48x32xf32, #tpu.memory_space<vmem>>, vector<48x32xf32>
    %c0_97 = arith.constant 0 : index
    %c0_98 = arith.constant 0 : index
    %124 = vector.load %arg8[%c0_97, %c0_98] : memref<1x32xf32, #tpu.memory_space<vmem>>, vector<1x32xf32>
    %c0_99 = arith.constant 0 : index
    %c0_100 = arith.constant 0 : index
    %125 = vector.load %arg9[%c0_99, %c0_100] : memref<1x32xf32, #tpu.memory_space<vmem>>, vector<1x32xf32>
    %c0_101 = arith.constant 0 : index
    %c0_102 = arith.constant 0 : index
    %126 = vector.load %arg10[%c0_101, %c0_102] : memref<1x32xf32, #tpu.memory_space<vmem>>, vector<1x32xf32>
    %127 = vector.shape_cast %122 : vector<4x2x8x16xf32> to vector<8x8x16xf32>
    %cst_103 = arith.constant 0.000000e+00 : f32
    %128 = vector.broadcast %cst_103 : f32 to vector<8x1x16xf32>
    %129 = vector.extract_strided_slice %127 {offsets = [0, 0, 0], sizes = [8, 7, 16], strides = [1, 1, 1]} : vector<8x8x16xf32> to vector<8x7x16xf32>
    %130 = tpu.concatenate %128, %129 in 1 : vector<8x1x16xf32>, vector<8x7x16xf32> -> vector<8x8x16xf32>
    %131 = vector.extract_strided_slice %127 {offsets = [0, 1, 0], sizes = [8, 7, 16], strides = [1, 1, 1]} : vector<8x8x16xf32> to vector<8x7x16xf32>
    %132 = tpu.concatenate %131, %128 in 1 : vector<8x7x16xf32>, vector<8x1x16xf32> -> vector<8x8x16xf32>
    %133 = tpu.concatenate %130, %127, %132 in 2 : vector<8x8x16xf32>, vector<8x8x16xf32>, vector<8x8x16xf32> -> vector<8x8x48xf32>
    %134 = vector.shape_cast %133 : vector<8x8x48xf32> to vector<64x48xf32>
    %cst_104 = arith.constant dense<0.000000e+00> : vector<64x32xf32>
    %135 = tpu.matmul %134, %123, %cst_104 {dimension_numbers = #tpu.dot_dimension_numbers<[1], [0], [0], [1], [0, 0, 1, 1], [], []>} : vector<64x48xf32>, vector<48x32xf32>, vector<64x32xf32> -> vector<64x32xf32>
    %136 = vector.shape_cast %135 : vector<64x32xf32> to vector<4x2x8x32xf32>
    %137 = vector.shape_cast %124 : vector<1x32xf32> to vector<1x1x1x32xf32>
    %138 = vector.broadcast %137 : vector<1x1x1x32xf32> to vector<4x2x8x32xf32>
    %139 = arith.addf %136, %138 : vector<4x2x8x32xf32>
    %cst_105 = arith.constant dense<0.000000e+00> : vector<4x2x32xf32>
    %140 = vector.multi_reduction <add>, %139, %cst_105 [2] : vector<4x2x8x32xf32> to vector<4x2x32xf32>
    %141 = vector.shape_cast %140 : vector<4x2x32xf32> to vector<4x2x1x32xf32>
    %cst_106 = arith.constant 8.000000e+00 : f32
    %142 = vector.broadcast %cst_106 : f32 to vector<4x2x1x32xf32>
    %143 = arith.divf %141, %142 : vector<4x2x1x32xf32>
    %144 = vector.broadcast %143 : vector<4x2x1x32xf32> to vector<4x2x8x32xf32>
    %145 = arith.subf %139, %144 : vector<4x2x8x32xf32>
    %146 = arith.mulf %145, %145 : vector<4x2x8x32xf32>
    %cst_107 = arith.constant dense<0.000000e+00> : vector<4x2x32xf32>
    %147 = vector.multi_reduction <add>, %146, %cst_107 [2] : vector<4x2x8x32xf32> to vector<4x2x32xf32>
    %148 = vector.shape_cast %147 : vector<4x2x32xf32> to vector<4x2x1x32xf32>
    %cst_108 = arith.constant 8.000000e+00 : f32
    %149 = vector.broadcast %cst_108 : f32 to vector<4x2x1x32xf32>
    %150 = arith.divf %148, %149 : vector<4x2x1x32xf32>
    %151 = vector.broadcast %143 : vector<4x2x1x32xf32> to vector<4x2x8x32xf32>
    %152 = arith.subf %139, %151 : vector<4x2x8x32xf32>
    %cst_109 = arith.constant 9.99999974E-6 : f32
    %153 = vector.broadcast %cst_109 : f32 to vector<4x2x1x32xf32>
    %154 = arith.addf %150, %153 : vector<4x2x1x32xf32>
    %155 = math.rsqrt %154 : vector<4x2x1x32xf32>
    %156 = vector.broadcast %155 : vector<4x2x1x32xf32> to vector<4x2x8x32xf32>
    %157 = arith.mulf %152, %156 : vector<4x2x8x32xf32>
    %158 = vector.shape_cast %125 : vector<1x32xf32> to vector<1x1x1x32xf32>
    %159 = vector.broadcast %158 : vector<1x1x1x32xf32> to vector<4x2x8x32xf32>
    %160 = arith.mulf %157, %159 : vector<4x2x8x32xf32>
    %161 = vector.shape_cast %126 : vector<1x32xf32> to vector<1x1x1x32xf32>
    %162 = vector.broadcast %161 : vector<1x1x1x32xf32> to vector<4x2x8x32xf32>
    %163 = arith.addf %160, %162 : vector<4x2x8x32xf32>
    %c0_110 = arith.constant 0 : index
    %c0_111 = arith.constant 0 : index
    %c0_112 = arith.constant 0 : index
    %c0_113 = arith.constant 0 : index
    %164 = vector.load %arg20[%c0_110, %c0_111, %c0_112, %c0_113] : memref<4x2x8x32xf32, #tpu.memory_space<vmem>>, vector<4x2x8x32xf32>
    tpu.vector_store %arg20[%c0_110, %c0_111, %c0_112, %c0_113], %163 {strides = array<i32>} : memref<4x2x8x32xf32, #tpu.memory_space<vmem>>, vector<4x2x8x32xf32>,
    %c0_114 = arith.constant 0 : index
    %c0_115 = arith.constant 0 : index
    %c0_116 = arith.constant 0 : index
    %165 = vector.load %arg17[%c0_114, %c0_115, %c0_116] : memref<2x8x32xf32, #tpu.memory_space<vmem>>, vector<2x8x32xf32>
    %c0_117 = arith.constant 0 : index
    %c0_118 = arith.constant 0 : index
    %c0_119 = arith.constant 0 : index
    %c0_120 = arith.constant 0 : index
    %166 = vector.load %arg20[%c0_117, %c0_118, %c0_119, %c0_120] : memref<4x2x8x32xf32, #tpu.memory_space<vmem>>, vector<1x2x8x32xf32>
    %167 = vector.shape_cast %166 : vector<1x2x8x32xf32> to vector<2x8x32xf32>
    %168 = arith.addf %165, %167 : vector<2x8x32xf32>
    %cst_121 = arith.constant 1.000000e+00 : f32
    %169 = vector.broadcast %cst_121 : f32 to vector<2x8x32xf32>
    %170 = arith.cmpf oge, %168, %169 : vector<2x8x32xf32>
    %171 = arith.extui %170 : vector<2x8x32xi1> to vector<2x8x32xi32>
    %172 = arith.sitofp %171 : vector<2x8x32xi32> to vector<2x8x32xf32>
    %cst_122 = arith.constant 1.000000e+00 : f32
    %173 = vector.broadcast %cst_122 : f32 to vector<2x8x32xf32>
    %174 = arith.subf %173, %172 : vector<2x8x32xf32>
    %175 = arith.mulf %168, %174 : vector<2x8x32xf32>
    %c0_123 = arith.constant 0 : index
    %c0_124 = arith.constant 0 : index
    %c0_125 = arith.constant 0 : index
    %176 = vector.load %arg17[%c0_123, %c0_124, %c0_125] : memref<2x8x32xf32, #tpu.memory_space<vmem>>, vector<2x8x32xf32>
    tpu.vector_store %arg17[%c0_123, %c0_124, %c0_125], %175 {strides = array<i32>} : memref<2x8x32xf32, #tpu.memory_space<vmem>>, vector<2x8x32xf32>,
    %177 = vector.shape_cast %172 : vector<2x8x32xf32> to vector<2x4x2x32xf32>
    %cst_126 = arith.constant dense<0.000000e+00> : vector<2x4x32xf32>
    %178 = vector.multi_reduction <add>, %177, %cst_126 [2] : vector<2x4x2x32xf32> to vector<2x4x32xf32>
    %cst_127 = arith.constant 5.000000e-01 : f32
    %179 = vector.broadcast %cst_127 : f32 to vector<2x4x32xf32>
    %180 = arith.mulf %178, %179 : vector<2x4x32xf32>
    %c0_128 = arith.constant 0 : index
    %c0_129 = arith.constant 0 : index
    %c0_130 = arith.constant 0 : index
    %c0_131 = arith.constant 0 : index
    %181 = vector.load %arg23[%c0_128, %c0_129, %c0_130, %c0_131] : memref<4x2x4x32xf32, #tpu.memory_space<vmem>>, vector<1x2x4x32xf32>
    %182 = vector.shape_cast %181 : vector<1x2x4x32xf32> to vector<2x4x32xf32>
    %183 = vector.shape_cast %180 : vector<2x4x32xf32> to vector<1x2x4x32xf32>
    tpu.vector_store %arg23[%c0_128, %c0_129, %c0_130, %c0_131], %183 {strides = array<i32>} : memref<4x2x4x32xf32, #tpu.memory_space<vmem>>, vector<1x2x4x32xf32>,
    %c0_132 = arith.constant 0 : index
    %c0_133 = arith.constant 0 : index
    %c0_134 = arith.constant 0 : index
    %184 = vector.load %arg17[%c0_132, %c0_133, %c0_134] : memref<2x8x32xf32, #tpu.memory_space<vmem>>, vector<2x8x32xf32>
    %c1_135 = arith.constant 1 : index
    %c0_136 = arith.constant 0 : index
    %c0_137 = arith.constant 0 : index
    %c0_138 = arith.constant 0 : index
    %185 = vector.load %arg20[%c1_135, %c0_136, %c0_137, %c0_138] : memref<4x2x8x32xf32, #tpu.memory_space<vmem>>, vector<1x2x8x32xf32>
    %186 = vector.shape_cast %185 : vector<1x2x8x32xf32> to vector<2x8x32xf32>
    %187 = arith.addf %184, %186 : vector<2x8x32xf32>
    %cst_139 = arith.constant 1.000000e+00 : f32
    %188 = vector.broadcast %cst_139 : f32 to vector<2x8x32xf32>
    %189 = arith.cmpf oge, %187, %188 : vector<2x8x32xf32>
    %190 = arith.extui %189 : vector<2x8x32xi1> to vector<2x8x32xi32>
    %191 = arith.sitofp %190 : vector<2x8x32xi32> to vector<2x8x32xf32>
    %cst_140 = arith.constant 1.000000e+00 : f32
    %192 = vector.broadcast %cst_140 : f32 to vector<2x8x32xf32>
    %193 = arith.subf %192, %191 : vector<2x8x32xf32>
    %194 = arith.mulf %187, %193 : vector<2x8x32xf32>
    %c0_141 = arith.constant 0 : index
    %c0_142 = arith.constant 0 : index
    %c0_143 = arith.constant 0 : index
    %195 = vector.load %arg17[%c0_141, %c0_142, %c0_143] : memref<2x8x32xf32, #tpu.memory_space<vmem>>, vector<2x8x32xf32>
    tpu.vector_store %arg17[%c0_141, %c0_142, %c0_143], %194 {strides = array<i32>} : memref<2x8x32xf32, #tpu.memory_space<vmem>>, vector<2x8x32xf32>,
    %196 = vector.shape_cast %191 : vector<2x8x32xf32> to vector<2x4x2x32xf32>
    %cst_144 = arith.constant dense<0.000000e+00> : vector<2x4x32xf32>
    %197 = vector.multi_reduction <add>, %196, %cst_144 [2] : vector<2x4x2x32xf32> to vector<2x4x32xf32>
    %cst_145 = arith.constant 5.000000e-01 : f32
    %198 = vector.broadcast %cst_145 : f32 to vector<2x4x32xf32>
    %199 = arith.mulf %197, %198 : vector<2x4x32xf32>
    %c1_146 = arith.constant 1 : index
    %c0_147 = arith.constant 0 : index
    %c0_148 = arith.constant 0 : index
    %c0_149 = arith.constant 0 : index
    %200 = vector.load %arg23[%c1_146, %c0_147, %c0_148, %c0_149] : memref<4x2x4x32xf32, #tpu.memory_space<vmem>>, vector<1x2x4x32xf32>
    %201 = vector.shape_cast %200 : vector<1x2x4x32xf32> to vector<2x4x32xf32>
    %202 = vector.shape_cast %199 : vector<2x4x32xf32> to vector<1x2x4x32xf32>
    tpu.vector_store %arg23[%c1_146, %c0_147, %c0_148, %c0_149], %202 {strides = array<i32>} : memref<4x2x4x32xf32, #tpu.memory_space<vmem>>, vector<1x2x4x32xf32>,
    %c0_150 = arith.constant 0 : index
    %c0_151 = arith.constant 0 : index
    %c0_152 = arith.constant 0 : index
    %203 = vector.load %arg17[%c0_150, %c0_151, %c0_152] : memref<2x8x32xf32, #tpu.memory_space<vmem>>, vector<2x8x32xf32>
    %c2_153 = arith.constant 2 : index
    %c0_154 = arith.constant 0 : index
    %c0_155 = arith.constant 0 : index
    %c0_156 = arith.constant 0 : index
    %204 = vector.load %arg20[%c2_153, %c0_154, %c0_155, %c0_156] : memref<4x2x8x32xf32, #tpu.memory_space<vmem>>, vector<1x2x8x32xf32>
    %205 = vector.shape_cast %204 : vector<1x2x8x32xf32> to vector<2x8x32xf32>
    %206 = arith.addf %203, %205 : vector<2x8x32xf32>
    %cst_157 = arith.constant 1.000000e+00 : f32
    %207 = vector.broadcast %cst_157 : f32 to vector<2x8x32xf32>
    %208 = arith.cmpf oge, %206, %207 : vector<2x8x32xf32>
    %209 = arith.extui %208 : vector<2x8x32xi1> to vector<2x8x32xi32>
    %210 = arith.sitofp %209 : vector<2x8x32xi32> to vector<2x8x32xf32>
    %cst_158 = arith.constant 1.000000e+00 : f32
    %211 = vector.broadcast %cst_158 : f32 to vector<2x8x32xf32>
    %212 = arith.subf %211, %210 : vector<2x8x32xf32>
    %213 = arith.mulf %206, %212 : vector<2x8x32xf32>
    %c0_159 = arith.constant 0 : index
    %c0_160 = arith.constant 0 : index
    %c0_161 = arith.constant 0 : index
    %214 = vector.load %arg17[%c0_159, %c0_160, %c0_161] : memref<2x8x32xf32, #tpu.memory_space<vmem>>, vector<2x8x32xf32>
    tpu.vector_store %arg17[%c0_159, %c0_160, %c0_161], %213 {strides = array<i32>} : memref<2x8x32xf32, #tpu.memory_space<vmem>>, vector<2x8x32xf32>,
    %215 = vector.shape_cast %210 : vector<2x8x32xf32> to vector<2x4x2x32xf32>
    %cst_162 = arith.constant dense<0.000000e+00> : vector<2x4x32xf32>
    %216 = vector.multi_reduction <add>, %215, %cst_162 [2] : vector<2x4x2x32xf32> to vector<2x4x32xf32>
    %cst_163 = arith.constant 5.000000e-01 : f32
    %217 = vector.broadcast %cst_163 : f32 to vector<2x4x32xf32>
    %218 = arith.mulf %216, %217 : vector<2x4x32xf32>
    %c2_164 = arith.constant 2 : index
    %c0_165 = arith.constant 0 : index
    %c0_166 = arith.constant 0 : index
    %c0_167 = arith.constant 0 : index
    %219 = vector.load %arg23[%c2_164, %c0_165, %c0_166, %c0_167] : memref<4x2x4x32xf32, #tpu.memory_space<vmem>>, vector<1x2x4x32xf32>
    %220 = vector.shape_cast %219 : vector<1x2x4x32xf32> to vector<2x4x32xf32>
    %221 = vector.shape_cast %218 : vector<2x4x32xf32> to vector<1x2x4x32xf32>
    tpu.vector_store %arg23[%c2_164, %c0_165, %c0_166, %c0_167], %221 {strides = array<i32>} : memref<4x2x4x32xf32, #tpu.memory_space<vmem>>, vector<1x2x4x32xf32>,
    %c0_168 = arith.constant 0 : index
    %c0_169 = arith.constant 0 : index
    %c0_170 = arith.constant 0 : index
    %222 = vector.load %arg17[%c0_168, %c0_169, %c0_170] : memref<2x8x32xf32, #tpu.memory_space<vmem>>, vector<2x8x32xf32>
    %c3_171 = arith.constant 3 : index
    %c0_172 = arith.constant 0 : index
    %c0_173 = arith.constant 0 : index
    %c0_174 = arith.constant 0 : index
    %223 = vector.load %arg20[%c3_171, %c0_172, %c0_173, %c0_174] : memref<4x2x8x32xf32, #tpu.memory_space<vmem>>, vector<1x2x8x32xf32>
    %224 = vector.shape_cast %223 : vector<1x2x8x32xf32> to vector<2x8x32xf32>
    %225 = arith.addf %222, %224 : vector<2x8x32xf32>
    %cst_175 = arith.constant 1.000000e+00 : f32
    %226 = vector.broadcast %cst_175 : f32 to vector<2x8x32xf32>
    %227 = arith.cmpf oge, %225, %226 : vector<2x8x32xf32>
    %228 = arith.extui %227 : vector<2x8x32xi1> to vector<2x8x32xi32>
    %229 = arith.sitofp %228 : vector<2x8x32xi32> to vector<2x8x32xf32>
    %cst_176 = arith.constant 1.000000e+00 : f32
    %230 = vector.broadcast %cst_176 : f32 to vector<2x8x32xf32>
    %231 = arith.subf %230, %229 : vector<2x8x32xf32>
    %232 = arith.mulf %225, %231 : vector<2x8x32xf32>
    %c0_177 = arith.constant 0 : index
    %c0_178 = arith.constant 0 : index
    %c0_179 = arith.constant 0 : index
    %233 = vector.load %arg17[%c0_177, %c0_178, %c0_179] : memref<2x8x32xf32, #tpu.memory_space<vmem>>, vector<2x8x32xf32>
    tpu.vector_store %arg17[%c0_177, %c0_178, %c0_179], %232 {strides = array<i32>} : memref<2x8x32xf32, #tpu.memory_space<vmem>>, vector<2x8x32xf32>,
    %234 = vector.shape_cast %229 : vector<2x8x32xf32> to vector<2x4x2x32xf32>
    %cst_180 = arith.constant dense<0.000000e+00> : vector<2x4x32xf32>
    %235 = vector.multi_reduction <add>, %234, %cst_180 [2] : vector<2x4x2x32xf32> to vector<2x4x32xf32>
    %cst_181 = arith.constant 5.000000e-01 : f32
    %236 = vector.broadcast %cst_181 : f32 to vector<2x4x32xf32>
    %237 = arith.mulf %235, %236 : vector<2x4x32xf32>
    %c3_182 = arith.constant 3 : index
    %c0_183 = arith.constant 0 : index
    %c0_184 = arith.constant 0 : index
    %c0_185 = arith.constant 0 : index
    %238 = vector.load %arg23[%c3_182, %c0_183, %c0_184, %c0_185] : memref<4x2x4x32xf32, #tpu.memory_space<vmem>>, vector<1x2x4x32xf32>
    %239 = vector.shape_cast %238 : vector<1x2x4x32xf32> to vector<2x4x32xf32>
    %240 = vector.shape_cast %237 : vector<2x4x32xf32> to vector<1x2x4x32xf32>
    tpu.vector_store %arg23[%c3_182, %c0_183, %c0_184, %c0_185], %240 {strides = array<i32>} : memref<4x2x4x32xf32, #tpu.memory_space<vmem>>, vector<1x2x4x32xf32>,
    %c0_186 = arith.constant 0 : index
    %c0_187 = arith.constant 0 : index
    %c0_188 = arith.constant 0 : index
    %c0_189 = arith.constant 0 : index
    %241 = vector.load %arg23[%c0_186, %c0_187, %c0_188, %c0_189] : memref<4x2x4x32xf32, #tpu.memory_space<vmem>>, vector<4x2x4x32xf32>
    %c0_190 = arith.constant 0 : index
    %c0_191 = arith.constant 0 : index
    %242 = vector.load %arg11[%c0_190, %c0_191] : memref<96x64xf32, #tpu.memory_space<vmem>>, vector<96x64xf32>
    %c0_192 = arith.constant 0 : index
    %c0_193 = arith.constant 0 : index
    %243 = vector.load %arg12[%c0_192, %c0_193] : memref<1x64xf32, #tpu.memory_space<vmem>>, vector<1x64xf32>
    %c0_194 = arith.constant 0 : index
    %c0_195 = arith.constant 0 : index
    %244 = vector.load %arg13[%c0_194, %c0_195] : memref<1x64xf32, #tpu.memory_space<vmem>>, vector<1x64xf32>
    %c0_196 = arith.constant 0 : index
    %c0_197 = arith.constant 0 : index
    %245 = vector.load %arg14[%c0_196, %c0_197] : memref<1x64xf32, #tpu.memory_space<vmem>>, vector<1x64xf32>
    %246 = vector.shape_cast %241 : vector<4x2x4x32xf32> to vector<8x4x32xf32>
    %cst_198 = arith.constant 0.000000e+00 : f32
    %247 = vector.broadcast %cst_198 : f32 to vector<8x1x32xf32>
    %248 = vector.extract_strided_slice %246 {offsets = [0, 0, 0], sizes = [8, 3, 32], strides = [1, 1, 1]} : vector<8x4x32xf32> to vector<8x3x32xf32>
    %249 = tpu.concatenate %247, %248 in 1 : vector<8x1x32xf32>, vector<8x3x32xf32> -> vector<8x4x32xf32>
    %250 = vector.extract_strided_slice %246 {offsets = [0, 1, 0], sizes = [8, 3, 32], strides = [1, 1, 1]} : vector<8x4x32xf32> to vector<8x3x32xf32>
    %251 = tpu.concatenate %250, %247 in 1 : vector<8x3x32xf32>, vector<8x1x32xf32> -> vector<8x4x32xf32>
    %252 = tpu.concatenate %249, %246, %251 in 2 : vector<8x4x32xf32>, vector<8x4x32xf32>, vector<8x4x32xf32> -> vector<8x4x96xf32>
    %253 = vector.shape_cast %252 : vector<8x4x96xf32> to vector<32x96xf32>
    %cst_199 = arith.constant dense<0.000000e+00> : vector<32x64xf32>
    %254 = tpu.matmul %253, %242, %cst_199 {dimension_numbers = #tpu.dot_dimension_numbers<[1], [0], [0], [1], [0, 0, 1, 1], [], []>} : vector<32x96xf32>, vector<96x64xf32>, vector<32x64xf32> -> vector<32x64xf32>
    %255 = vector.shape_cast %254 : vector<32x64xf32> to vector<4x2x4x64xf32>
    %256 = vector.shape_cast %243 : vector<1x64xf32> to vector<1x1x1x64xf32>
    %257 = vector.broadcast %256 : vector<1x1x1x64xf32> to vector<4x2x4x64xf32>
    %258 = arith.addf %255, %257 : vector<4x2x4x64xf32>
    %cst_200 = arith.constant dense<0.000000e+00> : vector<4x2x64xf32>
    %259 = vector.multi_reduction <add>, %258, %cst_200 [2] : vector<4x2x4x64xf32> to vector<4x2x64xf32>
    %260 = vector.shape_cast %259 : vector<4x2x64xf32> to vector<4x2x1x64xf32>
    %cst_201 = arith.constant 4.000000e+00 : f32
    %261 = vector.broadcast %cst_201 : f32 to vector<4x2x1x64xf32>
    %262 = arith.divf %260, %261 : vector<4x2x1x64xf32>
    %263 = vector.broadcast %262 : vector<4x2x1x64xf32> to vector<4x2x4x64xf32>
    %264 = arith.subf %258, %263 : vector<4x2x4x64xf32>
    %265 = arith.mulf %264, %264 : vector<4x2x4x64xf32>
    %cst_202 = arith.constant dense<0.000000e+00> : vector<4x2x64xf32>
    %266 = vector.multi_reduction <add>, %265, %cst_202 [2] : vector<4x2x4x64xf32> to vector<4x2x64xf32>
    %267 = vector.shape_cast %266 : vector<4x2x64xf32> to vector<4x2x1x64xf32>
    %cst_203 = arith.constant 4.000000e+00 : f32
    %268 = vector.broadcast %cst_203 : f32 to vector<4x2x1x64xf32>
    %269 = arith.divf %267, %268 : vector<4x2x1x64xf32>
    %270 = vector.broadcast %262 : vector<4x2x1x64xf32> to vector<4x2x4x64xf32>
    %271 = arith.subf %258, %270 : vector<4x2x4x64xf32>
    %cst_204 = arith.constant 9.99999974E-6 : f32
    %272 = vector.broadcast %cst_204 : f32 to vector<4x2x1x64xf32>
    %273 = arith.addf %269, %272 : vector<4x2x1x64xf32>
    %274 = math.rsqrt %273 : vector<4x2x1x64xf32>
    %275 = vector.broadcast %274 : vector<4x2x1x64xf32> to vector<4x2x4x64xf32>
    %276 = arith.mulf %271, %275 : vector<4x2x4x64xf32>
    %277 = vector.shape_cast %244 : vector<1x64xf32> to vector<1x1x1x64xf32>
    %278 = vector.broadcast %277 : vector<1x1x1x64xf32> to vector<4x2x4x64xf32>
    %279 = arith.mulf %276, %278 : vector<4x2x4x64xf32>
    %280 = vector.shape_cast %245 : vector<1x64xf32> to vector<1x1x1x64xf32>
    %281 = vector.broadcast %280 : vector<1x1x1x64xf32> to vector<4x2x4x64xf32>
    %282 = arith.addf %279, %281 : vector<4x2x4x64xf32>
    %c0_205 = arith.constant 0 : index
    %c0_206 = arith.constant 0 : index
    %c0_207 = arith.constant 0 : index
    %c0_208 = arith.constant 0 : index
    %283 = vector.load %arg21[%c0_205, %c0_206, %c0_207, %c0_208] : memref<4x2x4x64xf32, #tpu.memory_space<vmem>>, vector<4x2x4x64xf32>
    tpu.vector_store %arg21[%c0_205, %c0_206, %c0_207, %c0_208], %282 {strides = array<i32>} : memref<4x2x4x64xf32, #tpu.memory_space<vmem>>, vector<4x2x4x64xf32>,
    %c0_209 = arith.constant 0 : index
    %c0_210 = arith.constant 0 : index
    %c0_211 = arith.constant 0 : index
    %284 = vector.load %arg18[%c0_209, %c0_210, %c0_211] : memref<2x4x64xf32, #tpu.memory_space<vmem>>, vector<2x4x64xf32>
    %c0_212 = arith.constant 0 : index
    %c0_213 = arith.constant 0 : index
    %c0_214 = arith.constant 0 : index
    %c0_215 = arith.constant 0 : index
    %285 = vector.load %arg21[%c0_212, %c0_213, %c0_214, %c0_215] : memref<4x2x4x64xf32, #tpu.memory_space<vmem>>, vector<1x2x4x64xf32>
    %286 = vector.shape_cast %285 : vector<1x2x4x64xf32> to vector<2x4x64xf32>
    %287 = arith.addf %284, %286 : vector<2x4x64xf32>
    %cst_216 = arith.constant 1.000000e+00 : f32
    %288 = vector.broadcast %cst_216 : f32 to vector<2x4x64xf32>
    %289 = arith.cmpf oge, %287, %288 : vector<2x4x64xf32>
    %290 = arith.extui %289 : vector<2x4x64xi1> to vector<2x4x64xi32>
    %291 = arith.sitofp %290 : vector<2x4x64xi32> to vector<2x4x64xf32>
    %cst_217 = arith.constant 1.000000e+00 : f32
    %292 = vector.broadcast %cst_217 : f32 to vector<2x4x64xf32>
    %293 = arith.subf %292, %291 : vector<2x4x64xf32>
    %294 = arith.mulf %287, %293 : vector<2x4x64xf32>
    %c0_218 = arith.constant 0 : index
    %c0_219 = arith.constant 0 : index
    %c0_220 = arith.constant 0 : index
    %295 = vector.load %arg18[%c0_218, %c0_219, %c0_220] : memref<2x4x64xf32, #tpu.memory_space<vmem>>, vector<2x4x64xf32>
    tpu.vector_store %arg18[%c0_218, %c0_219, %c0_220], %294 {strides = array<i32>} : memref<2x4x64xf32, #tpu.memory_space<vmem>>, vector<2x4x64xf32>,
    %296 = vector.shape_cast %291 : vector<2x4x64xf32> to vector<2x2x2x64xf32>
    %cst_221 = arith.constant dense<0.000000e+00> : vector<2x2x64xf32>
    %297 = vector.multi_reduction <add>, %296, %cst_221 [2] : vector<2x2x2x64xf32> to vector<2x2x64xf32>
    %cst_222 = arith.constant 5.000000e-01 : f32
    %298 = vector.broadcast %cst_222 : f32 to vector<2x2x64xf32>
    %299 = arith.mulf %297, %298 : vector<2x2x64xf32>
    %300 = vector.extract_strided_slice %299 {offsets = [0, 0, 0], sizes = [2, 1, 64], strides = [1, 1, 1]} : vector<2x2x64xf32> to vector<2x1x64xf32>
    %301 = vector.shape_cast %300 : vector<2x1x64xf32> to vector<2x64xf32>
    %302 = vector.extract_strided_slice %299 {offsets = [0, 1, 0], sizes = [2, 1, 64], strides = [1, 1, 1]} : vector<2x2x64xf32> to vector<2x1x64xf32>
    %303 = vector.shape_cast %302 : vector<2x1x64xf32> to vector<2x64xf32>
    %304 = tpu.concatenate %301, %303 in 1 : vector<2x64xf32>, vector<2x64xf32> -> vector<2x128xf32>
    %c0_223 = arith.constant 0 : index
    %c0_224 = arith.constant 0 : index
    %c0_225 = arith.constant 0 : index
    %305 = vector.load %arg15[%c0_223, %c0_224, %c0_225] : memref<4x2x128xf32, #tpu.memory_space<vmem>>, vector<1x2x128xf32>
    %306 = vector.shape_cast %305 : vector<1x2x128xf32> to vector<2x128xf32>
    %307 = vector.shape_cast %304 : vector<2x128xf32> to vector<1x2x128xf32>
    tpu.vector_store %arg15[%c0_223, %c0_224, %c0_225], %307 {strides = array<i32>} : memref<4x2x128xf32, #tpu.memory_space<vmem>>, vector<1x2x128xf32>,
    %c0_226 = arith.constant 0 : index
    %c0_227 = arith.constant 0 : index
    %c0_228 = arith.constant 0 : index
    %308 = vector.load %arg18[%c0_226, %c0_227, %c0_228] : memref<2x4x64xf32, #tpu.memory_space<vmem>>, vector<2x4x64xf32>
    %c1_229 = arith.constant 1 : index
    %c0_230 = arith.constant 0 : index
    %c0_231 = arith.constant 0 : index
    %c0_232 = arith.constant 0 : index
    %309 = vector.load %arg21[%c1_229, %c0_230, %c0_231, %c0_232] : memref<4x2x4x64xf32, #tpu.memory_space<vmem>>, vector<1x2x4x64xf32>
    %310 = vector.shape_cast %309 : vector<1x2x4x64xf32> to vector<2x4x64xf32>
    %311 = arith.addf %308, %310 : vector<2x4x64xf32>
    %cst_233 = arith.constant 1.000000e+00 : f32
    %312 = vector.broadcast %cst_233 : f32 to vector<2x4x64xf32>
    %313 = arith.cmpf oge, %311, %312 : vector<2x4x64xf32>
    %314 = arith.extui %313 : vector<2x4x64xi1> to vector<2x4x64xi32>
    %315 = arith.sitofp %314 : vector<2x4x64xi32> to vector<2x4x64xf32>
    %cst_234 = arith.constant 1.000000e+00 : f32
    %316 = vector.broadcast %cst_234 : f32 to vector<2x4x64xf32>
    %317 = arith.subf %316, %315 : vector<2x4x64xf32>
    %318 = arith.mulf %311, %317 : vector<2x4x64xf32>
    %c0_235 = arith.constant 0 : index
    %c0_236 = arith.constant 0 : index
    %c0_237 = arith.constant 0 : index
    %319 = vector.load %arg18[%c0_235, %c0_236, %c0_237] : memref<2x4x64xf32, #tpu.memory_space<vmem>>, vector<2x4x64xf32>
    tpu.vector_store %arg18[%c0_235, %c0_236, %c0_237], %318 {strides = array<i32>} : memref<2x4x64xf32, #tpu.memory_space<vmem>>, vector<2x4x64xf32>,
    %320 = vector.shape_cast %315 : vector<2x4x64xf32> to vector<2x2x2x64xf32>
    %cst_238 = arith.constant dense<0.000000e+00> : vector<2x2x64xf32>
    %321 = vector.multi_reduction <add>, %320, %cst_238 [2] : vector<2x2x2x64xf32> to vector<2x2x64xf32>
    %cst_239 = arith.constant 5.000000e-01 : f32
    %322 = vector.broadcast %cst_239 : f32 to vector<2x2x64xf32>
    %323 = arith.mulf %321, %322 : vector<2x2x64xf32>
    %324 = vector.extract_strided_slice %323 {offsets = [0, 0, 0], sizes = [2, 1, 64], strides = [1, 1, 1]} : vector<2x2x64xf32> to vector<2x1x64xf32>
    %325 = vector.shape_cast %324 : vector<2x1x64xf32> to vector<2x64xf32>
    %326 = vector.extract_strided_slice %323 {offsets = [0, 1, 0], sizes = [2, 1, 64], strides = [1, 1, 1]} : vector<2x2x64xf32> to vector<2x1x64xf32>
    %327 = vector.shape_cast %326 : vector<2x1x64xf32> to vector<2x64xf32>
    %328 = tpu.concatenate %325, %327 in 1 : vector<2x64xf32>, vector<2x64xf32> -> vector<2x128xf32>
    %c1_240 = arith.constant 1 : index
    %c0_241 = arith.constant 0 : index
    %c0_242 = arith.constant 0 : index
    %329 = vector.load %arg15[%c1_240, %c0_241, %c0_242] : memref<4x2x128xf32, #tpu.memory_space<vmem>>, vector<1x2x128xf32>
    %330 = vector.shape_cast %329 : vector<1x2x128xf32> to vector<2x128xf32>
    %331 = vector.shape_cast %328 : vector<2x128xf32> to vector<1x2x128xf32>
    tpu.vector_store %arg15[%c1_240, %c0_241, %c0_242], %331 {strides = array<i32>} : memref<4x2x128xf32, #tpu.memory_space<vmem>>, vector<1x2x128xf32>,
    %c0_243 = arith.constant 0 : index
    %c0_244 = arith.constant 0 : index
    %c0_245 = arith.constant 0 : index
    %332 = vector.load %arg18[%c0_243, %c0_244, %c0_245] : memref<2x4x64xf32, #tpu.memory_space<vmem>>, vector<2x4x64xf32>
    %c2_246 = arith.constant 2 : index
    %c0_247 = arith.constant 0 : index
    %c0_248 = arith.constant 0 : index
    %c0_249 = arith.constant 0 : index
    %333 = vector.load %arg21[%c2_246, %c0_247, %c0_248, %c0_249] : memref<4x2x4x64xf32, #tpu.memory_space<vmem>>, vector<1x2x4x64xf32>
    %334 = vector.shape_cast %333 : vector<1x2x4x64xf32> to vector<2x4x64xf32>
    %335 = arith.addf %332, %334 : vector<2x4x64xf32>
    %cst_250 = arith.constant 1.000000e+00 : f32
    %336 = vector.broadcast %cst_250 : f32 to vector<2x4x64xf32>
    %337 = arith.cmpf oge, %335, %336 : vector<2x4x64xf32>
    %338 = arith.extui %337 : vector<2x4x64xi1> to vector<2x4x64xi32>
    %339 = arith.sitofp %338 : vector<2x4x64xi32> to vector<2x4x64xf32>
    %cst_251 = arith.constant 1.000000e+00 : f32
    %340 = vector.broadcast %cst_251 : f32 to vector<2x4x64xf32>
    %341 = arith.subf %340, %339 : vector<2x4x64xf32>
    %342 = arith.mulf %335, %341 : vector<2x4x64xf32>
    %c0_252 = arith.constant 0 : index
    %c0_253 = arith.constant 0 : index
    %c0_254 = arith.constant 0 : index
    %343 = vector.load %arg18[%c0_252, %c0_253, %c0_254] : memref<2x4x64xf32, #tpu.memory_space<vmem>>, vector<2x4x64xf32>
    tpu.vector_store %arg18[%c0_252, %c0_253, %c0_254], %342 {strides = array<i32>} : memref<2x4x64xf32, #tpu.memory_space<vmem>>, vector<2x4x64xf32>,
    %344 = vector.shape_cast %339 : vector<2x4x64xf32> to vector<2x2x2x64xf32>
    %cst_255 = arith.constant dense<0.000000e+00> : vector<2x2x64xf32>
    %345 = vector.multi_reduction <add>, %344, %cst_255 [2] : vector<2x2x2x64xf32> to vector<2x2x64xf32>
    %cst_256 = arith.constant 5.000000e-01 : f32
    %346 = vector.broadcast %cst_256 : f32 to vector<2x2x64xf32>
    %347 = arith.mulf %345, %346 : vector<2x2x64xf32>
    %348 = vector.extract_strided_slice %347 {offsets = [0, 0, 0], sizes = [2, 1, 64], strides = [1, 1, 1]} : vector<2x2x64xf32> to vector<2x1x64xf32>
    %349 = vector.shape_cast %348 : vector<2x1x64xf32> to vector<2x64xf32>
    %350 = vector.extract_strided_slice %347 {offsets = [0, 1, 0], sizes = [2, 1, 64], strides = [1, 1, 1]} : vector<2x2x64xf32> to vector<2x1x64xf32>
    %351 = vector.shape_cast %350 : vector<2x1x64xf32> to vector<2x64xf32>
    %352 = tpu.concatenate %349, %351 in 1 : vector<2x64xf32>, vector<2x64xf32> -> vector<2x128xf32>
    %c2_257 = arith.constant 2 : index
    %c0_258 = arith.constant 0 : index
    %c0_259 = arith.constant 0 : index
    %353 = vector.load %arg15[%c2_257, %c0_258, %c0_259] : memref<4x2x128xf32, #tpu.memory_space<vmem>>, vector<1x2x128xf32>
    %354 = vector.shape_cast %353 : vector<1x2x128xf32> to vector<2x128xf32>
    %355 = vector.shape_cast %352 : vector<2x128xf32> to vector<1x2x128xf32>
    tpu.vector_store %arg15[%c2_257, %c0_258, %c0_259], %355 {strides = array<i32>} : memref<4x2x128xf32, #tpu.memory_space<vmem>>, vector<1x2x128xf32>,
    %c0_260 = arith.constant 0 : index
    %c0_261 = arith.constant 0 : index
    %c0_262 = arith.constant 0 : index
    %356 = vector.load %arg18[%c0_260, %c0_261, %c0_262] : memref<2x4x64xf32, #tpu.memory_space<vmem>>, vector<2x4x64xf32>
    %c3_263 = arith.constant 3 : index
    %c0_264 = arith.constant 0 : index
    %c0_265 = arith.constant 0 : index
    %c0_266 = arith.constant 0 : index
    %357 = vector.load %arg21[%c3_263, %c0_264, %c0_265, %c0_266] : memref<4x2x4x64xf32, #tpu.memory_space<vmem>>, vector<1x2x4x64xf32>
    %358 = vector.shape_cast %357 : vector<1x2x4x64xf32> to vector<2x4x64xf32>
    %359 = arith.addf %356, %358 : vector<2x4x64xf32>
    %cst_267 = arith.constant 1.000000e+00 : f32
    %360 = vector.broadcast %cst_267 : f32 to vector<2x4x64xf32>
    %361 = arith.cmpf oge, %359, %360 : vector<2x4x64xf32>
    %362 = arith.extui %361 : vector<2x4x64xi1> to vector<2x4x64xi32>
    %363 = arith.sitofp %362 : vector<2x4x64xi32> to vector<2x4x64xf32>
    %cst_268 = arith.constant 1.000000e+00 : f32
    %364 = vector.broadcast %cst_268 : f32 to vector<2x4x64xf32>
    %365 = arith.subf %364, %363 : vector<2x4x64xf32>
    %366 = arith.mulf %359, %365 : vector<2x4x64xf32>
    %c0_269 = arith.constant 0 : index
    %c0_270 = arith.constant 0 : index
    %c0_271 = arith.constant 0 : index
    %367 = vector.load %arg18[%c0_269, %c0_270, %c0_271] : memref<2x4x64xf32, #tpu.memory_space<vmem>>, vector<2x4x64xf32>
    tpu.vector_store %arg18[%c0_269, %c0_270, %c0_271], %366 {strides = array<i32>} : memref<2x4x64xf32, #tpu.memory_space<vmem>>, vector<2x4x64xf32>,
    %368 = vector.shape_cast %363 : vector<2x4x64xf32> to vector<2x2x2x64xf32>
    %cst_272 = arith.constant dense<0.000000e+00> : vector<2x2x64xf32>
    %369 = vector.multi_reduction <add>, %368, %cst_272 [2] : vector<2x2x2x64xf32> to vector<2x2x64xf32>
    %cst_273 = arith.constant 5.000000e-01 : f32
    %370 = vector.broadcast %cst_273 : f32 to vector<2x2x64xf32>
    %371 = arith.mulf %369, %370 : vector<2x2x64xf32>
    %372 = vector.extract_strided_slice %371 {offsets = [0, 0, 0], sizes = [2, 1, 64], strides = [1, 1, 1]} : vector<2x2x64xf32> to vector<2x1x64xf32>
    %373 = vector.shape_cast %372 : vector<2x1x64xf32> to vector<2x64xf32>
    %374 = vector.extract_strided_slice %371 {offsets = [0, 1, 0], sizes = [2, 1, 64], strides = [1, 1, 1]} : vector<2x2x64xf32> to vector<2x1x64xf32>
    %375 = vector.shape_cast %374 : vector<2x1x64xf32> to vector<2x64xf32>
    %376 = tpu.concatenate %373, %375 in 1 : vector<2x64xf32>, vector<2x64xf32> -> vector<2x128xf32>
    %c3_274 = arith.constant 3 : index
    %c0_275 = arith.constant 0 : index
    %c0_276 = arith.constant 0 : index
    %377 = vector.load %arg15[%c3_274, %c0_275, %c0_276] : memref<4x2x128xf32, #tpu.memory_space<vmem>>, vector<1x2x128xf32>
    %378 = vector.shape_cast %377 : vector<1x2x128xf32> to vector<2x128xf32>
    %379 = vector.shape_cast %376 : vector<2x128xf32> to vector<1x2x128xf32>
    tpu.vector_store %arg15[%c3_274, %c0_275, %c0_276], %379 {strides = array<i32>} : memref<4x2x128xf32, #tpu.memory_space<vmem>>, vector<1x2x128xf32>,
    return
  }
  func.func @transform_0(%arg0: i32, %arg1: i32) -> (i32, i32, i32, i32) {
    %c0_i32 = arith.constant 0 : i32
    %c0_i32_0 = arith.constant 0 : i32
    %c0_i32_1 = arith.constant 0 : i32
    return %arg1, %arg0, %c0_i32, %c0_i32_0 : i32, i32, i32, i32
  }
  func.func @transform_1(%arg0: i32, %arg1: i32) -> (i32, i32) {
    %c0_i32 = arith.constant 0 : i32
    %c0_i32_0 = arith.constant 0 : i32
    %c0_i32_1 = arith.constant 0 : i32
    return %c0_i32, %c0_i32_0 : i32, i32
  }
  func.func @transform_2(%arg0: i32, %arg1: i32) -> (i32, i32) {
    %c0_i32 = arith.constant 0 : i32
    %c0_i32_0 = arith.constant 0 : i32
    %c0_i32_1 = arith.constant 0 : i32
    return %c0_i32, %c0_i32_0 : i32, i32
  }
  func.func @transform_3(%arg0: i32, %arg1: i32) -> (i32, i32) {
    %c0_i32 = arith.constant 0 : i32
    %c0_i32_0 = arith.constant 0 : i32
    %c0_i32_1 = arith.constant 0 : i32
    return %c0_i32, %c0_i32_0 : i32, i32
  }
  func.func @transform_4(%arg0: i32, %arg1: i32) -> (i32, i32) {
    %c0_i32 = arith.constant 0 : i32
    %c0_i32_0 = arith.constant 0 : i32
    %c0_i32_1 = arith.constant 0 : i32
    return %c0_i32, %c0_i32_0 : i32, i32
  }
  func.func @transform_5(%arg0: i32, %arg1: i32) -> (i32, i32) {
    %c0_i32 = arith.constant 0 : i32
    %c0_i32_0 = arith.constant 0 : i32
    %c0_i32_1 = arith.constant 0 : i32
    return %c0_i32, %c0_i32_0 : i32, i32
  }
  func.func @transform_6(%arg0: i32, %arg1: i32) -> (i32, i32) {
    %c0_i32 = arith.constant 0 : i32
    %c0_i32_0 = arith.constant 0 : i32
    %c0_i32_1 = arith.constant 0 : i32
    return %c0_i32, %c0_i32_0 : i32, i32
  }
  func.func @transform_7(%arg0: i32, %arg1: i32) -> (i32, i32) {
    %c0_i32 = arith.constant 0 : i32
    %c0_i32_0 = arith.constant 0 : i32
    %c0_i32_1 = arith.constant 0 : i32
    return %c0_i32, %c0_i32_0 : i32, i32
  }
  func.func @transform_8(%arg0: i32, %arg1: i32) -> (i32, i32) {
    %c0_i32 = arith.constant 0 : i32
    %c0_i32_0 = arith.constant 0 : i32
    %c0_i32_1 = arith.constant 0 : i32
    return %c0_i32, %c0_i32_0 : i32, i32
  }
  func.func @transform_9(%arg0: i32, %arg1: i32) -> (i32, i32) {
    %c0_i32 = arith.constant 0 : i32
    %c0_i32_0 = arith.constant 0 : i32
    %c0_i32_1 = arith.constant 0 : i32
    return %c0_i32, %c0_i32_0 : i32, i32
  }
  func.func @transform_10(%arg0: i32, %arg1: i32) -> (i32, i32) {
    %c0_i32 = arith.constant 0 : i32
    %c0_i32_0 = arith.constant 0 : i32
    %c0_i32_1 = arith.constant 0 : i32
    return %c0_i32, %c0_i32_0 : i32, i32
  }
  func.func @transform_11(%arg0: i32, %arg1: i32) -> (i32, i32) {
    %c0_i32 = arith.constant 0 : i32
    %c0_i32_0 = arith.constant 0 : i32
    %c0_i32_1 = arith.constant 0 : i32
    return %c0_i32, %c0_i32_0 : i32, i32
  }
  func.func @transform_12(%arg0: i32, %arg1: i32) -> (i32, i32) {
    %c0_i32 = arith.constant 0 : i32
    %c0_i32_0 = arith.constant 0 : i32
    %c0_i32_1 = arith.constant 0 : i32
    return %c0_i32, %c0_i32_0 : i32, i32
  }
  func.func @transform_13(%arg0: i32, %arg1: i32) -> (i32, i32, i32) {
    %c0_i32 = arith.constant 0 : i32
    %c0_i32_0 = arith.constant 0 : i32
    return %arg1, %arg0, %c0_i32 : i32, i32, i32
  }
}

module attributes {stable_mosaic.version = 11 : i64} {
  func.func @bigru_kernel(%arg0: i32, %arg1: i32, %arg2: memref<1x3x4x2x64xf32, #tpu.memory_space<vmem>>, %arg3: memref<1x3x64x64xf32, #tpu.memory_space<vmem>>, %arg4: memref<1x3x1x64xf32, #tpu.memory_space<vmem>>, %arg5: memref<1x4x2x64xf32, #tpu.memory_space<vmem>>, %arg6: memref<2x64xf32, #tpu.memory_space<vmem>>) attributes {dimension_semantics = [#tpu.dimension_semantics<parallel>, #tpu.dimension_semantics<arbitrary>], iteration_bounds = array<i64: 2, 1>, scalar_prefetch = 0 : i64, scratch_operands = 1 : i64, tpu.core_type = #tpu.core_type<tc>, window_params = [{transform_indices = @transform_0, window_bounds = array<i64: 1, 3, 4, 2, 64>}, {transform_indices = @transform_1, window_bounds = array<i64: 1, 3, 64, 64>}, {transform_indices = @transform_2, window_bounds = array<i64: 1, 3, 1, 64>}, {transform_indices = @transform_3, window_bounds = array<i64: 1, 4, 2, 64>}]} {
    %c0_i32 = arith.constant 0 : i32
    %0 = arith.cmpi eq, %arg1, %c0_i32 : i32
    %1 = arith.extui %0 : i1 to i32
    %c0_i32_0 = arith.constant 0 : i32
    %2 = arith.cmpi ne, %1, %c0_i32_0 : i32
    scf.if %2 {
      %cst_136 = arith.constant 0.000000e+00 : f32
      %175 = vector.broadcast %cst_136 : f32 to vector<2x64xf32>
      %c0_137 = arith.constant 0 : index
      %c0_138 = arith.constant 0 : index
      %176 = vector.load %arg6[%c0_137, %c0_138] : memref<2x64xf32, #tpu.memory_space<vmem>>, vector<2x64xf32>
      tpu.vector_store %arg6[%c0_137, %c0_138], %175 {strides = array<i32>} : memref<2x64xf32, #tpu.memory_space<vmem>>, vector<2x64xf32>,
    } else {
    }
    %c0 = arith.constant 0 : index
    %c0_1 = arith.constant 0 : index
    %c0_2 = arith.constant 0 : index
    %c0_3 = arith.constant 0 : index
    %3 = vector.load %arg3[%c0, %c0_1, %c0_2, %c0_3] : memref<1x3x64x64xf32, #tpu.memory_space<vmem>>, vector<1x1x64x64xf32>
    %4 = vector.shape_cast %3 : vector<1x1x64x64xf32> to vector<64x64xf32>
    %c0_4 = arith.constant 0 : index
    %c1 = arith.constant 1 : index
    %c0_5 = arith.constant 0 : index
    %c0_6 = arith.constant 0 : index
    %5 = vector.load %arg3[%c0_4, %c1, %c0_5, %c0_6] : memref<1x3x64x64xf32, #tpu.memory_space<vmem>>, vector<1x1x64x64xf32>
    %6 = vector.shape_cast %5 : vector<1x1x64x64xf32> to vector<64x64xf32>
    %c0_7 = arith.constant 0 : index
    %c2 = arith.constant 2 : index
    %c0_8 = arith.constant 0 : index
    %c0_9 = arith.constant 0 : index
    %7 = vector.load %arg3[%c0_7, %c2, %c0_8, %c0_9] : memref<1x3x64x64xf32, #tpu.memory_space<vmem>>, vector<1x1x64x64xf32>
    %8 = vector.shape_cast %7 : vector<1x1x64x64xf32> to vector<64x64xf32>
    %c0_10 = arith.constant 0 : index
    %c0_11 = arith.constant 0 : index
    %c0_12 = arith.constant 0 : index
    %c0_13 = arith.constant 0 : index
    %9 = vector.load %arg4[%c0_10, %c0_11, %c0_12, %c0_13] : memref<1x3x1x64xf32, #tpu.memory_space<vmem>>, vector<1x1x1x64xf32>
    %10 = vector.shape_cast %9 : vector<1x1x1x64xf32> to vector<1x64xf32>
    %c0_14 = arith.constant 0 : index
    %c1_15 = arith.constant 1 : index
    %c0_16 = arith.constant 0 : index
    %c0_17 = arith.constant 0 : index
    %11 = vector.load %arg4[%c0_14, %c1_15, %c0_16, %c0_17] : memref<1x3x1x64xf32, #tpu.memory_space<vmem>>, vector<1x1x1x64xf32>
    %12 = vector.shape_cast %11 : vector<1x1x1x64xf32> to vector<1x64xf32>
    %c0_18 = arith.constant 0 : index
    %c2_19 = arith.constant 2 : index
    %c0_20 = arith.constant 0 : index
    %c0_21 = arith.constant 0 : index
    %13 = vector.load %arg4[%c0_18, %c2_19, %c0_20, %c0_21] : memref<1x3x1x64xf32, #tpu.memory_space<vmem>>, vector<1x1x1x64xf32>
    %14 = vector.shape_cast %13 : vector<1x1x1x64xf32> to vector<1x64xf32>
    %c0_22 = arith.constant 0 : index
    %c0_23 = arith.constant 0 : index
    %15 = vector.load %arg6[%c0_22, %c0_23] : memref<2x64xf32, #tpu.memory_space<vmem>>, vector<2x64xf32>
    %cst = arith.constant dense<0.000000e+00> : vector<2x64xf32>
    %16 = tpu.matmul %15, %4, %cst {dimension_numbers = #tpu.dot_dimension_numbers<[1], [0], [0], [1], [0, 0, 1, 1], [], []>} : vector<2x64xf32>, vector<64x64xf32>, vector<2x64xf32> -> vector<2x64xf32>
    %17 = vector.broadcast %10 : vector<1x64xf32> to vector<2x64xf32>
    %18 = arith.addf %16, %17 : vector<2x64xf32>
    %cst_24 = arith.constant dense<0.000000e+00> : vector<2x64xf32>
    %19 = tpu.matmul %15, %6, %cst_24 {dimension_numbers = #tpu.dot_dimension_numbers<[1], [0], [0], [1], [0, 0, 1, 1], [], []>} : vector<2x64xf32>, vector<64x64xf32>, vector<2x64xf32> -> vector<2x64xf32>
    %20 = vector.broadcast %12 : vector<1x64xf32> to vector<2x64xf32>
    %21 = arith.addf %19, %20 : vector<2x64xf32>
    %cst_25 = arith.constant dense<0.000000e+00> : vector<2x64xf32>
    %22 = tpu.matmul %15, %8, %cst_25 {dimension_numbers = #tpu.dot_dimension_numbers<[1], [0], [0], [1], [0, 0, 1, 1], [], []>} : vector<2x64xf32>, vector<64x64xf32>, vector<2x64xf32> -> vector<2x64xf32>
    %23 = vector.broadcast %14 : vector<1x64xf32> to vector<2x64xf32>
    %24 = arith.addf %22, %23 : vector<2x64xf32>
    %c0_26 = arith.constant 0 : index
    %c0_27 = arith.constant 0 : index
    %c0_28 = arith.constant 0 : index
    %c0_29 = arith.constant 0 : index
    %c0_30 = arith.constant 0 : index
    %25 = vector.load %arg2[%c0_26, %c0_27, %c0_28, %c0_29, %c0_30] : memref<1x3x4x2x64xf32, #tpu.memory_space<vmem>>, vector<1x1x1x2x64xf32>
    %26 = vector.shape_cast %25 : vector<1x1x1x2x64xf32> to vector<2x64xf32>
    %27 = arith.addf %26, %18 : vector<2x64xf32>
    %28 = arith.negf %27 : vector<2x64xf32>
    %29 = math.exp %28 : vector<2x64xf32>
    %cst_31 = arith.constant 1.000000e+00 : f32
    %30 = vector.broadcast %cst_31 : f32 to vector<2x64xf32>
    %31 = arith.addf %30, %29 : vector<2x64xf32>
    %32 = arith.divf %30, %31 : vector<2x64xf32>
    %c0_32 = arith.constant 0 : index
    %c1_33 = arith.constant 1 : index
    %c0_34 = arith.constant 0 : index
    %c0_35 = arith.constant 0 : index
    %c0_36 = arith.constant 0 : index
    %33 = vector.load %arg2[%c0_32, %c1_33, %c0_34, %c0_35, %c0_36] : memref<1x3x4x2x64xf32, #tpu.memory_space<vmem>>, vector<1x1x1x2x64xf32>
    %34 = vector.shape_cast %33 : vector<1x1x1x2x64xf32> to vector<2x64xf32>
    %35 = arith.addf %34, %21 : vector<2x64xf32>
    %36 = arith.negf %35 : vector<2x64xf32>
    %37 = math.exp %36 : vector<2x64xf32>
    %cst_37 = arith.constant 1.000000e+00 : f32
    %38 = vector.broadcast %cst_37 : f32 to vector<2x64xf32>
    %39 = arith.addf %38, %37 : vector<2x64xf32>
    %40 = arith.divf %38, %39 : vector<2x64xf32>
    %c0_38 = arith.constant 0 : index
    %c2_39 = arith.constant 2 : index
    %c0_40 = arith.constant 0 : index
    %c0_41 = arith.constant 0 : index
    %c0_42 = arith.constant 0 : index
    %41 = vector.load %arg2[%c0_38, %c2_39, %c0_40, %c0_41, %c0_42] : memref<1x3x4x2x64xf32, #tpu.memory_space<vmem>>, vector<1x1x1x2x64xf32>
    %42 = vector.shape_cast %41 : vector<1x1x1x2x64xf32> to vector<2x64xf32>
    %43 = arith.mulf %32, %24 : vector<2x64xf32>
    %44 = arith.addf %42, %43 : vector<2x64xf32>
    %45 = math.tanh %44 : vector<2x64xf32>
    %cst_43 = arith.constant 1.000000e+00 : f32
    %46 = vector.broadcast %cst_43 : f32 to vector<2x64xf32>
    %47 = arith.subf %46, %40 : vector<2x64xf32>
    %48 = arith.mulf %47, %45 : vector<2x64xf32>
    %49 = arith.mulf %40, %15 : vector<2x64xf32>
    %50 = arith.addf %48, %49 : vector<2x64xf32>
    %c0_44 = arith.constant 0 : index
    %c0_45 = arith.constant 0 : index
    %51 = vector.load %arg6[%c0_44, %c0_45] : memref<2x64xf32, #tpu.memory_space<vmem>>, vector<2x64xf32>
    tpu.vector_store %arg6[%c0_44, %c0_45], %50 {strides = array<i32>} : memref<2x64xf32, #tpu.memory_space<vmem>>, vector<2x64xf32>,
    %c0_46 = arith.constant 0 : index
    %c0_47 = arith.constant 0 : index
    %c0_48 = arith.constant 0 : index
    %c0_49 = arith.constant 0 : index
    %52 = vector.load %arg5[%c0_46, %c0_47, %c0_48, %c0_49] : memref<1x4x2x64xf32, #tpu.memory_space<vmem>>, vector<1x1x2x64xf32>
    %53 = vector.shape_cast %52 : vector<1x1x2x64xf32> to vector<2x64xf32>
    %54 = vector.shape_cast %50 : vector<2x64xf32> to vector<1x1x2x64xf32>
    tpu.vector_store %arg5[%c0_46, %c0_47, %c0_48, %c0_49], %54 {strides = array<i32>} : memref<1x4x2x64xf32, #tpu.memory_space<vmem>>, vector<1x1x2x64xf32>,
    %c0_50 = arith.constant 0 : index
    %c0_51 = arith.constant 0 : index
    %55 = vector.load %arg6[%c0_50, %c0_51] : memref<2x64xf32, #tpu.memory_space<vmem>>, vector<2x64xf32>
    %cst_52 = arith.constant dense<0.000000e+00> : vector<2x64xf32>
    %56 = tpu.matmul %55, %4, %cst_52 {dimension_numbers = #tpu.dot_dimension_numbers<[1], [0], [0], [1], [0, 0, 1, 1], [], []>} : vector<2x64xf32>, vector<64x64xf32>, vector<2x64xf32> -> vector<2x64xf32>
    %57 = vector.broadcast %10 : vector<1x64xf32> to vector<2x64xf32>
    %58 = arith.addf %56, %57 : vector<2x64xf32>
    %cst_53 = arith.constant dense<0.000000e+00> : vector<2x64xf32>
    %59 = tpu.matmul %55, %6, %cst_53 {dimension_numbers = #tpu.dot_dimension_numbers<[1], [0], [0], [1], [0, 0, 1, 1], [], []>} : vector<2x64xf32>, vector<64x64xf32>, vector<2x64xf32> -> vector<2x64xf32>
    %60 = vector.broadcast %12 : vector<1x64xf32> to vector<2x64xf32>
    %61 = arith.addf %59, %60 : vector<2x64xf32>
    %cst_54 = arith.constant dense<0.000000e+00> : vector<2x64xf32>
    %62 = tpu.matmul %55, %8, %cst_54 {dimension_numbers = #tpu.dot_dimension_numbers<[1], [0], [0], [1], [0, 0, 1, 1], [], []>} : vector<2x64xf32>, vector<64x64xf32>, vector<2x64xf32> -> vector<2x64xf32>
    %63 = vector.broadcast %14 : vector<1x64xf32> to vector<2x64xf32>
    %64 = arith.addf %62, %63 : vector<2x64xf32>
    %c0_55 = arith.constant 0 : index
    %c0_56 = arith.constant 0 : index
    %c1_57 = arith.constant 1 : index
    %c0_58 = arith.constant 0 : index
    %c0_59 = arith.constant 0 : index
    %65 = vector.load %arg2[%c0_55, %c0_56, %c1_57, %c0_58, %c0_59] : memref<1x3x4x2x64xf32, #tpu.memory_space<vmem>>, vector<1x1x1x2x64xf32>
    %66 = vector.shape_cast %65 : vector<1x1x1x2x64xf32> to vector<2x64xf32>
    %67 = arith.addf %66, %58 : vector<2x64xf32>
    %68 = arith.negf %67 : vector<2x64xf32>
    %69 = math.exp %68 : vector<2x64xf32>
    %cst_60 = arith.constant 1.000000e+00 : f32
    %70 = vector.broadcast %cst_60 : f32 to vector<2x64xf32>
    %71 = arith.addf %70, %69 : vector<2x64xf32>
    %72 = arith.divf %70, %71 : vector<2x64xf32>
    %c0_61 = arith.constant 0 : index
    %c1_62 = arith.constant 1 : index
    %c1_63 = arith.constant 1 : index
    %c0_64 = arith.constant 0 : index
    %c0_65 = arith.constant 0 : index
    %73 = vector.load %arg2[%c0_61, %c1_62, %c1_63, %c0_64, %c0_65] : memref<1x3x4x2x64xf32, #tpu.memory_space<vmem>>, vector<1x1x1x2x64xf32>
    %74 = vector.shape_cast %73 : vector<1x1x1x2x64xf32> to vector<2x64xf32>
    %75 = arith.addf %74, %61 : vector<2x64xf32>
    %76 = arith.negf %75 : vector<2x64xf32>
    %77 = math.exp %76 : vector<2x64xf32>
    %cst_66 = arith.constant 1.000000e+00 : f32
    %78 = vector.broadcast %cst_66 : f32 to vector<2x64xf32>
    %79 = arith.addf %78, %77 : vector<2x64xf32>
    %80 = arith.divf %78, %79 : vector<2x64xf32>
    %c0_67 = arith.constant 0 : index
    %c2_68 = arith.constant 2 : index
    %c1_69 = arith.constant 1 : index
    %c0_70 = arith.constant 0 : index
    %c0_71 = arith.constant 0 : index
    %81 = vector.load %arg2[%c0_67, %c2_68, %c1_69, %c0_70, %c0_71] : memref<1x3x4x2x64xf32, #tpu.memory_space<vmem>>, vector<1x1x1x2x64xf32>
    %82 = vector.shape_cast %81 : vector<1x1x1x2x64xf32> to vector<2x64xf32>
    %83 = arith.mulf %72, %64 : vector<2x64xf32>
    %84 = arith.addf %82, %83 : vector<2x64xf32>
    %85 = math.tanh %84 : vector<2x64xf32>
    %cst_72 = arith.constant 1.000000e+00 : f32
    %86 = vector.broadcast %cst_72 : f32 to vector<2x64xf32>
    %87 = arith.subf %86, %80 : vector<2x64xf32>
    %88 = arith.mulf %87, %85 : vector<2x64xf32>
    %89 = arith.mulf %80, %55 : vector<2x64xf32>
    %90 = arith.addf %88, %89 : vector<2x64xf32>
    %c0_73 = arith.constant 0 : index
    %c0_74 = arith.constant 0 : index
    %91 = vector.load %arg6[%c0_73, %c0_74] : memref<2x64xf32, #tpu.memory_space<vmem>>, vector<2x64xf32>
    tpu.vector_store %arg6[%c0_73, %c0_74], %90 {strides = array<i32>} : memref<2x64xf32, #tpu.memory_space<vmem>>, vector<2x64xf32>,
    %c0_75 = arith.constant 0 : index
    %c1_76 = arith.constant 1 : index
    %c0_77 = arith.constant 0 : index
    %c0_78 = arith.constant 0 : index
    %92 = vector.load %arg5[%c0_75, %c1_76, %c0_77, %c0_78] : memref<1x4x2x64xf32, #tpu.memory_space<vmem>>, vector<1x1x2x64xf32>
    %93 = vector.shape_cast %92 : vector<1x1x2x64xf32> to vector<2x64xf32>
    %94 = vector.shape_cast %90 : vector<2x64xf32> to vector<1x1x2x64xf32>
    tpu.vector_store %arg5[%c0_75, %c1_76, %c0_77, %c0_78], %94 {strides = array<i32>} : memref<1x4x2x64xf32, #tpu.memory_space<vmem>>, vector<1x1x2x64xf32>,
    %c0_79 = arith.constant 0 : index
    %c0_80 = arith.constant 0 : index
    %95 = vector.load %arg6[%c0_79, %c0_80] : memref<2x64xf32, #tpu.memory_space<vmem>>, vector<2x64xf32>
    %cst_81 = arith.constant dense<0.000000e+00> : vector<2x64xf32>
    %96 = tpu.matmul %95, %4, %cst_81 {dimension_numbers = #tpu.dot_dimension_numbers<[1], [0], [0], [1], [0, 0, 1, 1], [], []>} : vector<2x64xf32>, vector<64x64xf32>, vector<2x64xf32> -> vector<2x64xf32>
    %97 = vector.broadcast %10 : vector<1x64xf32> to vector<2x64xf32>
    %98 = arith.addf %96, %97 : vector<2x64xf32>
    %cst_82 = arith.constant dense<0.000000e+00> : vector<2x64xf32>
    %99 = tpu.matmul %95, %6, %cst_82 {dimension_numbers = #tpu.dot_dimension_numbers<[1], [0], [0], [1], [0, 0, 1, 1], [], []>} : vector<2x64xf32>, vector<64x64xf32>, vector<2x64xf32> -> vector<2x64xf32>
    %100 = vector.broadcast %12 : vector<1x64xf32> to vector<2x64xf32>
    %101 = arith.addf %99, %100 : vector<2x64xf32>
    %cst_83 = arith.constant dense<0.000000e+00> : vector<2x64xf32>
    %102 = tpu.matmul %95, %8, %cst_83 {dimension_numbers = #tpu.dot_dimension_numbers<[1], [0], [0], [1], [0, 0, 1, 1], [], []>} : vector<2x64xf32>, vector<64x64xf32>, vector<2x64xf32> -> vector<2x64xf32>
    %103 = vector.broadcast %14 : vector<1x64xf32> to vector<2x64xf32>
    %104 = arith.addf %102, %103 : vector<2x64xf32>
    %c0_84 = arith.constant 0 : index
    %c0_85 = arith.constant 0 : index
    %c2_86 = arith.constant 2 : index
    %c0_87 = arith.constant 0 : index
    %c0_88 = arith.constant 0 : index
    %105 = vector.load %arg2[%c0_84, %c0_85, %c2_86, %c0_87, %c0_88] : memref<1x3x4x2x64xf32, #tpu.memory_space<vmem>>, vector<1x1x1x2x64xf32>
    %106 = vector.shape_cast %105 : vector<1x1x1x2x64xf32> to vector<2x64xf32>
    %107 = arith.addf %106, %98 : vector<2x64xf32>
    %108 = arith.negf %107 : vector<2x64xf32>
    %109 = math.exp %108 : vector<2x64xf32>
    %cst_89 = arith.constant 1.000000e+00 : f32
    %110 = vector.broadcast %cst_89 : f32 to vector<2x64xf32>
    %111 = arith.addf %110, %109 : vector<2x64xf32>
    %112 = arith.divf %110, %111 : vector<2x64xf32>
    %c0_90 = arith.constant 0 : index
    %c1_91 = arith.constant 1 : index
    %c2_92 = arith.constant 2 : index
    %c0_93 = arith.constant 0 : index
    %c0_94 = arith.constant 0 : index
    %113 = vector.load %arg2[%c0_90, %c1_91, %c2_92, %c0_93, %c0_94] : memref<1x3x4x2x64xf32, #tpu.memory_space<vmem>>, vector<1x1x1x2x64xf32>
    %114 = vector.shape_cast %113 : vector<1x1x1x2x64xf32> to vector<2x64xf32>
    %115 = arith.addf %114, %101 : vector<2x64xf32>
    %116 = arith.negf %115 : vector<2x64xf32>
    %117 = math.exp %116 : vector<2x64xf32>
    %cst_95 = arith.constant 1.000000e+00 : f32
    %118 = vector.broadcast %cst_95 : f32 to vector<2x64xf32>
    %119 = arith.addf %118, %117 : vector<2x64xf32>
    %120 = arith.divf %118, %119 : vector<2x64xf32>
    %c0_96 = arith.constant 0 : index
    %c2_97 = arith.constant 2 : index
    %c2_98 = arith.constant 2 : index
    %c0_99 = arith.constant 0 : index
    %c0_100 = arith.constant 0 : index
    %121 = vector.load %arg2[%c0_96, %c2_97, %c2_98, %c0_99, %c0_100] : memref<1x3x4x2x64xf32, #tpu.memory_space<vmem>>, vector<1x1x1x2x64xf32>
    %122 = vector.shape_cast %121 : vector<1x1x1x2x64xf32> to vector<2x64xf32>
    %123 = arith.mulf %112, %104 : vector<2x64xf32>
    %124 = arith.addf %122, %123 : vector<2x64xf32>
    %125 = math.tanh %124 : vector<2x64xf32>
    %cst_101 = arith.constant 1.000000e+00 : f32
    %126 = vector.broadcast %cst_101 : f32 to vector<2x64xf32>
    %127 = arith.subf %126, %120 : vector<2x64xf32>
    %128 = arith.mulf %127, %125 : vector<2x64xf32>
    %129 = arith.mulf %120, %95 : vector<2x64xf32>
    %130 = arith.addf %128, %129 : vector<2x64xf32>
    %c0_102 = arith.constant 0 : index
    %c0_103 = arith.constant 0 : index
    %131 = vector.load %arg6[%c0_102, %c0_103] : memref<2x64xf32, #tpu.memory_space<vmem>>, vector<2x64xf32>
    tpu.vector_store %arg6[%c0_102, %c0_103], %130 {strides = array<i32>} : memref<2x64xf32, #tpu.memory_space<vmem>>, vector<2x64xf32>,
    %c0_104 = arith.constant 0 : index
    %c2_105 = arith.constant 2 : index
    %c0_106 = arith.constant 0 : index
    %c0_107 = arith.constant 0 : index
    %132 = vector.load %arg5[%c0_104, %c2_105, %c0_106, %c0_107] : memref<1x4x2x64xf32, #tpu.memory_space<vmem>>, vector<1x1x2x64xf32>
    %133 = vector.shape_cast %132 : vector<1x1x2x64xf32> to vector<2x64xf32>
    %134 = vector.shape_cast %130 : vector<2x64xf32> to vector<1x1x2x64xf32>
    tpu.vector_store %arg5[%c0_104, %c2_105, %c0_106, %c0_107], %134 {strides = array<i32>} : memref<1x4x2x64xf32, #tpu.memory_space<vmem>>, vector<1x1x2x64xf32>,
    %c0_108 = arith.constant 0 : index
    %c0_109 = arith.constant 0 : index
    %135 = vector.load %arg6[%c0_108, %c0_109] : memref<2x64xf32, #tpu.memory_space<vmem>>, vector<2x64xf32>
    %cst_110 = arith.constant dense<0.000000e+00> : vector<2x64xf32>
    %136 = tpu.matmul %135, %4, %cst_110 {dimension_numbers = #tpu.dot_dimension_numbers<[1], [0], [0], [1], [0, 0, 1, 1], [], []>} : vector<2x64xf32>, vector<64x64xf32>, vector<2x64xf32> -> vector<2x64xf32>
    %137 = vector.broadcast %10 : vector<1x64xf32> to vector<2x64xf32>
    %138 = arith.addf %136, %137 : vector<2x64xf32>
    %cst_111 = arith.constant dense<0.000000e+00> : vector<2x64xf32>
    %139 = tpu.matmul %135, %6, %cst_111 {dimension_numbers = #tpu.dot_dimension_numbers<[1], [0], [0], [1], [0, 0, 1, 1], [], []>} : vector<2x64xf32>, vector<64x64xf32>, vector<2x64xf32> -> vector<2x64xf32>
    %140 = vector.broadcast %12 : vector<1x64xf32> to vector<2x64xf32>
    %141 = arith.addf %139, %140 : vector<2x64xf32>
    %cst_112 = arith.constant dense<0.000000e+00> : vector<2x64xf32>
    %142 = tpu.matmul %135, %8, %cst_112 {dimension_numbers = #tpu.dot_dimension_numbers<[1], [0], [0], [1], [0, 0, 1, 1], [], []>} : vector<2x64xf32>, vector<64x64xf32>, vector<2x64xf32> -> vector<2x64xf32>
    %143 = vector.broadcast %14 : vector<1x64xf32> to vector<2x64xf32>
    %144 = arith.addf %142, %143 : vector<2x64xf32>
    %c0_113 = arith.constant 0 : index
    %c0_114 = arith.constant 0 : index
    %c3 = arith.constant 3 : index
    %c0_115 = arith.constant 0 : index
    %c0_116 = arith.constant 0 : index
    %145 = vector.load %arg2[%c0_113, %c0_114, %c3, %c0_115, %c0_116] : memref<1x3x4x2x64xf32, #tpu.memory_space<vmem>>, vector<1x1x1x2x64xf32>
    %146 = vector.shape_cast %145 : vector<1x1x1x2x64xf32> to vector<2x64xf32>
    %147 = arith.addf %146, %138 : vector<2x64xf32>
    %148 = arith.negf %147 : vector<2x64xf32>
    %149 = math.exp %148 : vector<2x64xf32>
    %cst_117 = arith.constant 1.000000e+00 : f32
    %150 = vector.broadcast %cst_117 : f32 to vector<2x64xf32>
    %151 = arith.addf %150, %149 : vector<2x64xf32>
    %152 = arith.divf %150, %151 : vector<2x64xf32>
    %c0_118 = arith.constant 0 : index
    %c1_119 = arith.constant 1 : index
    %c3_120 = arith.constant 3 : index
    %c0_121 = arith.constant 0 : index
    %c0_122 = arith.constant 0 : index
    %153 = vector.load %arg2[%c0_118, %c1_119, %c3_120, %c0_121, %c0_122] : memref<1x3x4x2x64xf32, #tpu.memory_space<vmem>>, vector<1x1x1x2x64xf32>
    %154 = vector.shape_cast %153 : vector<1x1x1x2x64xf32> to vector<2x64xf32>
    %155 = arith.addf %154, %141 : vector<2x64xf32>
    %156 = arith.negf %155 : vector<2x64xf32>
    %157 = math.exp %156 : vector<2x64xf32>
    %cst_123 = arith.constant 1.000000e+00 : f32
    %158 = vector.broadcast %cst_123 : f32 to vector<2x64xf32>
    %159 = arith.addf %158, %157 : vector<2x64xf32>
    %160 = arith.divf %158, %159 : vector<2x64xf32>
    %c0_124 = arith.constant 0 : index
    %c2_125 = arith.constant 2 : index
    %c3_126 = arith.constant 3 : index
    %c0_127 = arith.constant 0 : index
    %c0_128 = arith.constant 0 : index
    %161 = vector.load %arg2[%c0_124, %c2_125, %c3_126, %c0_127, %c0_128] : memref<1x3x4x2x64xf32, #tpu.memory_space<vmem>>, vector<1x1x1x2x64xf32>
    %162 = vector.shape_cast %161 : vector<1x1x1x2x64xf32> to vector<2x64xf32>
    %163 = arith.mulf %152, %144 : vector<2x64xf32>
    %164 = arith.addf %162, %163 : vector<2x64xf32>
    %165 = math.tanh %164 : vector<2x64xf32>
    %cst_129 = arith.constant 1.000000e+00 : f32
    %166 = vector.broadcast %cst_129 : f32 to vector<2x64xf32>
    %167 = arith.subf %166, %160 : vector<2x64xf32>
    %168 = arith.mulf %167, %165 : vector<2x64xf32>
    %169 = arith.mulf %160, %135 : vector<2x64xf32>
    %170 = arith.addf %168, %169 : vector<2x64xf32>
    %c0_130 = arith.constant 0 : index
    %c0_131 = arith.constant 0 : index
    %171 = vector.load %arg6[%c0_130, %c0_131] : memref<2x64xf32, #tpu.memory_space<vmem>>, vector<2x64xf32>
    tpu.vector_store %arg6[%c0_130, %c0_131], %170 {strides = array<i32>} : memref<2x64xf32, #tpu.memory_space<vmem>>, vector<2x64xf32>,
    %c0_132 = arith.constant 0 : index
    %c3_133 = arith.constant 3 : index
    %c0_134 = arith.constant 0 : index
    %c0_135 = arith.constant 0 : index
    %172 = vector.load %arg5[%c0_132, %c3_133, %c0_134, %c0_135] : memref<1x4x2x64xf32, #tpu.memory_space<vmem>>, vector<1x1x2x64xf32>
    %173 = vector.shape_cast %172 : vector<1x1x2x64xf32> to vector<2x64xf32>
    %174 = vector.shape_cast %170 : vector<2x64xf32> to vector<1x1x2x64xf32>
    tpu.vector_store %arg5[%c0_132, %c3_133, %c0_134, %c0_135], %174 {strides = array<i32>} : memref<1x4x2x64xf32, #tpu.memory_space<vmem>>, vector<1x1x2x64xf32>,
    return
  }
  func.func @transform_0(%arg0: i32, %arg1: i32) -> (i32, i32, i32, i32, i32) {
    %c0_i32 = arith.constant 0 : i32
    %c0_i32_0 = arith.constant 0 : i32
    %c0_i32_1 = arith.constant 0 : i32
    %c0_i32_2 = arith.constant 0 : i32
    return %arg0, %c0_i32, %arg1, %c0_i32_0, %c0_i32_1 : i32, i32, i32, i32, i32
  }
  func.func @transform_1(%arg0: i32, %arg1: i32) -> (i32, i32, i32, i32) {
    %c0_i32 = arith.constant 0 : i32
    %c0_i32_0 = arith.constant 0 : i32
    %c0_i32_1 = arith.constant 0 : i32
    %c0_i32_2 = arith.constant 0 : i32
    return %arg0, %c0_i32, %c0_i32_0, %c0_i32_1 : i32, i32, i32, i32
  }
  func.func @transform_2(%arg0: i32, %arg1: i32) -> (i32, i32, i32, i32) {
    %c0_i32 = arith.constant 0 : i32
    %c0_i32_0 = arith.constant 0 : i32
    %c0_i32_1 = arith.constant 0 : i32
    %c0_i32_2 = arith.constant 0 : i32
    return %arg0, %c0_i32, %c0_i32_0, %c0_i32_1 : i32, i32, i32, i32
  }
  func.func @transform_3(%arg0: i32, %arg1: i32) -> (i32, i32, i32, i32) {
    %c0_i32 = arith.constant 0 : i32
    %c0_i32_0 = arith.constant 0 : i32
    %c0_i32_1 = arith.constant 0 : i32
    return %arg0, %arg1, %c0_i32, %c0_i32_0 : i32, i32, i32, i32
  }
}

</mosaic_0001>

<bundles_post_ra>
// kernel: snn_forward.3
= control target key start
LH: loop header
LB: loop body
LE: loop exit
PB: predicated region body
PF: predicated region fallthrough
CT: control target
= control target key end

     0   :  { %s1064_s12 = smov 0   ;;  %s1066_s13 = smov 0   ;;  %s1355_s0 = inlined_call_operand.vmem [shape: f32[2,3,4,2,64], index: 0, kind: input, shape index: {}]   ;;  %s1356_s1 = inlined_call_operand.vmem [shape: f32[2,3,64,64], index: 1, kind: input, shape index: {}]   ;;  %s1357_s2 = inlined_call_operand.vmem [shape: f32[2,3,1,64], index: 2, kind: input, shape index: {}]   ;;  %s1358_s3 = inlined_call_operand.vmem [shape: f32[2,4,2,64], index: 3, kind: output, shape index: {}]  }
   0x1   :  { %s1068_s14 = smov 0  }
   0x2 LB: > { %s25_s15 = sadd.s32 1, %s1037_s13  ;;  %p888_p0 = scmp.ge.s32.totalorder %s1041_s14, 1  ;;  %s1041_s14 = sphi %s1068_s14, %s13_s14   ;;  %s1037_s13 = sphi %s1066_s13, %s1360_s13   ;;  %s1033_s12 = sphi %s1064_s12, %s1359_s12  }
   0x3   : > { %p27_p1 = scmp.ge.s32.totalorder %s25_s15, 2  ;;  %p177_p2 = scmp.lt.s32.totalorder %s1041_s14, 3 }
   0x5   : > { %s1362_s15 = smov (%p27_p1, %s25_s15), 0  ;;  %p178_p3 = pnand %p888_p0, %p177_p2 }
   0x6   : > { %p219_p4 = scmp.lt.s32.totalorder (!%p178_p3), %s1033_s12, 1 }
   0x7   : > { %181 = sbr.rel (%p178_p3) target bundleno = 764 (0x2fc), region = 32 }
   0xc   : > { %vm251_vm0 = vcmask 517120   ;;  %v1043_v0 = vmov 0.0   ;;  %s1364_s12 = smov (!%p219_p4, %s1033_s12), 1  ;;  %vm288_vm1 = vcmask 523264  }
   0xd   : > { %252 = vst.msk [vmem:[#allocation2] sm:$0x3] %vm251_vm0, %v1043_v0  ;;  %s949_s16 = smul.u32 192, %s1364_s12  ;;  %s947_s28 = sshll.u32 %s1364_s12, 3 }
   0xe   : > { %s950_s20 = smul.u32 3, %s1364_s12  ;;  %s1291_s4 = scalar_lea.vmem %s1358_s3, %s947_s28 }
   0xf   : > { %s1089_s19 = scalar_lea.vmem %s1356_s1, %s949_s16  ;;  %s948_s24 = smul.u32 24, %s1364_s12 }
  0x10   : > { %v1092_v1 = vld [vmem:[%s1089_s19 + $0x38] sm:$0xff]  ;;  %v1098_v3 = vld [vmem:[%s1089_s19 + $0x30] sm:$0xff]  ;;  %v1106_v5 = vld [vmem:[%s1089_s19 + $0x28] sm:$0xff]  ;;  %s1146_s23 = scalar_lea.vmem %s1357_s2, %s950_s20 }
  0x11   : > { %v1095_v2 = vld [vmem:[%s1089_s19 + $0x78] sm:$0xff]  ;;  %300 = vmatpush.msra.mxu0 %v1092_v1  ;;  %v1103_v4 = vld [vmem:[%s1089_s19 + $0x70] sm:$0xff]  ;;  %v1109_v6 = vld [vmem:[%s1089_s19 + $0x68] sm:$0xff]  ;;  %425 = vmatpush.msra.mxu3 %v1092_v1  ;;  %s1269_s27 = scalar_lea.vmem %s1355_s0, %s948_s24 }
  0x12   : > { %323 = vmatpush.msra.mxu1 %v1095_v2  ;;  %v1116_v7 = vld [vmem:[%s1089_s19 + $0x20] sm:$0xff]  ;;  %v1125_v9 = vld [vmem:[%s1089_s19 + $0xb8] sm:$0xff]  ;;  %v1135_v12 = vld [vmem:[%s1089_s19 + $0xb0] sm:$0xff] }
  0x13   : > { %301 = vmatpush.msra.mxu0 %v1098_v3  ;;  %v1119_v8 = vld [vmem:[%s1089_s19 + $0x60] sm:$0xff]  ;;  %426 = vmatpush.msra.mxu3 %v1098_v3  ;;  %v1128_v10 = vld [vmem:[%s1089_s19 + $0x18] sm:$0xff]  ;;  %v1141_v13 = vld [vmem:[%s1089_s19 + $0xa8] sm:$0xff] }
  0x14   : > { %324 = vmatpush.msra.mxu1 %v1103_v4  ;;  %v1131_v11 = vld [vmem:[%s1089_s19 + $0x58] sm:$0xff]  ;;  %346 = vmatpush.msra.mxu2 %v1125_v9  ;;  %v1149_v14 = vld [vmem:[%s1089_s19 + $0x10] sm:$0xff]  ;;  %v1159_v16 = vld [vmem:[%s1089_s19 + $0xa0] sm:$0xff] }
  0x15   : > { %302 = vmatpush.msra.mxu0 %v1106_v5  ;;  %427 = vmatpush.msra.mxu3 %v1106_v5  ;;  %v1152_v15 = vld [vmem:[%s1089_s19 + $0x50] sm:$0xff]  ;;  %v1162_v17 = vld [vmem:[%s1089_s19 + $0x8] sm:$0xff]  ;;  %v1172_v19 = vld [vmem:[%s1089_s19 + $0x98] sm:$0xff] }
  0x16   : > { %325 = vmatpush.msra.mxu1 %v1109_v6  ;;  %347 = vmatpush.msra.mxu2 %v1135_v12  ;;  %v1165_v18 = vld [vmem:[%s1089_s19 + $0x48] sm:$0xff]  ;;  %v1175_v20 = vld [vmem:[%s1089_s19] sm:$0xff]  ;;  %v1188_v23 = vld [vmem:[%s1089_s19 + $0x90] sm:$0xff] }
  0x17   : > { %303 = vmatpush.msra.mxu0 %v1116_v7  ;;  %428 = vmatpush.msra.mxu3 %v1116_v7  ;;  %v1178_v21 = vld [vmem:[%s1089_s19 + $0x40] sm:$0xff]  ;;  %v1198_v24 = vld [vmem:[%s1089_s19 + $0x88] sm:$0xff]  ;;  %v917_v60 = vld [vmem:[%s1269_s27 + $0x10] sm:$0x3] }
  0x18   : > { %326 = vmatpush.msra.mxu1 %v1119_v8  ;;  %348 = vmatpush.msra.mxu2 %v1141_v13  ;;  %v1184_v22 = vld [vmem:[#allocation2] sm:$0x3]  ;;  %v915_v31 = vld [vmem:[%s1269_s27 + $0x8] sm:$0x3]  ;;  %v1282_v46 = vld [vmem:[%s1146_s23 + $0x2] ss:$0 sm:$0xff] }
  0x19   : > { %304 = vmatpush.msra.mxu0 %v1128_v10  ;;  %429 = vmatpush.msra.mxu3 %v1128_v10  ;;  %v1203_v25 = vld [vmem:[%s1089_s19 + $0x80] sm:$0xff] }
  0x1a   : > { %327 = vmatpush.msra.mxu1 %v1131_v11  ;;  %349 = vmatpush.msra.mxu2 %v1159_v16  ;;  %v1272_v26 = vld [vmem:[%s1146_s23] ss:$0 sm:$0xff]  ;;  %v1275_v27 = vld [vmem:[%s1146_s23 + $0x1] ss:$0 sm:$0xff] }
  0x1b   : > { %305 = vmatpush.msra.mxu0 %v1149_v14  ;;  %430 = vmatpush.msra.mxu3 %v1149_v14  ;;  %v358_v29 = vld [vmem:[%s1269_s27] sm:$0x3] }
  0x1c   : > { %328 = vmatpush.msra.mxu1 %v1152_v15  ;;  %350 = vmatpush.msra.mxu2 %v1172_v19 }
  0x1d   : > { %306 = vmatpush.msra.mxu0 %v1162_v17  ;;  %431 = vmatpush.msra.mxu3 %v1162_v17 }
  0x1e   : > { %329 = vmatpush.msra.mxu1 %v1165_v18  ;;  %351 = vmatpush.msra.mxu2 %v1188_v23 }
  0x1f   : > { %307 = vmatpush.msra.mxu0 %v1175_v20  ;;  %432 = vmatpush.msra.mxu3 %v1175_v20 }
  0x20   : > { %330 = vmatpush.msra.mxu1 %v1178_v21  ;;  %911 = vmatmul.msk.f32.vlgmr.msra.gmra.mxu0 %vm288_vm1, %v1184_v22 }
  0x21   : > { %912 = vmatmul.msk.f32.vlgmr.msra.gmra.mxu1 %vm288_vm1, %v1184_v22  ;;  %445 = vmatpush.msrb.mxu0 %v1095_v2 }
  0x22   : > { %465 = vmatpush.msrb.mxu1 %v1125_v9  ;;  %352 = vmatpush.msra.mxu2 %v1198_v24 }
  0x23   : > { %446 = vmatpush.msrb.mxu0 %v1103_v4  ;;  %565 = vmatpush.msrb.mxu3 %v1095_v2 }
  0x24   : > { %466 = vmatpush.msrb.mxu1 %v1135_v12  ;;  %353 = vmatpush.msra.mxu2 %v1203_v25 }
  0x25   : > { %447 = vmatpush.msrb.mxu0 %v1109_v6  ;;  %913 = vmatmul.msk.f32.vlgmr.msra.gmra.mxu2 %vm288_vm1, %v1184_v22 }
  0x26   : > { %467 = vmatpush.msrb.mxu1 %v1141_v13  ;;  %545 = vmatpush.msrb.mxu2 %v1092_v1 }
  0x27   : > { %448 = vmatpush.msrb.mxu0 %v1119_v8  ;;  %566 = vmatpush.msrb.mxu3 %v1103_v4 }
  0x28   : > { %468 = vmatpush.msrb.mxu1 %v1159_v16  ;;  %546 = vmatpush.msrb.mxu2 %v1098_v3 }
  0x29   : > { %449 = vmatpush.msrb.mxu0 %v1131_v11  ;;  %567 = vmatpush.msrb.mxu3 %v1109_v6 }
  0x2a   : > { %469 = vmatpush.msrb.mxu1 %v1172_v19  ;;  %547 = vmatpush.msrb.mxu2 %v1106_v5 }
  0x2b   : > { %450 = vmatpush.msrb.mxu0 %v1152_v15  ;;  %568 = vmatpush.msrb.mxu3 %v1119_v8 }
  0x2c   : > { %470 = vmatpush.msrb.mxu1 %v1188_v23  ;;  %548 = vmatpush.msrb.mxu2 %v1116_v7 }
  0x2d   : > { %451 = vmatpush.msrb.mxu0 %v1165_v18  ;;  %569 = vmatpush.msrb.mxu3 %v1131_v11 }
  0x2e   : > { %471 = vmatpush.msrb.mxu1 %v1198_v24  ;;  %549 = vmatpush.msrb.mxu2 %v1128_v10 }
  0x2f   : > { %452 = vmatpush.msrb.mxu0 %v1178_v21  ;;  %570 = vmatpush.msrb.mxu3 %v1152_v15 }
  0x30   : > { %472 = vmatpush.msrb.mxu1 %v1203_v25  ;;  %550 = vmatpush.msrb.mxu2 %v1149_v14 }
  0x31   : > { %585 = vmatpush.msra.mxu0 %v1125_v9  ;;  %571 = vmatpush.msrb.mxu3 %v1165_v18 }
  0x32   : > { %665 = vmatpush.msra.mxu1 %v1092_v1  ;;  %551 = vmatpush.msrb.mxu2 %v1162_v17 }
  0x33   : > { %586 = vmatpush.msra.mxu0 %v1135_v12  ;;  %572 = vmatpush.msrb.mxu3 %v1178_v21 }
  0x34   : > { %666 = vmatpush.msra.mxu1 %v1098_v3  ;;  %552 = vmatpush.msrb.mxu2 %v1175_v20 }
  0x35   : > { %587 = vmatpush.msra.mxu0 %v1141_v13 }
  0x36   : > { %685 = vmatpush.msra.mxu2 %v1095_v2  ;;  %667 = vmatpush.msra.mxu1 %v1106_v5 }
  0x37   : > { %588 = vmatpush.msra.mxu0 %v1159_v16 }
  0x38   : > { %686 = vmatpush.msra.mxu2 %v1103_v4  ;;  %668 = vmatpush.msra.mxu1 %v1116_v7 }
  0x39   : > { %589 = vmatpush.msra.mxu0 %v1172_v19 }
  0x3a   : > { %687 = vmatpush.msra.mxu2 %v1109_v6  ;;  %669 = vmatpush.msra.mxu1 %v1128_v10 }
  0x3b   : > { %590 = vmatpush.msra.mxu0 %v1188_v23 }
  0x3c   : > { %688 = vmatpush.msra.mxu2 %v1119_v8  ;;  %670 = vmatpush.msra.mxu1 %v1149_v14  ;;  %v923_v14 = vld [vmem:[%s1269_s27 + $0xa] sm:$0x3] }
  0x3d   : > { %591 = vmatpush.msra.mxu0 %v1198_v24 }
  0x3e   : > { %689 = vmatpush.msra.mxu2 %v1131_v11  ;;  %671 = vmatpush.msra.mxu1 %v1162_v17 }
  0x3f   : > { %592 = vmatpush.msra.mxu0 %v1203_v25 }
  0x40   : > { %690 = vmatpush.msra.mxu2 %v1152_v15  ;;  %672 = vmatpush.msra.mxu1 %v1175_v20 }
  0x42   : > { %691 = vmatpush.msra.mxu2 %v1165_v18 }
  0x44   : > { %692 = vmatpush.msra.mxu2 %v1178_v21 }
  0x9d   : > { %v309_v28 = vpop.f32.mrf.mxu0 }
  0x9e   : > { %v332_v30 = vpop.f32.mrf.mxu1  ;;  %v310_v32 = vadd.f32 %v1272_v26, %v309_v28 }
  0x9f   : > { %v333_v33 = vadd.f32 %v1275_v27, %v332_v30 }
  0xa0   : > { %v359_v34 = vadd.f32 %v358_v29, %v310_v32 }
  0xa1   : > { %v381_v35 = vadd.f32 %v915_v31, %v333_v33 }
  0xa2   : > { %v914_v36 = vmul.f32 -1.442695, %v359_v34 }
  0xa3   : > { %v916_v37 = vmul.f32 -1.442695, %v381_v35 }
  0xa4   : > { %979 = vpow2.f32 %v914_v36 }
  0xa5   : > { %981 = vpow2.f32 %v916_v37 }
  0xa8   : > { %v355_v49 = vpop.f32.mrf.mxu2 }
  0xa9   : > { %v356_v54 = vadd.f32 %v1282_v46, %v355_v49 }
  0xaa   : > { %v980_v38 = vpop.eup %979 }
  0xab   : > { %v982_v39 = vpop.eup %981  ;;  %v363_v40 = vadd.f32 1.0, %v980_v38 }
  0xac   : > { %v385_v41 = vadd.f32 1.0, %v982_v39 }
  0xad   : > { %983 = vrcp.f32 %v363_v40  ;;  %v375_v50 = vand.u32 2147483648, %v363_v40  ;;  %v373_v52 = vand.u32 2147483647, %v363_v40  ;;  %vm369_vm3 = vweird.f32 %v363_v40 }
  0xae   : > { %985 = vrcp.f32 %v385_v41  ;;  %vm391_vm6 = vweird.f32 %v385_v41  ;;  %v397_v61 = vand.u32 2147483648, %v385_v41  ;;  %v395_v63 = vand.u32 2147483647, %v385_v41 }
  0xaf   : > { %v376_v56 = vor.u32 1.1754944e-38, %v375_v50  ;;  %vm374_vm5 = vcmp.eq.f32.partialorder %v373_v52, 8.507059e+37 }
  0xb0   : > { %v398_v2 = vor.u32 1.1754944e-38, %v397_v61  ;;  %vm396_vm9 = vcmp.eq.f32.partialorder %v395_v63, 8.507059e+37  ;;  %v932_v61 = vld [vmem:[%s1269_s27 + $0xc] sm:$0x3] }
  0xb3   : > { %v984_v42 = vpop.eup %983 }
  0xb4   : > { %v986_v43 = vpop.eup %985  ;;  %v365_v44 = vmul.f32 %v984_v42, %v363_v40  ;;  %vm370_vm2 = vweird.f32 %v984_v42 }
  0xb5   : > { %v387_v45 = vmul.f32 %v986_v43, %v385_v41  ;;  %vm371_vm4 = vmor %vm369_vm3, %vm370_vm2  ;;  %vm392_vm7 = vweird.f32 %v986_v43 }
  0xb6   : > { %v366_v47 = vsub.f32 1.0, %v365_v44  ;;  %vm393_vm8 = vmor %vm391_vm6, %vm392_vm7 }
  0xb7   : > { %v388_v48 = vsub.f32 1.0, %v387_v45 }
  0xb8   : > { %v367_v51 = vmul.f32 %v984_v42, %v366_v47 }
  0xb9   : > { %v389_v53 = vmul.f32 %v986_v43, %v388_v48 }
  0xba   : > { %v368_v55 = vadd.f32 %v984_v42, %v367_v51 }
  0xbb   : > { %v390_v59 = vadd.f32 %v986_v43, %v389_v53 }
  0xbc   : > { %v372_v57 = vsel %vm371_vm4, %v984_v42, %v368_v55 }
  0xbd   : > { %v377_v58 = vsel %vm374_vm5, %v376_v56, %v372_v57  ;;  %v394_v1 = vsel %vm393_vm8, %v986_v43, %v390_v59  ;;  %v925_v43 = vld [vmem:[%s1269_s27 + $0x12] sm:$0x3]  ;;  %v930_v59 = vld [vmem:[%s1269_s27 + $0x4] sm:$0x3] }
  0xbe   : > { %v403_v62 = vmul.f32 %v377_v58, %v356_v54  ;;  %v399_v3 = vsel %vm396_vm9, %v398_v2, %v394_v1 }
  0xbf   : > { %v406_v4 = vsub.f32 1.0, %v399_v3  ;;  %v408_v7 = vmul.f32 %v399_v3, %v1184_v22 }
  0xc0   : > { %v404_v0 = vadd.f32 %v917_v60, %v403_v62 }
  0xc2   : > { %987 = vtanh.f32 %v404_v0 }
  0xc8   : > { %v988_v5 = vpop.eup %987 }
  0xc9   : > { %v407_v6 = vmul.f32 %v988_v5, %v406_v4 }
  0xcb   : > { %v409_v8 = vadd.f32 %v408_v7, %v407_v6 }
  0xcd   : > { %411 = vst.msk [vmem:[#allocation2] sm:$0x3] %vm251_vm0, %v409_v8 }
  0xce   : > { %412 = vst.msk [vmem:[%s1291_s4] sm:$0x3] %vm251_vm0, %v409_v8 }
  0xd4   : > { %v1296_v10 = vld [vmem:[#allocation2] sm:$0x3] }
  0xd5   : > { %918 = vmatmul.msk.f32.vlgmr.msra.gmra.mxu3 %vm288_vm1, %v1296_v10  ;;  %919 = vmatmul.msk.f32.vlgmr.msrb.gmra.mxu0 %vm288_vm1, %v1296_v10 }
  0xd6   : > { %920 = vmatmul.msk.f32.vlgmr.msrb.gmra.mxu1 %vm288_vm1, %v1296_v10  ;;  %705 = vmatpush.msra.mxu3 %v1125_v9 }
  0xd8   : > { %706 = vmatpush.msra.mxu3 %v1135_v12  ;;  %v921_v12 = vld [vmem:[%s1269_s27 + $0x2] sm:$0x3] }
  0xda   : > { %707 = vmatpush.msra.mxu3 %v1141_v13 }
  0xdc   : > { %708 = vmatpush.msra.mxu3 %v1159_v16 }
  0xde   : > { %709 = vmatpush.msra.mxu3 %v1172_v19 }
  0xe0   : > { %710 = vmatpush.msra.mxu3 %v1188_v23 }
  0xe2   : > { %711 = vmatpush.msra.mxu3 %v1198_v24 }
  0xe4   : > { %712 = vmatpush.msra.mxu3 %v1203_v25 }
 0x152   : > { %v454_v11 = vpop.f32.mrf.mxu0 }
 0x153   : > { %v455_v15 = vadd.f32 %v1275_v27, %v454_v11  ;;  %v474_v36 = vpop.f32.mrf.mxu1 }
 0x154   : > { %v475_v39 = vadd.f32 %v1282_v46, %v474_v36 }
 0x155   : > { %v501_v17 = vadd.f32 %v923_v14, %v455_v15 }
 0x157   : > { %v924_v9 = vmul.f32 -1.442695, %v501_v17 }
 0x158   : > { %v434_v18 = vpop.f32.mrf.mxu3 }
 0x159   : > { %989 = vpow2.f32 %v924_v9  ;;  %v435_v13 = vadd.f32 %v1272_v26, %v434_v18 }
 0x15b   : > { %v479_v16 = vadd.f32 %v921_v12, %v435_v13 }
 0x15d   : > { %v922_v20 = vmul.f32 -1.442695, %v479_v16 }
 0x15f   : > { %v990_v19 = vpop.eup %989  ;;  %991 = vpow2.f32 %v922_v20 }
 0x160   : > { %v505_v21 = vadd.f32 1.0, %v990_v19 }
 0x162   : > { %993 = vrcp.f32 %v505_v21  ;;  %v517_v44 = vand.u32 2147483648, %v505_v21  ;;  %vm511_vm15 = vweird.f32 %v505_v21  ;;  %v515_v47 = vand.u32 2147483647, %v505_v21 }
 0x164   : > { %v518_v50 = vor.u32 1.1754944e-38, %v517_v44  ;;  %vm516_vm3 = vcmp.eq.f32.partialorder %v515_v47, 8.507059e+37 }
 0x165   : > { %v992_v22 = vpop.eup %991 }
 0x166   : > { %v483_v23 = vadd.f32 1.0, %v992_v22 }
 0x168   : > { %995 = vrcp.f32 %v483_v23  ;;  %v994_v24 = vpop.eup %993  ;;  %v495_v32 = vand.u32 2147483648, %v483_v23  ;;  %v493_v34 = vand.u32 2147483647, %v483_v23  ;;  %vm489_vm11 = vweird.f32 %v483_v23 }
 0x169   : > { %v507_v25 = vmul.f32 %v994_v24, %v505_v21  ;;  %vm512_vm14 = vweird.f32 %v994_v24 }
 0x16a   : > { %v496_v38 = vor.u32 1.1754944e-38, %v495_v32  ;;  %vm494_vm13 = vcmp.eq.f32.partialorder %v493_v34, 8.507059e+37  ;;  %vm513_vm2 = vmor %vm511_vm15, %vm512_vm14 }
 0x16b   : > { %v508_v30 = vsub.f32 1.0, %v507_v25 }
 0x16d   : > { %v509_v35 = vmul.f32 %v994_v24, %v508_v30 }
 0x16e   : > { %v996_v28 = vpop.eup %995 }
 0x16f   : > { %v485_v29 = vmul.f32 %v996_v28, %v483_v23  ;;  %vm490_vm10 = vweird.f32 %v996_v28  ;;  %v510_v41 = vadd.f32 %v994_v24, %v509_v35 }
 0x170   : > { %vm491_vm12 = vmor %vm489_vm11, %vm490_vm10 }
 0x171   : > { %v486_v31 = vsub.f32 1.0, %v485_v29  ;;  %v514_v49 = vsel %vm513_vm2, %v994_v24, %v510_v41  ;;  %v934_v24 = vld [vmem:[%s1269_s27 + $0x14] sm:$0x3] }
 0x172   : > { %v519_v51 = vsel %vm516_vm3, %v518_v50, %v514_v49 }
 0x173   : > { %v487_v33 = vmul.f32 %v996_v28, %v486_v31  ;;  %v526_v52 = vsub.f32 1.0, %v519_v51  ;;  %v528_v54 = vmul.f32 %v519_v51, %v1296_v10 }
 0x175   : > { %v488_v37 = vadd.f32 %v996_v28, %v487_v33 }
 0x177   : > { %v492_v40 = vsel %vm491_vm12, %v996_v28, %v488_v37 }
 0x178   : > { %v497_v42 = vsel %vm494_vm13, %v496_v38, %v492_v40 }
 0x179   : > { %v523_v45 = vmul.f32 %v497_v42, %v475_v39  ;;  %v939_v42 = vld [vmem:[%s1269_s27 + $0x6] sm:$0x3] }
 0x17b   : > { %v524_v48 = vadd.f32 %v925_v43, %v523_v45 }
 0x17d   : > { %997 = vtanh.f32 %v524_v48  ;;  %v941_v48 = vld [vmem:[%s1269_s27 + $0xe] sm:$0x3] }
 0x183   : > { %v998_v53 = vpop.eup %997 }
 0x184   : > { %v527_v55 = vmul.f32 %v998_v53, %v526_v52 }
 0x186   : > { %v529_v56 = vadd.f32 %v528_v54, %v527_v55 }
 0x188   : > { %926 = vst.msk [vmem:[%s1291_s4 + $0x2] sm:$0x3] %vm251_vm0, %v529_v56 }
 0x189   : > { %530 = vst.msk [vmem:[#allocation2] sm:$0x3] %vm251_vm0, %v529_v56 }
 0x190   : > { %v533_v57 = vld [vmem:[#allocation2] sm:$0x3] }
 0x191   : > { %927 = vmatmul.msk.f32.vlgmr.msrb.gmra.mxu2 %vm288_vm1, %v533_v57  ;;  %928 = vmatmul.msk.f32.vlgmr.msrb.gmra.mxu3 %vm288_vm1, %v533_v57 }
 0x192   : > { %929 = vmatmul.msk.f32.vlgmr.msra.gmra.mxu0 %vm288_vm1, %v533_v57 }
 0x20f   : > { %v594_v13 = vpop.f32.mrf.mxu0 }
 0x210   : > { %v595_v21 = vadd.f32 %v1282_v46, %v594_v13 }
 0x214   : > { %v554_v58 = vpop.f32.mrf.mxu2  ;;  %v574_v60 = vpop.f32.mrf.mxu3 }
 0x215   : > { %v555_v62 = vadd.f32 %v1272_v26, %v554_v58  ;;  %v575_v63 = vadd.f32 %v1275_v27, %v574_v60 }
 0x217   : > { %v599_v0 = vadd.f32 %v930_v59, %v555_v62  ;;  %v621_v1 = vadd.f32 %v932_v61, %v575_v63 }
 0x219   : > { %v931_v2 = vmul.f32 -1.442695, %v599_v0  ;;  %v933_v3 = vmul.f32 -1.442695, %v621_v1 }
 0x21b   : > { %999 = vpow2.f32 %v931_v2 }
 0x21c   : > { %1001 = vpow2.f32 %v933_v3 }
 0x221   : > { %v1000_v4 = vpop.eup %999 }
 0x222   : > { %v1002_v5 = vpop.eup %1001  ;;  %v603_v6 = vadd.f32 1.0, %v1000_v4 }
 0x223   : > { %v625_v7 = vadd.f32 1.0, %v1002_v5  ;;  %v943_v5 = vld [vmem:[%s1269_s27 + $0x16] sm:$0x3] }
 0x224   : > { %1003 = vrcp.f32 %v603_v6  ;;  %v615_v17 = vand.u32 2147483648, %v603_v6  ;;  %v613_v12 = vand.u32 2147483647, %v603_v6  ;;  %vm609_vm5 = vweird.f32 %v603_v6 }
 0x225   : > { %1005 = vrcp.f32 %v625_v7  ;;  %v637_v29 = vand.u32 2147483648, %v625_v7  ;;  %vm631_vm9 = vweird.f32 %v625_v7  ;;  %v635_v30 = vand.u32 2147483647, %v625_v7 }
 0x226   : > { %v616_v19 = vor.u32 1.1754944e-38, %v615_v17  ;;  %vm614_vm7 = vcmp.eq.f32.partialorder %v613_v12, 8.507059e+37 }
 0x227   : > { %v638_v33 = vor.u32 1.1754944e-38, %v637_v29  ;;  %vm636_vm11 = vcmp.eq.f32.partialorder %v635_v30, 8.507059e+37 }
 0x22a   : > { %v1004_v8 = vpop.eup %1003 }
 0x22b   : > { %v1006_v10 = vpop.eup %1005  ;;  %v605_v11 = vmul.f32 %v1004_v8, %v603_v6  ;;  %vm610_vm4 = vweird.f32 %v1004_v8 }
 0x22c   : > { %v627_v14 = vmul.f32 %v1006_v10, %v625_v7  ;;  %vm611_vm6 = vmor %vm609_vm5, %vm610_vm4  ;;  %vm632_vm8 = vweird.f32 %v1006_v10 }
 0x22d   : > { %v606_v15 = vsub.f32 1.0, %v605_v11  ;;  %vm633_vm10 = vmor %vm631_vm9, %vm632_vm8 }
 0x22e   : > { %v628_v9 = vsub.f32 1.0, %v627_v14 }
 0x22f   : > { %v607_v18 = vmul.f32 %v1004_v8, %v606_v15 }
 0x230   : > { %v629_v16 = vmul.f32 %v1006_v10, %v628_v9 }
 0x231   : > { %v608_v20 = vadd.f32 %v1004_v8, %v607_v18 }
 0x232   : > { %v630_v25 = vadd.f32 %v1006_v10, %v629_v16 }
 0x233   : > { %v612_v22 = vsel %vm611_vm6, %v1004_v8, %v608_v20 }
 0x234   : > { %v617_v23 = vsel %vm614_vm7, %v616_v19, %v612_v22  ;;  %v634_v32 = vsel %vm633_vm10, %v1006_v10, %v630_v25 }
 0x235   : > { %v643_v28 = vmul.f32 %v617_v23, %v595_v21  ;;  %v639_v34 = vsel %vm636_vm11, %v638_v33, %v634_v32 }
 0x236   : > { %v646_v35 = vsub.f32 1.0, %v639_v34  ;;  %v648_v38 = vmul.f32 %v639_v34, %v533_v57 }
 0x237   : > { %v644_v31 = vadd.f32 %v934_v24, %v643_v28 }
 0x239   : > { %1007 = vtanh.f32 %v644_v31 }
 0x23f   : > { %v1008_v36 = vpop.eup %1007 }
 0x240   : > { %v647_v37 = vmul.f32 %v1008_v36, %v646_v35 }
 0x242   : > { %v649_v39 = vadd.f32 %v648_v38, %v647_v37 }
 0x244   : > { %935 = vst.msk [vmem:[%s1291_s4 + $0x4] sm:$0x3] %vm251_vm0, %v649_v39 }
 0x245   : > { %650 = vst.msk [vmem:[#allocation2] sm:$0x3] %vm251_vm0, %v649_v39 }
 0x24c   : > { %v653_v40 = vld [vmem:[#allocation2] sm:$0x3] }
 0x24d   : > { %936 = vmatmul.msk.f32.vlgmr.msra.gmra.mxu1 %vm288_vm1, %v653_v40  ;;  %937 = vmatmul.msk.f32.vlgmr.msra.gmra.mxu2 %vm288_vm1, %v653_v40 }
 0x24e   : > { %938 = vmatmul.msk.f32.vlgmr.msra.gmra.mxu3 %vm288_vm1, %v653_v40 }
 0x2ca   : > { %v674_v41 = vpop.f32.mrf.mxu1 }
 0x2cb   : > { %v675_v43 = vadd.f32 %v1272_v26, %v674_v41 }
 0x2cd   : > { %v719_v44 = vadd.f32 %v939_v42, %v675_v43 }
 0x2cf   : > { %v940_v45 = vmul.f32 -1.442695, %v719_v44 }
 0x2d0   : > { %v694_v47 = vpop.f32.mrf.mxu2 }
 0x2d1   : > { %1009 = vpow2.f32 %v940_v45  ;;  %v695_v49 = vadd.f32 %v1275_v27, %v694_v47  ;;  %v714_v62 = vpop.f32.mrf.mxu3 }
 0x2d2   : > { %v715_v2 = vadd.f32 %v1282_v46, %v714_v62 }
 0x2d3   : > { %v741_v50 = vadd.f32 %v941_v48, %v695_v49 }
 0x2d5   : > { %v942_v51 = vmul.f32 -1.442695, %v741_v50 }
 0x2d7   : > { %v1010_v52 = vpop.eup %1009  ;;  %1011 = vpow2.f32 %v942_v51 }
 0x2d8   : > { %v723_v53 = vadd.f32 1.0, %v1010_v52 }
 0x2da   : > { %1013 = vrcp.f32 %v723_v53  ;;  %v735_v26 = vand.u32 2147483648, %v723_v53  ;;  %v733_v60 = vand.u32 2147483647, %v723_v53  ;;  %vm729_vm12 = vweird.f32 %v723_v53 }
 0x2dc   : > { %v736_v0 = vor.u32 1.1754944e-38, %v735_v26  ;;  %vm734_vm14 = vcmp.eq.f32.partialorder %v733_v60, 8.507059e+37 }
 0x2dd   : > { %v1012_v54 = vpop.eup %1011 }
 0x2de   : > { %v745_v55 = vadd.f32 1.0, %v1012_v54 }
 0x2e0   : > { %v1014_v56 = vpop.eup %1013  ;;  %1015 = vrcp.f32 %v745_v55  ;;  %v757_v7 = vand.u32 2147483648, %v745_v55  ;;  %v755_v10 = vand.u32 2147483647, %v745_v55  ;;  %vm751_vm2 = vweird.f32 %v745_v55 }
 0x2e1   : > { %v725_v57 = vmul.f32 %v1014_v56, %v723_v53  ;;  %vm730_vm1 = vweird.f32 %v1014_v56 }
 0x2e2   : > { %vm731_vm13 = vmor %vm729_vm12, %vm730_vm1  ;;  %v758_v15 = vor.u32 1.1754944e-38, %v757_v7  ;;  %vm756_vm4 = vcmp.eq.f32.partialorder %v755_v10, 8.507059e+37 }
 0x2e3   : > { %v726_v58 = vsub.f32 1.0, %v725_v57 }
 0x2e5   : > { %v727_v59 = vmul.f32 %v1014_v56, %v726_v58 }
 0x2e6   : > { %v1016_v61 = vpop.eup %1015 }
 0x2e7   : > { %v747_v27 = vmul.f32 %v1016_v61, %v745_v55  ;;  %v728_v63 = vadd.f32 %v1014_v56, %v727_v59  ;;  %vm752_vm15 = vweird.f32 %v1016_v61 }
 0x2e8   : > { %vm753_vm3 = vmor %vm751_vm2, %vm752_vm15 }
 0x2e9   : > { %v748_v1 = vsub.f32 1.0, %v747_v27  ;;  %v732_v3 = vsel %vm731_vm13, %v1014_v56, %v728_v63 }
 0x2ea   : > { %v737_v4 = vsel %vm734_vm14, %v736_v0, %v732_v3 }
 0x2eb   : > { %v749_v6 = vmul.f32 %v1016_v61, %v748_v1  ;;  %v763_v8 = vmul.f32 %v737_v4, %v715_v2 }
 0x2ed   : > { %v750_v11 = vadd.f32 %v1016_v61, %v749_v6  ;;  %v764_v14 = vadd.f32 %v943_v5, %v763_v8 }
 0x2ef   : > { %v754_v17 = vsel %vm753_vm3, %v1016_v61, %v750_v11  ;;  %1017 = vtanh.f32 %v764_v14 }
 0x2f0   : > { %v759_v9 = vsel %vm756_vm4, %v758_v15, %v754_v17 }
 0x2f1   : > { %v766_v46 = vsub.f32 1.0, %v759_v9  ;;  %v768_v13 = vmul.f32 %v759_v9, %v653_v40 }
 0x2f5   : > { %v1018_v18 = vpop.eup %1017 }
 0x2f6   : > { %v767_v12 = vmul.f32 %v1018_v18, %v766_v46 }
 0x2f8   : > { %v769_v16 = vadd.f32 %v768_v13, %v767_v12 }
 0x2fa   : > { %770 = vst.msk [vmem:[#allocation2] sm:$0x3] %vm251_vm0, %v769_v16 }
 0x2fb   : > { %944 = vst.msk [vmem:[%s1291_s4 + $0x6] sm:$0x3] %vm251_vm0, %v769_v16 }
 0x2fc PF: > { %s13_s14 = sadd.s32 1, %s1041_s14   ;;  %s1359_s12 = smov %s1037_s13 }
 0x2fd   : > { %p10_p5 = scmp.ge.s32.totalorder %s13_s14, 4   ;;  %s1360_s13 = smov %s1362_s15 }
 0x2ff   :  { %12 = sbr.rel (!%p10_p5) target bundleno = 2 (0x2), region = 90 }

// kernel: snn_forward.2
= control target key start
LH: loop header
LB: loop body
LE: loop exit
PB: predicated region body
PF: predicated region fallthrough
CT: control target
= control target key end

     0   :  { %s3639_s29 = smov 2   ;;  %vm144_vm0 = vcmask 1046528   ;;  %s3640_s17 = smov 4   ;;  %vm5435_vm1 = vcmask 1040384   ;;  %vm372_vm2 = vcmask 1045504   ;;  %vm289_vm3 = vcmask 15360   ;;  %s5421_s0 = inlined_call_operand.vmem [shape: f32[4,2,16,2], index: 0, kind: input, shape index: {}]   ;;  %s5422_s2 = inlined_call_operand.vmem [shape: f32[1,16], index: 2, kind: input, shape index: {}]   ;;  %s5423_s1 = inlined_call_operand.vmem [shape: f32[6,16], index: 1, kind: input, shape index: {}]   ;;  %s5424_s3 = inlined_call_operand.vmem [shape: f32[1,16], index: 3, kind: input, shape index: {}]   ;;  %s5425_s4 = inlined_call_operand.vmem [shape: f32[1,16], index: 4, kind: input, shape index: {}]   ;;  %s5426_s5 = inlined_call_operand.vmem [shape: f32[48,32], index: 5, kind: input, shape index: {}]   ;;  %s5427_s6 = inlined_call_operand.vmem [shape: f32[1,32], index: 6, kind: input, shape index: {}]   ;;  %s5428_s7 = inlined_call_operand.vmem [shape: f32[1,32], index: 7, kind: input, shape index: {}]   ;;  %s5429_s8 = inlined_call_operand.vmem [shape: f32[1,32], index: 8, kind: input, shape index: {}]   ;;  %s5430_s9 = inlined_call_operand.vmem [shape: f32[96,64], index: 9, kind: input, shape index: {}]   ;;  %s5431_s10 = inlined_call_operand.vmem [shape: f32[1,64], index: 10, kind: input, shape index: {}]   ;;  %s5432_s11 = inlined_call_operand.vmem [shape: f32[1,64], index: 11, kind: input, shape index: {}]   ;;  %s5433_s12 = inlined_call_operand.vmem [shape: f32[1,64], index: 12, kind: input, shape index: {}]   ;;  %s5434_s13 = inlined_call_operand.vmem [shape: f32[4,2,128], index: 13, kind: output, shape index: {}]  }
   0x1   :  { %v3721_v0 = vld [vmem:[%s5421_s0 + $0x8] sm:$0xff]  ;;  %v3726_v1 = vld [vmem:[%s5421_s0] sm:$0xff]  ;;  %v3737_v4 = vld [vmem:[%s5421_s0 + $0x10] sm:$0xff]  ;;  %vm306_vm4 = vcmask 31744   ;;  %vm323_vm5 = vcmask 48128   ;;  %vm48_vm6 = vcmask 130048  }
   0x2   :  { %187 = vrot.lane.b32.xlu1 %v3721_v0, %s3639_s29  ;;  %185 = vrot.lane.b32.xlu0 %v3726_v1, %s3639_s29  ;;  %v145_v2 = vrot.slane %v3726_v1, 1  ;;  %v146_v3 = vrot.slane %v3721_v0, 1  ;;  %v3742_v5 = vld [vmem:[%s5421_s0 + $0x18] sm:$0xff]  ;;  %v148_v6 = vrot.slane %v3737_v4, 1  ;;  %v3758_v12 = vld [vmem:[%s5421_s0 + $0x40] sm:$0xff]  ;;  %v97_v48 = vrot.slane %v3721_v0, 7 }
   0x3   :  { %189 = vrot.lane.b32.xlu2 %v3737_v4, %s3639_s29  ;;  %v149_v9 = vrot.slane %v3742_v5, 1  ;;  %v3763_v13 = vld [vmem:[%s5421_s0 + $0x48] sm:$0xff]  ;;  %v157_v14 = vrot.slane %v3758_v12, 1  ;;  %v3773_v16 = vld [vmem:[%s5421_s0 + $0x20] sm:$0xff]  ;;  %v3797_v23 = vld [vmem:[%s5421_s0 + $0x50] sm:$0xff]  ;;  %v96_v49 = vrot.slane %v3726_v1, 7 }
   0x4   :  { %v177_v7 = vsel %vm144_vm0, %v146_v3, 0.0  ;;  %v147_v8 = vsel %vm144_vm0, %v145_v2, %v146_v3  ;;  %v158_v15 = vrot.slane %v3763_v13, 1  ;;  %v3778_v17 = vld [vmem:[%s5421_s0 + $0x28] sm:$0xff]  ;;  %v151_v18 = vrot.slane %v3773_v16, 1  ;;  %v3802_v24 = vld [vmem:[%s5421_s0 + $0x58] sm:$0xff]  ;;  %v3812_v28 = vld [vmem:[%s5421_s0 + $0x30] sm:$0xff] }
   0x5   :  { %v150_v10 = vsel %vm144_vm0, %v148_v6, %v149_v9  ;;  %v178_v11 = vsel %vm144_vm0, %v149_v9, 0.0  ;;  %v152_v20 = vrot.slane %v3778_v17, 1  ;;  %v160_v25 = vrot.slane %v3797_v23, 1  ;;  %v3817_v29 = vld [vmem:[%s5421_s0 + $0x38] sm:$0xff]  ;;  %v3836_v35 = vld [vmem:[%s5421_s0 + $0x60] sm:$0xff]  ;;  %v3841_v36 = vld [vmem:[%s5421_s0 + $0x68] sm:$0xff] }
   0x6   :  { %v159_v19 = vsel %vm144_vm0, %v157_v14, %v158_v15  ;;  %v181_v22 = vsel %vm144_vm0, %v158_v15, 0.0  ;;  %v161_v27 = vrot.slane %v3802_v24, 1  ;;  %v154_v31 = vrot.slane %v3812_v28, 1  ;;  %v3857_v41 = vld [vmem:[%s5421_s0 + $0x70] sm:$0xff]  ;;  %v3862_v42 = vld [vmem:[%s5421_s0 + $0x78] sm:$0xff] }
   0x7   :  { %v153_v21 = vsel %vm144_vm0, %v151_v18, %v152_v20  ;;  %v179_v26 = vsel %vm144_vm0, %v152_v20, 0.0  ;;  %v155_v32 = vrot.slane %v3817_v29, 1  ;;  %v163_v38 = vrot.slane %v3836_v35, 1  ;;  %v75_v53 = vld [vmem:[%s5423_s1] sm:$0x3f] }
   0x8   :  { %v162_v30 = vsel %vm144_vm0, %v160_v25, %v161_v27  ;;  %v182_v34 = vsel %vm144_vm0, %v161_v27, 0.0  ;;  %v164_v39 = vrot.slane %v3841_v36, 1  ;;  %v166_v43 = vrot.slane %v3857_v41, 1  ;;  %3502 = vmatpush.msk.msra.mxu0 %vm372_vm2, %v75_v53  ;;  %3566 = vmatpush.msk.msra.mxu3 %vm372_vm2, %v75_v53 }
   0x9   :  { %v156_v33 = vsel %vm144_vm0, %v154_v31, %v155_v32  ;;  %v180_v37 = vsel %vm144_vm0, %v155_v32, 0.0  ;;  %v167_v45 = vrot.slane %v3862_v42, 1  ;;  %v98_v50 = vsel %vm5435_vm1, %v96_v49, %v97_v48 }
   0xa   :  { %243 = vrot.lane.b32.xlu1 %v177_v7, %s3640_s17  ;;  %241 = vrot.lane.b32.xlu0 %v147_v8, %s3640_s17  ;;  %v165_v40 = vsel %vm144_vm0, %v163_v38, %v164_v39  ;;  %v183_v44 = vsel %vm144_vm0, %v164_v39, 0.0  ;;  %v100_v51 = vrot.slane %v3742_v5, 7  ;;  %v99_v52 = vrot.slane %v3737_v4, 7 }
   0xb   :  { %245 = vrot.lane.b32.xlu2 %v150_v10, %s3640_s17  ;;  %v168_v46 = vsel %vm144_vm0, %v166_v43, %v167_v45  ;;  %v184_v47 = vsel %vm144_vm0, %v167_v45, 0.0  ;;  %v103_v56 = vrot.slane %v3778_v17, 7  ;;  %v102_v59 = vrot.slane %v3773_v16, 7 }
   0xc   :  { %v101_v54 = vsel %vm5435_vm1, %v99_v52, %v100_v51  ;;  %v136_v62 = vsel %vm5435_vm1, 0.0, %v96_v49  ;;  %v112_v4 = vrot.slane %v3802_v24, 7  ;;  %v111_v6 = vrot.slane %v3797_v23, 7 }
   0xd   :  { %v104_v61 = vsel %vm5435_vm1, %v102_v59, %v103_v56  ;;  %v137_v14 = vsel %vm5435_vm1, 0.0, %v99_v52  ;;  %vm882_vm2 = vcmask 123904  }
  0x12   :  { %191 = vrot.lane.b32.xlu0 %v3742_v5, %s3639_s29  ;;  %247 = vrot.lane.b32.xlu1 %v178_v11, %s3640_s17  ;;  %v108_v5 = vrot.slane %v3758_v12, 7  ;;  %v113_v11 = vsel %vm5435_vm1, %v111_v6, %v112_v4 }
  0x13   :  { %201 = vrot.lane.b32.xlu2 %v3758_v12, %s3639_s29 }
  0x14   :  { %v140_v15 = vsel %vm5435_vm1, 0.0, %v108_v5 }
  0x1a   :  { %257 = vrot.lane.b32.xlu0 %v159_v19, %s3640_s17  ;;  %193 = vrot.lane.b32.xlu1 %v3773_v16, %s3639_s29 }
  0x1b   :  { %249 = vrot.lane.b32.xlu2 %v153_v21, %s3640_s17 }
  0x22   :  { %203 = vrot.lane.b32.xlu0 %v3763_v13, %s3639_s29  ;;  %259 = vrot.lane.b32.xlu1 %v181_v22, %s3640_s17  ;;  %v109_v22 = vrot.slane %v3763_v13, 7 }
  0x23   :  { %195 = vrot.lane.b32.xlu2 %v3778_v17, %s3639_s29 }
  0x24   :  { %v110_v25 = vsel %vm5435_vm1, %v108_v5, %v109_v22 }
  0x2a   :  { %251 = vrot.lane.b32.xlu0 %v179_v26, %s3640_s17  ;;  %205 = vrot.lane.b32.xlu1 %v3797_v23, %s3639_s29 }
  0x2b   :  { %261 = vrot.lane.b32.xlu2 %v162_v30, %s3640_s17 }
  0x32   :  { %197 = vrot.lane.b32.xlu0 %v3812_v28, %s3639_s29  ;;  %253 = vrot.lane.b32.xlu1 %v156_v33, %s3640_s17  ;;  %v138_v33 = vsel %vm5435_vm1, 0.0, %v102_v59  ;;  %v114_v59 = vrot.slane %v3836_v35, 7 }
  0x33   :  { %207 = vrot.lane.b32.xlu2 %v3802_v24, %s3639_s29 }
  0x3a   :  { %263 = vrot.lane.b32.xlu0 %v182_v34, %s3640_s17  ;;  %199 = vrot.lane.b32.xlu1 %v3817_v29, %s3639_s29  ;;  %v141_v34 = vsel %vm5435_vm1, 0.0, %v111_v6 }
  0x3b   :  { %255 = vrot.lane.b32.xlu2 %v180_v37, %s3640_s17 }
  0x42   :  { %209 = vrot.lane.b32.xlu0 %v3836_v35, %s3639_s29  ;;  %265 = vrot.lane.b32.xlu1 %v165_v40, %s3640_s17 }
  0x43   :  { %211 = vrot.lane.b32.xlu2 %v3841_v36, %s3639_s29 }
  0x4a   :  { %267 = vrot.lane.b32.xlu0 %v183_v44, %s3640_s17  ;;  %213 = vrot.lane.b32.xlu1 %v3857_v41, %s3639_s29 }
  0x4b   :  { %269 = vrot.lane.b32.xlu2 %v168_v46, %s3640_s17  ;;  %v105_v46 = vrot.slane %v3812_v28, 7  ;;  %v106_v28 = vrot.slane %v3817_v29, 7  ;;  %v115_v29 = vrot.slane %v3841_v36, 7 }
  0x4d   :  { %v139_v53 = vsel %vm5435_vm1, 0.0, %v105_v46  ;;  %v116_v4 = vsel %vm5435_vm1, %v114_v59, %v115_v29 }
  0x52   :  { %215 = vrot.lane.b32.xlu0 %v3862_v42, %s3639_s29  ;;  %271 = vrot.lane.b32.xlu1 %v184_v47, %s3640_s17  ;;  %v118_v47 = vrot.slane %v3862_v42, 7 }
  0x5d   :  { %v190_v55 = vpop.permute.xlu2 %189 }
  0x5e   :  { %v292_v17 = vsel %vm289_vm3, %v137_v14, %v190_v55 }
  0x65   :  { %v246_v60 = vpop.permute.xlu2 %245 }
  0x66   :  { %v309_v20 = vsel %vm306_vm4, %v292_v17, %v246_v60  ;;  %v107_v60 = vsel %vm5435_vm1, %v105_v46, %v106_v28 }
  0x6d   :  { %v202_v3 = vpop.permute.xlu2 %201 }
  0x6e   :  { %v298_v12 = vsel %vm289_vm3, %v140_v15, %v202_v3 }
  0x74   :  { %v188_v57 = vpop.permute.xlu1 %187  ;;  %v186_v58 = vpop.permute.xlu0 %185 }
  0x75   :  { %v290_v63 = vsel %vm289_vm3, %v136_v62, %v186_v58  ;;  %v291_v7 = vsel %vm289_vm3, %v98_v50, %v188_v57  ;;  %v250_v16 = vpop.permute.xlu2 %249  ;;  %v117_v50 = vrot.slane %v3857_v41, 7 }
  0x7c   :  { %v244_v0 = vpop.permute.xlu1 %243  ;;  %v242_v1 = vpop.permute.xlu0 %241 }
  0x7d   :  { %v307_v2 = vsel %vm306_vm4, %v290_v63, %v242_v1  ;;  %v308_v10 = vsel %vm306_vm4, %v291_v7, %v244_v0  ;;  %v196_v23 = vpop.permute.xlu2 %195  ;;  %v142_v63 = vsel %vm5435_vm1, 0.0, %v114_v59 }
  0x7e   :  { %3503 = vmatmul.msk.f32.vlgmr.msra.gmra.mxu0 %vm323_vm5, %v307_v2  ;;  %v295_v45 = vsel %vm289_vm3, %v104_v61, %v196_v23 }
  0x84   :  { %v192_v8 = vpop.permute.xlu0 %191  ;;  %v248_v9 = vpop.permute.xlu1 %247 }
  0x85   :  { %v293_v24 = vsel %vm289_vm3, %v101_v54, %v192_v8  ;;  %v262_v37 = vpop.permute.xlu2 %261  ;;  %v119_v54 = vsel %vm5435_vm1, %v117_v50, %v118_v47  ;;  %v143_v8 = vsel %vm5435_vm1, 0.0, %v117_v50 }
  0x86   :  { %3504 = vmatmul.msk.f32.gmra.mxu0 %vm323_vm5, %v308_v10  ;;  %v310_v31 = vsel %vm306_vm4, %v293_v24, %v248_v9 }
  0x8c   :  { %v258_v18 = vpop.permute.xlu0 %257  ;;  %v194_v19 = vpop.permute.xlu1 %193 }
  0x8d   :  { %v315_v21 = vsel %vm306_vm4, %v298_v12, %v258_v18  ;;  %v294_v13 = vsel %vm289_vm3, %v138_v33, %v194_v19  ;;  %v208_v52 = vpop.permute.xlu2 %207  ;;  %v3641_v18 = vmov 0.0   ;;  %v3642_v19 = vmov 16.0  }
  0x8e   :  { %3505 = vmatmul.msk.f32.gmra.mxu0 %vm323_vm5, %v309_v20  ;;  %3511 = vmatmul.msk.f32.vlgmr.msra.gmra.mxu3 %vm323_vm5, %v315_v21  ;;  %v311_v43 = vsel %vm306_vm4, %v294_v13, %v250_v16  ;;  %v301_v56 = vsel %vm289_vm3, %v113_v11, %v208_v52  ;;  %49 = vst.msk [vmem:[#allocation2] sm:$0xff] %vm48_vm6, %v3641_v18  ;;  %3585 = vrcp.f32 %v3642_v19  ;;  %v3972_v21 = vld [vmem:[%s5422_s2] ss:$0 sm:$0xff] }
  0x8f   :  { %50 = vst.msk [vmem:[#allocation2 + $0x8] sm:$0xff] %vm48_vm6, %v3641_v18 }
  0x90   :  { %51 = vst.msk [vmem:[#allocation2 + $0x10] sm:$0xff] %vm48_vm6, %v3641_v18 }
  0x91   :  { %52 = vst.msk [vmem:[#allocation2 + $0x18] sm:$0xff] %vm48_vm6, %v3641_v18 }
  0x94   :  { %v204_v26 = vpop.permute.xlu0 %203  ;;  %v260_v27 = vpop.permute.xlu1 %259 }
  0x95   :  { %v299_v30 = vsel %vm289_vm3, %v110_v25, %v204_v26  ;;  %v256_v61 = vpop.permute.xlu2 %255  ;;  %v3586_v22 = vpop.eup %3585 }
  0x96   :  { %3506 = vmatmul.msk.f32.gmra.mxu0 %vm323_vm5, %v310_v31  ;;  %v316_v32 = vsel %vm306_vm4, %v299_v30, %v260_v27  ;;  %v534_v24 = vmul.f32 16.0, %v3586_v22  ;;  %vm538_vm7 = vweird.f32 %v3586_v22 }
  0x97   :  { %3512 = vmatmul.msk.f32.gmra.mxu3 %vm323_vm5, %v316_v32 }
  0x98   :  { %v535_v31 = vsub.f32 1.0, %v534_v24 }
  0x9a   :  { %v536_v13 = vmul.f32 %v3586_v22, %v535_v31 }
  0x9c   :  { %v252_v38 = vpop.permute.xlu0 %251  ;;  %v206_v39 = vpop.permute.xlu1 %205 }
  0x9d   :  { %v300_v40 = vsel %vm289_vm3, %v141_v34, %v206_v39  ;;  %v312_v51 = vsel %vm306_vm4, %v295_v45, %v252_v38  ;;  %v212_v5 = vpop.permute.xlu2 %211  ;;  %v537_v39 = vadd.f32 %v3586_v22, %v536_v13 }
  0x9e   :  { %3507 = vmatmul.msk.f32.gmra.mxu0 %vm323_vm5, %v311_v43  ;;  %v317_v44 = vsel %vm306_vm4, %v300_v40, %v262_v37  ;;  %v303_v6 = vsel %vm289_vm3, %v116_v4, %v212_v5 }
  0x9f   :  { %3513 = vmatmul.msk.f32.gmra.mxu3 %vm323_vm5, %v317_v44  ;;  %v3978_v45 = vsel %vm538_vm7, %v3586_v22, %v537_v39 }
  0xa4   :  { %v198_v48 = vpop.permute.xlu0 %197  ;;  %v254_v49 = vpop.permute.xlu1 %253 }
  0xa5   :  { %v296_v55 = vsel %vm289_vm3, %v139_v53, %v198_v48  ;;  %v270_v11 = vpop.permute.xlu2 %269 }
  0xa6   :  { %3508 = vmatmul.msk.f32.gmra.mxu0 %vm323_vm5, %v312_v51  ;;  %v313_v58 = vsel %vm306_vm4, %v296_v55, %v254_v49 }
  0xac   :  { %v264_v42 = vpop.permute.xlu0 %263  ;;  %v200_v57 = vpop.permute.xlu1 %199 }
  0xad   :  { %v318_v41 = vsel %vm306_vm4, %v301_v56, %v264_v42  ;;  %v297_v62 = vsel %vm289_vm3, %v107_v60, %v200_v57 }
  0xae   :  { %3509 = vmatmul.msk.f32.gmra.mxu0 %vm323_vm5, %v313_v58  ;;  %3514 = vmatmul.msk.f32.gmra.mxu3 %vm323_vm5, %v318_v41  ;;  %v314_v3 = vsel %vm306_vm4, %v297_v62, %v256_v61 }
  0xb4   :  { %v210_v0 = vpop.permute.xlu0 %209  ;;  %v266_v1 = vpop.permute.xlu1 %265 }
  0xb5   :  { %v302_v2 = vsel %vm289_vm3, %v142_v63, %v210_v0 }
  0xb6   :  { %3510 = vmatmul.msk.f32.gmra.mxu0 %vm323_vm5, %v314_v3  ;;  %v319_v35 = vsel %vm306_vm4, %v302_v2, %v266_v1 }
  0xb7   :  { %3515 = vmatmul.msk.f32.gmra.mxu3 %vm323_vm5, %v319_v35 }
  0xbc   :  { %v268_v7 = vpop.permute.xlu0 %267  ;;  %v214_v9 = vpop.permute.xlu1 %213 }
  0xbd   :  { %v320_v36 = vsel %vm306_vm4, %v303_v6, %v268_v7  ;;  %v304_v10 = vsel %vm289_vm3, %v143_v8, %v214_v9 }
  0xbe   :  { %v321_v14 = vsel %vm306_vm4, %v304_v10, %v270_v11 }
  0xbf   :  { %3516 = vmatmul.msk.f32.gmra.mxu3 %vm323_vm5, %v320_v36 }
  0xc4   :  { %v216_v15 = vpop.permute.xlu0 %215  ;;  %v272_v17 = vpop.permute.xlu1 %271 }
  0xc5   :  { %v305_v16 = vsel %vm289_vm3, %v119_v54, %v216_v15 }
  0xc6   :  { %v322_v12 = vsel %vm306_vm4, %v305_v16, %v272_v17 }
  0xc7   :  { %3517 = vmatmul.msk.f32.gmra.mxu3 %vm323_vm5, %v321_v14 }
  0xcf   :  { %3518 = vmatmul.msk.f32.gmra.mxu3 %vm323_vm5, %v322_v12 }
  0xfb   :  { %v393_v20 = vpop.f32.mrf.mxu0 }
  0xfc   :  { %v444_v23 = vadd.f32 %v3972_v21, %v393_v20 }
  0xfe   :  { %v461_v27 = vsel %vm48_vm6, %v444_v23, 0.0 }
 0x103   :  { %v396_v25 = vpop.f32.mrf.mxu0 }
 0x104   :  { %v445_v26 = vadd.f32 %v3972_v21, %v396_v25 }
 0x106   :  { %v462_v30 = vsel %vm48_vm6, %v445_v26, 0.0 }
 0x107   :  { %v463_v32 = vadd.f32 %v462_v30, %v461_v27 }
 0x109   :  { %v464_v33 = vrot.slane %v463_v32, 4 }
 0x10b   :  { %v465_v34 = vadd.f32 %v464_v33, %v463_v32  ;;  %v399_v37 = vpop.f32.mrf.mxu0 }
 0x10c   :  { %v446_v46 = vadd.f32 %v3972_v21, %v399_v37 }
 0x10d   :  { %v466_v38 = vrot.slane %v465_v34, 2 }
 0x10e   :  { %v470_v51 = vsel %vm48_vm6, %v446_v46, 0.0 }
 0x10f   :  { %v467_v40 = vadd.f32 %v466_v38, %v465_v34 }
 0x111   :  { %v468_v43 = vrot.slane %v467_v40, 1  ;;  %v417_v44 = vpop.f32.mrf.mxu3 }
 0x112   :  { %v452_v42 = vadd.f32 %v3972_v21, %v417_v44 }
 0x113   :  { %v469_v47 = vadd.f32 %v468_v43, %v467_v40  ;;  %v402_v48 = vpop.f32.mrf.mxu0 }
 0x114   :  { %v447_v49 = vadd.f32 %v3972_v21, %v402_v48  ;;  %v497_v29 = vsel %vm48_vm6, %v452_v42, 0.0 }
 0x115   :  { %v540_v50 = vmul.f32 %v3978_v45, %v469_v47 }
 0x116   :  { %v471_v52 = vsel %vm48_vm6, %v447_v49, 0.0 }
 0x117   :  { %v3985_v53 = vsub.f32 %v444_v23, %v540_v50  ;;  %v3987_v54 = vsub.f32 %v445_v26, %v540_v50  ;;  %v472_v55 = vadd.f32 %v471_v52, %v470_v51 }
 0x119   :  { %v564_v56 = vmul.f32 %v3985_v53, %v3985_v53  ;;  %v565_v28 = vmul.f32 %v3987_v54, %v3987_v54  ;;  %v473_v57 = vrot.slane %v472_v55, 4 }
 0x11a   :  { %v420_v58 = vpop.f32.mrf.mxu3 }
 0x11b   :  { %v580_v41 = vsel %vm48_vm6, %v564_v56, 0.0  ;;  %v581_v59 = vsel %vm48_vm6, %v565_v28, 0.0  ;;  %v474_v60 = vadd.f32 %v473_v57, %v472_v55  ;;  %v453_v61 = vadd.f32 %v3972_v21, %v420_v58  ;;  %v405_v62 = vpop.f32.mrf.mxu0 }
 0x11c   :  { %v582_v63 = vadd.f32 %v581_v59, %v580_v41  ;;  %v448_v8 = vadd.f32 %v3972_v21, %v405_v62 }
 0x11d   :  { %v475_v0 = vrot.slane %v474_v60, 2  ;;  %v498_v1 = vsel %vm48_vm6, %v453_v61, 0.0 }
 0x11e   :  { %v583_v2 = vrot.slane %v582_v63, 4  ;;  %v499_v3 = vadd.f32 %v498_v1, %v497_v29  ;;  %v479_v19 = vsel %vm48_vm6, %v448_v8, 0.0 }
 0x11f   :  { %v476_v35 = vadd.f32 %v475_v0, %v474_v60 }
 0x120   :  { %v584_v4 = vadd.f32 %v583_v2, %v582_v63  ;;  %v500_v5 = vrot.slane %v499_v3, 4 }
 0x121   :  { %v477_v6 = vrot.slane %v476_v35, 1 }
 0x122   :  { %v585_v7 = vrot.slane %v584_v4, 2  ;;  %v501_v36 = vadd.f32 %v500_v5, %v499_v3  ;;  %v423_v32 = vpop.f32.mrf.mxu3 }
 0x123   :  { %v478_v9 = vadd.f32 %v477_v6, %v476_v35  ;;  %v408_v10 = vpop.f32.mrf.mxu0  ;;  %v4021_v51 = vadd.f32 %v3972_v21, %v423_v32 }
 0x124   :  { %v586_v11 = vadd.f32 %v585_v7, %v584_v4  ;;  %v502_v14 = vrot.slane %v501_v36, 2  ;;  %v449_v15 = vadd.f32 %v3972_v21, %v408_v10 }
 0x125   :  { %v541_v16 = vmul.f32 %v3978_v45, %v478_v9  ;;  %v506_v62 = vsel %vm48_vm6, %v4021_v51, 0.0 }
 0x126   :  { %v587_v17 = vrot.slane %v586_v11, 1  ;;  %v503_v12 = vadd.f32 %v502_v14, %v501_v36  ;;  %v480_v20 = vsel %vm48_vm6, %v449_v15, 0.0 }
 0x127   :  { %v4004_v22 = vsub.f32 %v446_v46, %v541_v16  ;;  %v4006_v23 = vsub.f32 %v447_v49, %v541_v16  ;;  %v481_v24 = vadd.f32 %v480_v20, %v479_v19 }
 0x128   :  { %v588_v25 = vadd.f32 %v587_v17, %v586_v11  ;;  %v504_v26 = vrot.slane %v503_v12, 1 }
 0x129   :  { %v566_v27 = vmul.f32 %v4004_v22, %v4004_v22  ;;  %v567_v30 = vmul.f32 %v4006_v23, %v4006_v23  ;;  %v482_v31 = vrot.slane %v481_v24, 4 }
 0x12a   :  { %v652_v33 = vmul.f32 %v588_v25, %v3978_v45  ;;  %v505_v13 = vadd.f32 %v504_v26, %v503_v12 }
 0x12b   :  { %v589_v34 = vsel %vm48_vm6, %v566_v27, 0.0  ;;  %v590_v37 = vsel %vm48_vm6, %v567_v30, 0.0  ;;  %v483_v38 = vadd.f32 %v482_v31, %v481_v24  ;;  %v411_v39 = vpop.f32.mrf.mxu0 }
 0x12c   :  { %v660_v40 = vadd.f32 1e-05, %v652_v33  ;;  %v591_v43 = vadd.f32 %v590_v37, %v589_v34  ;;  %v544_v44 = vmul.f32 %v3978_v45, %v505_v13 }
 0x12d   :  { %v484_v46 = vrot.slane %v483_v38, 2 }
 0x12e   :  { %3587 = vrsqrt.f32 %v660_v40  ;;  %v592_v47 = vrot.slane %v591_v43, 4  ;;  %v4016_v48 = vsub.f32 %v452_v42, %v544_v44  ;;  %v4018_v49 = vsub.f32 %v453_v61, %v544_v44 }
 0x12f   :  { %v485_v50 = vadd.f32 %v484_v46, %v483_v38  ;;  %v4029_v42 = vadd.f32 %v3972_v21, %v411_v39  ;;  %vm674_vm9 = vweird.f32 %v660_v40  ;;  %v4064_v46 = vld [vmem:[%s5424_s3] ss:$0 sm:$0xff]  ;;  %s3643_s3 = smov 16  }
 0x130   :  { %v593_v52 = vadd.f32 %v592_v47, %v591_v43  ;;  %v572_v55 = vmul.f32 %v4016_v48, %v4016_v48  ;;  %v573_v56 = vmul.f32 %v4018_v49, %v4018_v49 }
 0x131   :  { %v486_v28 = vrot.slane %v485_v50, 1  ;;  %v426_v57 = vpop.f32.mrf.mxu3  ;;  %v488_v36 = vsel %vm48_vm6, %v4029_v42, 0.0 }
 0x132   :  { %v594_v58 = vrot.slane %v593_v52, 2  ;;  %v616_v41 = vsel %vm48_vm6, %v572_v55, 0.0  ;;  %v4032_v59 = vadd.f32 %v3972_v21, %v426_v57  ;;  %v617_v60 = vsel %vm48_vm6, %v573_v56, 0.0 }
 0x133   :  { %v487_v61 = vadd.f32 %v486_v28, %v485_v50  ;;  %v414_v63 = vpop.f32.mrf.mxu0  ;;  %v618_v1 = vadd.f32 %v617_v60, %v616_v41 }
 0x134   :  { %v3588_v29 = vpop.eup %3587  ;;  %v595_v0 = vadd.f32 %v594_v58, %v593_v52  ;;  %v507_v2 = vsel %vm48_vm6, %v4032_v59, 0.0  ;;  %v4040_v3 = vadd.f32 %v3972_v21, %v414_v63 }
 0x135   :  { %v669_v35 = vmul.f32 %v3588_v29, %v660_v40  ;;  %v542_v4 = vmul.f32 %v3978_v45, %v487_v61  ;;  %v508_v5 = vadd.f32 %v507_v2, %v506_v62  ;;  %v619_v7 = vrot.slane %v618_v1, 4  ;;  %v4072_v40 = vld [vmem:[%s5425_s4] ss:$0 sm:$0xff]  ;;  %s3644_s4 = smov 32  }
 0x136   :  { %v596_v6 = vrot.slane %v595_v0, 1  ;;  %v489_v9 = vsel %vm48_vm6, %v4040_v3, 0.0  ;;  %vm675_vm8 = vweird.f32 %v3588_v29 }
 0x137   :  { %v670_v10 = vmul.f32 %v3588_v29, %v669_v35  ;;  %v4047_v11 = vsub.f32 %v448_v8, %v542_v4  ;;  %v4049_v14 = vsub.f32 %v449_v15, %v542_v4  ;;  %v509_v16 = vrot.slane %v508_v5, 4  ;;  %vm676_vm10 = vmor %vm674_vm9, %vm675_vm8 }
 0x138   :  { %v597_v17 = vadd.f32 %v596_v6, %v595_v0  ;;  %v620_v12 = vadd.f32 %v619_v7, %v618_v1  ;;  %v490_v19 = vadd.f32 %v489_v9, %v488_v36 }
 0x139   :  { %v671_v20 = vmul.f32 0.5, %v670_v10  ;;  %v568_v24 = vmul.f32 %v4047_v11, %v4047_v11  ;;  %v569_v25 = vmul.f32 %v4049_v14, %v4049_v14  ;;  %v510_v26 = vadd.f32 %v509_v16, %v508_v5 }
 0x13a   :  { %v653_v27 = vmul.f32 %v597_v17, %v3978_v45  ;;  %v621_v30 = vrot.slane %v620_v12, 2  ;;  %v491_v8 = vrot.slane %v490_v19, 4  ;;  %v429_v31 = vpop.f32.mrf.mxu3 }
 0x13b   :  { %v672_v15 = vsub.f32 1.5, %v671_v20  ;;  %v598_v32 = vsel %vm48_vm6, %v568_v24, 0.0  ;;  %v599_v33 = vsel %vm48_vm6, %v569_v25, 0.0  ;;  %v511_v13 = vrot.slane %v510_v26, 2 }
 0x13c   :  { %v4058_v34 = vadd.f32 1e-05, %v653_v27  ;;  %v622_v37 = vadd.f32 %v621_v30, %v620_v12  ;;  %v600_v38 = vadd.f32 %v599_v33, %v598_v32  ;;  %v492_v39 = vadd.f32 %v491_v8, %v490_v19 }
 0x13d   :  { %v673_v43 = vmul.f32 %v3588_v29, %v672_v15  ;;  %v512_v44 = vadd.f32 %v511_v13, %v510_v26  ;;  %v4093_v16 = vadd.f32 %v3972_v21, %v429_v31  ;;  %v818_v13 = vld [vmem:[#allocation2] sm:$0xff] }
 0x13e   :  { %3589 = vrsqrt.f32 %v4058_v34  ;;  %v623_v47 = vrot.slane %v622_v37, 1  ;;  %v601_v50 = vrot.slane %v600_v38, 4  ;;  %v493_v56 = vrot.slane %v492_v39, 2 }
 0x13f   :  { %v677_v52 = vsel %vm676_vm10, %v3588_v29, %v673_v43  ;;  %v513_v55 = vrot.slane %v512_v44, 1  ;;  %v515_v8 = vsel %vm48_vm6, %v4093_v16, 0.0  ;;  %v819_v43 = vld [vmem:[#allocation2 + $0x8] sm:$0xff]  ;;  %vm684_vm12 = vweird.f32 %v4058_v34 }
 0x140   :  { %v748_v28 = vmul.f32 %v677_v52, %v3985_v53  ;;  %v749_v57 = vmul.f32 %v677_v52, %v3987_v54  ;;  %v624_v58 = vadd.f32 %v623_v47, %v622_v37  ;;  %v602_v41 = vadd.f32 %v601_v50, %v600_v38 }
 0x141   :  { %v514_v60 = vadd.f32 %v513_v55, %v512_v44  ;;  %v494_v61 = vadd.f32 %v493_v56, %v492_v39 }
 0x142   :  { %v767_v62 = vmul.f32 %v4064_v46, %v748_v28  ;;  %v768_v63 = vmul.f32 %v4064_v46, %v749_v57  ;;  %v656_v29 = vmul.f32 %v624_v58, %v3978_v45  ;;  %v603_v0 = vrot.slane %v602_v41, 2  ;;  %v432_v1 = vpop.f32.mrf.mxu3 }
 0x143   :  { %v545_v53 = vmul.f32 %v3978_v45, %v514_v60  ;;  %v495_v54 = vrot.slane %v494_v61, 1  ;;  %v4079_v2 = vadd.f32 %v3972_v21, %v432_v1 }
 0x144   :  { %v3590_v35 = vpop.eup %3589  ;;  %v786_v4 = vadd.f32 %v4072_v40, %v767_v62  ;;  %v787_v5 = vadd.f32 %v4072_v40, %v768_v63  ;;  %v4083_v6 = vadd.f32 1e-05, %v656_v29  ;;  %v604_v7 = vadd.f32 %v603_v0, %v602_v41 }
 0x145   :  { %v679_v36 = vmul.f32 %v3590_v35, %v4058_v34  ;;  %v4087_v9 = vsub.f32 %v4021_v51, %v545_v53  ;;  %v4090_v10 = vsub.f32 %v4032_v59, %v545_v53  ;;  %v496_v12 = vadd.f32 %v495_v54, %v494_v61 }
 0x146   :  { %802 = vst.msk [vmem:[#allocation5] sm:$0xff] %vm48_vm6, %v786_v4  ;;  %3591 = vrsqrt.f32 %v4083_v6  ;;  %v605_v17 = vrot.slane %v604_v7, 1  ;;  %v516_v59 = vsel %vm48_vm6, %v4079_v2, 0.0  ;;  %vm685_vm11 = vweird.f32 %v3590_v35 }
 0x147   :  { %803 = vst.msk [vmem:[#allocation5 + $0x8] sm:$0xff] %vm48_vm6, %v787_v5  ;;  %v680_v19 = vmul.f32 %v3590_v35, %v679_v36  ;;  %v574_v20 = vmul.f32 %v4087_v9, %v4087_v9  ;;  %v575_v51 = vmul.f32 %v4090_v10, %v4090_v10  ;;  %v543_v25 = vmul.f32 %v3978_v45, %v496_v12  ;;  %vm686_vm13 = vmor %vm684_vm12, %vm685_vm11 }
 0x148   :  { %v606_v24 = vadd.f32 %v605_v17, %v604_v7  ;;  %v517_v33 = vadd.f32 %v516_v59, %v515_v8  ;;  %vm714_vm3 = vweird.f32 %v4083_v6 }
 0x149   :  { %v681_v26 = vmul.f32 0.5, %v680_v19  ;;  %v625_v27 = vsel %vm48_vm6, %v574_v20, 0.0  ;;  %v626_v30 = vsel %vm48_vm6, %v575_v51, 0.0  ;;  %v4111_v32 = vsub.f32 %v4029_v42, %v543_v25 }
 0x14a   :  { %v654_v31 = vmul.f32 %v606_v24, %v3978_v45  ;;  %v627_v15 = vadd.f32 %v626_v30, %v625_v27  ;;  %v435_v38 = vpop.f32.mrf.mxu3  ;;  %v4118_v50 = vsub.f32 %v4040_v3, %v543_v25  ;;  %v518_v58 = vrot.slane %v517_v33, 4 }
 0x14b   :  { %v682_v37 = vsub.f32 1.5, %v681_v26  ;;  %v570_v57 = vmul.f32 %v4111_v32, %v4111_v32  ;;  %v4156_v27 = vadd.f32 %v3972_v21, %v435_v38 }
 0x14c   :  { %v4113_v39 = vpop.eup %3591  ;;  %v4115_v44 = vadd.f32 1e-05, %v654_v31  ;;  %v628_v47 = vrot.slane %v627_v15, 4  ;;  %v571_v63 = vmul.f32 %v4118_v50, %v4118_v50 }
 0x14d   :  { %v822_v52 = vld [vmem:[#allocation5] sm:$0xff]  ;;  %v683_v55 = vmul.f32 %v3590_v35, %v682_v37  ;;  %v709_v42 = vmul.f32 %v4113_v39, %v4083_v6  ;;  %vm715_vm4 = vweird.f32 %v4113_v39  ;;  %v607_v36 = vsel %vm48_vm6, %v570_v57, 0.0 }
 0x14e   :  { %v823_v56 = vld [vmem:[#allocation5 + $0x8] sm:$0xff]  ;;  %v826_v28 = vadd.f32 %v822_v52, %v818_v13  ;;  %3593 = vrsqrt.f32 %v4115_v44  ;;  %v629_v61 = vadd.f32 %v628_v47, %v627_v15  ;;  %v608_v17 = vsel %vm48_vm6, %v571_v63, 0.0  ;;  %vm716_vm5 = vmor %vm714_vm3, %vm715_vm4  ;;  %v821_v63 = vld [vmem:[#allocation2 + $0x18] sm:$0xff] }
 0x14f   :  { %v827_v41 = vadd.f32 %v823_v56, %v819_v43  ;;  %v687_v60 = vsel %vm686_vm13, %v3590_v35, %v683_v55  ;;  %v710_v3 = vmul.f32 %v4113_v39, %v709_v42  ;;  %v519_v35 = vadd.f32 %v518_v58, %v517_v33 }
 0x150   :  { %vm830_vm14 = vcmp.ge.f32.partialorder %v826_v28, 1.0  ;;  %v750_v34 = vmul.f32 %v687_v60, %v4004_v22  ;;  %v751_v62 = vmul.f32 %v687_v60, %v4006_v23  ;;  %v630_v54 = vrot.slane %v629_v61, 2 }
 0x151   :  { %vm831_vm15 = vcmp.ge.f32.partialorder %v827_v41, 1.0  ;;  %v4132_v29 = vsel %vm830_vm14, 1.0, %v3641_v18  ;;  %v711_v0 = vmul.f32 0.5, %v710_v3  ;;  %v609_v31 = vadd.f32 %v608_v17, %v607_v36 }
 0x152   :  { %v4135_v1 = vsel %vm831_vm15, 1.0, %v3641_v18  ;;  %v842_v53 = vsub.f32 1.0, %v4132_v29  ;;  %v769_v23 = vmul.f32 %v4064_v46, %v750_v34  ;;  %v770_v7 = vmul.f32 %v4064_v46, %v751_v62  ;;  %v438_v59 = vpop.f32.mrf.mxu3 }
 0x153   :  { %v843_v22 = vsub.f32 1.0, %v4135_v1  ;;  %v883_v19 = vsel %vm882_vm2, %v4132_v29, 0.0  ;;  %v712_v51 = vsub.f32 1.5, %v711_v0  ;;  %v858_v24 = vrot.slane %v4132_v29, 2 }
 0x154   :  { %v4142_v4 = vpop.eup %3593  ;;  %v846_v5 = vmul.f32 %v842_v53, %v826_v28  ;;  %v788_v20 = vadd.f32 %v4072_v40, %v769_v23  ;;  %v789_v25 = vadd.f32 %v4072_v40, %v770_v7  ;;  %v631_v8 = vadd.f32 %v630_v54, %v629_v61  ;;  %v820_v61 = vld [vmem:[#allocation2 + $0x10] sm:$0xff] }
 0x155   :  { %v847_v12 = vmul.f32 %v843_v22, %v827_v41  ;;  %v689_v26 = vmul.f32 %v4142_v4, %v4115_v44  ;;  %v713_v30 = vmul.f32 %v4113_v39, %v712_v51  ;;  %v520_v15 = vrot.slane %v519_v35, 2 }
 0x156   :  { %850 = vst.msk [vmem:[#allocation2] sm:$0xff] %vm48_vm6, %v846_v5  ;;  %v884_v33 = vrot.slane %v883_v19, 4  ;;  %vm695_vm7 = vweird.f32 %v4142_v4  ;;  %v4168_v37 = vadd.f32 %v3972_v21, %v438_v59  ;;  %v632_v43 = vrot.slane %v631_v8, 1 }
 0x157   :  { %851 = vst.msk [vmem:[#allocation2 + $0x8] sm:$0xff] %vm48_vm6, %v847_v12  ;;  %v690_v13 = vmul.f32 %v4142_v4, %v689_v26  ;;  %v717_v38 = vsel %vm716_vm5, %v4113_v39, %v713_v30  ;;  %v610_v47 = vrot.slane %v609_v31, 4  ;;  %v521_v52 = vadd.f32 %v520_v15, %v519_v35 }
 0x158   :  { %804 = vst.msk [vmem:[#allocation5 + $0x10] sm:$0xff] %vm48_vm6, %v788_v20  ;;  %v756_v55 = vmul.f32 %v717_v38, %v4016_v48  ;;  %v757_v42 = vmul.f32 %v717_v38, %v4018_v49  ;;  %v525_v56 = vsel %vm48_vm6, %v4168_v37, 0.0  ;;  %v633_v28 = vadd.f32 %v632_v43, %v631_v8 }
 0x159   :  { %805 = vst.msk [vmem:[#allocation5 + $0x18] sm:$0xff] %vm48_vm6, %v789_v25  ;;  %v691_v6 = vmul.f32 0.5, %v690_v13  ;;  %v611_v57 = vadd.f32 %v610_v47, %v609_v31  ;;  %v522_v58 = vrot.slane %v521_v52, 1  ;;  %v524_v21 = vsel %vm48_vm6, %v4156_v27, 0.0 }
 0x15a   :  { %v775_v41 = vmul.f32 %v4064_v46, %v756_v55  ;;  %v776_v39 = vmul.f32 %v4064_v46, %v757_v42  ;;  %v526_v3 = vadd.f32 %v525_v56, %v524_v21  ;;  %vm694_vm8 = vweird.f32 %v4115_v44 }
 0x15b   :  { %v692_v60 = vsub.f32 1.5, %v691_v6  ;;  %v657_v48 = vmul.f32 %v633_v28, %v3978_v45  ;;  %v612_v49 = vrot.slane %v611_v57, 2  ;;  %v523_v34 = vadd.f32 %v522_v58, %v521_v52  ;;  %vm696_vm9 = vmor %vm694_vm8, %vm695_vm7 }
 0x15c   :  { %v859_v62 = vrot.slane %v4132_v29, 4  ;;  %v794_v0 = vadd.f32 %v4072_v40, %v775_v41  ;;  %v795_v53 = vadd.f32 %v4072_v40, %v776_v39  ;;  %v885_v23 = vadd.f32 %v884_v33, %v883_v19 }
 0x15d   :  { %v693_v22 = vmul.f32 %v4142_v4, %v692_v60  ;;  %v890_v54 = vsel %vm882_vm2, %v858_v24, 0.0  ;;  %v4189_v44 = vadd.f32 1e-05, %v657_v48  ;;  %v613_v5 = vadd.f32 %v612_v49, %v611_v57 }
 0x15e   :  { %810 = vst.msk [vmem:[#allocation5 + $0x40] sm:$0xff] %vm48_vm6, %v794_v0  ;;  %v546_v12 = vmul.f32 %v3978_v45, %v523_v34  ;;  %v527_v20 = vrot.slane %v526_v3, 4  ;;  %v860_v24 = vrot.slane %v4132_v29, 6  ;;  %v891_v25 = vrot.slane %v890_v54, 4 }
 0x15f   :  { %v824_v35 = vld [vmem:[#allocation5 + $0x10] sm:$0xff]  ;;  %v697_v17 = vsel %vm696_vm9, %v4142_v4, %v693_v22  ;;  %811 = vst.msk [vmem:[#allocation5 + $0x48] sm:$0xff] %vm48_vm6, %v795_v53  ;;  %3595 = vrsqrt.f32 %v4189_v44  ;;  %v614_v26 = vrot.slane %v613_v5, 1  ;;  %v861_v15 = vrot.slane %v4135_v1, 2 }
 0x160   :  { %v825_v7 = vld [vmem:[#allocation5 + $0x18] sm:$0xff]  ;;  %v828_v36 = vadd.f32 %v824_v35, %v820_v61  ;;  %v752_v19 = vmul.f32 %v697_v17, %v4047_v11  ;;  %v753_v59 = vmul.f32 %v697_v17, %v4049_v14  ;;  %v4209_v14 = vsub.f32 %v4093_v16, %v546_v12 }
 0x161   :  { %v829_v51 = vadd.f32 %v825_v7, %v821_v63  ;;  %v528_v38 = vadd.f32 %v527_v20, %v526_v3  ;;  %v886_v43 = vrot.slane %v885_v23, 2  ;;  %v862_v55 = vrot.slane %v4135_v1, 4  ;;  %v1052_v20 = vld [vmem:[#allocation2] sm:$0xff] }
 0x162   :  { %vm832_vm10 = vcmp.ge.f32.partialorder %v828_v36, 1.0  ;;  %v771_v30 = vmul.f32 %v4064_v46, %v752_v19  ;;  %v772_v8 = vmul.f32 %v4064_v46, %v753_v59  ;;  %v892_v42 = vadd.f32 %v891_v25, %v890_v54 }
 0x163   :  { %vm833_vm11 = vcmp.ge.f32.partialorder %v829_v51, 1.0  ;;  %v4200_v4 = vsel %vm832_vm10, 1.0, %v3641_v18  ;;  %v615_v16 = vadd.f32 %v614_v26, %v613_v5  ;;  %v4218_v28 = vsub.f32 %v4079_v2, %v546_v12 }
 0x164   :  { %v4205_v31 = vsel %vm833_vm11, 1.0, %v3641_v18  ;;  %v844_v11 = vsub.f32 1.0, %v4200_v4  ;;  %v790_v13 = vadd.f32 %v4072_v40, %v771_v30  ;;  %v791_v52 = vadd.f32 %v4072_v40, %v772_v8 }
 0x165   :  { %v845_v33 = vsub.f32 1.0, %v4205_v31  ;;  %v3596_v6 = vpop.eup %3595  ;;  %v863_v57 = vrot.slane %v4135_v1, 6  ;;  %v864_v58 = vrot.slane %v4200_v4, 2  ;;  %v939_v21 = vsel %vm882_vm2, %v4200_v4, 0.0 }
 0x166   :  { %v848_v47 = vmul.f32 %v844_v11, %v828_v36  ;;  %806 = vst.msk [vmem:[#allocation5 + $0x20] sm:$0xff] %vm48_vm6, %v790_v13  ;;  %v719_v41 = vmul.f32 %v3596_v6, %v4189_v44  ;;  %v576_v39 = vmul.f32 %v4209_v14, %v4209_v14  ;;  %v655_v60 = vmul.f32 %v615_v16, %v3978_v45 }
 0x167   :  { %v849_v56 = vmul.f32 %v845_v33, %v829_v51  ;;  %v577_v2 = vmul.f32 %v4218_v28, %v4218_v28  ;;  %v529_v3 = vrot.slane %v528_v38, 2  ;;  %v887_v61 = vadd.f32 %v886_v43, %v885_v23  ;;  %807 = vst.msk [vmem:[#allocation5 + $0x28] sm:$0xff] %vm48_vm6, %v791_v52  ;;  %v1053_v43 = vld [vmem:[#allocation2 + $0x8] sm:$0xff] }
 0x168   :  { %852 = vst.msk [vmem:[#allocation2 + $0x10] sm:$0xff] %vm48_vm6, %v848_v47  ;;  %v720_v48 = vmul.f32 %v3596_v6, %v719_v41  ;;  %v634_v49 = vsel %vm48_vm6, %v576_v39, 0.0  ;;  %v893_v34 = vrot.slane %v892_v42, 2  ;;  %v897_v63 = vsel %vm882_vm2, %v859_v62, 0.0 }
 0x169   :  { %853 = vst.msk [vmem:[#allocation2 + $0x18] sm:$0xff] %vm48_vm6, %v849_v56  ;;  %vm724_vm12 = vweird.f32 %v4189_v44  ;;  %v4236_v0 = vadd.f32 1e-05, %v655_v60  ;;  %v635_v53 = vsel %vm48_vm6, %v577_v2, 0.0  ;;  %v530_v22 = vadd.f32 %v529_v3, %v528_v38 }
 0x16a   :  { %v940_v54 = vrot.slane %v939_v21, 4  ;;  %v721_v35 = vmul.f32 0.5, %v720_v48  ;;  %v636_v5 = vadd.f32 %v635_v53, %v634_v49  ;;  %v894_v7 = vadd.f32 %v893_v34, %v892_v42 }
 0x16b   :  { %v4240_v23 = vsel %vm882_vm2, %v864_v58, 0.0  ;;  %v531_v36 = vrot.slane %v530_v22, 1  ;;  %v888_v17 = vrot.slane %v887_v61, 1  ;;  %v898_v12 = vrot.slane %v897_v63, 4 }
 0x16c   :  { %v722_v62 = vsub.f32 1.5, %v721_v35  ;;  %vm725_vm13 = vweird.f32 %v3596_v6  ;;  %3597 = vrsqrt.f32 %v4236_v0  ;;  %v637_v19 = vrot.slane %v636_v5, 4 }
 0x16d   :  { %v1057_v51 = vld [vmem:[#allocation5 + $0x20] sm:$0xff]  ;;  %v865_v59 = vrot.slane %v4200_v4, 4  ;;  %v866_v25 = vrot.slane %v4200_v4, 6  ;;  %v895_v30 = vrot.slane %v894_v7, 1  ;;  %v947_v8 = vrot.slane %v4240_v23, 4  ;;  %vm726_vm15 = vmor %vm724_vm12, %vm725_vm13 }
 0x16e   :  { %v1061_v26 = vadd.f32 %v1057_v51, %v1052_v20  ;;  %v723_v11 = vmul.f32 %v3596_v6, %v722_v62  ;;  %v638_v33 = vadd.f32 %v637_v19, %v636_v5  ;;  %v532_v13 = vadd.f32 %v531_v36, %v530_v22  ;;  %v1058_v47 = vld [vmem:[#allocation5 + $0x28] sm:$0xff] }
 0x16f   :  { %v4246_v38 = vadd.f32 %v940_v54, %v939_v21  ;;  %v4251_v52 = vadd.f32 %v888_v17, %v887_v61  ;;  %v899_v42 = vadd.f32 %v898_v12, %v897_v63  ;;  %v1062_v56 = vadd.f32 %v1058_v47, %v1053_v43 }
 0x170   :  { %vm1065_vm14 = vcmp.ge.f32.partialorder %v1061_v26, 1.0  ;;  %v727_v58 = vsel %vm726_vm15, %v3596_v6, %v723_v11  ;;  %v904_v21 = vsel %vm882_vm2, %v860_v24, 0.0  ;;  %v639_v39 = vrot.slane %v638_v33, 2 }
 0x171   :  { %v4254_v16 = vsel %vm1065_vm14, 1.0, %v3641_v18  ;;  %v4260_v60 = vadd.f32 %v895_v30, %v894_v7  ;;  %v911_v44 = vsel %vm882_vm2, %v4135_v1, 0.0  ;;  %vm1066_vm3 = vcmp.ge.f32.partialorder %v1062_v56, 1.0 }
 0x172   :  { %v1077_v41 = vsub.f32 1.0, %v4254_v16  ;;  %v4264_v2 = vpop.eup %3597  ;;  %v758_v3 = vmul.f32 %v727_v58, %v4087_v9  ;;  %v759_v61 = vmul.f32 %v727_v58, %v4090_v10  ;;  %v547_v6 = vmul.f32 %v3978_v45, %v532_v13 }
 0x173   :  { %v4270_v29 = vsel %vm1066_vm3, 1.0, %v3641_v18  ;;  %v900_v48 = vrot.slane %v899_v42, 2  ;;  %v905_v49 = vrot.slane %v904_v21, 4  ;;  %v912_v22 = vrot.slane %v911_v44, 4 }
 0x174   :  { %v1081_v24 = vmul.f32 %v1077_v41, %v1061_v26  ;;  %v1078_v34 = vsub.f32 1.0, %v4270_v29  ;;  %v777_v63 = vmul.f32 %v4064_v46, %v758_v3  ;;  %v778_v53 = vmul.f32 %v4064_v46, %v759_v61  ;;  %v1285_v41 = vld [vmem:[#allocation5 + $0x40] sm:$0xff] }
 0x175   :  { %v1093_v9 = vrot.slane %v4254_v16, 2  ;;  %v1094_v10 = vrot.slane %v4254_v16, 4  ;;  %v699_v54 = vmul.f32 %v4264_v2, %v4236_v0  ;;  %vm704_vm4 = vweird.f32 %v4236_v0 }
 0x176   :  { %1085 = vst.msk [vmem:[#allocation2] sm:$0xff] %vm48_vm6, %v1081_v24  ;;  %v640_v35 = vadd.f32 %v639_v39, %v638_v33  ;;  %v1082_v5 = vmul.f32 %v1078_v34, %v1062_v56  ;;  %v796_v7 = vadd.f32 %v4072_v40, %v777_v63  ;;  %v797_v36 = vadd.f32 %v4072_v40, %v778_v53 }
 0x177   :  { %v4284_v17 = vsub.f32 %v4156_v27, %v547_v6  ;;  %v700_v12 = vmul.f32 %v4264_v2, %v699_v54  ;;  %v4288_v51 = vsub.f32 %v4168_v37, %v547_v6  ;;  %v901_v62 = vadd.f32 %v900_v48, %v899_v42 }
 0x178   :  { %v641_v20 = vrot.slane %v640_v35, 1  ;;  %1086 = vst.msk [vmem:[#allocation2 + $0x8] sm:$0xff] %vm48_vm6, %v1082_v5  ;;  %v906_v26 = vadd.f32 %v905_v49, %v904_v21  ;;  %v913_v30 = vadd.f32 %v912_v22, %v911_v44  ;;  %v918_v11 = vsel %vm882_vm2, %v861_v15, 0.0 }
 0x179   :  { %v578_v19 = vmul.f32 %v4284_v17, %v4284_v17  ;;  %812 = vst.msk [vmem:[#allocation5 + $0x50] sm:$0xff] %vm48_vm6, %v796_v7  ;;  %v701_v27 = vmul.f32 0.5, %v700_v12  ;;  %v579_v37 = vmul.f32 %v4288_v51, %v4288_v51  ;;  %v902_v13 = vrot.slane %v901_v62, 1 }
 0x17a   :  { %v642_v33 = vadd.f32 %v641_v20, %v640_v35  ;;  %813 = vst.msk [vmem:[#allocation5 + $0x58] sm:$0xff] %vm48_vm6, %v797_v36  ;;  %v907_v47 = vrot.slane %v906_v26, 2  ;;  %v914_v42 = vrot.slane %v913_v30, 2  ;;  %v919_v56 = vrot.slane %v918_v11, 4  ;;  %v1286_v35 = vld [vmem:[#allocation5 + $0x48] sm:$0xff] }
 0x17b   :  { %v643_v43 = vsel %vm48_vm6, %v578_v19, 0.0  ;;  %v702_v58 = vsub.f32 1.5, %v701_v27  ;;  %vm705_vm5 = vweird.f32 %v4264_v2  ;;  %v644_v21 = vsel %vm48_vm6, %v579_v37, 0.0 }
 0x17c   :  { %v658_v15 = vmul.f32 %v642_v33, %v3978_v45  ;;  %v1095_v39 = vrot.slane %v4254_v16, 6  ;;  %v645_v3 = vadd.f32 %v644_v21, %v643_v43  ;;  %v908_v61 = vadd.f32 %v907_v47, %v906_v26  ;;  %vm706_vm7 = vmor %vm704_vm4, %vm705_vm5 }
 0x17d   :  { %v1280_v44 = vld [vmem:[#allocation2] sm:$0xff]  ;;  %v920_v6 = vadd.f32 %v919_v56, %v918_v11  ;;  %v703_v24 = vmul.f32 %v4264_v2, %v702_v58  ;;  %v915_v34 = vadd.f32 %v914_v42, %v913_v30  ;;  %v4310_v63 = vsel %vm882_vm2, %v4254_v16, 0.0 }
 0x17e   :  { %v4306_v48 = vadd.f32 1e-05, %v658_v15  ;;  %v1289_v49 = vadd.f32 %v1285_v41, %v1280_v44  ;;  %v646_v53 = vrot.slane %v645_v3, 4  ;;  %v903_v22 = vadd.f32 %v902_v13, %v901_v62 }
 0x17f   :  { %v921_v54 = vrot.slane %v920_v6, 2  ;;  %v707_v5 = vsel %vm706_vm7, %v4264_v2, %v703_v24  ;;  %v1281_v7 = vld [vmem:[#allocation2 + $0x8] sm:$0xff]  ;;  %v925_v36 = vsel %vm882_vm2, %v862_v55, 0.0  ;;  %v909_v2 = vrot.slane %v908_v61, 1 }
 0x180   :  { %3599 = vrsqrt.f32 %v4306_v48  ;;  %vm1293_vm8 = vcmp.ge.f32.partialorder %v1289_v49, 1.0  ;;  %v754_v12 = vmul.f32 %v707_v5, %v4111_v32  ;;  %v755_v20 = vmul.f32 %v707_v5, %v4118_v50 }
 0x181   :  { %v1290_v0 = vadd.f32 %v1286_v35, %v1281_v7  ;;  %v4322_v19 = vsel %vm1293_vm8, 1.0, %v3641_v18  ;;  %v647_v26 = vadd.f32 %v646_v53, %v645_v3  ;;  %v916_v30 = vrot.slane %v915_v34, 1 }
 0x182   :  { %v1305_v62 = vsub.f32 1.0, %v4322_v19  ;;  %v773_v11 = vmul.f32 %v4064_v46, %v754_v12  ;;  %v774_v27 = vmul.f32 %v4064_v46, %v755_v20  ;;  %v922_v33 = vadd.f32 %v921_v54, %v920_v6 }
 0x183   :  { %vm1294_vm9 = vcmp.ge.f32.partialorder %v1290_v0, 1.0  ;;  %v648_v50 = vrot.slane %v647_v26, 2  ;;  %v926_v37 = vrot.slane %v925_v36, 4  ;;  %v910_v15 = vadd.f32 %v909_v2, %v908_v61 }
 0x184   :  { %v4328_v55 = vsel %vm1294_vm9, 1.0, %v3641_v18  ;;  %v1309_v32 = vmul.f32 %v1305_v62, %v1289_v49  ;;  %v792_v13 = vadd.f32 %v4072_v40, %v773_v11  ;;  %v793_v43 = vadd.f32 %v4072_v40, %v774_v27 }
 0x185   :  { %v1306_v47 = vsub.f32 1.0, %v4328_v55  ;;  %v923_v42 = vrot.slane %v922_v33, 1  ;;  %v649_v58 = vadd.f32 %v648_v50, %v647_v26  ;;  %v927_v21 = vadd.f32 %v926_v37, %v925_v36 }
 0x186   :  { %v3600_v56 = vpop.eup %3599  ;;  %1313 = vst.msk [vmem:[#allocation2] sm:$0xff] %vm48_vm6, %v1309_v32  ;;  %v932_v41 = vsel %vm882_vm2, %v863_v57, 0.0  ;;  %v4340_v44 = vsel %vm882_vm2, %v1093_v9, 0.0  ;;  %v917_v24 = vadd.f32 %v916_v30, %v915_v34  ;;  %v996_v1 = vmul.f32 0.5, %v4260_v60 }
 0x187   :  { %808 = vst.msk [vmem:[#allocation5 + $0x30] sm:$0xff] %vm48_vm6, %v792_v13  ;;  %v729_v3 = vmul.f32 %v3600_v56, %v4306_v48  ;;  %v1310_v6 = vmul.f32 %v1306_v47, %v1290_v0  ;;  %v650_v49 = vrot.slane %v649_v58, 1  ;;  %v928_v61 = vrot.slane %v927_v21, 2 }
 0x188   :  { %809 = vst.msk [vmem:[#allocation5 + $0x38] sm:$0xff] %vm48_vm6, %v793_v43  ;;  %v933_v53 = vrot.slane %v932_v41, 4  ;;  %v924_v57 = vadd.f32 %v923_v42, %v922_v33  ;;  %v995_v9 = vmul.f32 0.5, %v4251_v52  ;;  %v997_v35 = vmul.f32 0.5, %v903_v22  ;;  %v1054_v22 = vld [vmem:[#allocation2 + $0x10] sm:$0xff]  ;;  %v1055_v33 = vld [vmem:[#allocation2 + $0x18] sm:$0xff] }
 0x189   :  { %v730_v54 = vmul.f32 %v3600_v56, %v729_v3  ;;  %1314 = vst.msk [vmem:[#allocation2 + $0x8] sm:$0xff] %vm48_vm6, %v1310_v6  ;;  %v651_v5 = vadd.f32 %v650_v49, %v649_v58  ;;  %v929_v7 = vadd.f32 %v928_v61, %v927_v21  ;;  %v998_v12 = vmul.f32 0.5, %v910_v15 }
 0x18a   :  { %v934_v36 = vadd.f32 %v933_v53, %v932_v41  ;;  %vm1027_vm10 = vcmask 1041409   ;;  %vm1029_vm11 = vcmask 1042434   ;;  %vm1031_vm12 = vcmask 1043459  }
 0x18b   :  { %v731_v20 = vmul.f32 0.5, %v730_v54  ;;  %v659_v34 = vmul.f32 %v651_v5, %v3978_v45  ;;  %v930_v0 = vrot.slane %v929_v7, 1  ;;  %v1028_v60 = vsel %vm1027_vm10, %v996_v1, %v995_v9 }
 0x18c   :  { %v935_v62 = vrot.slane %v934_v36, 2  ;;  %vm734_vm13 = vweird.f32 %v4306_v48  ;;  %vm735_vm14 = vweird.f32 %v3600_v56  ;;  %v1030_v52 = vsel %vm1029_vm11, %v997_v35, %v1028_v60 }
 0x18d   :  { %v732_v26 = vsub.f32 1.5, %v731_v20  ;;  %v4352_v30 = vadd.f32 1e-05, %v659_v34  ;;  %v1032_v27 = vsel %vm1031_vm12, %v998_v12, %v1030_v52  ;;  %vm1033_vm15 = vcmask 1044484   ;;  %vm736_vm3 = vmor %vm734_vm13, %vm735_vm14 }
 0x18e   :  { %v1059_v2 = vld [vmem:[#allocation5 + $0x30] sm:$0xff]  ;;  %v936_v11 = vadd.f32 %v935_v62, %v934_v36  ;;  %v999_v37 = vmul.f32 0.5, %v917_v24  ;;  %v1000_v13 = vmul.f32 0.5, %v924_v57  ;;  %v931_v47 = vadd.f32 %v930_v0, %v929_v7 }
 0x18f   :  { %v1060_v45 = vld [vmem:[#allocation5 + $0x38] sm:$0xff]  ;;  %v1063_v32 = vadd.f32 %v1059_v2, %v1054_v22  ;;  %v733_v50 = vmul.f32 %v3600_v56, %v732_v26  ;;  %3601 = vrsqrt.f32 %v4352_v30  ;;  %vm1035_vm4 = vcmask 1045509  }
 0x190   :  { %v1064_v43 = vadd.f32 %v1060_v45, %v1055_v33  ;;  %v937_v58 = vrot.slane %v936_v11, 1  ;;  %v1034_v15 = vsel %vm1033_vm15, %v999_v37, %v1032_v27  ;;  %v1118_v48 = vrot.slane %v4310_v63, 4 }
 0x191   :  { %vm1067_vm5 = vcmp.ge.f32.partialorder %v1063_v32, 1.0  ;;  %v737_v42 = vsel %vm736_vm3, %v3600_v56, %v733_v50  ;;  %v1125_v6 = vrot.slane %v4340_v44, 4  ;;  %v1036_v53 = vsel %vm1035_vm4, %v1000_v13, %v1034_v15 }
 0x192   :  { %vm1068_vm7 = vcmp.ge.f32.partialorder %v1064_v43, 1.0  ;;  %v4361_v21 = vsel %vm1067_vm5, 1.0, %v3641_v18  ;;  %v760_v41 = vmul.f32 %v737_v42, %v4209_v14  ;;  %v761_v3 = vmul.f32 %v737_v42, %v4218_v28  ;;  %v1508_v42 = vld [vmem:[#allocation2] sm:$0xff] }
 0x193   :  { %v4368_v24 = vsel %vm1068_vm7, 1.0, %v3641_v18  ;;  %v1079_v56 = vsub.f32 1.0, %v4361_v21  ;;  %vm1037_vm8 = vcmask 1046534   ;;  %v1099_v14 = vrot.slane %v4361_v21, 2 }
 0x194   :  { %v1080_v49 = vsub.f32 1.0, %v4368_v24  ;;  %v779_v61 = vmul.f32 %v4064_v46, %v760_v41  ;;  %v1173_v28 = vsel %vm882_vm2, %v4361_v21, 0.0  ;;  %v780_v54 = vmul.f32 %v4064_v46, %v761_v3 }
 0x195   :  { %v1083_v1 = vmul.f32 %v1079_v56, %v1063_v32  ;;  %v3602_v57 = vpop.eup %3601  ;;  %v938_v5 = vadd.f32 %v937_v58, %v936_v11  ;;  %v1001_v7 = vmul.f32 0.5, %v931_v47  ;;  %v4380_v36 = vadd.f32 %v1118_v48, %v4310_v63  ;;  %v1509_v48 = vld [vmem:[#allocation2 + $0x8] sm:$0xff] }
 0x196   :  { %v1084_v9 = vmul.f32 %v1080_v49, %v1064_v43  ;;  %v798_v35 = vadd.f32 %v4072_v40, %v779_v61  ;;  %v799_v12 = vadd.f32 %v4072_v40, %v780_v54  ;;  %v739_v20 = vmul.f32 %v3602_v57, %v4352_v30 }
 0x197   :  { %1087 = vst.msk [vmem:[#allocation2 + $0x10] sm:$0xff] %vm48_vm6, %v1083_v1  ;;  %vm744_vm9 = vweird.f32 %v4352_v30  ;;  %v1174_v34 = vrot.slane %v1173_v28, 4  ;;  %v1002_v0 = vmul.f32 0.5, %v938_v5  ;;  %v1038_v62 = vsel %vm1037_vm8, %v1001_v7, %v1036_v53 }
 0x198   :  { %1088 = vst.msk [vmem:[#allocation2 + $0x18] sm:$0xff] %vm48_vm6, %v1084_v9  ;;  %vm1039_vm13 = vcmask 1047559   ;;  %v4389_v60 = vsel %vm882_vm2, %v1099_v14, 0.0  ;;  %v740_v63 = vmul.f32 %v3602_v57, %v739_v20  ;;  %v867_v26 = vrot.slane %v4205_v31, 2 }
 0x199   :  { %814 = vst.msk [vmem:[#allocation5 + $0x60] sm:$0xff] %vm48_vm6, %v798_v35  ;;  %v942_v52 = vrot.slane %v4246_v38, 2  ;;  %v1040_v22 = vsel %vm1039_vm13, %v1002_v0, %v1038_v62  ;;  %v948_v2 = vadd.f32 %v947_v8, %v4240_v23  ;;  %v953_v11 = vsel %vm882_vm2, %v865_v59, 0.0 }
 0x19a   :  { %815 = vst.msk [vmem:[#allocation5 + $0x68] sm:$0xff] %vm48_vm6, %v799_v12  ;;  %v960_v27 = vsel %vm882_vm2, %v866_v25, 0.0  ;;  %v1100_v33 = vrot.slane %v4361_v21, 4  ;;  %v1101_v45 = vrot.slane %v4361_v21, 6  ;;  %v741_v32 = vmul.f32 0.5, %v740_v63  ;;  %v1287_v25 = vld [vmem:[#allocation5 + $0x50] sm:$0xff] }
 0x19b   :  { %1050 = vst.msk [vmem:[#allocation8] sm:$0xff] %vm48_vm6, %v1040_v22  ;;  %v954_v50 = vrot.slane %v953_v11, 4  ;;  %v868_v37 = vrot.slane %v4205_v31, 4  ;;  %v943_v23 = vadd.f32 %v942_v52, %v4246_v38  ;;  %v949_v8 = vrot.slane %v948_v2, 2  ;;  %v1288_v38 = vld [vmem:[#allocation5 + $0x58] sm:$0xff] }
 0x19c   :  { %v961_v13 = vrot.slane %v960_v27, 4  ;;  %v1181_v59 = vrot.slane %v4389_v60, 4  ;;  %v742_v43 = vsub.f32 1.5, %v741_v32  ;;  %vm745_vm14 = vweird.f32 %v3602_v57 }
 0x19d   :  { %v955_v4 = vadd.f32 %v954_v50, %v953_v11  ;;  %v4411_v47 = vadd.f32 %v1174_v34, %v1173_v28  ;;  %v869_v15 = vrot.slane %v4205_v31, 6  ;;  %v967_v41 = vsel %vm882_vm2, %v4205_v31, 0.0  ;;  %vm746_vm3 = vmor %vm744_vm9, %vm745_vm14 }
 0x19e   :  { %v1282_v58 = vld [vmem:[#allocation2 + $0x10] sm:$0xff]  ;;  %v4417_v3 = vsel %vm882_vm2, %v867_v26, 0.0  ;;  %v743_v56 = vmul.f32 %v3602_v57, %v742_v43  ;;  %v950_v53 = vadd.f32 %v949_v8, %v948_v2  ;;  %v944_v54 = vrot.slane %v943_v23, 1 }
 0x19f   :  { %v1283_v49 = vld [vmem:[#allocation2 + $0x18] sm:$0xff]  ;;  %v1291_v61 = vadd.f32 %v1287_v25, %v1282_v58  ;;  %v956_v1 = vrot.slane %v955_v4, 2  ;;  %v962_v9 = vadd.f32 %v961_v13, %v960_v27  ;;  %v981_v35 = vsel %vm882_vm2, %v868_v37, 0.0 }
 0x1a0   :  { %v1513_v14 = vld [vmem:[#allocation5 + $0x60] sm:$0xff]  ;;  %v1292_v28 = vadd.f32 %v1288_v38, %v1283_v49  ;;  %v747_v12 = vsel %vm746_vm3, %v3602_v57, %v743_v56  ;;  %v968_v20 = vrot.slane %v967_v41, 4  ;;  %v951_v30 = vrot.slane %v950_v53, 1 }
 0x1a1   :  { %v1514_v5 = vld [vmem:[#allocation5 + $0x68] sm:$0xff]  ;;  %v1517_v7 = vadd.f32 %v1513_v14, %v1508_v42  ;;  %vm1295_vm5 = vcmp.ge.f32.partialorder %v1291_v61, 1.0  ;;  %v762_v0 = vmul.f32 %v747_v12, %v4284_v17  ;;  %v763_v62 = vmul.f32 %v747_v12, %v4288_v51 }
 0x1a2   :  { %v1518_v34 = vadd.f32 %v1514_v5, %v1509_v48  ;;  %vm1296_vm7 = vcmp.ge.f32.partialorder %v1292_v28, 1.0  ;;  %v4425_v63 = vld [vmem:[#allocation8] sm:$0xff]  ;;  %v957_v26 = vadd.f32 %v956_v1, %v955_v4  ;;  %v975_v52 = vrot.slane %v4417_v3, 4 }
 0x1a3   :  { %vm1521_vm1 = vcmp.ge.f32.partialorder %v1517_v7, 1.0  ;;  %1809 = vrot.lane.b32.xlu2 %v4425_v63, %s3643_s3  ;;  %v781_v17 = vmul.f32 %v4064_v46, %v762_v0  ;;  %v782_v51 = vmul.f32 %v4064_v46, %v763_v62  ;;  %v4441_v11 = vsel %vm1295_vm5, 1.0, %v3641_v18 }
 0x1a4   :  { %vm1522_vm9 = vcmp.ge.f32.partialorder %v1518_v34, 1.0  ;;  %v4431_v57 = vsel %vm1521_vm1, 1.0, %v3641_v18  ;;  %v4444_v27 = vsel %vm1296_vm7, 1.0, %v3641_v18  ;;  %v963_v37 = vrot.slane %v962_v9, 2 }
 0x1a5   :  { %v4436_v22 = vsel %vm1522_vm9, 1.0, %v3641_v18  ;;  %v1533_v2 = vsub.f32 1.0, %v4431_v57  ;;  %v800_v50 = vadd.f32 %v4072_v40, %v781_v17  ;;  %v969_v8 = vadd.f32 %v968_v20, %v967_v41 }
 0x1a6   :  { %v1534_v32 = vsub.f32 1.0, %v4436_v22  ;;  %v801_v46 = vadd.f32 %v4072_v40, %v782_v51  ;;  %v945_v43 = vadd.f32 %v944_v54, %v943_v23  ;;  %v982_v4 = vrot.slane %v981_v35, 4 }
 0x1a7   :  { %v1537_v13 = vmul.f32 %v1533_v2, %v1517_v7  ;;  %816 = vst.msk [vmem:[#allocation5 + $0x70] sm:$0xff] %vm48_vm6, %v800_v50  ;;  %v1307_v42 = vsub.f32 1.0, %v4441_v11  ;;  %v1308_v58 = vsub.f32 1.0, %v4444_v27  ;;  %v1761_v38 = vrot.slane %v4425_v63, 7 }
 0x1a8   :  { %v1538_v25 = vmul.f32 %v1534_v32, %v1518_v34  ;;  %v1549_v48 = vrot.slane %v4431_v57, 2  ;;  %v1785_v41 = vrot.slane %v4425_v63, 1  ;;  %v952_v56 = vadd.f32 %v951_v30, %v950_v53  ;;  %817 = vst.msk [vmem:[#allocation5 + $0x78] sm:$0xff] %vm48_vm6, %v801_v46 }
 0x1a9   :  { %1541 = vst.msk [vmem:[#allocation2] sm:$0xff] %vm48_vm6, %v1537_v13  ;;  %v958_v49 = vrot.slane %v957_v26, 1  ;;  %v1311_v40 = vmul.f32 %v1307_v42, %v1291_v61  ;;  %v1312_v23 = vmul.f32 %v1308_v58, %v1292_v28  ;;  %v964_v1 = vadd.f32 %v963_v37, %v962_v9 }
 0x1aa   :  { %1542 = vst.msk [vmem:[#allocation2 + $0x8] sm:$0xff] %vm48_vm6, %v1538_v25  ;;  %v970_v14 = vrot.slane %v969_v8, 2  ;;  %v1801_v54 = vsel %vm144_vm0, %v1785_v41, 0.0  ;;  %v976_v7 = vadd.f32 %v975_v52, %v4417_v3  ;;  %v983_v12 = vadd.f32 %v982_v4, %v981_v35 }
 0x1ab   :  { %v959_v5 = vadd.f32 %v958_v49, %v957_v26  ;;  %1315 = vst.msk [vmem:[#allocation2 + $0x10] sm:$0xff] %vm48_vm6, %v1311_v40  ;;  %1841 = vrot.lane.b32.xlu0 %v1801_v54, %s3644_s4  ;;  %v965_v53 = vrot.slane %v964_v1, 1  ;;  %v988_v61 = vsel %vm882_vm2, %v869_v15, 0.0  ;;  %v1003_v28 = vmul.f32 0.5, %v945_v43 }
 0x1ac   :  { %v971_v20 = vadd.f32 %v970_v14, %v969_v8  ;;  %1316 = vst.msk [vmem:[#allocation2 + $0x18] sm:$0xff] %vm48_vm6, %v1312_v23  ;;  %v977_v9 = vrot.slane %v976_v7, 2  ;;  %v984_v34 = vrot.slane %v983_v12, 2  ;;  %v989_v0 = vrot.slane %v988_v61, 4 }
 0x1ad   :  { %v1004_v62 = vmul.f32 0.5, %v952_v56  ;;  %v1550_v3 = vrot.slane %v4431_v57, 4  ;;  %v966_v35 = vadd.f32 %v965_v53, %v964_v1  ;;  %v1005_v26 = vmul.f32 0.5, %v959_v5 }
 0x1ae   :  { %v972_v30 = vrot.slane %v971_v20, 1  ;;  %v978_v52 = vadd.f32 %v977_v9, %v976_v7  ;;  %v985_v17 = vadd.f32 %v984_v34, %v983_v12  ;;  %v990_v51 = vadd.f32 %v989_v0, %v988_v61  ;;  %v1515_v8 = vld [vmem:[#allocation5 + $0x70] sm:$0xff] }
 0x1af   :  { %v1041_v2 = vsel %vm1027_vm10, %v1004_v62, %v1003_v28  ;;  %v1573_v31 = vsel %vm882_vm2, %v4431_v57, 0.0  ;;  %v1006_v32 = vmul.f32 0.5, %v966_v35  ;;  %v1551_v37 = vrot.slane %v4431_v57, 6  ;;  %v1516_v4 = vld [vmem:[#allocation5 + $0x78] sm:$0xff] }
 0x1b0   :  { %v973_v15 = vadd.f32 %v972_v30, %v971_v20  ;;  %v1042_v50 = vsel %vm1029_vm11, %v1005_v26, %v1041_v2  ;;  %v979_v13 = vrot.slane %v978_v52, 1  ;;  %v986_v46 = vrot.slane %v985_v17, 1 }
 0x1b1   :  { %v991_v43 = vrot.slane %v990_v51, 2  ;;  %v1043_v42 = vsel %vm1031_vm12, %v1006_v32, %v1042_v50  ;;  %v1120_v58 = vrot.slane %v4380_v36, 2  ;;  %v1126_v41 = vadd.f32 %v1125_v6, %v4340_v44 }
 0x1b2   :  { %v1007_v25 = vmul.f32 0.5, %v973_v15  ;;  %v1574_v56 = vrot.slane %v1573_v31, 4  ;;  %v1510_v49 = vld [vmem:[#allocation2 + $0x10] sm:$0xff]  ;;  %v980_v40 = vadd.f32 %v979_v13, %v978_v52  ;;  %v987_v23 = vadd.f32 %v986_v46, %v985_v17 }
 0x1b3   :  { %v992_v1 = vadd.f32 %v991_v43, %v990_v51  ;;  %v1511_v14 = vld [vmem:[#allocation2 + $0x18] sm:$0xff]  ;;  %v1519_v54 = vadd.f32 %v1515_v8, %v1510_v49  ;;  %v1121_v7 = vadd.f32 %v1120_v58, %v4380_v36  ;;  %v1127_v12 = vrot.slane %v1126_v41, 2 }
 0x1b4   :  { %v1044_v5 = vsel %vm1033_vm15, %v1007_v25, %v1043_v42  ;;  %v1520_v53 = vadd.f32 %v1516_v4, %v1511_v14  ;;  %v1008_v61 = vmul.f32 0.5, %v980_v40  ;;  %v1131_v28 = vsel %vm882_vm2, %v1094_v10, 0.0 }
 0x1b5   :  { %v993_v20 = vrot.slane %v992_v1, 1  ;;  %v4483_v44 = vsel %vm882_vm2, %v1549_v48, 0.0  ;;  %vm1523_vm1 = vcmp.ge.f32.partialorder %v1519_v54, 1.0  ;;  %v1009_v6 = vmul.f32 0.5, %v987_v23 }
 0x1b6   :  { %v1122_v9 = vrot.slane %v1121_v7, 1  ;;  %vm1524_vm14 = vcmp.ge.f32.partialorder %v1520_v53, 1.0  ;;  %v4486_v34 = vsel %vm1523_vm1, 1.0, %v3641_v18  ;;  %v1045_v36 = vsel %vm1035_vm4, %v1008_v61, %v1044_v5 }
 0x1b7   :  { %v994_v0 = vadd.f32 %v993_v20, %v992_v1  ;;  %v4490_v62 = vsel %vm1524_vm14, 1.0, %v3641_v18  ;;  %v1535_v35 = vsub.f32 1.0, %v4486_v34  ;;  %v1128_v30 = vadd.f32 %v1127_v12, %v1126_v41 }
 0x1b8   :  { %v1132_v10 = vrot.slane %v1131_v28, 4  ;;  %v1536_v48 = vsub.f32 1.0, %v4490_v62  ;;  %v1096_v52 = vrot.slane %v4270_v29, 2  ;;  %v1097_v17 = vrot.slane %v4270_v29, 4 }
 0x1b9   :  { %v1010_v26 = vmul.f32 0.5, %v994_v0  ;;  %v4496_v51 = vadd.f32 %v1574_v56, %v1573_v31  ;;  %v1581_v2 = vrot.slane %v4483_v44, 4  ;;  %v1539_v15 = vmul.f32 %v1535_v35, %v1519_v54 }
 0x1ba   :  { %v1046_v32 = vsel %vm1037_vm8, %v1009_v6, %v1045_v36  ;;  %v1540_v50 = vmul.f32 %v1536_v48, %v1520_v53  ;;  %v1555_v8 = vrot.slane %v4486_v34, 2  ;;  %v1098_v46 = vrot.slane %v4270_v29, 6 }
 0x1bb   :  { %v1047_v13 = vsel %vm1039_vm13, %v1010_v26, %v1046_v32  ;;  %1543 = vst.msk [vmem:[#allocation2 + $0x10] sm:$0xff] %vm48_vm6, %v1539_v15  ;;  %v1123_v43 = vadd.f32 %v1122_v9, %v1121_v7  ;;  %v1129_v4 = vrot.slane %v1128_v30, 1  ;;  %v1133_v25 = vadd.f32 %v1132_v10, %v1131_v28 }
 0x1bc   :  { %v1138_v31 = vsel %vm882_vm2, %v1095_v39, 0.0  ;;  %1544 = vst.msk [vmem:[#allocation2 + $0x18] sm:$0xff] %vm48_vm6, %v1540_v50  ;;  %v1145_v58 = vsel %vm882_vm2, %v4270_v29, 0.0  ;;  %v1152_v41 = vsel %vm882_vm2, %v1096_v52, 0.0  ;;  %v1159_v56 = vsel %vm882_vm2, %v1097_v17, 0.0 }
 0x1bd   :  { %v1139_v42 = vrot.slane %v1138_v31, 4  ;;  %1051 = vst.msk [vmem:[#allocation8 + $0x8] sm:$0xff] %vm48_vm6, %v1047_v13  ;;  %v1130_v49 = vadd.f32 %v1129_v4, %v1128_v30  ;;  %v1134_v40 = vrot.slane %v1133_v25, 2  ;;  %v1146_v23 = vrot.slane %v1145_v58, 4 }
 0x1be   :  { %v1153_v1 = vrot.slane %v1152_v41, 4  ;;  %v1556_v16 = vrot.slane %v4486_v34, 4  ;;  %v1160_v39 = vrot.slane %v1159_v56, 4  ;;  %v1166_v54 = vsel %vm882_vm2, %v1098_v46, 0.0 }
 0x1bf   :  { %v1140_v14 = vadd.f32 %v1139_v42, %v1138_v31  ;;  %v1135_v5 = vadd.f32 %v1134_v40, %v1133_v25  ;;  %v1147_v7 = vadd.f32 %v1146_v23, %v1145_v58  ;;  %v1167_v29 = vrot.slane %v1166_v54, 4 }
 0x1c0   :  { %v1154_v12 = vadd.f32 %v1153_v1, %v1152_v41  ;;  %v1161_v20 = vadd.f32 %v1160_v39, %v1159_v56  ;;  %v1229_v61 = vmul.f32 0.5, %v1123_v43  ;;  %v1230_v28 = vmul.f32 0.5, %v1130_v49 }
 0x1c1   :  { %v1141_v53 = vrot.slane %v1140_v14, 2  ;;  %v1136_v6 = vrot.slane %v1135_v5, 1  ;;  %v1148_v9 = vrot.slane %v1147_v7, 2  ;;  %v1168_v36 = vadd.f32 %v1167_v29, %v1166_v54 }
 0x1c2   :  { %v1155_v0 = vrot.slane %v1154_v12, 2  ;;  %v1162_v30 = vrot.slane %v1161_v20, 2  ;;  %v1261_v10 = vsel %vm1027_vm10, %v1230_v28, %v1229_v61  ;;  %v1321_v48 = vrot.slane %v4322_v19, 2 }
 0x1c3   :  { %v1142_v35 = vadd.f32 %v1141_v53, %v1140_v14  ;;  %v1137_v26 = vadd.f32 %v1136_v6, %v1135_v5  ;;  %v1149_v52 = vadd.f32 %v1148_v9, %v1147_v7  ;;  %v1169_v15 = vrot.slane %v1168_v36, 2 }
 0x1c4   :  { %v1156_v17 = vadd.f32 %v1155_v0, %v1154_v12  ;;  %v4517_v32 = vld [vmem:[#allocation8 + $0x8] sm:$0xff]  ;;  %v1163_v13 = vadd.f32 %v1162_v30, %v1161_v20  ;;  %v1322_v46 = vrot.slane %v4322_v19, 4  ;;  %v1323_v43 = vrot.slane %v4322_v19, 6 }
 0x1c5   :  { %v1143_v50 = vrot.slane %v1142_v35, 1  ;;  %1811 = vrot.lane.b32.xlu1 %v4517_v32, %s3643_s3  ;;  %v1786_v4 = vrot.slane %v4517_v32, 1  ;;  %v1150_v25 = vrot.slane %v1149_v52, 1  ;;  %v1324_v42 = vrot.slane %v4328_v55, 2 }
 0x1c6   :  { %v1157_v31 = vrot.slane %v1156_v17, 1  ;;  %v1164_v41 = vrot.slane %v1163_v13, 1  ;;  %v1170_v56 = vadd.f32 %v1169_v15, %v1168_v36  ;;  %v1231_v49 = vmul.f32 0.5, %v1137_v26 }
 0x1c7   :  { %v1144_v58 = vadd.f32 %v1143_v50, %v1142_v35  ;;  %v1802_v40 = vsel %vm144_vm0, %v1786_v4, 0.0  ;;  %v1151_v23 = vadd.f32 %v1150_v25, %v1149_v52  ;;  %v1325_v14 = vrot.slane %v4328_v55, 4 }
 0x1c8   :  { %v1158_v1 = vadd.f32 %v1157_v31, %v1156_v17  ;;  %1843 = vrot.lane.b32.xlu2 %v1802_v40, %s3644_s4  ;;  %v1165_v39 = vadd.f32 %v1164_v41, %v1163_v13  ;;  %v1171_v54 = vrot.slane %v1170_v56, 1  ;;  %v1262_v7 = vsel %vm1029_vm11, %v1231_v49, %v1261_v10 }
 0x1c9   :  { %v1232_v5 = vmul.f32 0.5, %v1144_v58  ;;  %v1233_v12 = vmul.f32 0.5, %v1151_v23  ;;  %v1326_v53 = vrot.slane %v4328_v55, 6  ;;  %v1345_v20 = vsel %vm882_vm2, %v4322_v19, 0.0 }
 0x1ca   :  { %v1234_v29 = vmul.f32 0.5, %v1158_v1  ;;  %v1172_v61 = vadd.f32 %v1171_v54, %v1170_v56  ;;  %v1235_v28 = vmul.f32 0.5, %v1165_v39  ;;  %v1346_v9 = vrot.slane %v1345_v20, 4 }
 0x1cb   :  { %v1263_v6 = vsel %vm1031_vm12, %v1232_v5, %v1262_v7  ;;  %v1352_v36 = vsel %vm882_vm2, %v1321_v48, 0.0  ;;  %v1359_v35 = vsel %vm882_vm2, %v1322_v46, 0.0  ;;  %v1366_v30 = vsel %vm882_vm2, %v1323_v43, 0.0 }
 0x1cc   :  { %v1264_v0 = vsel %vm1033_vm15, %v1233_v12, %v1263_v6  ;;  %v1236_v10 = vmul.f32 0.5, %v1172_v61  ;;  %v1347_v52 = vadd.f32 %v1346_v9, %v1345_v20  ;;  %v1353_v17 = vrot.slane %v1352_v36, 4 }
 0x1cd   :  { %v1265_v26 = vsel %vm1035_vm4, %v1234_v29, %v1264_v0  ;;  %v1360_v15 = vrot.slane %v1359_v35, 4  ;;  %v1367_v50 = vrot.slane %v1366_v30, 4  ;;  %v1373_v13 = vsel %vm882_vm2, %v4328_v55, 0.0 }
 0x1ce   :  { %v1266_v19 = vsel %vm1037_vm8, %v1235_v28, %v1265_v26  ;;  %v1348_v25 = vrot.slane %v1347_v52, 2  ;;  %v1354_v48 = vadd.f32 %v1353_v17, %v1352_v36  ;;  %v1374_v31 = vrot.slane %v1373_v13, 4 }
 0x1cf   :  { %v1267_v4 = vsel %vm1039_vm13, %v1236_v10, %v1266_v19  ;;  %v1361_v46 = vadd.f32 %v1360_v15, %v1359_v35  ;;  %v1368_v43 = vadd.f32 %v1367_v50, %v1366_v30  ;;  %v1380_v58 = vsel %vm882_vm2, %v1324_v42, 0.0 }
 0x1d0   :  { %1278 = vst.msk [vmem:[#allocation8 + $0x10] sm:$0xff] %vm48_vm6, %v1267_v4  ;;  %v1387_v41 = vsel %vm882_vm2, %v1325_v14, 0.0  ;;  %v1349_v56 = vadd.f32 %v1348_v25, %v1347_v52  ;;  %v1355_v49 = vrot.slane %v1354_v48, 2  ;;  %v1375_v40 = vadd.f32 %v1374_v31, %v1373_v13 }
 0x1d1   :  { %v1381_v23 = vrot.slane %v1380_v58, 4  ;;  %v1362_v1 = vrot.slane %v1361_v46, 2  ;;  %v1369_v39 = vrot.slane %v1368_v43, 2  ;;  %v1388_v55 = vrot.slane %v1387_v41, 4 }
 0x1d2   :  { %v1394_v54 = vsel %vm882_vm2, %v1326_v53, 0.0  ;;  %v1350_v5 = vrot.slane %v1349_v56, 1  ;;  %v1356_v7 = vadd.f32 %v1355_v49, %v1354_v48  ;;  %v1376_v12 = vrot.slane %v1375_v40, 2 }
 0x1d3   :  { %v1382_v29 = vadd.f32 %v1381_v23, %v1380_v58  ;;  %v1363_v20 = vadd.f32 %v1362_v1, %v1361_v46  ;;  %v1370_v61 = vadd.f32 %v1369_v39, %v1368_v43  ;;  %v1389_v28 = vadd.f32 %v1388_v55, %v1387_v41 }
 0x1d4   :  { %v1395_v6 = vrot.slane %v1394_v54, 4  ;;  %v1351_v42 = vadd.f32 %v1350_v5, %v1349_v56  ;;  %v1357_v9 = vrot.slane %v1356_v7, 1  ;;  %v1377_v14 = vadd.f32 %v1376_v12, %v1375_v40 }
 0x1d5   :  { %v1383_v0 = vrot.slane %v1382_v29, 2  ;;  %v1364_v36 = vrot.slane %v1363_v20, 1  ;;  %v1371_v35 = vrot.slane %v1370_v61, 1  ;;  %v1390_v30 = vrot.slane %v1389_v28, 2 }
 0x1d6   :  { %v1396_v10 = vadd.f32 %v1395_v6, %v1394_v54  ;;  %v4548_v26 = vsel %vm882_vm2, %v4486_v34, 0.0  ;;  %v1358_v52 = vadd.f32 %v1357_v9, %v1356_v7  ;;  %v1378_v17 = vrot.slane %v1377_v14, 1 }
 0x1d7   :  { %v4550_v53 = vld [vmem:[#allocation8 + $0x10] sm:$0xff]  ;;  %v1384_v19 = vadd.f32 %v1383_v0, %v1382_v29  ;;  %v1365_v50 = vadd.f32 %v1364_v36, %v1363_v20  ;;  %v1372_v13 = vadd.f32 %v1371_v35, %v1370_v61  ;;  %v1457_v4 = vmul.f32 0.5, %v1351_v42 }
 0x1d8   :  { %1813 = vrot.lane.b32.xlu0 %v4550_v53, %s3643_s3  ;;  %v1787_v15 = vrot.slane %v4550_v53, 1  ;;  %v1379_v25 = vadd.f32 %v1378_v17, %v1377_v14  ;;  %v1391_v31 = vadd.f32 %v1390_v30, %v1389_v28  ;;  %v1397_v46 = vrot.slane %v1396_v10, 2 }
 0x1d9   :  { %v1385_v48 = vrot.slane %v1384_v19, 1  ;;  %v1458_v58 = vmul.f32 0.5, %v1358_v52  ;;  %v1459_v41 = vmul.f32 0.5, %v1365_v50  ;;  %v1460_v56 = vmul.f32 0.5, %v1372_v13 }
 0x1da   :  { %v1803_v43 = vsel %vm144_vm0, %v1787_v15, 0.0  ;;  %v1392_v40 = vrot.slane %v1391_v31, 1  ;;  %v1398_v23 = vadd.f32 %v1397_v46, %v1396_v10  ;;  %v1461_v1 = vmul.f32 0.5, %v1379_v25 }
 0x1db   :  { %1845 = vrot.lane.b32.xlu1 %v1803_v43, %s3644_s4  ;;  %v1386_v49 = vadd.f32 %v1385_v48, %v1384_v19  ;;  %v1489_v39 = vsel %vm1027_vm10, %v1458_v58, %v1457_v4  ;;  %v1102_v55 = vrot.slane %v4368_v24, 2  ;;  %v1103_v54 = vrot.slane %v4368_v24, 4 }
 0x1dc   :  { %v1104_v5 = vrot.slane %v4368_v24, 6  ;;  %v1393_v7 = vadd.f32 %v1392_v40, %v1391_v31  ;;  %v1399_v12 = vrot.slane %v1398_v23, 1  ;;  %v1490_v20 = vsel %vm1029_vm11, %v1459_v41, %v1489_v39 }
 0x1dd   :  { %v1462_v29 = vmul.f32 0.5, %v1386_v49  ;;  %v1491_v61 = vsel %vm1031_vm12, %v1460_v56, %v1490_v20  ;;  %v1176_v28 = vrot.slane %v4411_v47, 2  ;;  %v1182_v6 = vadd.f32 %v1181_v59, %v4389_v60 }
 0x1de   :  { %v1187_v42 = vsel %vm882_vm2, %v1100_v33, 0.0  ;;  %v1400_v9 = vadd.f32 %v1399_v12, %v1398_v23  ;;  %v1463_v14 = vmul.f32 0.5, %v1393_v7  ;;  %v1492_v0 = vsel %vm1033_vm15, %v1461_v1, %v1491_v61 }
 0x1df   :  { %v1188_v36 = vrot.slane %v1187_v42, 4  ;;  %v1493_v35 = vsel %vm1035_vm4, %v1462_v29, %v1492_v0  ;;  %v1177_v30 = vadd.f32 %v1176_v28, %v4411_v47  ;;  %v1183_v10 = vrot.slane %v1182_v6, 2 }
 0x1e0   :  { %v1194_v52 = vsel %vm882_vm2, %v1101_v45, 0.0  ;;  %v1464_v17 = vmul.f32 0.5, %v1400_v9  ;;  %v1494_v60 = vsel %vm1037_vm8, %v1463_v14, %v1493_v35  ;;  %v1201_v50 = vsel %vm882_vm2, %v4368_v24, 0.0 }
 0x1e1   :  { %v1189_v59 = vadd.f32 %v1188_v36, %v1187_v42  ;;  %v1195_v19 = vrot.slane %v1194_v52, 4  ;;  %v1178_v33 = vrot.slane %v1177_v30, 1  ;;  %v1184_v15 = vadd.f32 %v1183_v10, %v1182_v6 }
 0x1e2   :  { %v1208_v13 = vsel %vm882_vm2, %v1102_v55, 0.0  ;;  %v1495_v4 = vsel %vm1039_vm13, %v1464_v17, %v1494_v60  ;;  %v1202_v48 = vrot.slane %v1201_v50, 4  ;;  %v1215_v46 = vsel %vm882_vm2, %v1103_v54, 0.0 }
 0x1e3   :  { %v1190_v47 = vrot.slane %v1189_v59, 2  ;;  %v1196_v25 = vadd.f32 %v1195_v19, %v1194_v52  ;;  %1506 = vst.msk [vmem:[#allocation8 + $0x20] sm:$0xff] %vm48_vm6, %v1495_v4  ;;  %v1179_v21 = vadd.f32 %v1178_v33, %v1177_v30  ;;  %v1185_v45 = vrot.slane %v1184_v15, 1 }
 0x1e4   :  { %v1209_v31 = vrot.slane %v1208_v13, 4  ;;  %v1203_v41 = vadd.f32 %v1202_v48, %v1201_v50  ;;  %v1216_v56 = vrot.slane %v1215_v46, 4  ;;  %v1630_v24 = vrot.slane %v4548_v26, 4 }
 0x1e5   :  { %v1191_v43 = vadd.f32 %v1190_v47, %v1189_v59  ;;  %v1197_v58 = vrot.slane %v1196_v25, 2  ;;  %v1186_v49 = vadd.f32 %v1185_v45, %v1184_v15  ;;  %v1222_v23 = vsel %vm882_vm2, %v1104_v5, 0.0 }
 0x1e6   :  { %v1210_v40 = vadd.f32 %v1209_v31, %v1208_v13  ;;  %v1204_v55 = vrot.slane %v1203_v41, 2  ;;  %v1217_v7 = vadd.f32 %v1216_v56, %v1215_v46  ;;  %v1223_v29 = vrot.slane %v1222_v23, 4 }
 0x1e7   :  { %v1192_v1 = vrot.slane %v1191_v43, 1  ;;  %v1198_v39 = vadd.f32 %v1197_v58, %v1196_v25  ;;  %v1237_v20 = vmul.f32 0.5, %v1179_v21  ;;  %v1238_v61 = vmul.f32 0.5, %v1186_v49 }
 0x1e8   :  { %v1211_v12 = vrot.slane %v1210_v40, 2  ;;  %v1205_v6 = vadd.f32 %v1204_v55, %v1203_v41  ;;  %v1218_v42 = vrot.slane %v1217_v7, 2  ;;  %v4588_v9 = vsel %vm882_vm2, %v1555_v8, 0.0 }
 0x1e9   :  { %v1193_v28 = vadd.f32 %v1192_v1, %v1191_v43  ;;  %v1199_v54 = vrot.slane %v1198_v39, 1  ;;  %v1224_v0 = vadd.f32 %v1223_v29, %v1222_v23  ;;  %v1268_v5 = vsel %vm1027_vm10, %v1238_v61, %v1237_v20 }
 0x1ea   :  { %v1212_v14 = vadd.f32 %v1211_v12, %v1210_v40  ;;  %v4591_v36 = vld [vmem:[#allocation8 + $0x20] sm:$0xff]  ;;  %v1206_v30 = vrot.slane %v1205_v6, 1  ;;  %v1219_v10 = vadd.f32 %v1218_v42, %v1217_v7  ;;  %v1552_v59 = vrot.slane %v4436_v22, 2 }
 0x1eb   :  { %v1200_v35 = vadd.f32 %v1199_v54, %v1198_v39  ;;  %v1239_v52 = vmul.f32 0.5, %v1193_v28  ;;  %1817 = vrot.lane.b32.xlu1 %v4591_v36, %s3643_s3  ;;  %v1225_v60 = vrot.slane %v1224_v0, 2  ;;  %v1553_v8 = vrot.slane %v4436_v22, 4 }
 0x1ec   :  { %v1213_v17 = vrot.slane %v1212_v14, 1  ;;  %v1207_v19 = vadd.f32 %v1206_v30, %v1205_v6  ;;  %v1220_v33 = vrot.slane %v1219_v10, 1  ;;  %v1789_v47 = vrot.slane %v4591_v36, 1 }
 0x1ed   :  { %v1240_v15 = vmul.f32 0.5, %v1200_v35  ;;  %v1269_v50 = vsel %vm1029_vm11, %v1239_v52, %v1268_v5  ;;  %v1226_v4 = vadd.f32 %v1225_v60, %v1224_v0  ;;  %v1554_v25 = vrot.slane %v4436_v22, 6 }
 0x1ee   :  { %v1214_v13 = vadd.f32 %v1213_v17, %v1212_v14  ;;  %v1221_v48 = vadd.f32 %v1220_v33, %v1219_v10  ;;  %v1241_v21 = vmul.f32 0.5, %v1207_v19  ;;  %v1576_v31 = vrot.slane %v4496_v51, 2 }
 0x1ef   :  { %v1270_v45 = vsel %vm1031_vm12, %v1240_v15, %v1269_v50  ;;  %v1227_v46 = vrot.slane %v1226_v4, 1  ;;  %v1582_v58 = vadd.f32 %v1581_v2, %v4483_v44  ;;  %v1587_v41 = vsel %vm882_vm2, %v1550_v3, 0.0 }
 0x1f0   :  { %v1242_v43 = vmul.f32 0.5, %v1214_v13  ;;  %v1243_v56 = vmul.f32 0.5, %v1221_v48  ;;  %v1271_v49 = vsel %vm1033_vm15, %v1241_v21, %v1270_v45  ;;  %v1577_v40 = vadd.f32 %v1576_v31, %v4496_v51 }
 0x1f1   :  { %v1588_v23 = vrot.slane %v1587_v41, 4  ;;  %v1228_v1 = vadd.f32 %v1227_v46, %v1226_v4  ;;  %v1583_v55 = vrot.slane %v1582_v58, 2  ;;  %v1594_v7 = vsel %vm882_vm2, %v1551_v37, 0.0 }
 0x1f2   :  { %v1272_v39 = vsel %vm1035_vm4, %v1242_v43, %v1271_v49  ;;  %v1578_v2 = vrot.slane %v1577_v40, 1  ;;  %v1595_v29 = vrot.slane %v1594_v7, 4  ;;  %v1601_v61 = vsel %vm882_vm2, %v4436_v22, 0.0 }
 0x1f3   :  { %v1273_v44 = vsel %vm1037_vm8, %v1243_v56, %v1272_v39  ;;  %v1589_v12 = vadd.f32 %v1588_v23, %v1587_v41  ;;  %v1244_v3 = vmul.f32 0.5, %v1228_v1  ;;  %v1584_v20 = vadd.f32 %v1583_v55, %v1582_v58 }
 0x1f4   :  { %v1608_v51 = vsel %vm882_vm2, %v1552_v59, 0.0  ;;  %v1579_v28 = vadd.f32 %v1578_v2, %v1577_v40  ;;  %v1596_v6 = vadd.f32 %v1595_v29, %v1594_v7  ;;  %v1602_v42 = vrot.slane %v1601_v61, 4 }
 0x1f5   :  { %v1590_v54 = vrot.slane %v1589_v12, 2  ;;  %v1274_v57 = vsel %vm1039_vm13, %v1244_v3, %v1273_v44  ;;  %v1585_v14 = vrot.slane %v1584_v20, 1  ;;  %v1609_v37 = vrot.slane %v1608_v51, 4 }
 0x1f6   :  { %v1615_v0 = vsel %vm882_vm2, %v1553_v8, 0.0  ;;  %1279 = vst.msk [vmem:[#allocation8 + $0x18] sm:$0xff] %vm48_vm6, %v1274_v57  ;;  %v1597_v35 = vrot.slane %v1596_v6, 2  ;;  %v1603_v30 = vadd.f32 %v1602_v42, %v1601_v61  ;;  %v1805_v22 = vsel %vm144_vm0, %v1789_v47, 0.0 }
 0x1f7   :  { %v1591_v5 = vadd.f32 %v1590_v54, %v1589_v12  ;;  %v1616_v10 = vrot.slane %v1615_v0, 4  ;;  %v1586_v52 = vadd.f32 %v1585_v14, %v1584_v20  ;;  %v1610_v17 = vadd.f32 %v1609_v37, %v1608_v51 }
 0x1f8   :  { %v1622_v60 = vsel %vm882_vm2, %v1554_v25, 0.0  ;;  %v1598_v19 = vadd.f32 %v1597_v35, %v1596_v6  ;;  %v1604_v33 = vrot.slane %v1603_v30, 2  ;;  %v1685_v4 = vmul.f32 0.5, %v1579_v28 }
 0x1f9   :  { %v1592_v59 = vrot.slane %v1591_v5, 1  ;;  %v1617_v15 = vadd.f32 %v1616_v10, %v1615_v0  ;;  %v1611_v50 = vrot.slane %v1610_v17, 2  ;;  %v1623_v13 = vrot.slane %v1622_v60, 4 }
 0x1fa   :  { %v1686_v8 = vmul.f32 0.5, %v1586_v52  ;;  %v1599_v21 = vrot.slane %v1598_v19, 1  ;;  %v1605_v45 = vadd.f32 %v1604_v33, %v1603_v30  ;;  %v1327_v58 = vrot.slane %v4441_v11, 2 }
 0x1fb   :  { %v1593_v48 = vadd.f32 %v1592_v59, %v1591_v5  ;;  %v1618_v31 = vrot.slane %v1617_v15, 2  ;;  %v1612_v46 = vadd.f32 %v1611_v50, %v1610_v17  ;;  %v1624_v43 = vadd.f32 %v1623_v13, %v1622_v60 }
 0x1fc   :  { %v1717_v47 = vsel %vm1027_vm10, %v1686_v8, %v1685_v4  ;;  %v1600_v41 = vadd.f32 %v1599_v21, %v1598_v19  ;;  %v1606_v25 = vrot.slane %v1605_v45, 1  ;;  %v1328_v39 = vrot.slane %v4441_v11, 4 }
 0x1fd   :  { %v1619_v56 = vadd.f32 %v1618_v31, %v1617_v15  ;;  %v1687_v49 = vmul.f32 0.5, %v1593_v48  ;;  %v4625_v40 = vld [vmem:[#allocation8 + $0x18] sm:$0xff]  ;;  %v1613_v23 = vrot.slane %v1612_v46, 1  ;;  %v1625_v1 = vrot.slane %v1624_v43, 2 }
 0x1fe   :  { %v1329_v55 = vrot.slane %v4441_v11, 6  ;;  %1815 = vrot.lane.b32.xlu2 %v4625_v40, %s3643_s3  ;;  %v1788_v7 = vrot.slane %v4625_v40, 1  ;;  %v1607_v44 = vadd.f32 %v1606_v25, %v1605_v45  ;;  %v1330_v12 = vrot.slane %v4444_v27, 2 }
 0x1ff   :  { %v1620_v2 = vrot.slane %v1619_v56, 1  ;;  %v1614_v29 = vadd.f32 %v1613_v23, %v1612_v46  ;;  %v1626_v3 = vadd.f32 %v1625_v1, %v1624_v43  ;;  %v1688_v20 = vmul.f32 0.5, %v1600_v41 }
 0x200   :  { %v1718_v61 = vsel %vm1029_vm11, %v1687_v49, %v1717_v47  ;;  %v1804_v51 = vsel %vm144_vm0, %v1788_v7, 0.0  ;;  %v1689_v54 = vmul.f32 0.5, %v1607_v44  ;;  %v1331_v6 = vrot.slane %v4444_v27, 4 }
 0x201   :  { %v1621_v28 = vadd.f32 %v1620_v2, %v1619_v56  ;;  %1847 = vrot.lane.b32.xlu0 %v1804_v51, %s3644_s4  ;;  %v1627_v42 = vrot.slane %v1626_v3, 1  ;;  %v1690_v57 = vmul.f32 0.5, %v1614_v29  ;;  %v1719_v14 = vsel %vm1031_vm12, %v1688_v20, %v1718_v61 }
 0x202   :  { %v1332_v37 = vrot.slane %v4444_v27, 6  ;;  %v1720_v5 = vsel %vm1033_vm15, %v1689_v54, %v1719_v14  ;;  %v1401_v35 = vsel %vm882_vm2, %v4441_v11, 0.0  ;;  %v1408_v30 = vsel %vm882_vm2, %v1327_v58, 0.0 }
 0x203   :  { %v1691_v0 = vmul.f32 0.5, %v1621_v28  ;;  %v1628_v10 = vadd.f32 %v1627_v42, %v1626_v3  ;;  %v1721_v52 = vsel %vm1035_vm4, %v1690_v57, %v1720_v5  ;;  %v1402_v17 = vrot.slane %v1401_v35, 4 }
 0x204   :  { %v1409_v60 = vrot.slane %v1408_v30, 4  ;;  %v1415_v19 = vsel %vm882_vm2, %v1328_v39, 0.0  ;;  %v1422_v33 = vsel %vm882_vm2, %v1329_v55, 0.0  ;;  %v1429_v15 = vsel %vm882_vm2, %v4444_v27, 0.0 }
 0x205   :  { %v1722_v59 = vsel %vm1037_vm8, %v1691_v0, %v1721_v52  ;;  %v1692_v50 = vmul.f32 0.5, %v1628_v10  ;;  %v1403_v13 = vadd.f32 %v1402_v17, %v1401_v35  ;;  %v1416_v11 = vrot.slane %v1415_v19, 4 }
 0x206   :  { %v1410_v4 = vadd.f32 %v1409_v60, %v1408_v30  ;;  %1849 = vrot.lane.b32.xlu2 %v1805_v22, %s3644_s4  ;;  %v1423_v8 = vrot.slane %v1422_v33, 4  ;;  %v1430_v48 = vrot.slane %v1429_v15, 4  ;;  %v1436_v21 = vsel %vm882_vm2, %v1330_v12, 0.0 }
 0x207   :  { %v1443_v45 = vsel %vm882_vm2, %v1331_v6, 0.0  ;;  %v1723_v31 = vsel %vm1039_vm13, %v1692_v50, %v1722_v59  ;;  %v1404_v46 = vrot.slane %v1403_v13, 2  ;;  %v1417_v47 = vadd.f32 %v1416_v11, %v1415_v19 }
 0x208   :  { %v1411_v43 = vrot.slane %v1410_v4, 2  ;;  %1734 = vst.msk [vmem:[#allocation8 + $0x30] sm:$0xff] %vm48_vm6, %v1723_v31  ;;  %v1424_v27 = vadd.f32 %v1423_v8, %v1422_v33  ;;  %v1431_v58 = vadd.f32 %v1430_v48, %v1429_v15  ;;  %v1437_v41 = vrot.slane %v1436_v21, 4 }
 0x209   :  { %v1444_v25 = vrot.slane %v1443_v45, 4  ;;  %v1405_v56 = vadd.f32 %v1404_v46, %v1403_v13  ;;  %v1418_v22 = vrot.slane %v1417_v47, 2  ;;  %v1450_v23 = vsel %vm882_vm2, %v1332_v37, 0.0 }
 0x20a   :  { %v1412_v49 = vadd.f32 %v1411_v43, %v1410_v4  ;;  %v1425_v1 = vrot.slane %v1424_v27, 2  ;;  %v1432_v39 = vrot.slane %v1431_v58, 2  ;;  %v1438_v55 = vadd.f32 %v1437_v41, %v1436_v21 }
 0x20b   :  { %v1445_v7 = vadd.f32 %v1444_v25, %v1443_v45  ;;  %v1406_v44 = vrot.slane %v1405_v56, 1  ;;  %v1419_v12 = vadd.f32 %v1418_v22, %v1417_v47  ;;  %v1451_v29 = vrot.slane %v1450_v23, 4 }
 0x20c   :  { %v1413_v2 = vrot.slane %v1412_v49, 1  ;;  %v1426_v3 = vadd.f32 %v1425_v1, %v1424_v27  ;;  %v1433_v20 = vadd.f32 %v1432_v39, %v1431_v58  ;;  %v1439_v61 = vrot.slane %v1438_v55, 2 }
 0x20d   :  { %v1446_v51 = vrot.slane %v1445_v7, 2  ;;  %v1407_v28 = vadd.f32 %v1406_v44, %v1405_v56  ;;  %v1420_v6 = vrot.slane %v1419_v12, 1  ;;  %v1452_v42 = vadd.f32 %v1451_v29, %v1450_v23 }
 0x20e   :  { %v1414_v54 = vadd.f32 %v1413_v2, %v1412_v49  ;;  %v1427_v57 = vrot.slane %v1426_v3, 1  ;;  %v1434_v14 = vrot.slane %v1433_v20, 1  ;;  %v1440_v0 = vadd.f32 %v1439_v61, %v1438_v55 }
 0x20f   :  { %v1447_v37 = vadd.f32 %v1446_v51, %v1445_v7  ;;  %v4655_v5 = vld [vmem:[#allocation8 + $0x30] sm:$0xff]  ;;  %v1421_v35 = vadd.f32 %v1420_v6, %v1419_v12  ;;  %v1453_v30 = vrot.slane %v1452_v42, 2  ;;  %v1465_v10 = vmul.f32 0.5, %v1407_v28  ;;  %v1747_v6 = vld [vmem:[%s5426_s5 + $0x18] sm:$0xff] }
 0x210   :  { %v1466_v52 = vmul.f32 0.5, %v1414_v54  ;;  %v1557_v17 = vrot.slane %v4486_v34, 6  ;;  %1821 = vrot.lane.b32.xlu2 %v4655_v5, %s3643_s3  ;;  %v1428_v60 = vadd.f32 %v1427_v57, %v1426_v3  ;;  %v1435_v59 = vadd.f32 %v1434_v14, %v1433_v20  ;;  %v1748_v34 = vld [vmem:[%s5426_s5 + $0x20] sm:$0xff] }
 0x211   :  { %v1441_v19 = vrot.slane %v1440_v0, 1  ;;  %v1448_v33 = vrot.slane %v1447_v37, 1  ;;  %v1454_v15 = vadd.f32 %v1453_v30, %v1452_v42  ;;  %v1467_v50 = vmul.f32 0.5, %v1421_v35 }
 0x212   :  { %v1496_v13 = vsel %vm1027_vm10, %v1466_v52, %v1465_v10  ;;  %v1631_v4 = vadd.f32 %v1630_v24, %v4548_v26  ;;  %v1637_v11 = vrot.slane %v4588_v9, 4  ;;  %v1468_v48 = vmul.f32 0.5, %v1428_v60  ;;  %v1746_v52 = vld [vmem:[%s5426_s5 + $0x10] sm:$0xff] }
 0x213   :  { %v1442_v8 = vadd.f32 %v1441_v19, %v1440_v0  ;;  %v1449_v21 = vadd.f32 %v1448_v33, %v1447_v37  ;;  %v1455_v45 = vrot.slane %v1454_v15, 1  ;;  %v1469_v31 = vmul.f32 0.5, %v1435_v59 }
 0x214   :  { %v1497_v46 = vsel %vm1029_vm11, %v1467_v50, %v1496_v13  ;;  %v1558_v27 = vrot.slane %v4490_v62, 2  ;;  %v1559_v58 = vrot.slane %v4490_v62, 4  ;;  %v1560_v24 = vrot.slane %v4490_v62, 6 }
 0x215   :  { %v1470_v43 = vmul.f32 0.5, %v1442_v8  ;;  %v1498_v47 = vsel %vm1031_vm12, %v1468_v48, %v1497_v46  ;;  %v1456_v41 = vadd.f32 %v1455_v45, %v1454_v15  ;;  %v1471_v25 = vmul.f32 0.5, %v1449_v21 }
 0x216   :  { %v1499_v26 = vsel %vm1033_vm15, %v1469_v31, %v1498_v47  ;;  %v1632_v49 = vrot.slane %v1631_v4, 2  ;;  %v1638_v22 = vadd.f32 %v1637_v11, %v4588_v9  ;;  %v1643_v23 = vsel %vm882_vm2, %v1556_v16, 0.0  ;;  %v1749_v9 = vld [vmem:[%s5426_s5 + $0x28] sm:$0xff]  ;;  %v1744_v47 = vld [vmem:[%s5426_s5] sm:$0xff] }
 0x217   :  { %v1500_v56 = vsel %vm1035_vm4, %v1470_v43, %v1499_v26  ;;  %v1472_v1 = vmul.f32 0.5, %v1456_v41  ;;  %v1644_v55 = vrot.slane %v1643_v23, 4  ;;  %v1650_v7 = vsel %vm882_vm2, %v1557_v17, 0.0  ;;  %1917 = vmatpush.msra.mxu1 %v1749_v9 }
 0x218   :  { %v1501_v39 = vsel %vm1037_vm8, %v1471_v25, %v1500_v56  ;;  %v1633_v44 = vadd.f32 %v1632_v49, %v1631_v4  ;;  %v1639_v2 = vrot.slane %v1638_v22, 2  ;;  %v1651_v12 = vrot.slane %v1650_v7, 4  ;;  %v1745_v4 = vld [vmem:[%s5426_s5 + $0x8] sm:$0xff] }
 0x219   :  { %v1657_v29 = vsel %vm882_vm2, %v4490_v62, 0.0  ;;  %v1502_v16 = vsel %vm1039_vm13, %v1472_v1, %v1501_v39  ;;  %v1645_v3 = vadd.f32 %v1644_v55, %v1643_v23  ;;  %v1664_v61 = vsel %vm882_vm2, %v1558_v27, 0.0  ;;  %1918 = vmatpush.msra.mxu1 %v1748_v34 }
 0x21a   :  { %v1658_v20 = vrot.slane %v1657_v29, 4  ;;  %1507 = vst.msk [vmem:[#allocation8 + $0x28] sm:$0xff] %vm48_vm6, %v1502_v16  ;;  %v1634_v51 = vrot.slane %v1633_v44, 1  ;;  %v1640_v28 = vadd.f32 %v1639_v2, %v1638_v22  ;;  %v1652_v62 = vadd.f32 %v1651_v12, %v1650_v7  ;;  %v1810_v7 = vpop.permute.xlu2 %1809 }
 0x21b   :  { %v1665_v54 = vrot.slane %v1664_v61, 4  ;;  %v1646_v42 = vrot.slane %v1645_v3, 2  ;;  %v1671_v14 = vsel %vm882_vm2, %v1559_v58, 0.0  ;;  %v1678_v0 = vsel %vm882_vm2, %v1560_v24, 0.0  ;;  %1919 = vmatpush.msra.mxu1 %v1747_v6 }
 0x21c   :  { %v1659_v57 = vadd.f32 %v1658_v20, %v1657_v29  ;;  %v1635_v37 = vadd.f32 %v1634_v51, %v1633_v44  ;;  %v1641_v35 = vrot.slane %v1640_v28, 1  ;;  %v1653_v30 = vrot.slane %v1652_v62, 2 }
 0x21d   :  { %v1666_v10 = vadd.f32 %v1665_v54, %v1664_v61  ;;  %v1647_v17 = vadd.f32 %v1646_v42, %v1645_v3  ;;  %v1672_v59 = vrot.slane %v1671_v14, 4  ;;  %v1679_v19 = vrot.slane %v1678_v0, 4  ;;  %1920 = vmatpush.msra.mxu1 %v1746_v52  ;;  %v1842_v9 = vpop.permute.xlu0 %1841 }
 0x21e   :  { %v1660_v60 = vrot.slane %v1659_v57, 2  ;;  %v1791_v33 = vrot.slane %v4655_v5, 1  ;;  %v1642_v15 = vadd.f32 %v1641_v35, %v1640_v28  ;;  %v1654_v50 = vadd.f32 %v1653_v30, %v1652_v62 }
 0x21f   :  { %v1667_v13 = vrot.slane %v1666_v10, 2  ;;  %v1648_v11 = vrot.slane %v1647_v17, 1  ;;  %v1673_v48 = vadd.f32 %v1672_v59, %v1671_v14  ;;  %v1680_v21 = vadd.f32 %v1679_v19, %v1678_v0  ;;  %1921 = vmatpush.msra.mxu1 %v1745_v4 }
 0x220   :  { %v1661_v8 = vadd.f32 %v1660_v60, %v1659_v57  ;;  %v1655_v45 = vrot.slane %v1654_v50, 1  ;;  %v1693_v46 = vmul.f32 0.5, %v1635_v37  ;;  %v1694_v43 = vmul.f32 0.5, %v1642_v15 }
 0x221   :  { %v1668_v31 = vadd.f32 %v1667_v13, %v1666_v10  ;;  %v4704_v27 = vld [vmem:[#allocation8 + $0x28] sm:$0xff]  ;;  %v1649_v58 = vadd.f32 %v1648_v11, %v1647_v17  ;;  %v1674_v25 = vrot.slane %v1673_v48, 2  ;;  %v1681_v26 = vrot.slane %v1680_v21, 2  ;;  %1922 = vmatpush.msra.mxu1 %v1744_v47 }
 0x222   :  { %v1662_v41 = vrot.slane %v1661_v8, 1  ;;  %1819 = vrot.lane.b32.xlu0 %v4704_v27, %s3643_s3  ;;  %v1790_v24 = vrot.slane %v4704_v27, 1  ;;  %v1656_v56 = vadd.f32 %v1655_v45, %v1654_v50  ;;  %vm5436_vm2 = vcmask 1040384   ;;  %v1844_v59 = vpop.permute.xlu2 %1843 }
 0x223   :  { %v1669_v49 = vrot.slane %v1668_v31, 1  ;;  %v1777_v22 = vsel %vm5436_vm2, 0.0, %v1761_v38  ;;  %v1675_v1 = vadd.f32 %v1674_v25, %v1673_v48  ;;  %v1682_v39 = vadd.f32 %v1681_v26, %v1680_v21 }
 0x224   :  { %v1663_v23 = vadd.f32 %v1662_v41, %v1661_v8  ;;  %v1695_v55 = vmul.f32 0.5, %v1649_v58  ;;  %v1806_v44 = vsel %vm144_vm0, %v1790_v24, 0.0  ;;  %v1696_v12 = vmul.f32 0.5, %v1656_v56 }
 0x225   :  { %v1670_v2 = vadd.f32 %v1669_v49, %v1668_v31  ;;  %v1724_v29 = vsel %vm1027_vm10, %v1694_v43, %v1693_v46  ;;  %1851 = vrot.lane.b32.xlu1 %v1806_v44, %s3644_s4  ;;  %v1676_v34 = vrot.slane %v1675_v1, 1  ;;  %v1683_v16 = vrot.slane %v1682_v39, 1 }
 0x226   :  { %v1697_v63 = vmul.f32 0.5, %v1663_v23  ;;  %v1725_v38 = vsel %vm1029_vm11, %v1695_v55, %v1724_v29  ;;  %v1865_v61 = vsel %vm48_vm6, %v1777_v22, %v1810_v7  ;;  %vm53_vm3 = vcmask 261120  }
 0x227   :  { %v1698_v3 = vmul.f32 0.5, %v1670_v2  ;;  %v1726_v20 = vsel %vm1031_vm12, %v1696_v12, %v1725_v38  ;;  %v1677_v51 = vadd.f32 %v1676_v34, %v1675_v1  ;;  %v1684_v28 = vadd.f32 %v1683_v16, %v1682_v39  ;;  %54 = vst.msk [vmem:[#allocation3] sm:$0xff] %vm53_vm3, %v3641_v18  ;;  %v4767_v12 = vld [vmem:[%s5427_s6] ss:$0 sm:$0xff] }
 0x228   :  { %v1727_v62 = vsel %vm1033_vm15, %v1697_v63, %v1726_v20  ;;  %v1874_v54 = vsel %vm53_vm3, %v1865_v61, %v1842_v9  ;;  %vm1882_vm5 = vcmask 392192   ;;  %55 = vst.msk [vmem:[#allocation3 + $0x8] sm:$0xff] %vm53_vm3, %v3641_v18  ;;  %v1807_v42 = vsel %vm144_vm0, %v1791_v33, 0.0  ;;  %vm5437_vm15 = vmmov %vm5436_vm2 }
 0x229   :  { %v1728_v6 = vsel %vm1035_vm4, %v1698_v3, %v1727_v62  ;;  %v1699_v57 = vmul.f32 0.5, %v1677_v51  ;;  %3535 = vmatmul.msk.f32.vlgmr.msra.gmra.mxu1 %vm1882_vm5, %v1874_v54  ;;  %v1700_v14 = vmul.f32 0.5, %v1684_v28  ;;  %v1762_v35 = vrot.slane %v4517_v32, 7  ;;  %vm5438_vm4 = vmmov %vm5436_vm2 }
 0x22a   :  { %1853 = vrot.lane.b32.xlu0 %v1807_v42, %s3644_s4  ;;  %v1763_v32 = vrot.slane %v4550_v53, 7  ;;  %v1764_v8 = vrot.slane %v4625_v40, 7  ;;  %v1765_v53 = vrot.slane %v4591_v36, 7  ;;  %v1766_v25 = vrot.slane %v4704_v27, 7 }
 0x22b   :  { %v1729_v0 = vsel %vm1037_vm8, %v1699_v57, %v1728_v6  ;;  %v1778_v60 = vsel %vm5437_vm15, 0.0, %v1762_v35  ;;  %v1767_v22 = vrot.slane %v4655_v5, 7  ;;  %v3645_v23 = vmov 8.0  }
 0x22c   :  { %v1730_v37 = vsel %vm1039_vm13, %v1700_v14, %v1729_v0  ;;  %v1779_v50 = vsel %vm5438_vm4, 0.0, %v1763_v32  ;;  %3603 = vrcp.f32 %v3645_v23 }
 0x22d   :  { %1735 = vst.msk [vmem:[#allocation8 + $0x38] sm:$0xff] %vm48_vm6, %v1730_v37 }
 0x232   :  { %v3604_v7 = vpop.eup %3603 }
 0x233   :  { %v2016_v5 = vmul.f32 8.0, %v3604_v7  ;;  %vm2020_vm1 = vweird.f32 %v3604_v7 }
 0x234   :  { %v1743_v30 = vld [vmem:[#allocation8 + $0x38] sm:$0xff] }
 0x235   :  { %1823 = vrot.lane.b32.xlu1 %v1743_v30, %s3643_s3  ;;  %v1792_v10 = vrot.slane %v1743_v30, 1  ;;  %v1768_v2 = vrot.slane %v1743_v30, 7  ;;  %v2017_v63 = vsub.f32 1.0, %v2016_v5 }
 0x237   :  { %v1808_v52 = vsel %vm144_vm0, %v1792_v10, 0.0  ;;  %v1812_v17 = vpop.permute.xlu1 %1811  ;;  %vm5439_vm0 = vmmov %vm5436_vm2  ;;  %v2018_v28 = vmul.f32 %v3604_v7, %v2017_v63 }
 0x238   :  { %1855 = vrot.lane.b32.xlu2 %v1808_v52, %s3644_s4  ;;  %v1866_v19 = vsel %vm48_vm6, %v1778_v60, %v1812_v17  ;;  %v1780_v21 = vsel %vm5439_vm0, 0.0, %v1764_v8  ;;  %vm5440_vm8 = vmmov %vm5439_vm0 }
 0x239   :  { %v1875_v33 = vsel %vm53_vm3, %v1866_v19, %v1844_v59  ;;  %v1781_v47 = vsel %vm5440_vm8, 0.0, %v1765_v53  ;;  %vm5441_vm13 = vmmov %vm5439_vm0  ;;  %v2019_v6 = vadd.f32 %v3604_v7, %v2018_v28 }
 0x23a   :  { %3536 = vmatmul.msk.f32.gmra.mxu1 %vm1882_vm5, %v1875_v33  ;;  %v1782_v24 = vsel %vm5441_vm13, 0.0, %v1766_v25  ;;  %vm5442_vm7 = vmmov %vm5439_vm0 }
 0x23b   :  { %v1783_v55 = vsel %vm5442_vm7, 0.0, %v1767_v22  ;;  %vm5443_vm9 = vmmov %vm5439_vm0  ;;  %v4775_v14 = vsel %vm2020_vm1, %v3604_v7, %v2019_v6  ;;  %vm2268_vm1 = vcmask 254976  }
 0x23c   :  { %v1784_v34 = vsel %vm5443_vm9, 0.0, %v1768_v2 }
 0x24a   :  { %v1814_v15 = vpop.permute.xlu0 %1813 }
 0x24b   :  { %v1867_v13 = vsel %vm48_vm6, %v1779_v50, %v1814_v15 }
 0x24d   :  { %v1846_v4 = vpop.permute.xlu1 %1845 }
 0x24e   :  { %v1876_v11 = vsel %vm53_vm3, %v1867_v13, %v1846_v4 }
 0x24f   :  { %3537 = vmatmul.msk.f32.gmra.mxu1 %vm1882_vm5, %v1876_v11 }
 0x258   :  { %v1816_v48 = vpop.permute.xlu2 %1815 }
 0x259   :  { %v1868_v45 = vsel %vm48_vm6, %v1780_v21, %v1816_v48 }
 0x25d   :  { %v1818_v43 = vpop.permute.xlu1 %1817 }
 0x25e   :  { %v1869_v58 = vsel %vm48_vm6, %v1781_v47, %v1818_v43  ;;  %v4785_v43 = vld [vmem:[%s5428_s7] ss:$0 sm:$0xff]  ;;  %s3646_s7 = smov 64  }
 0x260   :  { %v1850_v41 = vpop.permute.xlu2 %1849 }
 0x261   :  { %v1878_v40 = vsel %vm53_vm3, %v1869_v58, %v1850_v41 }
 0x26a   :  { %v1822_v1 = vpop.permute.xlu2 %1821 }
 0x26b   :  { %v1871_v27 = vsel %vm48_vm6, %v1783_v55, %v1822_v1  ;;  %v2236_v1 = vld [vmem:[#allocation3] sm:$0xff] }
 0x273   :  { %v1848_v31 = vpop.permute.xlu0 %1847 }
 0x274   :  { %v1877_v46 = vsel %vm53_vm3, %v1868_v45, %v1848_v31 }
 0x275   :  { %3538 = vmatmul.msk.f32.gmra.mxu1 %vm1882_vm5, %v1877_v46 }
 0x27d   :  { %3539 = vmatmul.msk.f32.gmra.mxu1 %vm1882_vm5, %v1878_v40  ;;  %v4790_v40 = vld [vmem:[%s5429_s8] ss:$0 sm:$0xff] }
 0x292   :  { %v1856_v38 = vpop.permute.xlu2 %1855 }
 0x294   :  { %v1820_v26 = vpop.permute.xlu0 %1819 }
 0x295   :  { %v1870_v36 = vsel %vm48_vm6, %v1782_v24, %v1820_v26 }
 0x297   :  { %v1852_v56 = vpop.permute.xlu1 %1851 }
 0x298   :  { %v1879_v49 = vsel %vm53_vm3, %v1870_v36, %v1852_v56 }
 0x299   :  { %3540 = vmatmul.msk.f32.gmra.mxu1 %vm1882_vm5, %v1879_v49 }
 0x29c   :  { %v1854_v39 = vpop.permute.xlu0 %1853 }
 0x29d   :  { %v1880_v44 = vsel %vm53_vm3, %v1871_v27, %v1854_v39 }
 0x2a1   :  { %3541 = vmatmul.msk.f32.gmra.mxu1 %vm1882_vm5, %v1880_v44 }
 0x2a6   :  { %v1924_v29 = vpop.f32.mrf.mxu1 }
 0x2a7   :  { %v1824_v9 = vpop.permute.xlu1 %1823  ;;  %v1951_v16 = vadd.f32 %v4767_v12, %v1924_v29 }
 0x2a8   :  { %v1872_v3 = vsel %vm48_vm6, %v1784_v34, %v1824_v9 }
 0x2a9   :  { %v1881_v20 = vsel %vm53_vm3, %v1872_v3, %v1856_v38  ;;  %v1959_v61 = vsel %vm53_vm3, %v1951_v16, 0.0 }
 0x2aa   :  { %3542 = vmatmul.msk.f32.gmra.mxu1 %vm1882_vm5, %v1881_v20  ;;  %v1960_v51 = vrot.slane %v1959_v61, 4 }
 0x2ac   :  { %v1961_v62 = vadd.f32 %v1960_v51, %v1959_v61 }
 0x2ae   :  { %v1962_v54 = vrot.slane %v1961_v62, 2 }
 0x2b0   :  { %v1963_v42 = vadd.f32 %v1962_v54, %v1961_v62 }
 0x2b2   :  { %v1964_v57 = vrot.slane %v1963_v42, 1 }
 0x2b4   :  { %v1965_v0 = vadd.f32 %v1964_v57, %v1963_v42 }
 0x2b6   :  { %v2022_v37 = vmul.f32 %v4775_v14, %v1965_v0 }
 0x2b7   :  { %v1927_v4 = vpop.f32.mrf.mxu1 }
 0x2b8   :  { %v2030_v35 = vsub.f32 %v1951_v16, %v2022_v37  ;;  %v1952_v8 = vadd.f32 %v4767_v12, %v1927_v4 }
 0x2ba   :  { %v2038_v30 = vmul.f32 %v2030_v35, %v2030_v35  ;;  %v1966_v21 = vsel %vm53_vm3, %v1952_v8, 0.0 }
 0x2bb   :  { %v1967_v45 = vrot.slane %v1966_v21, 4 }
 0x2bc   :  { %v2046_v10 = vsel %vm53_vm3, %v2038_v30, 0.0 }
 0x2bd   :  { %v2047_v52 = vrot.slane %v2046_v10, 4  ;;  %v1968_v53 = vadd.f32 %v1967_v45, %v1966_v21 }
 0x2bf   :  { %v2048_v17 = vadd.f32 %v2047_v52, %v2046_v10  ;;  %v1969_v47 = vrot.slane %v1968_v53, 2 }
 0x2c1   :  { %v2049_v60 = vrot.slane %v2048_v17, 2  ;;  %v1970_v25 = vadd.f32 %v1969_v47, %v1968_v53 }
 0x2c3   :  { %v2050_v59 = vadd.f32 %v2049_v60, %v2048_v17  ;;  %v1971_v24 = vrot.slane %v1970_v25, 1 }
 0x2c5   :  { %v2051_v19 = vrot.slane %v2050_v59, 1  ;;  %v1972_v56 = vadd.f32 %v1971_v24, %v1970_v25 }
 0x2c7   :  { %v2052_v33 = vadd.f32 %v2051_v19, %v2050_v59  ;;  %v2023_v49 = vmul.f32 %v4775_v14, %v1972_v56 }
 0x2c9   :  { %v2102_v32 = vmul.f32 %v2052_v33, %v4775_v14  ;;  %v2031_v22 = vsub.f32 %v1952_v8, %v2023_v49 }
 0x2cb   :  { %v2110_v15 = vadd.f32 1e-05, %v2102_v32  ;;  %v2039_v23 = vmul.f32 %v2031_v22, %v2031_v22 }
 0x2cc   :  { %v1930_v51 = vpop.f32.mrf.mxu1 }
 0x2cd   :  { %3605 = vrsqrt.f32 %v2110_v15  ;;  %vm2124_vm14 = vweird.f32 %v2110_v15  ;;  %v2053_v39 = vsel %vm53_vm3, %v2039_v23, 0.0  ;;  %v1953_v62 = vadd.f32 %v4767_v12, %v1930_v51 }
 0x2ce   :  { %v2054_v27 = vrot.slane %v2053_v39, 4 }
 0x2cf   :  { %v1973_v6 = vsel %vm53_vm3, %v1953_v62, 0.0 }
 0x2d0   :  { %v2055_v44 = vadd.f32 %v2054_v27, %v2053_v39  ;;  %v1974_v42 = vrot.slane %v1973_v6, 4 }
 0x2d2   :  { %v2056_v5 = vrot.slane %v2055_v44, 2  ;;  %v1975_v0 = vadd.f32 %v1974_v42, %v1973_v6 }
 0x2d3   :  { %v3606_v50 = vpop.eup %3605 }
 0x2d4   :  { %v2119_v13 = vmul.f32 %v3606_v50, %v2110_v15  ;;  %vm2125_vm6 = vweird.f32 %v3606_v50  ;;  %v2057_v9 = vadd.f32 %v2056_v5, %v2055_v44 }
 0x2d5   :  { %vm2126_vm2 = vmor %vm2124_vm14, %vm2125_vm6 }
 0x2d6   :  { %v2120_v11 = vmul.f32 %v3606_v50, %v2119_v13  ;;  %v2058_v16 = vrot.slane %v2057_v9, 1 }
 0x2d8   :  { %v2121_v48 = vmul.f32 0.5, %v2120_v11  ;;  %v2059_v63 = vadd.f32 %v2058_v16, %v2057_v9 }
 0x2da   :  { %v2122_v31 = vsub.f32 1.5, %v2121_v48  ;;  %v2103_v38 = vmul.f32 %v2059_v63, %v4775_v14 }
 0x2dc   :  { %v2123_v46 = vmul.f32 %v3606_v50, %v2122_v31  ;;  %v2111_v3 = vadd.f32 1e-05, %v2103_v38 }
 0x2de   :  { %v2127_v58 = vsel %vm2126_vm2, %v3606_v50, %v2123_v46  ;;  %3607 = vrsqrt.f32 %v2111_v3  ;;  %vm2134_vm4 = vweird.f32 %v2111_v3  ;;  %v2237_v50 = vld [vmem:[#allocation3 + $0x8] sm:$0xff] }
 0x2df   :  { %v2198_v41 = vmul.f32 %v2127_v58, %v2030_v35  ;;  %v1976_v35 = vrot.slane %v1975_v0, 2 }
 0x2e1   :  { %v2209_v26 = vmul.f32 %v4785_v43, %v2198_v41  ;;  %v1977_v52 = vadd.f32 %v1976_v35, %v1975_v0 }
 0x2e3   :  { %v2220_v36 = vadd.f32 %v4790_v40, %v2209_v26  ;;  %v1978_v60 = vrot.slane %v1977_v52, 1 }
 0x2e4   :  { %v3608_v20 = vpop.eup %3607 }
 0x2e5   :  { %2228 = vst.msk [vmem:[#allocation6] sm:$0xff] %vm53_vm3, %v2220_v36  ;;  %v2129_v61 = vmul.f32 %v3608_v20, %v2111_v3  ;;  %vm2135_vm15 = vweird.f32 %v3608_v20  ;;  %v1979_v19 = vadd.f32 %v1978_v60, %v1977_v52 }
 0x2e6   :  { %vm2136_vm0 = vmor %vm2134_vm4, %vm2135_vm15 }
 0x2e7   :  { %v2130_v28 = vmul.f32 %v3608_v20, %v2129_v61  ;;  %v2024_v33 = vmul.f32 %v4775_v14, %v1979_v19 }
 0x2e9   :  { %v2131_v54 = vmul.f32 0.5, %v2130_v28  ;;  %v4809_v32 = vsub.f32 %v1953_v62, %v2024_v33 }
 0x2eb   :  { %v2132_v57 = vsub.f32 1.5, %v2131_v54  ;;  %v2040_v15 = vmul.f32 %v4809_v32, %v4809_v32 }
 0x2ec   :  { %v2238_v55 = vld [vmem:[#allocation6] sm:$0xff] }
 0x2ed   :  { %v2240_v7 = vadd.f32 %v2238_v55, %v2236_v1  ;;  %v2133_v37 = vmul.f32 %v3608_v20, %v2132_v57  ;;  %v2060_v13 = vsel %vm53_vm3, %v2040_v15, 0.0 }
 0x2ee   :  { %v2061_v11 = vrot.slane %v2060_v13, 4 }
 0x2ef   :  { %vm2242_vm5 = vcmp.ge.f32.partialorder %v2240_v7, 1.0  ;;  %v2137_v30 = vsel %vm2136_vm0, %v3608_v20, %v2133_v37 }
 0x2f0   :  { %v4798_v2 = vsel %vm2242_vm5, 1.0, %v3641_v18  ;;  %v2199_v10 = vmul.f32 %v2137_v30, %v2031_v22  ;;  %v2062_v48 = vadd.f32 %v2061_v11, %v2060_v13  ;;  %vm2349_vm5 = vcmask 257024  }
 0x2f1   :  { %v2248_v29 = vsub.f32 1.0, %v4798_v2  ;;  %v2256_v11 = vrot.slane %v4798_v2, 2 }
 0x2f2   :  { %v2210_v17 = vmul.f32 %v4785_v43, %v2199_v10  ;;  %v2063_v45 = vrot.slane %v2062_v48, 2  ;;  %v1933_v47 = vpop.f32.mrf.mxu1 }
 0x2f3   :  { %v2250_v34 = vmul.f32 %v2248_v29, %v2240_v7  ;;  %v1954_v41 = vadd.f32 %v4767_v12, %v1933_v47  ;;  %v2269_v47 = vsel %vm2268_vm1, %v4798_v2, 0.0 }
 0x2f4   :  { %v2221_v59 = vadd.f32 %v4790_v40, %v2210_v17  ;;  %v2064_v53 = vadd.f32 %v2063_v45, %v2062_v48 }
 0x2f5   :  { %2252 = vst.msk [vmem:[#allocation3] sm:$0xff] %vm53_vm3, %v2250_v34  ;;  %v1980_v26 = vsel %vm53_vm3, %v1954_v41, 0.0 }
 0x2f6   :  { %2229 = vst.msk [vmem:[#allocation6 + $0x8] sm:$0xff] %vm53_vm3, %v2221_v59  ;;  %v2065_v58 = vrot.slane %v2064_v53, 1  ;;  %v1981_v24 = vrot.slane %v1980_v26, 4 }
 0x2f8   :  { %v2066_v25 = vadd.f32 %v2065_v58, %v2064_v53  ;;  %v1982_v56 = vadd.f32 %v1981_v24, %v1980_v26 }
 0x2fa   :  { %v2104_v36 = vmul.f32 %v2066_v25, %v4775_v14  ;;  %v1983_v22 = vrot.slane %v1982_v56, 2  ;;  %v1936_v23 = vpop.f32.mrf.mxu1  ;;  %v2270_v25 = vrot.slane %v2269_v47, 4 }
 0x2fb   :  { %v1955_v1 = vadd.f32 %v4767_v12, %v1936_v23 }
 0x2fc   :  { %v2112_v49 = vadd.f32 1e-05, %v2104_v36  ;;  %v1984_v39 = vadd.f32 %v1983_v22, %v1982_v56  ;;  %v2276_v56 = vsel %vm2268_vm1, %v2256_v11, 0.0 }
 0x2fd   :  { %v2239_v4 = vld [vmem:[#allocation6 + $0x8] sm:$0xff]  ;;  %v1987_v55 = vsel %vm53_vm3, %v1955_v1, 0.0 }
 0x2fe   :  { %v2241_v8 = vadd.f32 %v2239_v4, %v2237_v50  ;;  %3609 = vrsqrt.f32 %v2112_v49  ;;  %v1985_v27 = vrot.slane %v1984_v39, 1  ;;  %v1988_v7 = vrot.slane %v1987_v55, 4 }
 0x2ff   :  { %vm2144_vm7 = vweird.f32 %v2112_v49 }
 0x300   :  { %vm2243_vm8 = vcmp.ge.f32.partialorder %v2241_v8, 1.0  ;;  %v1986_v44 = vadd.f32 %v1985_v27, %v1984_v39  ;;  %v1989_v5 = vadd.f32 %v1988_v7, %v1987_v55  ;;  %v2277_v39 = vrot.slane %v2276_v56, 4 }
 0x301   :  { %v4815_v21 = vsel %vm2243_vm8, 1.0, %v3641_v18 }
 0x302   :  { %v2249_v31 = vsub.f32 1.0, %v4815_v21  ;;  %v2025_v34 = vmul.f32 %v4775_v14, %v1986_v44  ;;  %v1990_v16 = vrot.slane %v1989_v5, 2 }
 0x304   :  { %v2251_v46 = vmul.f32 %v2249_v31, %v2241_v8  ;;  %v3610_v29 = vpop.eup %3609  ;;  %v4826_v20 = vsub.f32 %v1954_v41, %v2025_v34  ;;  %v1991_v61 = vadd.f32 %v1990_v16, %v1989_v5  ;;  %v2278_v34 = vadd.f32 %v2277_v39, %v2276_v56 }
 0x305   :  { %v2139_v9 = vmul.f32 %v3610_v29, %v2112_v49  ;;  %vm2145_vm13 = vweird.f32 %v3610_v29 }
 0x306   :  { %2253 = vst.msk [vmem:[#allocation3 + $0x8] sm:$0xff] %vm53_vm3, %v2251_v46  ;;  %v2041_v62 = vmul.f32 %v4826_v20, %v4826_v20  ;;  %v1992_v54 = vrot.slane %v1991_v61, 1  ;;  %vm2146_vm9 = vmor %vm2144_vm7, %vm2145_vm13  ;;  %v2257_v46 = vrot.slane %v4798_v2, 4  ;;  %vm2771_vm7 = vcmask 1042432  }
 0x307   :  { %v2140_v3 = vmul.f32 %v3610_v29, %v2139_v9 }
 0x308   :  { %v2067_v57 = vsel %vm53_vm3, %v2041_v62, 0.0  ;;  %v1993_v0 = vadd.f32 %v1992_v54, %v1991_v61  ;;  %v2283_v44 = vsel %vm2268_vm1, %v2257_v46, 0.0 }
 0x309   :  { %v2141_v28 = vmul.f32 0.5, %v2140_v3  ;;  %v2068_v35 = vrot.slane %v2067_v57, 4  ;;  %v2284_v61 = vrot.slane %v2283_v44, 4 }
 0x30a   :  { %v2026_v10 = vmul.f32 %v4775_v14, %v1993_v0 }
 0x30b   :  { %v2142_v42 = vsub.f32 1.5, %v2141_v28  ;;  %v2069_v60 = vadd.f32 %v2068_v35, %v2067_v57 }
 0x30c   :  { %v4836_v33 = vsub.f32 %v1955_v1, %v2026_v10  ;;  %v2271_v1 = vadd.f32 %v2270_v25, %v2269_v47 }
 0x30d   :  { %v2143_v30 = vmul.f32 %v3610_v29, %v2142_v42  ;;  %v2070_v13 = vrot.slane %v2069_v60, 2  ;;  %v2285_v42 = vadd.f32 %v2284_v61, %v2283_v44 }
 0x30e   :  { %v2042_v8 = vmul.f32 %v4836_v33, %v4836_v33  ;;  %v2272_v9 = vrot.slane %v2271_v1, 2 }
 0x30f   :  { %v2147_v19 = vsel %vm2146_vm9, %v3610_v29, %v2143_v30  ;;  %v2071_v53 = vadd.f32 %v2070_v13, %v2069_v60 }
 0x310   :  { %v2200_v50 = vmul.f32 %v2147_v19, %v4809_v32  ;;  %v2074_v32 = vsel %vm53_vm3, %v2042_v8, 0.0  ;;  %v2273_v62 = vadd.f32 %v2272_v9, %v2271_v1  ;;  %v2286_v8 = vrot.slane %v2285_v42, 2 }
 0x311   :  { %v2072_v24 = vrot.slane %v2071_v53, 1  ;;  %v2075_v36 = vrot.slane %v2074_v32, 4 }
 0x312   :  { %v2211_v31 = vmul.f32 %v4785_v43, %v2200_v50  ;;  %v2274_v35 = vrot.slane %v2273_v62, 1 }
 0x313   :  { %v2073_v55 = vadd.f32 %v2072_v24, %v2071_v53  ;;  %v2076_v27 = vadd.f32 %v2075_v36, %v2074_v32  ;;  %v2287_v32 = vadd.f32 %v2286_v8, %v2285_v42 }
 0x314   :  { %v2222_v26 = vadd.f32 %v4790_v40, %v2211_v31  ;;  %v2275_v31 = vadd.f32 %v2274_v35, %v2273_v62 }
 0x315   :  { %v2105_v16 = vmul.f32 %v2073_v55, %v4775_v14  ;;  %v2288_v56 = vrot.slane %v2287_v32, 1 }
 0x316   :  { %v1939_v63 = vpop.f32.mrf.mxu1  ;;  %2230 = vst.msk [vmem:[#allocation6 + $0x10] sm:$0xff] %vm53_vm3, %v2222_v26 }
 0x317   :  { %v1956_v38 = vadd.f32 %v4767_v12, %v1939_v63  ;;  %v2077_v63 = vrot.slane %v2076_v27, 2  ;;  %v4864_v54 = vadd.f32 1e-05, %v2105_v16  ;;  %v2289_v9 = vadd.f32 %v2288_v56, %v2287_v32 }
 0x319   :  { %v1994_v51 = vsel %vm53_vm3, %v1956_v38, 0.0  ;;  %3611 = vrsqrt.f32 %v4864_v54  ;;  %vm2154_vm2 = vweird.f32 %v4864_v54 }
 0x31a   :  { %v1995_v6 = vrot.slane %v1994_v51, 4 }
 0x31c   :  { %v1996_v37 = vadd.f32 %v1995_v6, %v1994_v51  ;;  %v2279_v6 = vrot.slane %v2278_v34, 2 }
 0x31e   :  { %v1997_v52 = vrot.slane %v1996_v37, 2  ;;  %v1942_v17 = vpop.f32.mrf.mxu1  ;;  %v2280_v50 = vadd.f32 %v2279_v6, %v2278_v34 }
 0x31f   :  { %v4834_v59 = vadd.f32 %v4767_v12, %v1942_v17  ;;  %v2355_v17 = vld [vmem:[#allocation6 + $0x10] sm:$0xff]  ;;  %v3612_v26 = vpop.eup %3611 }
 0x320   :  { %v1998_v15 = vadd.f32 %v1997_v52, %v1996_v37  ;;  %v2352_v52 = vld [vmem:[#allocation3] sm:$0xff]  ;;  %v2281_v53 = vrot.slane %v2280_v50, 1  ;;  %vm2155_vm14 = vweird.f32 %v3612_v26 }
 0x321   :  { %v2001_v4 = vsel %vm53_vm3, %v4834_v59, 0.0  ;;  %v2357_v13 = vadd.f32 %v2355_v17, %v2352_v52  ;;  %vm2156_vm4 = vmor %vm2154_vm2, %vm2155_vm14 }
 0x322   :  { %v1999_v48 = vrot.slane %v1998_v15, 1  ;;  %v2002_v45 = vrot.slane %v2001_v4, 4  ;;  %v2282_v25 = vadd.f32 %v2281_v53, %v2280_v50 }
 0x323   :  { %vm2359_vm6 = vcmp.ge.f32.partialorder %v2357_v13, 1.0 }
 0x324   :  { %v2000_v58 = vadd.f32 %v1999_v48, %v1998_v15  ;;  %v2003_v41 = vadd.f32 %v2002_v45, %v2001_v4  ;;  %v2258_v15 = vrot.slane %v4798_v2, 6 }
 0x326   :  { %v2027_v49 = vmul.f32 %v4775_v14, %v2000_v58  ;;  %v2004_v22 = vrot.slane %v2003_v41, 2  ;;  %v4875_v58 = vsel %vm2359_vm6, 1.0, %v3641_v18  ;;  %v2290_v1 = vsel %vm2268_vm1, %v2258_v15, 0.0 }
 0x327   :  { %v1945_v23 = vpop.f32.mrf.mxu1  ;;  %v2291_v16 = vrot.slane %v2290_v1, 4 }
 0x328   :  { %v4854_v7 = vadd.f32 %v4767_v12, %v1945_v23  ;;  %v4857_v5 = vsub.f32 %v1956_v38, %v2027_v49  ;;  %v2005_v29 = vadd.f32 %v2004_v22, %v2003_v41  ;;  %v2078_v38 = vadd.f32 %v2077_v63, %v2076_v27 }
 0x329   :  { %v2149_v49 = vmul.f32 %v3612_v26, %v4864_v54  ;;  %v2325_v63 = vmul.f32 0.5, %v2275_v31  ;;  %v2259_v54 = vrot.slane %v4815_v21, 2 }
 0x32a   :  { %v2008_v3 = vsel %vm53_vm3, %v4854_v7, 0.0  ;;  %v2043_v51 = vmul.f32 %v4857_v5, %v4857_v5  ;;  %v2006_v28 = vrot.slane %v2005_v29, 1  ;;  %v2079_v30 = vrot.slane %v2078_v38, 1 }
 0x32b   :  { %v2009_v12 = vrot.slane %v2008_v3, 4  ;;  %v2150_v27 = vmul.f32 %v3612_v26, %v2149_v49 }
 0x32c   :  { %v2081_v57 = vsel %vm53_vm3, %v2043_v51, 0.0  ;;  %v2007_v0 = vadd.f32 %v2006_v28, %v2005_v29  ;;  %v2080_v4 = vadd.f32 %v2079_v30, %v2078_v38  ;;  %v2292_v38 = vadd.f32 %v2291_v16, %v2290_v1 }
 0x32d   :  { %v2010_v37 = vadd.f32 %v2009_v12, %v2008_v3  ;;  %v2082_v10 = vrot.slane %v2081_v57, 4  ;;  %v2326_v3 = vmul.f32 0.5, %v2282_v25  ;;  %v2151_v61 = vmul.f32 0.5, %v2150_v27 }
 0x32e   :  { %v2028_v60 = vmul.f32 %v4775_v14, %v2007_v0  ;;  %v2106_v46 = vmul.f32 %v2080_v4, %v4775_v14  ;;  %v2327_v12 = vmul.f32 0.5, %v2289_v9  ;;  %v2293_v30 = vrot.slane %v2292_v38, 2 }
 0x32f   :  { %v2011_v19 = vrot.slane %v2010_v37, 2  ;;  %v2083_v11 = vadd.f32 %v2082_v10, %v2081_v57  ;;  %v2341_v6 = vsel %vm1027_vm10, %v2326_v3, %v2325_v63  ;;  %v2152_v42 = vsub.f32 1.5, %v2151_v61 }
 0x330   :  { %v4871_v48 = vsub.f32 %v4834_v59, %v2028_v60  ;;  %v2365_v59 = vsub.f32 1.0, %v4875_v58  ;;  %v4880_v24 = vadd.f32 1e-05, %v2106_v46  ;;  %v2342_v17 = vsel %vm1029_vm11, %v2327_v12, %v2341_v6 }
 0x331   :  { %v2012_v45 = vadd.f32 %v2011_v19, %v2010_v37  ;;  %v2084_v47 = vrot.slane %v2083_v11, 2  ;;  %v2294_v19 = vadd.f32 %v2293_v30, %v2292_v38  ;;  %v2304_v25 = vsel %vm2268_vm1, %v2259_v54, 0.0 }
 0x332   :  { %v2044_v2 = vmul.f32 %v4871_v48, %v4871_v48  ;;  %v2367_v39 = vmul.f32 %v2365_v59, %v2357_v13  ;;  %3613 = vrsqrt.f32 %v4880_v24  ;;  %vm2164_vm15 = vweird.f32 %v4880_v24 }
 0x333   :  { %v2013_v41 = vrot.slane %v2012_v45, 1  ;;  %v2085_v36 = vadd.f32 %v2084_v47, %v2083_v11  ;;  %v2295_v8 = vrot.slane %v2294_v19, 1  ;;  %v2297_v47 = vsel %vm2268_vm1, %v4815_v21, 0.0 }
 0x334   :  { %v2088_v22 = vsel %vm53_vm3, %v2044_v2, 0.0  ;;  %2369 = vst.msk [vmem:[#allocation3] sm:$0xff] %vm53_vm3, %v2367_v39 }
 0x335   :  { %v2014_v23 = vadd.f32 %v2013_v41, %v2012_v45  ;;  %v2086_v55 = vrot.slane %v2085_v36, 1  ;;  %v2089_v44 = vrot.slane %v2088_v22, 4  ;;  %v2260_v45 = vrot.slane %v4815_v21, 4 }
 0x336   :  { %v2296_v2 = vadd.f32 %v2295_v8, %v2294_v19  ;;  %v2298_v41 = vrot.slane %v2297_v47, 4  ;;  %v2353_v19 = vld [vmem:[#allocation3 + $0x8] sm:$0xff] }
 0x337   :  { %v2029_v29 = vmul.f32 %v4775_v14, %v2014_v23  ;;  %v2087_v34 = vadd.f32 %v2086_v55, %v2085_v36  ;;  %v2090_v51 = vadd.f32 %v2089_v44, %v2088_v22  ;;  %v2305_v36 = vrot.slane %v2304_v25, 4 }
 0x338   :  { %v3614_v37 = vpop.eup %3613  ;;  %v2328_v22 = vmul.f32 0.5, %v2296_v2  ;;  %v2261_v23 = vrot.slane %v4815_v21, 6  ;;  %v2299_v1 = vadd.f32 %v2298_v41, %v2297_v47  ;;  %v2311_v44 = vsel %vm2268_vm1, %v2260_v45, 0.0 }
 0x339   :  { %v4889_v28 = vsub.f32 %v4854_v7, %v2029_v29  ;;  %v2107_v62 = vmul.f32 %v2087_v34, %v4775_v14  ;;  %v2091_v57 = vrot.slane %v2090_v51, 2  ;;  %v2153_v7 = vmul.f32 %v3612_v26, %v2152_v42 }
 0x33a   :  { %v2159_v10 = vmul.f32 %v3614_v37, %v4880_v24  ;;  %vm2165_vm0 = vweird.f32 %v3614_v37  ;;  %v2343_v9 = vsel %vm1031_vm12, %v2328_v22, %v2342_v17  ;;  %v2300_v34 = vrot.slane %v2299_v1, 2 }
 0x33b   :  { %v2045_v0 = vmul.f32 %v4889_v28, %v4889_v28  ;;  %v4896_v35 = vadd.f32 1e-05, %v2107_v62  ;;  %v2092_v52 = vadd.f32 %v2091_v57, %v2090_v51  ;;  %v2157_v15 = vsel %vm2156_vm4, %v3612_v26, %v2153_v7  ;;  %vm2166_vm8 = vmor %vm2164_vm15, %vm2165_vm0  ;;  %2350 = vst.msk [vmem:[#allocation9] sm:$0xf] %vm2349_vm5, %v2343_v9 }
 0x33c   :  { %v2160_v50 = vmul.f32 %v3614_v37, %v2159_v10  ;;  %v2201_v11 = vmul.f32 %v2157_v15, %v4826_v20  ;;  %v2306_v16 = vadd.f32 %v2305_v36, %v2304_v25  ;;  %v2301_v51 = vadd.f32 %v2300_v34, %v2299_v1 }
 0x33d   :  { %3615 = vrsqrt.f32 %v4896_v35  ;;  %v2095_v60 = vsel %vm53_vm3, %v2045_v0, 0.0  ;;  %v2093_v13 = vrot.slane %v2092_v52, 1  ;;  %vm2174_vm13 = vweird.f32 %v4896_v35 }
 0x33e   :  { %v2096_v4 = vrot.slane %v2095_v60, 4  ;;  %v2161_v31 = vmul.f32 0.5, %v2160_v50  ;;  %v2212_v32 = vmul.f32 %v4785_v43, %v2201_v11  ;;  %v2307_v12 = vrot.slane %v2306_v16, 2 }
 0x33f   :  { %v2094_v53 = vadd.f32 %v2093_v13, %v2092_v52  ;;  %v2312_v62 = vrot.slane %v2311_v44, 4  ;;  %v2318_v38 = vsel %vm2268_vm1, %v2261_v23, 0.0  ;;  %v2302_v57 = vrot.slane %v2301_v51, 1 }
 0x340   :  { %v2097_v46 = vadd.f32 %v2096_v4, %v2095_v60  ;;  %v2162_v26 = vsub.f32 1.5, %v2161_v31  ;;  %v2223_v49 = vadd.f32 %v4790_v40, %v2212_v32  ;;  %v2308_v0 = vadd.f32 %v2307_v12, %v2306_v16 }
 0x341   :  { %v2108_v59 = vmul.f32 %v2094_v53, %v4775_v14  ;;  %v2313_v30 = vadd.f32 %v2312_v62, %v2311_v44  ;;  %v2319_v7 = vrot.slane %v2318_v38, 4  ;;  %v2373_v17 = vrot.slane %v4875_v58, 2 }
 0x342   :  { %v2098_v20 = vrot.slane %v2097_v46, 2  ;;  %v2163_v39 = vmul.f32 %v3614_v37, %v2162_v26  ;;  %2231 = vst.msk [vmem:[#allocation6 + $0x18] sm:$0xff] %vm53_vm3, %v2223_v49  ;;  %v2309_v52 = vrot.slane %v2308_v0, 1  ;;  %v2303_v50 = vadd.f32 %v2302_v57, %v2301_v51  ;;  %v4943_v45 = vld [vmem:[#allocation9] sm:$0xf] }
 0x343   :  { %v3616_v56 = vpop.eup %3615  ;;  %v4914_v27 = vadd.f32 1e-05, %v2108_v59  ;;  %v2314_v13 = vrot.slane %v2313_v30, 2  ;;  %v2374_v4 = vrot.slane %v4875_v58, 4  ;;  %v2320_v31 = vadd.f32 %v2319_v7, %v2318_v38  ;;  %2780 = vrot.lane.b32.xlu0 %v4943_v45, %s3644_s4 }
 0x344   :  { %v2169_v55 = vmul.f32 %v3616_v56, %v4896_v35  ;;  %v2099_v29 = vadd.f32 %v2098_v20, %v2097_v46  ;;  %v2167_v21 = vsel %vm2166_vm8, %v3614_v37, %v2163_v39  ;;  %vm2175_vm9 = vweird.f32 %v3616_v56 }
 0x345   :  { %3617 = vrsqrt.f32 %v4914_v27  ;;  %v2202_v3 = vmul.f32 %v2167_v21, %v4836_v33  ;;  %vm2176_vm6 = vmor %vm2174_vm13, %vm2175_vm9  ;;  %vm2184_vm14 = vweird.f32 %v4914_v27  ;;  %v2755_v46 = vrot.slane %v4943_v45, 1 }
 0x346   :  { %v2170_v63 = vmul.f32 %v3616_v56, %v2169_v55  ;;  %v2100_v61 = vrot.slane %v2099_v29, 1  ;;  %v2310_v47 = vadd.f32 %v2309_v52, %v2308_v0  ;;  %v2375_v35 = vrot.slane %v4875_v58, 6 }
 0x347   :  { %v2213_v6 = vmul.f32 %v4785_v43, %v2202_v3  ;;  %v2772_v25 = vsel %vm2771_vm7, %v2755_v46, 0.0  ;;  %v2315_v26 = vadd.f32 %v2314_v13, %v2313_v30  ;;  %v2329_v49 = vmul.f32 0.5, %v2303_v50 }
 0x348   :  { %v2171_v24 = vmul.f32 0.5, %v2170_v63  ;;  %v2101_v42 = vadd.f32 %v2100_v61, %v2099_v29  ;;  %2812 = vrot.lane.b32.xlu2 %v2772_v25, %s3646_s7  ;;  %v2330_v22 = vmul.f32 0.5, %v2310_v47  ;;  %v2385_v23 = vsel %vm2268_vm1, %v4875_v58, 0.0  ;;  %v2468_v29 = vld [vmem:[#allocation3] sm:$0xff] }
 0x349   :  { %v2224_v10 = vadd.f32 %v4790_v40, %v2213_v6  ;;  %v2356_v54 = vld [vmem:[#allocation6 + $0x18] sm:$0xff]  ;;  %v2386_v21 = vrot.slane %v2385_v23, 4  ;;  %v2392_v63 = vsel %vm2268_vm1, %v2373_v17, 0.0 }
 0x34a   :  { %v2172_v37 = vsub.f32 1.5, %v2171_v24  ;;  %v2109_v33 = vmul.f32 %v2101_v42, %v4775_v14  ;;  %v2358_v11 = vadd.f32 %v2356_v54, %v2353_v19  ;;  %v2344_v16 = vsel %vm1027_vm10, %v2330_v22, %v2329_v49 }
 0x34b   :  { %v4931_v60 = vpop.eup %3617  ;;  %2232 = vst.msk [vmem:[#allocation6 + $0x20] sm:$0xff] %vm53_vm3, %v2224_v10  ;;  %v2393_v24 = vrot.slane %v2392_v63, 4  ;;  %v2387_v6 = vadd.f32 %v2386_v21, %v2385_v23 }
 0x34c   :  { %v2173_v15 = vmul.f32 %v3616_v56, %v2172_v37  ;;  %v2179_v14 = vmul.f32 %v4931_v60, %v4914_v27  ;;  %v4941_v8 = vadd.f32 1e-05, %v2109_v33  ;;  %vm2360_vm2 = vcmp.ge.f32.partialorder %v2358_v11, 1.0 }
 0x34d   :  { %v4953_v41 = vsel %vm2360_vm2, 1.0, %v3641_v18  ;;  %vm2185_vm15 = vweird.f32 %v4931_v60  ;;  %v2394_v0 = vadd.f32 %v2393_v24, %v2392_v63  ;;  %v2388_v52 = vrot.slane %v2387_v6, 2 }
 0x34e   :  { %v2177_v53 = vsel %vm2176_vm6, %v3616_v56, %v2173_v15  ;;  %v2180_v2 = vmul.f32 %v4931_v60, %v2179_v14  ;;  %3619 = vrsqrt.f32 %v4941_v8  ;;  %v2366_v59 = vsub.f32 1.0, %v4953_v41  ;;  %vm2186_vm4 = vmor %vm2184_vm14, %vm2185_vm15 }
 0x34f   :  { %v2203_v32 = vmul.f32 %v2177_v53, %v4857_v5  ;;  %v2321_v5 = vrot.slane %v2320_v31, 2  ;;  %v2316_v56 = vrot.slane %v2315_v26, 1  ;;  %v2395_v17 = vrot.slane %v2394_v0, 2 }
 0x350   :  { %v2181_v36 = vmul.f32 0.5, %v2180_v2  ;;  %v2368_v1 = vmul.f32 %v2366_v59, %v2358_v11  ;;  %v2406_v15 = vsel %vm2268_vm1, %v2375_v35, 0.0  ;;  %v2389_v13 = vadd.f32 %v2388_v52, %v2387_v6 }
 0x351   :  { %v2214_v20 = vmul.f32 %v4785_v43, %v2203_v32  ;;  %v2322_v44 = vadd.f32 %v2321_v5, %v2320_v31  ;;  %v2317_v34 = vadd.f32 %v2316_v56, %v2315_v26  ;;  %v2396_v11 = vadd.f32 %v2395_v17, %v2394_v0 }
 0x352   :  { %v2182_v55 = vsub.f32 1.5, %v2181_v36  ;;  %v2471_v9 = vld [vmem:[#allocation6 + $0x20] sm:$0xff]  ;;  %2370 = vst.msk [vmem:[#allocation3 + $0x8] sm:$0xff] %vm53_vm3, %v2368_v1  ;;  %v2407_v47 = vrot.slane %v2406_v15, 4  ;;  %vm2194_vm13 = vweird.f32 %v4941_v8  ;;  %v2376_v32 = vrot.slane %v4953_v41, 2 }
 0x353   :  { %v2225_v39 = vadd.f32 %v4790_v40, %v2214_v20  ;;  %v2473_v61 = vadd.f32 %v2471_v9, %v2468_v29  ;;  %v2323_v12 = vrot.slane %v2322_v44, 1  ;;  %v2331_v38 = vmul.f32 0.5, %v2317_v34 }
 0x354   :  { %v3620_v3 = vpop.eup %3619  ;;  %v2183_v51 = vmul.f32 %v4931_v60, %v2182_v55  ;;  %v2397_v35 = vrot.slane %v2396_v11, 1  ;;  %v2408_v59 = vadd.f32 %v2407_v47, %v2406_v15  ;;  %v2377_v5 = vrot.slane %v4953_v41, 4 }
 0x355   :  { %2233 = vst.msk [vmem:[#allocation6 + $0x28] sm:$0xff] %vm53_vm3, %v2225_v39  ;;  %v2189_v62 = vmul.f32 %v3620_v3, %v4941_v8  ;;  %vm2195_vm0 = vweird.f32 %v3620_v3  ;;  %vm2475_vm8 = vcmp.ge.f32.partialorder %v2473_v61, 1.0  ;;  %v2324_v57 = vadd.f32 %v2323_v12, %v2322_v44 }
 0x356   :  { %v2187_v42 = vsel %vm2186_vm4, %v4931_v60, %v2183_v51  ;;  %v4975_v37 = vsel %vm2475_vm8, 1.0, %v3641_v18  ;;  %v2345_v10 = vsel %vm1029_vm11, %v2331_v38, %v2344_v16  ;;  %v2399_v60 = vsel %vm2268_vm1, %v2374_v4, 0.0  ;;  %vm2196_vm9 = vmor %vm2194_vm13, %vm2195_vm0 }
 0x357   :  { %v2204_v30 = vmul.f32 %v2187_v42, %v4871_v48  ;;  %v2190_v7 = vmul.f32 %v3620_v3, %v2189_v62  ;;  %v2481_v27 = vsub.f32 1.0, %v4975_v37  ;;  %v2332_v33 = vmul.f32 0.5, %v2324_v57 }
 0x358   :  { %v2400_v46 = vrot.slane %v2399_v60, 4  ;;  %v2390_v4 = vrot.slane %v2389_v13, 1  ;;  %v2398_v36 = vadd.f32 %v2397_v35, %v2396_v11  ;;  %v2413_v56 = vsel %vm2268_vm1, %v4953_v41, 0.0 }
 0x359   :  { %v2215_v19 = vmul.f32 %v4785_v43, %v2204_v30  ;;  %v2191_v54 = vmul.f32 0.5, %v2190_v7  ;;  %v2483_v50 = vmul.f32 %v2481_v27, %v2473_v61  ;;  %v2346_v48 = vsel %vm1031_vm12, %v2332_v33, %v2345_v10  ;;  %v2469_v14 = vld [vmem:[#allocation3 + $0x8] sm:$0xff] }
 0x35a   :  { %2351 = vst.msk [vmem:[#allocation9 + $0x4] sm:$0xf] %vm2349_vm5, %v2346_v48  ;;  %v2401_v26 = vadd.f32 %v2400_v46, %v2399_v60  ;;  %v2391_v20 = vadd.f32 %v2390_v4, %v2389_v13  ;;  %v2409_v22 = vrot.slane %v2408_v59, 2  ;;  %v2442_v55 = vmul.f32 0.5, %v2398_v36 }
 0x35b   :  { %v2226_v31 = vadd.f32 %v4790_v40, %v2215_v19  ;;  %v2192_v53 = vsub.f32 1.5, %v2191_v54  ;;  %2485 = vst.msk [vmem:[#allocation3] sm:$0xff] %vm53_vm3, %v2483_v50  ;;  %v2414_v34 = vrot.slane %v2413_v56, 4  ;;  %v2378_v63 = vrot.slane %v4953_v41, 6 }
 0x35c   :  { %v2472_v58 = vld [vmem:[#allocation6 + $0x28] sm:$0xff]  ;;  %v2402_v49 = vrot.slane %v2401_v26, 2  ;;  %v2441_v39 = vmul.f32 0.5, %v2391_v20  ;;  %v2410_v9 = vadd.f32 %v2409_v22, %v2408_v59  ;;  %v2427_v61 = vsel %vm2268_vm1, %v2377_v5, 0.0 }
 0x35d   :  { %v2474_v2 = vadd.f32 %v2472_v58, %v2469_v14  ;;  %2234 = vst.msk [vmem:[#allocation6 + $0x30] sm:$0xff] %vm53_vm3, %v2226_v31  ;;  %v2193_v25 = vmul.f32 %v3620_v3, %v2192_v53  ;;  %v2415_v42 = vadd.f32 %v2414_v34, %v2413_v56  ;;  %v2428_v7 = vrot.slane %v2427_v61, 4 }
 0x35e   :  { %v2403_v29 = vadd.f32 %v2402_v49, %v2401_v26  ;;  %v2457_v62 = vsel %vm1027_vm10, %v2442_v55, %v2441_v39  ;;  %v2411_v6 = vrot.slane %v2410_v9, 1  ;;  %v2434_v52 = vsel %vm2268_vm1, %v2378_v63, 0.0 }
 0x35f   :  { %vm2476_vm6 = vcmp.ge.f32.partialorder %v2474_v2, 1.0  ;;  %v2197_v8 = vsel %vm2196_vm9, %v3620_v3, %v2193_v25  ;;  %v2420_v3 = vsel %vm2268_vm1, %v2376_v32, 0.0  ;;  %v2416_v27 = vrot.slane %v2415_v42, 2 }
 0x360   :  { %v4997_v23 = vsel %vm2476_vm6, 1.0, %v3641_v18  ;;  %v2205_v1 = vmul.f32 %v2197_v8, %v4889_v28  ;;  %v2404_v24 = vrot.slane %v2403_v29, 1  ;;  %v2421_v41 = vrot.slane %v2420_v3, 4 }
 0x361   :  { %v2482_v44 = vsub.f32 1.0, %v4997_v23  ;;  %v5002_v21 = vld [vmem:[#allocation9 + $0x4] sm:$0xf]  ;;  %v2412_v10 = vadd.f32 %v2411_v6, %v2410_v9  ;;  %v2429_v17 = vadd.f32 %v2428_v7, %v2427_v61  ;;  %v2435_v19 = vrot.slane %v2434_v52, 4 }
 0x362   :  { %v2216_v16 = vmul.f32 %v4785_v43, %v2205_v1  ;;  %v2584_v12 = vld [vmem:[#allocation3] sm:$0xff]  ;;  %2782 = vrot.lane.b32.xlu1 %v5002_v21, %s3644_s4  ;;  %v2756_v28 = vrot.slane %v5002_v21, 1  ;;  %v2405_v30 = vadd.f32 %v2404_v24, %v2403_v29  ;;  %v2422_v33 = vadd.f32 %v2421_v41, %v2420_v3 }
 0x363   :  { %v2484_v51 = vmul.f32 %v2482_v44, %v2474_v2  ;;  %v2444_v60 = vmul.f32 0.5, %v2412_v10  ;;  %v2417_v15 = vadd.f32 %v2416_v27, %v2415_v42  ;;  %v2430_v11 = vrot.slane %v2429_v17, 2 }
 0x364   :  { %v2587_v38 = vld [vmem:[#allocation6 + $0x30] sm:$0xff]  ;;  %v2227_v43 = vadd.f32 %v4790_v40, %v2216_v16  ;;  %v2773_v0 = vsel %vm2771_vm7, %v2756_v28, 0.0  ;;  %v2443_v40 = vmul.f32 0.5, %v2405_v30  ;;  %v2423_v50 = vrot.slane %v2422_v33, 2 }
 0x365   :  { %2486 = vst.msk [vmem:[#allocation3 + $0x8] sm:$0xff] %vm53_vm3, %v2484_v51  ;;  %v2589_v57 = vadd.f32 %v2587_v38, %v2584_v12  ;;  %2814 = vrot.lane.b32.xlu0 %v2773_v0, %s3646_s7  ;;  %v2436_v14 = vadd.f32 %v2435_v19, %v2434_v52  ;;  %v2418_v53 = vrot.slane %v2417_v15, 1  ;;  %v2489_v47 = vrot.slane %v4975_v37, 2 }
 0x366   :  { %2235 = vst.msk [vmem:[#allocation6 + $0x38] sm:$0xff] %vm53_vm3, %v2227_v43  ;;  %v2458_v13 = vsel %vm1029_vm11, %v2443_v40, %v2457_v62  ;;  %v2424_v46 = vadd.f32 %v2423_v50, %v2422_v33  ;;  %v2431_v4 = vadd.f32 %v2430_v11, %v2429_v17  ;;  %v2490_v32 = vrot.slane %v4975_v37, 4 }
 0x367   :  { %vm2591_vm14 = vcmp.ge.f32.partialorder %v2589_v57, 1.0  ;;  %v2459_v31 = vsel %vm1031_vm12, %v2444_v60, %v2458_v13  ;;  %v2437_v35 = vrot.slane %v2436_v14, 2  ;;  %v2419_v25 = vadd.f32 %v2418_v53, %v2417_v15 }
 0x368   :  { %v5018_v54 = vsel %vm2591_vm14, 1.0, %v3641_v18  ;;  %2466 = vst.msk [vmem:[#allocation9 + $0x8] sm:$0xf] %vm2349_vm5, %v2459_v31  ;;  %v2425_v26 = vrot.slane %v2424_v46, 1  ;;  %v2491_v59 = vrot.slane %v4975_v37, 6  ;;  %v2501_v20 = vsel %vm2268_vm1, %v4975_v37, 0.0 }
 0x369   :  { %v2597_v48 = vsub.f32 1.0, %v5018_v54  ;;  %v2432_v5 = vrot.slane %v2431_v4, 1  ;;  %v2438_v56 = vadd.f32 %v2437_v35, %v2436_v14  ;;  %v2502_v8 = vrot.slane %v2501_v20, 4 }
 0x36a   :  { %v2508_v49 = vsel %vm2268_vm1, %v2489_v47, 0.0  ;;  %v2426_v1 = vadd.f32 %v2425_v26, %v2424_v46  ;;  %v2445_v39 = vmul.f32 0.5, %v2419_v25  ;;  %v2515_v34 = vsel %vm2268_vm1, %v2490_v32, 0.0 }
 0x36b   :  { %v2599_v58 = vmul.f32 %v2597_v48, %v2589_v57  ;;  %v2509_v55 = vrot.slane %v2508_v49, 4  ;;  %v2433_v44 = vadd.f32 %v2432_v5, %v2431_v4  ;;  %v2439_v29 = vrot.slane %v2438_v56, 1 }
 0x36c   :  { %v2585_v2 = vld [vmem:[#allocation3 + $0x8] sm:$0xff]  ;;  %v2503_v9 = vadd.f32 %v2502_v8, %v2501_v20  ;;  %v2446_v16 = vmul.f32 0.5, %v2426_v1  ;;  %v2516_v63 = vrot.slane %v2515_v34, 4  ;;  %v2522_v33 = vsel %vm2268_vm1, %v2491_v59, 0.0 }
 0x36d   :  { %2601 = vst.msk [vmem:[#allocation3] sm:$0xff] %vm53_vm3, %v2599_v58  ;;  %v2588_v36 = vld [vmem:[#allocation6 + $0x38] sm:$0xff]  ;;  %v2510_v37 = vadd.f32 %v2509_v55, %v2508_v49  ;;  %v2440_v61 = vadd.f32 %v2439_v29, %v2438_v56  ;;  %v2447_v51 = vmul.f32 0.5, %v2433_v44  ;;  %v2492_v52 = vrot.slane %v4997_v23, 2 }
 0x36e   :  { %v2590_v22 = vadd.f32 %v2588_v36, %v2585_v2  ;;  %v2504_v12 = vrot.slane %v2503_v9, 2  ;;  %v2460_v62 = vsel %vm1027_vm10, %v2446_v16, %v2445_v39  ;;  %v2517_v43 = vadd.f32 %v2516_v63, %v2515_v34 }
 0x36f   :  { %v5036_v24 = vld [vmem:[#allocation9 + $0x8] sm:$0xf]  ;;  %v2511_v38 = vrot.slane %v2510_v37, 2  ;;  %v2448_v42 = vmul.f32 0.5, %v2440_v61  ;;  %v2461_v41 = vsel %vm1029_vm11, %v2447_v51, %v2460_v62  ;;  %v2523_v60 = vrot.slane %v2522_v33, 4 }
 0x370   :  { %vm2592_vm2 = vcmp.ge.f32.partialorder %v2590_v22, 1.0  ;;  %2784 = vrot.lane.b32.xlu1 %v5036_v24, %s3644_s4  ;;  %v2757_v6 = vrot.slane %v5036_v24, 1  ;;  %v2505_v0 = vadd.f32 %v2504_v12, %v2503_v9  ;;  %v2518_v7 = vrot.slane %v2517_v43, 2 }
 0x371   :  { %v5033_v3 = vsel %vm2592_vm2, 1.0, %v3641_v18  ;;  %v2512_v30 = vadd.f32 %v2511_v38, %v2510_v37  ;;  %v2462_v27 = vsel %vm1031_vm12, %v2448_v42, %v2461_v41  ;;  %v2493_v15 = vrot.slane %v4997_v23, 4 }
 0x372   :  { %v2598_v28 = vsub.f32 1.0, %v5033_v3  ;;  %v2774_v10 = vsel %vm2771_vm7, %v2757_v6, 0.0  ;;  %v2506_v40 = vrot.slane %v2505_v0, 1  ;;  %v2519_v19 = vadd.f32 %v2518_v7, %v2517_v43  ;;  %2467 = vst.msk [vmem:[#allocation9 + $0xc] sm:$0xf] %vm2349_vm5, %v2462_v27 }
 0x373   :  { %2816 = vrot.lane.b32.xlu0 %v2774_v10, %s3646_s7  ;;  %v2513_v17 = vrot.slane %v2512_v30, 1  ;;  %v2494_v50 = vrot.slane %v4997_v23, 6  ;;  %v2529_v48 = vsel %vm2268_vm1, %v4997_v23, 0.0  ;;  %v2536_v13 = vsel %vm2268_vm1, %v2492_v52, 0.0 }
 0x374   :  { %v2600_v57 = vmul.f32 %v2598_v28, %v2590_v22  ;;  %v2507_v11 = vadd.f32 %v2506_v40, %v2505_v0  ;;  %v2520_v31 = vrot.slane %v2519_v19, 1  ;;  %v2524_v53 = vadd.f32 %v2523_v60, %v2522_v33 }
 0x375   :  { %v2514_v14 = vadd.f32 %v2513_v17, %v2512_v30  ;;  %v2530_v46 = vrot.slane %v2529_v48, 4  ;;  %v2537_v47 = vrot.slane %v2536_v13, 4  ;;  %v2543_v58 = vsel %vm2268_vm1, %v2493_v15, 0.0 }
 0x376   :  { %2602 = vst.msk [vmem:[#allocation3 + $0x8] sm:$0xff] %vm53_vm3, %v2600_v57  ;;  %v2550_v4 = vsel %vm2268_vm1, %v2494_v50, 0.0  ;;  %v2521_v35 = vadd.f32 %v2520_v31, %v2519_v19  ;;  %v2525_v32 = vrot.slane %v2524_v53, 2  ;;  %v2557_v2 = vmul.f32 0.5, %v2507_v11 }
 0x377   :  { %v2558_v25 = vmul.f32 0.5, %v2514_v14  ;;  %v2531_v26 = vadd.f32 %v2530_v46, %v2529_v48  ;;  %v2538_v59 = vadd.f32 %v2537_v47, %v2536_v13  ;;  %v2544_v20 = vrot.slane %v2543_v58, 4 }
 0x378   :  { %v2551_v23 = vrot.slane %v2550_v4, 4  ;;  %v2526_v36 = vadd.f32 %v2525_v32, %v2524_v53  ;;  %v2559_v5 = vmul.f32 0.5, %v2521_v35  ;;  %v2605_v29 = vrot.slane %v5018_v54, 2 }
 0x379   :  { %v2573_v56 = vsel %vm1027_vm10, %v2558_v25, %v2557_v2  ;;  %v2532_v8 = vrot.slane %v2531_v26, 2  ;;  %v2539_v49 = vrot.slane %v2538_v59, 2  ;;  %v2545_v22 = vadd.f32 %v2544_v20, %v2543_v58  ;;  %v5058_v39 = vld [vmem:[#allocation9 + $0xc] sm:$0xf] }
 0x37a   :  { %v2552_v1 = vadd.f32 %v2551_v23, %v2550_v4  ;;  %v2527_v55 = vrot.slane %v2526_v36, 1  ;;  %v2574_v44 = vsel %vm1029_vm11, %v2559_v5, %v2573_v56  ;;  %v2606_v9 = vrot.slane %v5018_v54, 4  ;;  %2786 = vrot.lane.b32.xlu2 %v5058_v39, %s3644_s4 }
 0x37b   :  { %v2758_v34 = vrot.slane %v5058_v39, 1  ;;  %v2533_v16 = vadd.f32 %v2532_v8, %v2531_v26  ;;  %v2540_v37 = vadd.f32 %v2539_v49, %v2538_v59  ;;  %v2607_v63 = vrot.slane %v5018_v54, 6 }
 0x37c   :  { %v2528_v61 = vadd.f32 %v2527_v55, %v2526_v36  ;;  %v2546_v51 = vrot.slane %v2545_v22, 2  ;;  %v2553_v12 = vrot.slane %v2552_v1, 2  ;;  %v2617_v28 = vsel %vm2268_vm1, %v5018_v54, 0.0 }
 0x37d   :  { %v2775_v62 = vsel %vm2771_vm7, %v2758_v34, 0.0  ;;  %v2534_v38 = vrot.slane %v2533_v16, 1  ;;  %v2541_v43 = vrot.slane %v2540_v37, 1  ;;  %v2618_v6 = vrot.slane %v2617_v28, 4 }
 0x37e   :  { %2818 = vrot.lane.b32.xlu1 %v2775_v62, %s3646_s7  ;;  %v2560_v42 = vmul.f32 0.5, %v2528_v61  ;;  %v2547_v41 = vadd.f32 %v2546_v51, %v2545_v22  ;;  %v2554_v57 = vadd.f32 %v2553_v12, %v2552_v1  ;;  %v2624_v0 = vsel %vm2268_vm1, %v2605_v29, 0.0 }
 0x37f   :  { %v2535_v30 = vadd.f32 %v2534_v38, %v2533_v16  ;;  %v2542_v7 = vadd.f32 %v2541_v43, %v2540_v37  ;;  %v2619_v10 = vadd.f32 %v2618_v6, %v2617_v28  ;;  %v2625_v27 = vrot.slane %v2624_v0, 4 }
 0x380   :  { %v2575_v33 = vsel %vm1031_vm12, %v2560_v42, %v2574_v44  ;;  %v2548_v52 = vrot.slane %v2547_v41, 1  ;;  %v2555_v54 = vrot.slane %v2554_v57, 1  ;;  %v2631_v40 = vsel %vm2268_vm1, %v2606_v9, 0.0 }
 0x381   :  { %2582 = vst.msk [vmem:[#allocation9 + $0x10] sm:$0xf] %vm2349_vm5, %v2575_v33  ;;  %v2561_v17 = vmul.f32 0.5, %v2535_v30  ;;  %v2562_v19 = vmul.f32 0.5, %v2542_v7  ;;  %v2620_v60 = vrot.slane %v2619_v10, 2  ;;  %v2626_v15 = vadd.f32 %v2625_v27, %v2624_v0 }
 0x382   :  { %v2549_v50 = vadd.f32 %v2548_v52, %v2547_v41  ;;  %v2556_v48 = vadd.f32 %v2555_v54, %v2554_v57  ;;  %v2632_v13 = vrot.slane %v2631_v40, 4  ;;  %v2638_v11 = vsel %vm2268_vm1, %v2607_v63, 0.0 }
 0x383   :  { %v2576_v14 = vsel %vm1027_vm10, %v2562_v19, %v2561_v17  ;;  %v2621_v31 = vadd.f32 %v2620_v60, %v2619_v10  ;;  %v2627_v53 = vrot.slane %v2626_v15, 2  ;;  %v2639_v46 = vrot.slane %v2638_v11, 4 }
 0x384   :  { %v2563_v47 = vmul.f32 0.5, %v2549_v50  ;;  %v2633_v58 = vadd.f32 %v2632_v13, %v2631_v40  ;;  %v2608_v4 = vrot.slane %v5033_v3, 2  ;;  %v2564_v35 = vmul.f32 0.5, %v2556_v48 }
 0x385   :  { %v2622_v32 = vrot.slane %v2621_v31, 1  ;;  %v2628_v2 = vadd.f32 %v2627_v53, %v2626_v15  ;;  %v2640_v25 = vadd.f32 %v2639_v46, %v2638_v11  ;;  %v2609_v20 = vrot.slane %v5033_v3, 4 }
 0x386   :  { %v2577_v26 = vsel %vm1029_vm11, %v2563_v47, %v2576_v14  ;;  %v2634_v59 = vrot.slane %v2633_v58, 2  ;;  %v2645_v23 = vsel %vm2268_vm1, %v5033_v3, 0.0  ;;  %v2652_v55 = vsel %vm2268_vm1, %v2608_v4, 0.0 }
 0x387   :  { %v2578_v36 = vsel %vm1031_vm12, %v2564_v35, %v2577_v26  ;;  %v2623_v5 = vadd.f32 %v2622_v32, %v2621_v31  ;;  %v2629_v56 = vrot.slane %v2628_v2, 1  ;;  %v2641_v8 = vrot.slane %v2640_v25, 2 }
 0x388   :  { %v5083_v49 = vld [vmem:[#allocation9 + $0x10] sm:$0xf]  ;;  %2583 = vst.msk [vmem:[#allocation9 + $0x14] sm:$0xf] %vm2349_vm5, %v2578_v36  ;;  %v2635_v22 = vadd.f32 %v2634_v59, %v2633_v58  ;;  %v2646_v1 = vrot.slane %v2645_v23, 4  ;;  %v2610_v34 = vrot.slane %v5033_v3, 6 }
 0x389   :  { %2788 = vrot.lane.b32.xlu2 %v5083_v49, %s3644_s4  ;;  %v2759_v44 = vrot.slane %v5083_v49, 1  ;;  %v2630_v29 = vadd.f32 %v2629_v56, %v2628_v2  ;;  %v2642_v9 = vadd.f32 %v2641_v8, %v2640_v25  ;;  %v2673_v37 = vmul.f32 0.5, %v2623_v5  ;;  %v2719_v8 = vld [vmem:[%s5430_s9 + $0x58] sm:$0xff] }
 0x38a   :  { %v2636_v16 = vrot.slane %v2635_v22, 1  ;;  %v2647_v63 = vadd.f32 %v2646_v1, %v2645_v23  ;;  %v2653_v61 = vrot.slane %v2652_v55, 4  ;;  %v2659_v62 = vsel %vm2268_vm1, %v2609_v20, 0.0  ;;  %2893 = vmatpush.msra.mxu2 %v2719_v8  ;;  %v2717_v1 = vld [vmem:[%s5430_s9 + $0x48] sm:$0xff] }
 0x38b   :  { %v2776_v51 = vsel %vm2771_vm7, %v2759_v44, 0.0  ;;  %v2643_v12 = vrot.slane %v2642_v9, 1  ;;  %v2674_v28 = vmul.f32 0.5, %v2630_v29  ;;  %v2660_v42 = vrot.slane %v2659_v62, 4  ;;  %v2715_v44 = vld [vmem:[%s5430_s9 + $0x38] sm:$0xff] }
 0x38c   :  { %2820 = vrot.lane.b32.xlu1 %v2776_v51, %s3646_s7  ;;  %v2637_v38 = vadd.f32 %v2636_v16, %v2635_v22  ;;  %v2648_v43 = vrot.slane %v2647_v63, 2  ;;  %v2654_v6 = vadd.f32 %v2653_v61, %v2652_v55  ;;  %v2666_v3 = vsel %vm2268_vm1, %v2610_v34, 0.0  ;;  %v2718_v22 = vld [vmem:[%s5430_s9 + $0x50] sm:$0xff]  ;;  %v2716_v55 = vld [vmem:[%s5430_s9 + $0x40] sm:$0xff]  ;;  %v2711_v61 = vld [vmem:[%s5430_s9 + $0x18] sm:$0xff] }
 0x38d   :  { %v2644_v41 = vadd.f32 %v2643_v12, %v2642_v9  ;;  %v2689_v57 = vsel %vm1027_vm10, %v2674_v28, %v2673_v37  ;;  %v2661_v10 = vadd.f32 %v2660_v42, %v2659_v62  ;;  %v2667_v52 = vrot.slane %v2666_v3, 4  ;;  %2894 = vmatpush.msra.mxu2 %v2718_v22  ;;  %v2714_v34 = vld [vmem:[%s5430_s9 + $0x30] sm:$0xff]  ;;  %v2713_v37 = vld [vmem:[%s5430_s9 + $0x28] sm:$0xff] }
 0x38e   :  { %v2675_v0 = vmul.f32 0.5, %v2637_v38  ;;  %v2649_v30 = vadd.f32 %v2648_v43, %v2647_v63  ;;  %v2655_v7 = vrot.slane %v2654_v6, 2  ;;  %v2712_v63 = vld [vmem:[%s5430_s9 + $0x20] sm:$0xff]  ;;  %v2731_v51 = vrot.slane %v4943_v45, 7  ;;  %v2710_v12 = vld [vmem:[%s5430_s9 + $0x10] sm:$0xff]  ;;  %v2709_v28 = vld [vmem:[%s5430_s9 + $0x8] sm:$0xff] }
 0x38f   :  { %v5096_v27 = vld [vmem:[#allocation9 + $0x14] sm:$0xf]  ;;  %v2676_v33 = vmul.f32 0.5, %v2644_v41  ;;  %v2662_v15 = vrot.slane %v2661_v10, 2  ;;  %v2668_v50 = vadd.f32 %v2667_v52, %v2666_v3  ;;  %2895 = vmatpush.msra.mxu2 %v2717_v1  ;;  %v2708_v45 = vld [vmem:[%s5430_s9] sm:$0xff]  ;;  %v2732_v41 = vrot.slane %v5002_v21, 7 }
 0x390   :  { %2790 = vrot.lane.b32.xlu0 %v5096_v27, %s3644_s4  ;;  %v2760_v54 = vrot.slane %v5096_v27, 1  ;;  %v2690_v40 = vsel %vm1029_vm11, %v2675_v0, %v2689_v57  ;;  %v2650_v17 = vrot.slane %v2649_v30, 1  ;;  %v2656_v60 = vadd.f32 %v2655_v7, %v2654_v6 }
 0x391   :  { %v2691_v19 = vsel %vm1031_vm12, %v2676_v33, %v2690_v40  ;;  %v2663_v14 = vadd.f32 %v2662_v15, %v2661_v10  ;;  %v2669_v31 = vrot.slane %v2668_v50, 2  ;;  %2896 = vmatpush.msra.mxu2 %v2716_v55  ;;  %v2733_v33 = vrot.slane %v5036_v24, 7 }
 0x392   :  { %v2777_v48 = vsel %vm2771_vm7, %v2760_v54, 0.0  ;;  %2698 = vst.msk [vmem:[#allocation9 + $0x18] sm:$0xf] %vm2349_vm5, %v2691_v19  ;;  %v2651_v13 = vadd.f32 %v2650_v17, %v2649_v30  ;;  %v2657_v11 = vrot.slane %v2656_v60, 1  ;;  %v2734_v19 = vrot.slane %v5058_v39, 7 }
 0x393   :  { %2822 = vrot.lane.b32.xlu2 %v2777_v48, %s3646_s7  ;;  %v2664_v46 = vrot.slane %v2663_v14, 1  ;;  %v2670_v47 = vadd.f32 %v2669_v31, %v2668_v50  ;;  %2897 = vmatpush.msra.mxu2 %v2715_v44  ;;  %v2735_v24 = vrot.slane %v5083_v49, 7  ;;  %vm56_vm8 = vcmask 519168  }
 0x394   :  { %v2658_v53 = vadd.f32 %v2657_v11, %v2656_v60  ;;  %v2677_v35 = vmul.f32 0.5, %v2651_v13  ;;  %57 = vst.msk [vmem:[#allocation4] sm:$0xf] %vm56_vm8, %v3641_v18  ;;  %v3647_v44 = vmov 4.0  }
 0x395   :  { %v2665_v58 = vadd.f32 %v2664_v46, %v2663_v14  ;;  %v2671_v4 = vrot.slane %v2670_v47, 1  ;;  %2898 = vmatpush.msra.mxu2 %v2714_v34  ;;  %58 = vst.msk [vmem:[#allocation4 + $0x4] sm:$0xf] %vm56_vm8, %v3641_v18  ;;  %3621 = vrcp.f32 %v3647_v44  ;;  %v5203_v34 = vld [vmem:[%s5431_s10] ss:$0 sm:$0xff] }
 0x396   :  { %v2678_v32 = vmul.f32 0.5, %v2658_v53  ;;  %v2736_v53 = vrot.slane %v5096_v27, 7 }
 0x397   :  { %v2672_v25 = vadd.f32 %v2671_v4, %v2670_v47  ;;  %v2679_v26 = vmul.f32 0.5, %v2665_v58  ;;  %2899 = vmatpush.msra.mxu2 %v2713_v37 }
 0x398   :  { %v2692_v59 = vsel %vm1027_vm10, %v2678_v32, %v2677_v35 }
 0x399   :  { %v5106_v2 = vld [vmem:[#allocation9 + $0x18] sm:$0xf]  ;;  %v2680_v23 = vmul.f32 0.5, %v2672_v25  ;;  %v2693_v36 = vsel %vm1029_vm11, %v2679_v26, %v2692_v59  ;;  %2900 = vmatpush.msra.mxu2 %v2712_v63  ;;  %vm2844_vm11 = vcmask 523264  }
 0x39a   :  { %2792 = vrot.lane.b32.xlu0 %v5106_v2, %s3644_s4  ;;  %v2761_v20 = vrot.slane %v5106_v2, 1  ;;  %v2737_v27 = vrot.slane %v5106_v2, 7 }
 0x39b   :  { %v2694_v56 = vsel %vm1031_vm12, %v2680_v23, %v2693_v36  ;;  %2901 = vmatpush.msra.mxu2 %v2711_v61  ;;  %vm5444_vm12 = vcmask 1040384  }
 0x39c   :  { %v2778_v5 = vsel %vm2771_vm7, %v2761_v20, 0.0  ;;  %2699 = vst.msk [vmem:[#allocation9 + $0x1c] sm:$0xf] %vm2349_vm5, %v2694_v56  ;;  %v2747_v62 = vsel %vm5444_vm12, 0.0, %v2731_v51  ;;  %vm5445_vm1 = vmmov %vm5444_vm12  ;;  %vm2880_vm5 = vcmask 785408  }
 0x39d   :  { %2824 = vrot.lane.b32.xlu2 %v2778_v5, %s3646_s7  ;;  %2902 = vmatpush.msra.mxu2 %v2710_v12  ;;  %v2748_v3 = vsel %vm5445_vm1, 0.0, %v2732_v41  ;;  %vm5447_vm15 = vmmov %vm5445_vm1 }
 0x39e   :  { %v2750_v15 = vsel %vm5447_vm15, 0.0, %v2734_v19  ;;  %vm5448_vm4 = vmmov %vm5445_vm1 }
 0x39f   :  { %2903 = vmatpush.msra.mxu2 %v2709_v28  ;;  %v2751_v31 = vsel %vm5448_vm4, 0.0, %v2735_v24  ;;  %vm5449_vm0 = vmmov %vm5445_vm1 }
 0x3a0   :  { %v2752_v4 = vsel %vm5449_vm0, 0.0, %v2736_v53  ;;  %vm5450_vm13 = vmmov %vm5449_vm0 }
 0x3a1   :  { %2904 = vmatpush.msra.mxu2 %v2708_v45  ;;  %v2753_v26 = vsel %vm5450_vm13, 0.0, %v2737_v27  ;;  %vm5451_vm9 = vmmov %vm5449_vm0 }
 0x3a2   :  { %v2813_v43 = vpop.permute.xlu2 %2812 }
 0x3a3   :  { %v5132_v29 = vld [vmem:[#allocation9 + $0x1c] sm:$0xf] }
 0x3a4   :  { %2794 = vrot.lane.b32.xlu1 %v5132_v29, %s3644_s4  ;;  %v2762_v9 = vrot.slane %v5132_v29, 1  ;;  %v2738_v5 = vrot.slane %v5132_v29, 7 }
 0x3a6   :  { %v2779_v16 = vsel %vm2771_vm7, %v2762_v9, 0.0  ;;  %vm5446_vm7 = vmmov %vm5445_vm1  ;;  %v2754_v8 = vsel %vm5451_vm9, 0.0, %v2738_v5  ;;  %v3622_v9 = vpop.eup %3621 }
 0x3a7   :  { %2826 = vrot.lane.b32.xlu0 %v2779_v16, %s3646_s7  ;;  %v2749_v54 = vsel %vm5446_vm7, 0.0, %v2733_v33  ;;  %v2999_v29 = vmul.f32 4.0, %v3622_v9 }
 0x3a9   :  { %v3000_v61 = vsub.f32 1.0, %v2999_v29 }
 0x3b5   :  { %v2781_v38 = vpop.permute.xlu0 %2780 }
 0x3b6   :  { %v2836_v6 = vsel %vm53_vm3, %v2747_v62, %v2781_v38  ;;  %v3001_v38 = vmul.f32 %v3622_v9, %v3000_v61 }
 0x3b7   :  { %v2845_v42 = vsel %vm2844_vm11, %v2836_v6, %v2813_v43 }
 0x3b8   :  { %2861 = vst [vmem:[#allocation1] ss:$2 sm:$0xff] %v2845_v42  ;;  %v3002_v41 = vadd.f32 %v3622_v9, %v3001_v38 }
 0x3d4   :  { %v2783_v57 = vpop.permute.xlu1 %2782  ;;  %v2787_v60 = vpop.permute.xlu2 %2786 }
 0x3d5   :  { %v2837_v0 = vsel %vm53_vm3, %v2748_v3, %v2783_v57  ;;  %v2839_v50 = vsel %vm53_vm3, %v2750_v15, %v2787_v60 }
 0x3d7   :  { %v2815_v30 = vpop.permute.xlu0 %2814 }
 0x3d8   :  { %v2846_v7 = vsel %vm2844_vm11, %v2837_v0, %v2815_v30 }
 0x3d9   :  { %2863 = vst [vmem:[#allocation1 + $0x1] ss:$2 sm:$0xff] %v2846_v7 }
 0x3e0   :  { %v2876_v10 = vld.sshfl [vmem:[#allocation1] sm:$0xff pattern:$0x75316420] }
 0x3e1   :  { %3551 = vmatmul.msk.f32.vlgmr.msra.gmra.mxu2 %vm2880_vm5, %v2876_v10 }
 0x3e2   :  { %v2785_v52 = vpop.permute.xlu1 %2784 }
 0x3e3   :  { %v2838_v21 = vsel %vm53_vm3, %v2749_v54, %v2785_v52  ;;  %v2789_v14 = vpop.permute.xlu2 %2788 }
 0x3e4   :  { %v2840_v39 = vsel %vm53_vm3, %v2751_v31, %v2789_v14 }
 0x3e5   :  { %v2817_v40 = vpop.permute.xlu0 %2816 }
 0x3e6   :  { %v2847_v17 = vsel %vm2844_vm11, %v2838_v21, %v2817_v40 }
 0x3e7   :  { %2865 = vst [vmem:[#allocation1 + $0x10] ss:$2 sm:$0xff] %v2847_v17 }
 0x3ed   :  { %v2823_v35 = vpop.permute.xlu2 %2822 }
 0x3f0   :  { %v2819_v48 = vpop.permute.xlu1 %2818 }
 0x3f1   :  { %v2848_v13 = vsel %vm2844_vm11, %v2839_v50, %v2819_v48 }
 0x3f2   :  { %2867 = vst [vmem:[#allocation1 + $0x11] ss:$2 sm:$0xff] %v2848_v13 }
 0x3f7   :  { %v2825_v20 = vpop.permute.xlu2 %2824 }
 0x3f9   :  { %v2877_v11 = vld.sshfl [vmem:[#allocation1 + $0x10] sm:$0xff pattern:$0x75316420] }
 0x3fa   :  { %3552 = vmatmul.msk.f32.gmra.mxu2 %vm2880_vm5, %v2877_v11 }
 0x3fe   :  { %v2821_v46 = vpop.permute.xlu1 %2820 }
 0x3ff   :  { %v2849_v47 = vsel %vm2844_vm11, %v2840_v39, %v2821_v46 }
 0x400   :  { %2869 = vst [vmem:[#allocation1 + $0x20] ss:$2 sm:$0xff] %v2849_v47 }
 0x402   :  { %v2791_v58 = vpop.permute.xlu0 %2790 }
 0x403   :  { %v2841_v49 = vsel %vm53_vm3, %v2752_v4, %v2791_v58 }
 0x404   :  { %v2850_v32 = vsel %vm2844_vm11, %v2841_v49, %v2823_v35 }
 0x405   :  { %2871 = vst [vmem:[#allocation1 + $0x21] ss:$2 sm:$0xff] %v2850_v32 }
 0x40c   :  { %v2793_v25 = vpop.permute.xlu0 %2792  ;;  %v2878_v59 = vld.sshfl [vmem:[#allocation1 + $0x20] sm:$0xff pattern:$0x75316420] }
 0x40d   :  { %v2842_v23 = vsel %vm53_vm3, %v2753_v26, %v2793_v25  ;;  %3553 = vmatmul.msk.f32.gmra.mxu2 %vm2880_vm5, %v2878_v59 }
 0x40e   :  { %v2851_v36 = vsel %vm2844_vm11, %v2842_v23, %v2825_v20 }
 0x40f   :  { %2873 = vst [vmem:[#allocation1 + $0x30] ss:$2 sm:$0xff] %v2851_v36 }
 0x416   :  { %v2795_v56 = vpop.permute.xlu1 %2794 }
 0x417   :  { %v2843_v22 = vsel %vm53_vm3, %v2754_v8, %v2795_v56  ;;  %vm3003_vm3 = vweird.f32 %v3622_v9 }
 0x418   :  { %v5209_v7 = vsel %vm3003_vm3, %v3622_v9, %v3002_v41 }
 0x419   :  { %v2827_v2 = vpop.permute.xlu0 %2826 }
 0x41a   :  { %v2852_v1 = vsel %vm2844_vm11, %v2843_v22, %v2827_v2 }
 0x41b   :  { %2875 = vst [vmem:[#allocation1 + $0x31] ss:$2 sm:$0xff] %v2852_v1 }
 0x422   :  { %v2879_v55 = vld.sshfl [vmem:[#allocation1 + $0x30] sm:$0xff pattern:$0x75316420] }
 0x423   :  { %3554 = vmatmul.msk.f32.gmra.mxu2 %vm2880_vm5, %v2879_v55 }
 0x464   :  { %v2906_v16 = vpop.f32.mrf.mxu2 }
 0x465   :  { %v2922_v37 = vrot.slane %v2906_v16, 4  ;;  %v2933_v63 = vadd.f32 %v5203_v34, %v2906_v16 }
 0x467   :  { %v2934_v51 = vadd.f32 %v5203_v34, %v2922_v37  ;;  %v2942_v12 = vsel %vm56_vm8, %v2933_v63, 0.0 }
 0x468   :  { %v2943_v28 = vrot.slane %v2942_v12, 4 }
 0x469   :  { %v2949_v62 = vsel %vm56_vm8, %v2934_v51, 0.0 }
 0x46a   :  { %v2944_v43 = vadd.f32 %v2943_v28, %v2942_v12  ;;  %v2950_v6 = vrot.slane %v2949_v62, 4 }
 0x46c   :  { %v2945_v45 = vrot.slane %v2944_v43, 2  ;;  %v2951_v42 = vadd.f32 %v2950_v6, %v2949_v62 }
 0x46e   :  { %v2946_v57 = vadd.f32 %v2945_v45, %v2944_v43  ;;  %v2952_v3 = vrot.slane %v2951_v42, 2 }
 0x470   :  { %v2947_v0 = vrot.slane %v2946_v57, 1  ;;  %v2953_v30 = vadd.f32 %v2952_v3, %v2951_v42 }
 0x472   :  { %v2948_v10 = vadd.f32 %v2947_v0, %v2946_v57  ;;  %v2954_v33 = vrot.slane %v2953_v30, 1 }
 0x474   :  { %v2955_v52 = vadd.f32 %v2954_v33, %v2953_v30  ;;  %v3005_v54 = vmul.f32 %v5209_v7, %v2948_v10  ;;  %v5240_v10 = vld [vmem:[%s5432_s11] ss:$0 sm:$0xff] }
 0x476   :  { %v3006_v21 = vmul.f32 %v5209_v7, %v2955_v52  ;;  %v5213_v40 = vsub.f32 %v2933_v63, %v3005_v54 }
 0x478   :  { %v5215_v17 = vsub.f32 %v2934_v51, %v3006_v21  ;;  %v3021_v19 = vmul.f32 %v5213_v40, %v5213_v40 }
 0x47a   :  { %v3022_v60 = vmul.f32 %v5215_v17, %v5215_v17  ;;  %v3029_v15 = vsel %vm56_vm8, %v3021_v19, 0.0 }
 0x47b   :  { %v3030_v50 = vrot.slane %v3029_v15, 4 }
 0x47c   :  { %v3036_v48 = vsel %vm56_vm8, %v3022_v60, 0.0 }
 0x47d   :  { %v3031_v13 = vadd.f32 %v3030_v50, %v3029_v15  ;;  %v3037_v24 = vrot.slane %v3036_v48, 4  ;;  %v2909_v4 = vpop.f32.mrf.mxu2  ;;  %v5249_v15 = vld [vmem:[%s5433_s12] ss:$0 sm:$0xff] }
 0x47e   :  { %v2923_v35 = vrot.slane %v2909_v4, 4  ;;  %v2935_v49 = vadd.f32 %v5203_v34, %v2909_v4 }
 0x47f   :  { %v3032_v11 = vrot.slane %v3031_v13, 2  ;;  %v3038_v14 = vadd.f32 %v3037_v24, %v3036_v48 }
 0x480   :  { %v2936_v25 = vadd.f32 %v5203_v34, %v2923_v35  ;;  %v2956_v26 = vsel %vm56_vm8, %v2935_v49, 0.0 }
 0x481   :  { %v3033_v31 = vadd.f32 %v3032_v11, %v3031_v13  ;;  %v3039_v53 = vrot.slane %v3038_v14, 2  ;;  %v2957_v23 = vrot.slane %v2956_v26, 4 }
 0x482   :  { %v2963_v36 = vsel %vm56_vm8, %v2936_v25, 0.0 }
 0x483   :  { %v3034_v39 = vrot.slane %v3033_v31, 1  ;;  %v3040_v46 = vadd.f32 %v3039_v53, %v3038_v14  ;;  %v2958_v56 = vadd.f32 %v2957_v23, %v2956_v26  ;;  %v2964_v8 = vrot.slane %v2963_v36, 4 }
 0x485   :  { %v3035_v47 = vadd.f32 %v3034_v39, %v3033_v31  ;;  %v3041_v58 = vrot.slane %v3040_v46, 1  ;;  %v2959_v22 = vrot.slane %v2958_v56, 2  ;;  %v2965_v2 = vadd.f32 %v2964_v8, %v2963_v36 }
 0x487   :  { %v3042_v32 = vadd.f32 %v3041_v58, %v3040_v46  ;;  %v3085_v27 = vmul.f32 %v3035_v47, %v5209_v7  ;;  %v2960_v1 = vadd.f32 %v2959_v22, %v2958_v56  ;;  %v2966_v55 = vrot.slane %v2965_v2, 2 }
 0x489   :  { %v3086_v59 = vmul.f32 %v3042_v32, %v5209_v7  ;;  %v3093_v20 = vadd.f32 1e-05, %v3085_v27  ;;  %v2961_v9 = vrot.slane %v2960_v1, 1  ;;  %v2967_v16 = vadd.f32 %v2966_v55, %v2965_v2 }
 0x48b   :  { %v3094_v5 = vadd.f32 1e-05, %v3086_v59  ;;  %3623 = vrsqrt.f32 %v3093_v20  ;;  %v2962_v63 = vadd.f32 %v2961_v9, %v2960_v1  ;;  %v2968_v12 = vrot.slane %v2967_v16, 1 }
 0x48c   :  { %vm3107_vm14 = vweird.f32 %v3093_v20 }
 0x48d   :  { %3625 = vrsqrt.f32 %v3094_v5  ;;  %v3007_v28 = vmul.f32 %v5209_v7, %v2962_v63  ;;  %v2969_v43 = vadd.f32 %v2968_v12, %v2967_v16  ;;  %vm3117_vm1 = vweird.f32 %v3094_v5 }
 0x48f   :  { %v5230_v6 = vsub.f32 %v2935_v49, %v3007_v28  ;;  %v3008_v41 = vmul.f32 %v5209_v7, %v2969_v43 }
 0x490   :  { %v2912_v32 = vpop.f32.mrf.mxu2 }
 0x491   :  { %v3624_v44 = vpop.eup %3623  ;;  %v3023_v57 = vmul.f32 %v5230_v6, %v5230_v6  ;;  %v5235_v30 = vsub.f32 %v2936_v25, %v3008_v41  ;;  %v2924_v25 = vrot.slane %v2912_v32, 4  ;;  %v2937_v26 = vadd.f32 %v5203_v34, %v2912_v32 }
 0x492   :  { %v3102_v29 = vmul.f32 %v3624_v44, %v3093_v20  ;;  %vm3108_vm6 = vweird.f32 %v3624_v44 }
 0x493   :  { %v3626_v37 = vpop.eup %3625  ;;  %vm3109_vm12 = vmor %vm3107_vm14, %vm3108_vm6  ;;  %v3043_v33 = vsel %vm56_vm8, %v3023_v57, 0.0  ;;  %v3024_v21 = vmul.f32 %v5235_v30, %v5235_v30  ;;  %v2938_v23 = vadd.f32 %v5203_v34, %v2924_v25  ;;  %v2970_v36 = vsel %vm56_vm8, %v2937_v26, 0.0 }
 0x494   :  { %v3103_v61 = vmul.f32 %v3624_v44, %v3102_v29  ;;  %v3112_v51 = vmul.f32 %v3626_v37, %v3094_v5  ;;  %vm3118_vm2 = vweird.f32 %v3626_v37  ;;  %v3044_v19 = vrot.slane %v3043_v33, 4 }
 0x495   :  { %vm3119_vm5 = vmor %vm3117_vm1, %vm3118_vm2  ;;  %v3050_v13 = vsel %vm56_vm8, %v3024_v21, 0.0  ;;  %v2971_v56 = vrot.slane %v2970_v36, 4  ;;  %v2977_v8 = vsel %vm56_vm8, %v2938_v23, 0.0  ;;  %vm3243_vm14 = vcmask 517120  }
 0x496   :  { %v3104_v62 = vmul.f32 0.5, %v3103_v61  ;;  %v3113_v38 = vmul.f32 %v3626_v37, %v3112_v51  ;;  %v3045_v48 = vadd.f32 %v3044_v19, %v3043_v33  ;;  %v3051_v14 = vrot.slane %v3050_v13, 4 }
 0x497   :  { %v2972_v2 = vadd.f32 %v2971_v56, %v2970_v36  ;;  %v2978_v1 = vrot.slane %v2977_v8, 4 }
 0x498   :  { %v3105_v45 = vsub.f32 1.5, %v3104_v62  ;;  %v3114_v42 = vmul.f32 0.5, %v3113_v38  ;;  %v3046_v31 = vrot.slane %v3045_v48, 2 }
 0x499   :  { %v2973_v55 = vrot.slane %v2972_v2, 2 }
 0x49a   :  { %v3106_v3 = vmul.f32 %v3624_v44, %v3105_v45  ;;  %v3115_v0 = vsub.f32 1.5, %v3114_v42  ;;  %v3047_v46 = vadd.f32 %v3046_v31, %v3045_v48 }
 0x49b   :  { %v2974_v9 = vadd.f32 %v2973_v55, %v2972_v2 }
 0x49c   :  { %v3110_v52 = vsel %vm3109_vm12, %v3624_v44, %v3106_v3  ;;  %v3116_v54 = vmul.f32 %v3626_v37, %v3115_v0  ;;  %v3048_v4 = vrot.slane %v3047_v46, 1  ;;  %v2979_v44 = vadd.f32 %v2978_v1, %v2977_v8 }
 0x49d   :  { %v3181_v60 = vmul.f32 %v3110_v52, %v5213_v40  ;;  %v3052_v40 = vadd.f32 %v3051_v14, %v3050_v13  ;;  %v2975_v63 = vrot.slane %v2974_v9, 1 }
 0x49e   :  { %v3120_v50 = vsel %vm3119_vm5, %v3626_v37, %v3116_v54  ;;  %v2980_v29 = vrot.slane %v2979_v44, 2 }
 0x49f   :  { %v3182_v24 = vmul.f32 %v3120_v50, %v5215_v17  ;;  %v3192_v11 = vmul.f32 %v5240_v10, %v3181_v60  ;;  %v3053_v58 = vrot.slane %v3052_v40, 2  ;;  %v3049_v17 = vadd.f32 %v3048_v4, %v3047_v46 }
 0x4a0   :  { %v2981_v61 = vadd.f32 %v2980_v29, %v2979_v44  ;;  %v2976_v28 = vadd.f32 %v2975_v63, %v2974_v9 }
 0x4a1   :  { %v3193_v53 = vmul.f32 %v5240_v10, %v3182_v24  ;;  %v3203_v39 = vadd.f32 %v5249_v15, %v3192_v11  ;;  %v3054_v35 = vadd.f32 %v3053_v58, %v3052_v40  ;;  %v3087_v27 = vmul.f32 %v3049_v17, %v5209_v7 }
 0x4a2   :  { %v2982_v62 = vrot.slane %v2981_v61, 1  ;;  %v3009_v42 = vmul.f32 %v5209_v7, %v2976_v28 }
 0x4a3   :  { %v3204_v47 = vadd.f32 %v5249_v15, %v3193_v53  ;;  %3211 = vst.msk [vmem:[#allocation7] sm:$0xf] %vm56_vm8, %v3203_v39  ;;  %v3055_v49 = vrot.slane %v3054_v35, 1  ;;  %v3095_v20 = vadd.f32 1e-05, %v3087_v27 }
 0x4a4   :  { %v2983_v45 = vadd.f32 %v2982_v62, %v2981_v61  ;;  %v5267_v0 = vsub.f32 %v2937_v26, %v3009_v42 }
 0x4a5   :  { %3212 = vst.msk [vmem:[#allocation7 + $0x4] sm:$0xf] %vm56_vm8, %v3204_v47  ;;  %v3056_v59 = vadd.f32 %v3055_v49, %v3054_v35  ;;  %3627 = vrsqrt.f32 %v3095_v20  ;;  %vm3127_vm15 = vweird.f32 %v3095_v20 }
 0x4a6   :  { %v3010_v3 = vmul.f32 %v5209_v7, %v2983_v45  ;;  %v3025_v21 = vmul.f32 %v5267_v0, %v5267_v0  ;;  %v2915_v46 = vpop.f32.mrf.mxu2 }
 0x4a7   :  { %v3088_v5 = vmul.f32 %v3056_v59, %v5209_v7  ;;  %v2925_v58 = vrot.slane %v2915_v46, 4  ;;  %v2939_v4 = vadd.f32 %v5203_v34, %v2915_v46 }
 0x4a8   :  { %v5269_v54 = vsub.f32 %v2938_v23, %v3010_v3  ;;  %v3057_v48 = vsel %vm56_vm8, %v3025_v21, 0.0 }
 0x4a9   :  { %v3096_v22 = vadd.f32 1e-05, %v3088_v5  ;;  %v3058_v11 = vrot.slane %v3057_v48, 4  ;;  %v5284_v32 = vadd.f32 %v5203_v34, %v2925_v58  ;;  %v2984_v27 = vsel %vm56_vm8, %v2939_v4, 0.0  ;;  %v3220_v34 = vld [vmem:[#allocation4 + $0x4] sm:$0xf] }
 0x4aa   :  { %v3026_v50 = vmul.f32 %v5269_v54, %v5269_v54  ;;  %v2985_v59 = vrot.slane %v2984_v27, 4  ;;  %v3221_v36 = vld [vmem:[#allocation7] sm:$0xf] }
 0x4ab   :  { %3629 = vrsqrt.f32 %v3096_v22  ;;  %v3628_v16 = vpop.eup %3627  ;;  %vm3137_vm13 = vweird.f32 %v3096_v22  ;;  %v3059_v39 = vadd.f32 %v3058_v11, %v3057_v48  ;;  %v2991_v23 = vsel %vm56_vm8, %v5284_v32, 0.0 }
 0x4ac   :  { %v3122_v37 = vmul.f32 %v3628_v16, %v3095_v20  ;;  %vm3128_vm7 = vweird.f32 %v3628_v16  ;;  %v3064_v14 = vsel %vm56_vm8, %v3026_v50, 0.0  ;;  %v2986_v8 = vadd.f32 %v2985_v59, %v2984_v27  ;;  %v3222_v2 = vld [vmem:[#allocation7 + $0x4] sm:$0xf] }
 0x4ad   :  { %vm3129_vm4 = vmor %vm3127_vm15, %vm3128_vm7  ;;  %v3065_v40 = vrot.slane %v3064_v14, 4  ;;  %v3060_v17 = vrot.slane %v3059_v39, 2  ;;  %v3224_v55 = vadd.f32 %v3222_v2, %v3220_v34 }
 0x4ae   :  { %v3123_v12 = vmul.f32 %v3628_v16, %v3122_v37  ;;  %v2987_v29 = vrot.slane %v2986_v8, 2 }
 0x4af   :  { %v3066_v49 = vadd.f32 %v3065_v40, %v3064_v14  ;;  %v3061_v25 = vadd.f32 %v3060_v17, %v3059_v39  ;;  %vm3226_vm6 = vcmp.ge.f32.partialorder %v3224_v55, 1.0 }
 0x4b0   :  { %v3124_v43 = vmul.f32 0.5, %v3123_v12  ;;  %v2988_v61 = vadd.f32 %v2987_v29, %v2986_v8  ;;  %v3556_v28 = vsel %vm3226_vm6, 1.0, %v3641_v18 }
 0x4b1   :  { %v3630_v51 = vpop.eup %3629  ;;  %v3067_v26 = vrot.slane %v3066_v49, 2  ;;  %v3062_v5 = vrot.slane %v3061_v25, 1  ;;  %v3240_v3 = vrot.slane %v3556_v28, 2 }
 0x4b2   :  { %v3132_v38 = vmul.f32 %v3630_v51, %v3096_v22  ;;  %v3125_v57 = vsub.f32 1.5, %v3124_v43  ;;  %vm3138_vm0 = vweird.f32 %v3630_v51  ;;  %v2992_v22 = vrot.slane %v2991_v23, 4 }
 0x4b3   :  { %vm3139_vm9 = vmor %vm3137_vm13, %vm3138_vm0  ;;  %v3068_v56 = vadd.f32 %v3067_v26, %v3066_v49  ;;  %v3063_v44 = vadd.f32 %v3062_v5, %v3061_v25  ;;  %v2989_v43 = vrot.slane %v2988_v61, 1  ;;  %v3265_v11 = vsel %vm3243_vm14, %v3240_v3, 0.0 }
 0x4b4   :  { %v3133_v41 = vmul.f32 %v3630_v51, %v3132_v38  ;;  %v3126_v52 = vmul.f32 %v3628_v16, %v3125_v57  ;;  %v3266_v40 = vrot.slane %v3265_v11, 4 }
 0x4b5   :  { %v3069_v9 = vrot.slane %v3068_v56, 1  ;;  %v3089_v63 = vmul.f32 %v3063_v44, %v5209_v7 }
 0x4b6   :  { %v3134_v33 = vmul.f32 0.5, %v3133_v41  ;;  %v3130_v60 = vsel %vm3129_vm4, %v3628_v16, %v3126_v52  ;;  %v2993_v16 = vadd.f32 %v2992_v22, %v2991_v23  ;;  %v3232_v41 = vsub.f32 1.0, %v3556_v28 }
 0x4b7   :  { %v3183_v24 = vmul.f32 %v3130_v60, %v5230_v6  ;;  %v3070_v37 = vadd.f32 %v3069_v9, %v3068_v56  ;;  %v5296_v38 = vadd.f32 1e-05, %v3089_v63  ;;  %v2990_v52 = vadd.f32 %v2989_v43, %v2988_v61 }
 0x4b8   :  { %v3135_v19 = vsub.f32 1.5, %v3134_v33  ;;  %v3234_v60 = vmul.f32 %v3232_v41, %v3224_v55 }
 0x4b9   :  { %v3194_v53 = vmul.f32 %v5240_v10, %v3183_v24  ;;  %v3090_v62 = vmul.f32 %v3070_v37, %v5209_v7  ;;  %3631 = vrsqrt.f32 %v5296_v38  ;;  %v3011_v48 = vmul.f32 %v5209_v7, %v2990_v52 }
 0x4ba   :  { %v3136_v13 = vmul.f32 %v3630_v51, %v3135_v19  ;;  %3236 = vst.msk [vmem:[#allocation4 + $0x4] sm:$0xf] %vm56_vm8, %v3234_v60  ;;  %vm3147_vm2 = vweird.f32 %v5296_v38 }
 0x4bb   :  { %v3205_v35 = vadd.f32 %v5249_v15, %v3194_v53  ;;  %v5298_v33 = vadd.f32 1e-05, %v3090_v62  ;;  %v5308_v53 = vsub.f32 %v2939_v4, %v3011_v48 }
 0x4bc   :  { %v3140_v31 = vsel %vm3139_vm9, %v3630_v51, %v3136_v13  ;;  %v2994_v51 = vrot.slane %v2993_v16, 2 }
 0x4bd   :  { %v3184_v47 = vmul.f32 %v3140_v31, %v5235_v30  ;;  %3213 = vst.msk [vmem:[#allocation7 + $0x8] sm:$0xf] %vm56_vm8, %v3205_v35  ;;  %v3219_v30 = vld [vmem:[#allocation4] sm:$0xf]  ;;  %3633 = vrsqrt.f32 %v5298_v33  ;;  %v3258_v31 = vsel %vm3243_vm14, %v3556_v28, 0.0  ;;  %v3027_v17 = vmul.f32 %v5308_v53, %v5308_v53 }
 0x4be   :  { %v3223_v1 = vadd.f32 %v3221_v36, %v3219_v30  ;;  %v2995_v45 = vadd.f32 %v2994_v51, %v2993_v16  ;;  %v3259_v58 = vrot.slane %v3258_v31, 4  ;;  %vm3157_vm7 = vweird.f32 %v5298_v33 }
 0x4bf   :  { %v3195_v6 = vmul.f32 %v5240_v10, %v3184_v47  ;;  %v3632_v35 = vpop.eup %3631  ;;  %v3071_v30 = vsel %vm56_vm8, %v3027_v17, 0.0 }
 0x4c0   :  { %vm3225_vm3 = vcmp.ge.f32.partialorder %v3223_v1, 1.0  ;;  %v2996_v21 = vrot.slane %v2995_v45, 1  ;;  %v3142_v25 = vmul.f32 %v3632_v35, %v5296_v38  ;;  %v3260_v26 = vadd.f32 %v3259_v58, %v3258_v31 }
 0x4c1   :  { %v3206_v20 = vadd.f32 %v5249_v15, %v3195_v6  ;;  %v3555_v12 = vsel %vm3225_vm3, 1.0, %v3641_v18  ;;  %v3267_v6 = vadd.f32 %v3266_v40, %v3265_v11  ;;  %vm3148_vm12 = vweird.f32 %v3632_v35  ;;  %v3289_v40 = vld [vmem:[#allocation4 + $0x4] sm:$0xf] }
 0x4c2   :  { %v3231_v42 = vsub.f32 1.0, %v3555_v12  ;;  %v3239_v57 = vrot.slane %v3555_v12, 2  ;;  %v2997_v24 = vadd.f32 %v2996_v21, %v2995_v45  ;;  %v3244_v14 = vsel %vm3243_vm14, %v3555_v12, 0.0  ;;  %vm3149_vm5 = vmor %vm3147_vm2, %vm3148_vm12 }
 0x4c3   :  { %3214 = vst.msk [vmem:[#allocation7 + $0xc] sm:$0xf] %vm56_vm8, %v3206_v20  ;;  %v3245_v46 = vrot.slane %v3244_v14, 4  ;;  %v3634_v59 = vpop.eup %3633  ;;  %v3268_v23 = vrot.slane %v3267_v6, 2  ;;  %v3143_v5 = vmul.f32 %v3632_v35, %v3142_v25  ;;  %v3072_v22 = vrot.slane %v3071_v30, 4 }
 0x4c4   :  { %v3233_v19 = vmul.f32 %v3231_v42, %v3223_v1  ;;  %v3251_v50 = vsel %vm3243_vm14, %v3239_v57, 0.0  ;;  %v3012_v47 = vmul.f32 %v5209_v7, %v2997_v24  ;;  %v3152_v56 = vmul.f32 %v3634_v59, %v5298_v33 }
 0x4c5   :  { %v3252_v13 = vrot.slane %v3251_v50, 4  ;;  %v3246_v27 = vadd.f32 %v3245_v46, %v3244_v14  ;;  %v3269_v2 = vadd.f32 %v3268_v23, %v3267_v6  ;;  %v3261_v9 = vrot.slane %v3260_v26, 2 }
 0x4c6   :  { %3235 = vst.msk [vmem:[#allocation4] sm:$0xf] %vm56_vm8, %v3233_v19  ;;  %v5317_v4 = vsub.f32 %v5284_v32, %v3012_v47  ;;  %v3144_v32 = vmul.f32 0.5, %v3143_v5  ;;  %v3153_v55 = vmul.f32 %v3634_v59, %v3152_v56  ;;  %v3073_v29 = vadd.f32 %v3072_v22, %v3071_v30 }
 0x4c7   :  { %v3253_v39 = vadd.f32 %v3252_v13, %v3251_v50  ;;  %v3247_v36 = vrot.slane %v3246_v27, 2  ;;  %v3270_v63 = vrot.slane %v3269_v2, 1  ;;  %v3262_v28 = vadd.f32 %v3261_v9, %v3260_v26 }
 0x4c8   :  { %v3028_v8 = vmul.f32 %v5317_v4, %v5317_v4  ;;  %v3145_v61 = vsub.f32 1.5, %v3144_v32  ;;  %v3154_v51 = vmul.f32 0.5, %v3153_v55  ;;  %vm3158_vm1 = vweird.f32 %v3634_v59 }
 0x4c9   :  { %v3254_v49 = vrot.slane %v3253_v39, 2  ;;  %v3248_v1 = vadd.f32 %v3247_v36, %v3246_v27  ;;  %v3074_v62 = vrot.slane %v3073_v29, 2  ;;  %v3271_v45 = vadd.f32 %v3270_v63, %v3269_v2  ;;  %vm3159_vm15 = vmor %vm3157_vm7, %vm3158_vm1 }
 0x4ca   :  { %v3078_v44 = vsel %vm56_vm8, %v3028_v8, 0.0  ;;  %v3146_v42 = vmul.f32 %v3632_v35, %v3145_v61  ;;  %v3155_v41 = vsub.f32 1.5, %v3154_v51  ;;  %v3263_v3 = vrot.slane %v3262_v28, 1  ;;  %v3292_v6 = vld [vmem:[#allocation7 + $0xc] sm:$0xf] }
 0x4cb   :  { %v3255_v20 = vadd.f32 %v3254_v49, %v3253_v39  ;;  %v3079_v16 = vrot.slane %v3078_v44, 4  ;;  %v3249_v12 = vrot.slane %v3248_v1, 1  ;;  %v3075_v52 = vadd.f32 %v3074_v62, %v3073_v29  ;;  %v3291_v49 = vld [vmem:[#allocation7 + $0x8] sm:$0xf] }
 0x4cc   :  { %v3275_v60 = vmul.f32 0.5, %v3271_v45  ;;  %v3150_v50 = vsel %vm3149_vm5, %v3632_v35, %v3146_v42  ;;  %v3156_v48 = vmul.f32 %v3634_v59, %v3155_v41  ;;  %v3264_v13 = vadd.f32 %v3263_v3, %v3262_v28 }
 0x4cd   :  { %v3256_v34 = vrot.slane %v3255_v20, 1  ;;  %v3080_v43 = vadd.f32 %v3079_v16, %v3078_v44  ;;  %v3250_v57 = vadd.f32 %v3249_v12, %v3248_v1  ;;  %v3185_v24 = vmul.f32 %v3150_v50, %v5267_v0  ;;  %v3288_v38 = vld [vmem:[#allocation4] sm:$0xf] }
 0x4ce   :  { %v3076_v11 = vrot.slane %v3075_v52, 1  ;;  %v3160_v39 = vsel %vm3159_vm15, %v3634_v59, %v3156_v48  ;;  %v3274_v47 = vmul.f32 0.5, %v3264_v13  ;;  %v3293_v0 = vadd.f32 %v3291_v49, %v3288_v38 }
 0x4cf   :  { %v3257_v37 = vadd.f32 %v3256_v34, %v3255_v20  ;;  %v3081_v21 = vrot.slane %v3080_v43, 2  ;;  %v3272_v46 = vmul.f32 0.5, %v3250_v57  ;;  %v3186_v58 = vmul.f32 %v3160_v39, %v5269_v54 }
 0x4d0   :  { %v3196_v33 = vmul.f32 %v5240_v10, %v3185_v24  ;;  %v3077_v35 = vadd.f32 %v3076_v11, %v3075_v52  ;;  %v3294_v27 = vadd.f32 %v3292_v6, %v3289_v40  ;;  %vm3295_vm4 = vcmp.ge.f32.partialorder %v3293_v0, 1.0 }
 0x4d1   :  { %v3273_v19 = vmul.f32 0.5, %v3257_v37  ;;  %v3082_v14 = vadd.f32 %v3081_v21, %v3080_v43  ;;  %v5335_v25 = vsel %vm1027_vm10, %v3274_v47, %v3272_v46  ;;  %v3197_v26 = vmul.f32 %v5240_v10, %v3186_v58 }
 0x4d2   :  { %v3207_v59 = vadd.f32 %v5249_v15, %v3196_v33  ;;  %v3091_v20 = vmul.f32 %v3077_v35, %v5209_v7  ;;  %vm3296_vm0 = vcmp.ge.f32.partialorder %v3294_v27, 1.0  ;;  %v3557_v5 = vsel %vm3295_vm4, 1.0, %v3641_v18 }
 0x4d3   :  { %v3282_v31 = vsel %vm1027_vm10, %v3275_v60, %v3273_v19  ;;  %v3083_v17 = vrot.slane %v3082_v14, 1  ;;  %v3208_v54 = vadd.f32 %v5249_v15, %v3197_v26  ;;  %v3558_v56 = vsel %vm3296_vm0, 1.0, %v3641_v18 }
 0x4d4   :  { %3283 = vrot.lane.b32.xlu1 %v3282_v31, %s3646_s7  ;;  %3215 = vst.msk [vmem:[#allocation7 + $0x10] sm:$0xf] %vm56_vm8, %v3207_v59  ;;  %v5343_v36 = vadd.f32 1e-05, %v3091_v20  ;;  %v3301_v8 = vsub.f32 1.0, %v3557_v5  ;;  %v3309_v22 = vrot.slane %v3557_v5, 2 }
 0x4d5   :  { %v3084_v30 = vadd.f32 %v3083_v17, %v3082_v14  ;;  %3216 = vst.msk [vmem:[#allocation7 + $0x14] sm:$0xf] %vm56_vm8, %v3208_v54  ;;  %v3310_v2 = vrot.slane %v3558_v56, 2  ;;  %v3302_v55 = vsub.f32 1.0, %v3558_v56  ;;  %v3313_v16 = vsel %vm3243_vm14, %v3557_v5, 0.0 }
 0x4d6   :  { %3635 = vrsqrt.f32 %v5343_v36  ;;  %v3303_v1 = vmul.f32 %v3301_v8, %v3293_v0  ;;  %v3320_v32 = vsel %vm3243_vm14, %v3309_v22, 0.0  ;;  %v3314_v63 = vrot.slane %v3313_v16, 4 }
 0x4d7   :  { %v3092_v23 = vmul.f32 %v3084_v30, %v5209_v7  ;;  %v3321_v7 = vrot.slane %v3320_v32, 4  ;;  %v3334_v44 = vsel %vm3243_vm14, %v3310_v2, 0.0  ;;  %v3304_v29 = vmul.f32 %v3302_v55, %v3294_v27 }
 0x4d8   :  { %3305 = vst.msk [vmem:[#allocation4] sm:$0xf] %vm56_vm8, %v3303_v1  ;;  %v3335_v9 = vrot.slane %v3334_v44, 4  ;;  %v3327_v51 = vsel %vm3243_vm14, %v3558_v56, 0.0  ;;  %v3315_v62 = vadd.f32 %v3314_v63, %v3313_v16  ;;  %vm3167_vm13 = vweird.f32 %v5343_v36 }
 0x4d9   :  { %v5348_v34 = vadd.f32 1e-05, %v3092_v23  ;;  %v3322_v37 = vadd.f32 %v3321_v7, %v3320_v32  ;;  %3306 = vst.msk [vmem:[#allocation4 + $0x4] sm:$0xf] %vm56_vm8, %v3304_v29  ;;  %v3328_v43 = vrot.slane %v3327_v51, 4 }
 0x4da   :  { %v3336_v61 = vadd.f32 %v3335_v9, %v3334_v44  ;;  %v3316_v3 = vrot.slane %v3315_v62, 2 }
 0x4db   :  { %3637 = vrsqrt.f32 %v5348_v34  ;;  %v3323_v28 = vrot.slane %v3322_v37, 2  ;;  %v3329_v52 = vadd.f32 %v3328_v43, %v3327_v51  ;;  %vm3177_vm9 = vweird.f32 %v5348_v34  ;;  %v3361_v13 = vld [vmem:[#allocation7 + $0x10] sm:$0xf] }
 0x4dc   :  { %v3636_v12 = vpop.eup %3635  ;;  %v3337_v42 = vrot.slane %v3336_v61, 2  ;;  %v3317_v24 = vadd.f32 %v3316_v3, %v3315_v62  ;;  %v3362_v47 = vld [vmem:[#allocation7 + $0x14] sm:$0xf] }
 0x4dd   :  { %v3162_v45 = vmul.f32 %v3636_v12, %v5343_v36  ;;  %v3324_v57 = vadd.f32 %v3323_v28, %v3322_v37  ;;  %vm3168_vm3 = vweird.f32 %v3636_v12  ;;  %v3330_v11 = vrot.slane %v3329_v52, 2 }
 0x4de   :  { %v3338_v60 = vadd.f32 %v3337_v42, %v3336_v61  ;;  %v3318_v58 = vrot.slane %v3317_v24, 1  ;;  %vm3169_vm1 = vmor %vm3167_vm13, %vm3168_vm3 }
 0x4df   :  { %v3163_v21 = vmul.f32 %v3636_v12, %v3162_v45  ;;  %v3325_v50 = vrot.slane %v3324_v57, 1  ;;  %v3358_v48 = vld [vmem:[#allocation4] sm:$0xf]  ;;  %v3331_v33 = vadd.f32 %v3330_v11, %v3329_v52 }
 0x4e0   :  { %v3339_v39 = vrot.slane %v3338_v60, 1  ;;  %v3363_v38 = vadd.f32 %v3361_v13, %v3358_v48  ;;  %v3359_v46 = vld [vmem:[#allocation4 + $0x4] sm:$0xf]  ;;  %v3319_v27 = vadd.f32 %v3318_v58, %v3317_v24 }
 0x4e1   :  { %v3638_v41 = vpop.eup %3637  ;;  %v3164_v14 = vmul.f32 0.5, %v3163_v21  ;;  %v3326_v40 = vadd.f32 %v3325_v50, %v3324_v57  ;;  %v3364_v6 = vadd.f32 %v3362_v47, %v3359_v46  ;;  %v3332_v26 = vrot.slane %v3331_v33, 1 }
 0x4e2   :  { %v3172_v19 = vmul.f32 %v3638_v41, %v5348_v34  ;;  %vm3178_vm6 = vweird.f32 %v3638_v41  ;;  %v3340_v49 = vadd.f32 %v3339_v39, %v3338_v60  ;;  %vm3365_vm2 = vcmp.ge.f32.partialorder %v3363_v38, 1.0 }
 0x4e3   :  { %v3165_v35 = vsub.f32 1.5, %v3164_v14  ;;  %v3342_v0 = vmul.f32 0.5, %v3326_v40  ;;  %vm3366_vm12 = vcmp.ge.f32.partialorder %v3364_v6, 1.0  ;;  %v3560_v54 = vsel %vm3365_vm2, 1.0, %v3641_v18  ;;  %vm3179_vm5 = vmor %vm3177_vm9, %vm3178_vm6 }
 0x4e4   :  { %v3173_v31 = vmul.f32 %v3638_v41, %v3172_v19  ;;  %v3344_v20 = vmul.f32 0.5, %v3340_v49  ;;  %v3561_v23 = vsel %vm3366_vm12, 1.0, %v3641_v18  ;;  %v3333_v5 = vadd.f32 %v3332_v26, %v3331_v33 }
 0x4e5   :  { %v3166_v59 = vmul.f32 %v3636_v12, %v3165_v35  ;;  %v3341_v56 = vmul.f32 0.5, %v3319_v27  ;;  %v3371_v1 = vsub.f32 1.0, %v3560_v54  ;;  %v3372_v36 = vsub.f32 1.0, %v3561_v23 }
 0x4e6   :  { %v3174_v17 = vmul.f32 0.5, %v3173_v31  ;;  %v3351_v2 = vsel %vm1027_vm10, %v3344_v20, %v3342_v0  ;;  %v3379_v55 = vrot.slane %v3560_v54, 2  ;;  %v3380_v7 = vrot.slane %v3561_v23, 2 }
 0x4e7   :  { %v3170_v8 = vsel %vm3169_vm1, %v3636_v12, %v3166_v59  ;;  %3352 = vrot.lane.b32.xlu2 %v3351_v2, %s3646_s7  ;;  %v3373_v9 = vmul.f32 %v3371_v1, %v3363_v38  ;;  %v3343_v29 = vmul.f32 0.5, %v3333_v5  ;;  %v3383_v16 = vsel %vm3243_vm14, %v3560_v54, 0.0 }
 0x4e8   :  { %v3175_v30 = vsub.f32 1.5, %v3174_v17  ;;  %v3187_v32 = vmul.f32 %v3170_v8, %v5308_v53  ;;  %v3374_v61 = vmul.f32 %v3372_v36, %v3364_v6  ;;  %v3390_v34 = vsel %vm3243_vm14, %v3379_v55, 0.0 }
 0x4e9   :  { %3375 = vst.msk [vmem:[#allocation4] sm:$0xf] %vm56_vm8, %v3373_v9  ;;  %v3391_v53 = vrot.slane %v3390_v34, 4  ;;  %v3404_v51 = vsel %vm3243_vm14, %v3380_v7, 0.0  ;;  %v5380_v12 = vsel %vm1027_vm10, %v3343_v29, %v3341_v56  ;;  %v3384_v28 = vrot.slane %v3383_v16, 4 }
 0x4ea   :  { %v3176_v22 = vmul.f32 %v3638_v41, %v3175_v30  ;;  %v3198_v63 = vmul.f32 %v5240_v10, %v3187_v32  ;;  %3376 = vst.msk [vmem:[#allocation4 + $0x4] sm:$0xf] %vm56_vm8, %v3374_v61  ;;  %v3397_v45 = vsel %vm3243_vm14, %v3561_v23, 0.0 }
 0x4eb   :  { %v3392_v42 = vadd.f32 %v3391_v53, %v3390_v34  ;;  %v3398_v57 = vrot.slane %v3397_v45, 4 }
 0x4ec   :  { %v3180_v44 = vsel %vm3179_vm5, %v3638_v41, %v3176_v22  ;;  %v3209_v43 = vadd.f32 %v5249_v15, %v3198_v63  ;;  %v3385_v41 = vadd.f32 %v3384_v28, %v3383_v16 }
 0x4ed   :  { %v3188_v37 = vmul.f32 %v3180_v44, %v5317_v4  ;;  %v3405_v4 = vrot.slane %v3404_v51, 4  ;;  %v3393_v21 = vrot.slane %v3392_v42, 2  ;;  %v3399_v60 = vadd.f32 %v3398_v57, %v3397_v45 }
 0x4ee   :  { %3217 = vst.msk [vmem:[#allocation7 + $0x18] sm:$0xf] %vm56_vm8, %v3209_v43  ;;  %v3386_v19 = vrot.slane %v3385_v41, 2 }
 0x4ef   :  { %v3199_v62 = vmul.f32 %v5240_v10, %v3188_v37  ;;  %v3406_v52 = vadd.f32 %v3405_v4, %v3404_v51  ;;  %v3394_v50 = vadd.f32 %v3393_v21, %v3392_v42  ;;  %v3400_v13 = vrot.slane %v3399_v60, 2 }
 0x4f0   :  { %v3387_v48 = vadd.f32 %v3386_v19, %v3385_v41  ;;  %v3428_v14 = vld [vmem:[#allocation4] sm:$0xf] }
 0x4f1   :  { %v3210_v3 = vadd.f32 %v5249_v15, %v3199_v62  ;;  %v3407_v10 = vrot.slane %v3406_v52, 2  ;;  %v3395_v11 = vrot.slane %v3394_v50, 1  ;;  %v3401_v39 = vadd.f32 %v3400_v13, %v3399_v60  ;;  %v3429_v15 = vld [vmem:[#allocation4 + $0x4] sm:$0xf] }
 0x4f2   :  { %v3388_v31 = vrot.slane %v3387_v48, 1 }
 0x4f3   :  { %3218 = vst.msk [vmem:[#allocation7 + $0x1c] sm:$0xf] %vm56_vm8, %v3210_v3  ;;  %v3408_v24 = vadd.f32 %v3407_v10, %v3406_v52  ;;  %v3396_v40 = vadd.f32 %v3395_v11, %v3394_v50  ;;  %v3402_v58 = vrot.slane %v3401_v39, 1 }
 0x4f4   :  { %v3389_v47 = vadd.f32 %v3388_v31, %v3387_v48 }
 0x4f5   :  { %v3409_v38 = vrot.slane %v3408_v24, 1  ;;  %v3431_v46 = vld [vmem:[#allocation7 + $0x18] sm:$0xf]  ;;  %v3403_v49 = vadd.f32 %v3402_v58, %v3401_v39  ;;  %v3412_v6 = vmul.f32 0.5, %v3396_v40 }
 0x4f6   :  { %v3433_v35 = vadd.f32 %v3431_v46, %v3428_v14  ;;  %v3411_v59 = vmul.f32 0.5, %v3389_v47 }
 0x4f7   :  { %v3410_v33 = vadd.f32 %v3409_v38, %v3408_v24  ;;  %v3413_v30 = vmul.f32 0.5, %v3403_v49 }
 0x4f8   :  { %vm3435_vm7 = vcmp.ge.f32.partialorder %v3433_v35, 1.0 }
 0x4f9   :  { %v3414_v0 = vmul.f32 0.5, %v3410_v33  ;;  %v3563_v26 = vsel %vm3435_vm7, 1.0, %v3641_v18  ;;  %v3417_v56 = vsel %vm1027_vm10, %v3413_v30, %v3411_v59 }
 0x4fa   :  { %v3432_v17 = vld [vmem:[#allocation7 + $0x1c] sm:$0xf]  ;;  %v3441_v54 = vsub.f32 1.0, %v3563_v26  ;;  %v3449_v23 = vrot.slane %v3563_v26, 2  ;;  %v3453_v8 = vsel %vm3243_vm14, %v3563_v26, 0.0 }
 0x4fb   :  { %v3434_v27 = vadd.f32 %v3432_v17, %v3429_v15  ;;  %v3421_v20 = vsel %vm1027_vm10, %v3414_v0, %v3412_v6  ;;  %v3454_v55 = vrot.slane %v3453_v8, 4 }
 0x4fc   :  { %3422 = vrot.lane.b32.xlu0 %v3421_v20, %s3646_s7  ;;  %v3443_v22 = vmul.f32 %v3441_v54, %v3433_v35  ;;  %v3460_v1 = vsel %vm3243_vm14, %v3449_v23, 0.0 }
 0x4fd   :  { %vm3436_vm15 = vcmp.ge.f32.partialorder %v3434_v27, 1.0  ;;  %v3461_v36 = vrot.slane %v3460_v1, 4  ;;  %v3455_v37 = vadd.f32 %v3454_v55, %v3453_v8 }
 0x4fe   :  { %v3564_v5 = vsel %vm3436_vm15, 1.0, %v3641_v18  ;;  %3445 = vst.msk [vmem:[#allocation4] sm:$0xf] %vm56_vm8, %v3443_v22 }
 0x4ff   :  { %v3450_v2 = vrot.slane %v3564_v5, 2  ;;  %v3442_v32 = vsub.f32 1.0, %v3564_v5  ;;  %v3467_v7 = vsel %vm3243_vm14, %v3564_v5, 0.0  ;;  %v3462_v18 = vadd.f32 %v3461_v36, %v3460_v1 }
 0x500   :  { %v3468_v29 = vrot.slane %v3467_v7, 4  ;;  %v3456_v53 = vrot.slane %v3455_v37, 2 }
 0x501   :  { %v3474_v44 = vsel %vm3243_vm14, %v3450_v2, 0.0  ;;  %v3444_v9 = vmul.f32 %v3442_v32, %v3434_v27  ;;  %v3463_v61 = vrot.slane %v3462_v18, 2 }
 0x502   :  { %v3475_v16 = vrot.slane %v3474_v44, 4  ;;  %v3469_v63 = vadd.f32 %v3468_v29, %v3467_v7  ;;  %v3457_v43 = vadd.f32 %v3456_v53, %v3455_v37 }
 0x503   :  { %3446 = vst.msk [vmem:[#allocation4 + $0x4] sm:$0xf] %vm56_vm8, %v3444_v9  ;;  %v3464_v28 = vadd.f32 %v3463_v61, %v3462_v18 }
 0x504   :  { %v3476_v34 = vadd.f32 %v3475_v16, %v3474_v44  ;;  %v3470_v51 = vrot.slane %v3469_v63, 2  ;;  %v3458_v41 = vrot.slane %v3457_v43, 1 }
 0x505   :  { %v3465_v45 = vrot.slane %v3464_v28, 1 }
 0x506   :  { %v3477_v62 = vrot.slane %v3476_v34, 2  ;;  %v3471_v4 = vadd.f32 %v3470_v51, %v3469_v63  ;;  %v3459_v21 = vadd.f32 %v3458_v41, %v3457_v43 }
 0x507   :  { %v3466_v3 = vadd.f32 %v3465_v45, %v3464_v28 }
 0x508   :  { %v3478_v42 = vadd.f32 %v3477_v62, %v3476_v34  ;;  %v3472_v57 = vrot.slane %v3471_v4, 1  ;;  %v3481_v10 = vmul.f32 0.5, %v3459_v21 }
 0x509   :  { %v3482_v48 = vmul.f32 0.5, %v3466_v3 }
 0x50a   :  { %v3479_v52 = vrot.slane %v3478_v42, 1  ;;  %v3473_v19 = vadd.f32 %v3472_v57, %v3471_v4 }
 0x50c   :  { %v3480_v60 = vadd.f32 %v3479_v52, %v3478_v42  ;;  %v3483_v50 = vmul.f32 0.5, %v3473_v19 }
 0x50e   :  { %v3484_v13 = vmul.f32 0.5, %v3480_v60  ;;  %v3487_v24 = vsel %vm1027_vm10, %v3483_v50, %v3481_v10 }
 0x510   :  { %v3491_v11 = vsel %vm1027_vm10, %v3484_v13, %v3482_v48 }
 0x511   :  { %3492 = vrot.lane.b32.xlu1 %v3491_v11, %s3646_s7 }
 0x541   :  { %v3353_v39 = vpop.permute.xlu2 %3352 }
 0x542   :  { %v3355_v38 = vsel %vm2844_vm11, %v5380_v12, %v3353_v39 }
 0x543   :  { %3559 = vst [vmem:[%s5434_s13 + $0x2] sm:$0x3] %v3355_v38 }
 0x546   :  { %v3284_v14 = vpop.permute.xlu1 %3283 }
 0x547   :  { %v3286_v31 = vsel %vm2844_vm11, %v5335_v25, %v3284_v14 }
 0x548   :  { %3287 = vst [vmem:[%s5434_s13] sm:$0x3] %v3286_v31 }
 0x56e   :  { %v3423_v40 = vpop.permute.xlu0 %3422 }
 0x56f   :  { %v3425_v15 = vsel %vm2844_vm11, %v3417_v56, %v3423_v40 }
 0x570   :  { %3562 = vst [vmem:[%s5434_s13 + $0x4] sm:$0x3] %v3425_v15 }
 0x583   :  { %v3493_v25 = vpop.permute.xlu1 %3492 }
 0x584   :  { %v3495_v46 = vsel %vm2844_vm11, %v3487_v24, %v3493_v25 }
 0x585   :  { %3565 = vst [vmem:[%s5434_s13 + $0x6] sm:$0x3] %v3495_v46 }

</bundles_post_ra>
